<compile_context>
chip_gen: v7x
topology: tpu7x:2x2x1
jax: 0.10.0
libtpu: 0.0.40
codegen_flags: <defaults>
</compile_context>

<pallas_src>
import functools

import jax
import jax.numpy as jnp
from jax import lax
from jax.experimental import pallas as pl
from jax.experimental.pallas import tpu as pltpu

LANE = 128
VMEM_LIMIT = 32 * 1024 * 1024  # safe on v5e/v6e (128 MiB) and v7x (64 MiB) alike


def _round_up(v, m):
    return (v + m - 1) // m * m


# ---------------------------------------------------------------------------
# Fused Conv3x3(pad=1) + bias + ReLU + MaxPool2x2 kernel
# ---------------------------------------------------------------------------
def _conv_relu_pool_kernel(x_ref, w_ref, b_ref, o_ref, row_buf, *, W, THo):
    """One (batch, row-block) grid step.

    x_ref  : (1, H+2, W+2, Cpin) bf16  spatially padded input image (full image)
    w_ref  : (9*Cpin, Cpad)      bf16  (ky, kx, ci)-ordered conv weights
    b_ref  : (1, Cpad)           f32
    o_ref  : (1, THo, W//2, Cpad) bf16 pooled output rows of this block
    row_buf: VMEM (W, Cpad) f32 scratch used for the W-direction pool.
    """
    Wo = W // 2
    j = pl.program_id(1)
    r0 = j * (2 * THo)               # first conv-output row of this block
    bias = b_ref[...]                # (1, Cpad)
    w = w_ref[...]                   # (9*Cpin, Cpad)

    def body(oh, carry):
        cr = r0 + 2 * oh             # conv rows cr, cr+1 -> pooled row oh
        taps = []
        for ky in range(3):
            for kx in range(3):
                # rows {cr+ky, cr+ky+1}, cols kx..kx+W-1 of the padded image
                slab = x_ref[0, pl.ds(cr + ky, 2), pl.ds(kx, W), :]   # (2, W, Cpin)
                taps.append(slab.reshape(2 * W, slab.shape[-1]))
        patches = jnp.concatenate(taps, axis=-1)                      # (2W, 9*Cpin) bf16
        acc = jnp.dot(patches, w, preferred_element_type=jnp.float32) # (2W, Cpad) f32
        acc = jnp.maximum(acc + bias, 0.0)
        # 2x2 max-pool fused in the epilogue:
        #   H direction: the two conv rows occupy contiguous halves of acc.
        row_buf[...] = jnp.maximum(acc[:W, :], acc[W:, :])            # (W, Cpad)
        #   W direction: even/odd columns via sublane-strided VMEM reads.
        pooled = jnp.maximum(row_buf[pl.ds(0, Wo, stride=2), :],
                             row_buf[pl.ds(1, Wo, stride=2), :])      # (Wo, Cpad)
        o_ref[0, oh, :, :] = pooled.astype(o_ref.dtype)
        return carry

    lax.fori_loop(0, THo, body, 0)


def conv3x3_relu_pool(x, w, b, cout):
    """x: (B, H, W, Cpin) bf16, channels zero-padded to Cpin (multiple of 128).
    w: (3, 3, Cin_real, Cout_real) f32, b: (Cout_real,) f32.
    Returns pooled activations (B, H//2, W//2, Cpad) bf16 (padded channels = 0).
    """
    B, H, W, Cpin = x.shape
    assert H % 2 == 0 and W % 2 == 0, (H, W)
    cin = w.shape[2]
    Cpad = _round_up(cout, LANE)
    Ho, Wo = H // 2, W // 2
    THo = next(t for t in (8, 4, 2, 1) if Ho % t == 0)   # pooled rows per grid step

    # Zero-padded, (ky, kx, ci)-major weight matrix and bias (bf16 weights for
    # the MXU, f32 bias for the accumulator).  Padded rows/cols are zero, so the
    # padded output channels come out exactly 0 and stay 0 through later layers.
    wm = jnp.zeros((3, 3, Cpin, Cpad), jnp.float32).at[:, :, :cin, :cout].set(w)
    wm = wm.reshape(9 * Cpin, Cpad).astype(jnp.bfloat16)
    bm = jnp.zeros((1, Cpad), jnp.float32).at[0, :cout].set(b)

    xp = jnp.pad(x, ((0, 0), (1, 1), (1, 1), (0, 0)))    # conv padding=1

    flops = 2 * B * H * W * (9 * Cpin) * Cpad
    bytes_accessed = (xp.size * 2 + wm.size * 2 + bm.size * 4
                      + B * Ho * Wo * Cpad * 2)

    kernel = functools.partial(_conv_relu_pool_kernel, W=W, THo=THo)
    return pl.pallas_call(
        kernel,
        out_shape=jax.ShapeDtypeStruct((B, Ho, Wo, Cpad), jnp.bfloat16),
        grid=(B, Ho // THo),
        in_specs=[
            pl.BlockSpec((1, H + 2, W + 2, Cpin), lambda n, j: (n, 0, 0, 0)),
            pl.BlockSpec((9 * Cpin, Cpad), lambda n, j: (0, 0)),
            pl.BlockSpec((1, Cpad), lambda n, j: (0, 0)),
        ],
        out_specs=pl.BlockSpec((1, THo, Wo, Cpad), lambda n, j: (n, j, 0, 0)),
        scratch_shapes=[pltpu.VMEM((W, Cpad), jnp.float32)],
        compiler_params=pltpu.CompilerParams(
            dimension_semantics=("parallel", "parallel"),
            vmem_limit_bytes=VMEM_LIMIT),
        cost_estimate=pl.CostEstimate(
            flops=flops, transcendentals=0, bytes_accessed=bytes_accessed),
    )(xp, wm, bm)


# ---------------------------------------------------------------------------
# Fused Linear -> ReLU -> (Dropout: identity) -> Linear head kernel
# ---------------------------------------------------------------------------
def _mlp_head_kernel(x_ref, w1_ref, b1_ref, w2_ref, b2_ref, o_ref):
    h = jnp.dot(x_ref[...], w1_ref[...], preferred_element_type=jnp.float32)
    h = jnp.maximum(h + b1_ref[...], 0.0)
    # TODO(synk): nn.Dropout(drop_rate) is identity at inference; training-mode
    # dropout masking is not implemented.
    logits = jnp.dot(h.astype(w2_ref.dtype), w2_ref[...],
                     preferred_element_type=jnp.float32)
    o_ref[...] = logits + b2_ref[...]


def mlp_head(feat, w1, b1, w2, b2, n_classes):
    """feat: (B, F).  fc1+ReLU+fc2 fused in one Pallas kernel with all operand
    dims zero-padded to 128 lanes (lane-dense stores); logits sliced after."""
    B, F = feat.shape
    Fin, Hdim = w1.shape
    assert Fin == F, (Fin, F)
    Fp = _round_up(F, LANE)
    Hp = _round_up(Hdim, LANE)
    Np = _round_up(n_classes, LANE)

    xq = jnp.zeros((B, Fp), jnp.float32).at[:, :F].set(feat.astype(jnp.float32))
    xq = xq.astype(jnp.bfloat16)
    w1p = jnp.zeros((Fp, Hp), jnp.float32).at[:F, :Hdim].set(w1).astype(jnp.bfloat16)
    b1p = jnp.zeros((1, Hp), jnp.float32).at[0, :Hdim].set(b1)
    w2p = jnp.zeros((Hp, Np), jnp.float32).at[:Hdim, :n_classes].set(w2).astype(jnp.bfloat16)
    b2p = jnp.zeros((1, Np), jnp.float32).at[0, :n_classes].set(b2)

    out = pl.pallas_call(
        _mlp_head_kernel,
        out_shape=jax.ShapeDtypeStruct((B, Np), jnp.float32),
        grid=(1,),
        in_specs=[
            pl.BlockSpec((B, Fp), lambda i: (0, 0)),
            pl.BlockSpec((Fp, Hp), lambda i: (0, 0)),
            pl.BlockSpec((1, Hp), lambda i: (0, 0)),
            pl.BlockSpec((Hp, Np), lambda i: (0, 0)),
            pl.BlockSpec((1, Np), lambda i: (0, 0)),
        ],
        out_specs=pl.BlockSpec((B, Np), lambda i: (0, 0)),
        compiler_params=pltpu.CompilerParams(
            dimension_semantics=("arbitrary",),
            vmem_limit_bytes=VMEM_LIMIT),
    )(xq, w1p, b1p, w2p, b2p)
    return out[:, :n_classes]


# ---------------------------------------------------------------------------
# CNN5 parameters + forward
# ---------------------------------------------------------------------------
def init_cnn5_params(key, *, input_channels, c1, c2, c3, c4, flatten,
                     linear_size, n_classes):
    keys = jax.random.split(key, 14)

    def conv_p(kw, kb, cin, cout):
        w = 0.05 * jax.random.normal(kw, (3, 3, cin, cout), jnp.float32)
        b = 0.05 * jax.random.normal(kb, (cout,), jnp.float32)
        return w, b

    def lin_p(kw, kb, din, dout):
        w = 0.05 * jax.random.normal(kw, (din, dout), jnp.float32)
        b = 0.05 * jax.random.normal(kb, (dout,), jnp.float32)
        return w, b

    p = {}
    p["conv1_w"], p["conv1_b"] = conv_p(keys[0], keys[1], input_channels, c1)
    p["conv2_w"], p["conv2_b"] = conv_p(keys[2], keys[3], c1, c2)
    p["conv3_w"], p["conv3_b"] = conv_p(keys[4], keys[5], c2, c3)
    p["conv4_w"], p["conv4_b"] = conv_p(keys[6], keys[7], c3, c4)
    p["conv5_w"], p["conv5_b"] = conv_p(keys[8], keys[9], c4, c4)
    p["fc1_w"], p["fc1_b"] = lin_p(keys[10], keys[11], c4 * flatten * flatten,
                                   linear_size)
    p["fc2_w"], p["fc2_b"] = lin_p(keys[12], keys[13], linear_size, n_classes)
    return p


def cnn5_forward(params, x_nchw, cfg):
    c1, c2, c3, c4 = cfg["c1"], cfg["c2"], cfg["c3"], cfg["c4"]
    n_classes = cfg["n_classes"]

    # NCHW (PyTorch convention) -> NHWC; pad channels once to a 128 multiple
    # (padded channels stay exactly zero through every fused conv stage).
    x = jnp.transpose(x_nchw, (0, 2, 3, 1)).astype(jnp.float32)
    cin = x.shape[-1]
    cpin = _round_up(cin, LANE)
    x = jnp.pad(x, ((0, 0), (0, 0), (0, 0), (0, cpin - cin))).astype(jnp.bfloat16)

    for i, cout in enumerate((c1, c2, c3, c4, c4), start=1):
        x = conv3x3_relu_pool(x, params[f"conv{i}_w"], params[f"conv{i}_b"], cout)

    # nn.Flatten() on NCHW flattens in (C, H, W) order: drop channel padding,
    # transpose back and flatten before the fused FC head.
    B = x.shape[0]
    feat = jnp.transpose(x[..., :c4], (0, 3, 1, 2)).reshape(B, -1)
    return mlp_head(feat, params["fc1_w"], params["fc1_b"],
                    params["fc2_w"], params["fc2_b"], n_classes)


if __name__ == "__main__":
    # Small-but-consistent config: 5 conv+pool stages halve 32 -> 1, so
    # flatten = 1 (mirrors the module's `output_channels_4 * flatten * flatten`).
    batch = 2
    img_size = 32
    input_channels = 3
    c1, c2, c3, c4 = 8, 16, 16, 32
    flatten = img_size // (2 ** 5)            # = 1
    linear_size = 64
    n_classes = 29

    key = jax.random.PRNGKey(0)
    pkey, xkey = jax.random.split(key)
    params = init_cnn5_params(
        pkey, input_channels=input_channels, c1=c1, c2=c2, c3=c3, c4=c4,
        flatten=flatten, linear_size=linear_size, n_classes=n_classes)

    x = jax.random.normal(xkey, (batch, input_channels, img_size, img_size),
                          jnp.float32)

    cfg = dict(c1=c1, c2=c2, c3=c3, c4=c4, n_classes=n_classes)
    fwd = jax.jit(functools.partial(cnn5_forward, cfg=cfg))
    logits = jax.block_until_ready(fwd(params, x))

    assert logits.shape == (batch, n_classes), logits.shape
    assert bool(jnp.all(jnp.isfinite(logits)))
    print("KERNEL_OK")
</pallas_src>

<mosaic_0001>
module attributes {stable_mosaic.version = 11 : i64} {
  func.func @_conv_relu_pool_kernel(%arg0: i32, %arg1: i32, %arg2: memref<1x34x34x128xbf16, #tpu.memory_space<vmem>>, %arg3: memref<1152x128xbf16, #tpu.memory_space<vmem>>, %arg4: memref<1x128xf32, #tpu.memory_space<vmem>>, %arg5: memref<1x8x16x128xbf16, #tpu.memory_space<vmem>>, %arg6: memref<32x128xf32, #tpu.memory_space<vmem>>) attributes {dimension_semantics = [#tpu.dimension_semantics<parallel>, #tpu.dimension_semantics<parallel>], iteration_bounds = array<i64: 2, 2>, scalar_prefetch = 0 : i64, scratch_operands = 1 : i64, tpu.core_type = #tpu.core_type<tc>, window_params = [{transform_indices = @transform_0, window_bounds = array<i64: 1, 34, 34, 128>}, {pipeline_mode = #tpu.pipeline_mode<synchronous>, transform_indices = @transform_1, window_bounds = array<i64: 1152, 128>}, {pipeline_mode = #tpu.pipeline_mode<synchronous>, transform_indices = @transform_2, window_bounds = array<i64: 1, 128>}, {transform_indices = @transform_3, window_bounds = array<i64: 1, 8, 16, 128>}]} {
    %c16_i32 = arith.constant 16 : i32
    %0 = arith.muli %arg1, %c16_i32 : i32
    %c0 = arith.constant 0 : index
    %c0_0 = arith.constant 0 : index
    %1 = vector.load %arg4[%c0, %c0_0] : memref<1x128xf32, #tpu.memory_space<vmem>>, vector<1x128xf32>
    %c0_1 = arith.constant 0 : index
    %c0_2 = arith.constant 0 : index
    %2 = vector.load %arg3[%c0_1, %c0_2] : memref<1152x128xbf16, #tpu.memory_space<vmem>>, vector<1152x128xbf16>
    %c0_i32 = arith.constant 0 : i32
    %c8_i32 = arith.constant 8 : i32
    %3 = arith.addi %c0_i32, %c8_i32 : i32
    %c1_i32 = arith.constant 1 : i32
    scf.for %arg7 = %c0_i32 to %3 step %c1_i32  : i32 {
      %c2_i32 = arith.constant 2 : i32
      %4 = arith.muli %c2_i32, %arg7 : i32
      %5 = arith.addi %0, %4 : i32
      %c0_i32_4 = arith.constant 0 : i32
      %6 = arith.addi %5, %c0_i32_4 : i32
      %c0_5 = arith.constant 0 : index
      %7 = arith.index_cast %6 : i32 to index
      %c0_6 = arith.constant 0 : index
      %c0_7 = arith.constant 0 : index
      %8 = vector.load %arg2[%c0_5, %7, %c0_6, %c0_7] : memref<1x34x34x128xbf16, #tpu.memory_space<vmem>>, vector<1x2x32x128xbf16>
      %9 = vector.shape_cast %8 : vector<1x2x32x128xbf16> to vector<2x32x128xbf16>
      %10 = vector.shape_cast %9 : vector<2x32x128xbf16> to vector<64x128xbf16>
      %c0_i32_8 = arith.constant 0 : i32
      %11 = arith.addi %5, %c0_i32_8 : i32
      %c0_9 = arith.constant 0 : index
      %12 = arith.index_cast %11 : i32 to index
      %c1 = arith.constant 1 : index
      %c0_10 = arith.constant 0 : index
      %13 = vector.load %arg2[%c0_9, %12, %c1, %c0_10] : memref<1x34x34x128xbf16, #tpu.memory_space<vmem>>, vector<1x2x32x128xbf16>
      %14 = vector.shape_cast %13 : vector<1x2x32x128xbf16> to vector<2x32x128xbf16>
      %15 = vector.shape_cast %14 : vector<2x32x128xbf16> to vector<64x128xbf16>
      %c0_i32_11 = arith.constant 0 : i32
      %16 = arith.addi %5, %c0_i32_11 : i32
      %c0_12 = arith.constant 0 : index
      %17 = arith.index_cast %16 : i32 to index
      %c2 = arith.constant 2 : index
      %c0_13 = arith.constant 0 : index
      %18 = vector.load %arg2[%c0_12, %17, %c2, %c0_13] : memref<1x34x34x128xbf16, #tpu.memory_space<vmem>>, vector<1x2x32x128xbf16>
      %19 = vector.shape_cast %18 : vector<1x2x32x128xbf16> to vector<2x32x128xbf16>
      %20 = vector.shape_cast %19 : vector<2x32x128xbf16> to vector<64x128xbf16>
      %c1_i32_14 = arith.constant 1 : i32
      %21 = arith.addi %5, %c1_i32_14 : i32
      %c0_15 = arith.constant 0 : index
      %22 = arith.index_cast %21 : i32 to index
      %c0_16 = arith.constant 0 : index
      %c0_17 = arith.constant 0 : index
      %23 = vector.load %arg2[%c0_15, %22, %c0_16, %c0_17] : memref<1x34x34x128xbf16, #tpu.memory_space<vmem>>, vector<1x2x32x128xbf16>
      %24 = vector.shape_cast %23 : vector<1x2x32x128xbf16> to vector<2x32x128xbf16>
      %25 = vector.shape_cast %24 : vector<2x32x128xbf16> to vector<64x128xbf16>
      %c1_i32_18 = arith.constant 1 : i32
      %26 = arith.addi %5, %c1_i32_18 : i32
      %c0_19 = arith.constant 0 : index
      %27 = arith.index_cast %26 : i32 to index
      %c1_20 = arith.constant 1 : index
      %c0_21 = arith.constant 0 : index
      %28 = vector.load %arg2[%c0_19, %27, %c1_20, %c0_21] : memref<1x34x34x128xbf16, #tpu.memory_space<vmem>>, vector<1x2x32x128xbf16>
      %29 = vector.shape_cast %28 : vector<1x2x32x128xbf16> to vector<2x32x128xbf16>
      %30 = vector.shape_cast %29 : vector<2x32x128xbf16> to vector<64x128xbf16>
      %c1_i32_22 = arith.constant 1 : i32
      %31 = arith.addi %5, %c1_i32_22 : i32
      %c0_23 = arith.constant 0 : index
      %32 = arith.index_cast %31 : i32 to index
      %c2_24 = arith.constant 2 : index
      %c0_25 = arith.constant 0 : index
      %33 = vector.load %arg2[%c0_23, %32, %c2_24, %c0_25] : memref<1x34x34x128xbf16, #tpu.memory_space<vmem>>, vector<1x2x32x128xbf16>
      %34 = vector.shape_cast %33 : vector<1x2x32x128xbf16> to vector<2x32x128xbf16>
      %35 = vector.shape_cast %34 : vector<2x32x128xbf16> to vector<64x128xbf16>
      %c2_i32_26 = arith.constant 2 : i32
      %36 = arith.addi %5, %c2_i32_26 : i32
      %c0_27 = arith.constant 0 : index
      %37 = arith.index_cast %36 : i32 to index
      %c0_28 = arith.constant 0 : index
      %c0_29 = arith.constant 0 : index
      %38 = vector.load %arg2[%c0_27, %37, %c0_28, %c0_29] : memref<1x34x34x128xbf16, #tpu.memory_space<vmem>>, vector<1x2x32x128xbf16>
      %39 = vector.shape_cast %38 : vector<1x2x32x128xbf16> to vector<2x32x128xbf16>
      %40 = vector.shape_cast %39 : vector<2x32x128xbf16> to vector<64x128xbf16>
      %c2_i32_30 = arith.constant 2 : i32
      %41 = arith.addi %5, %c2_i32_30 : i32
      %c0_31 = arith.constant 0 : index
      %42 = arith.index_cast %41 : i32 to index
      %c1_32 = arith.constant 1 : index
      %c0_33 = arith.constant 0 : index
      %43 = vector.load %arg2[%c0_31, %42, %c1_32, %c0_33] : memref<1x34x34x128xbf16, #tpu.memory_space<vmem>>, vector<1x2x32x128xbf16>
      %44 = vector.shape_cast %43 : vector<1x2x32x128xbf16> to vector<2x32x128xbf16>
      %45 = vector.shape_cast %44 : vector<2x32x128xbf16> to vector<64x128xbf16>
      %c2_i32_34 = arith.constant 2 : i32
      %46 = arith.addi %5, %c2_i32_34 : i32
      %c0_35 = arith.constant 0 : index
      %47 = arith.index_cast %46 : i32 to index
      %c2_36 = arith.constant 2 : index
      %c0_37 = arith.constant 0 : index
      %48 = vector.load %arg2[%c0_35, %47, %c2_36, %c0_37] : memref<1x34x34x128xbf16, #tpu.memory_space<vmem>>, vector<1x2x32x128xbf16>
      %49 = vector.shape_cast %48 : vector<1x2x32x128xbf16> to vector<2x32x128xbf16>
      %50 = vector.shape_cast %49 : vector<2x32x128xbf16> to vector<64x128xbf16>
      %51 = tpu.concatenate %10, %15, %20, %25, %30, %35, %40, %45, %50 in 1 : vector<64x128xbf16>, vector<64x128xbf16>, vector<64x128xbf16>, vector<64x128xbf16>, vector<64x128xbf16>, vector<64x128xbf16>, vector<64x128xbf16>, vector<64x128xbf16>, vector<64x128xbf16> -> vector<64x1152xbf16>
      %cst = arith.constant dense<0.000000e+00> : vector<64x128xf32>
      %52 = tpu.matmul %51, %2, %cst {dimension_numbers = #tpu.dot_dimension_numbers<[1], [0], [0], [1], [0, 0, 1, 1], [], []>} : vector<64x1152xbf16>, vector<1152x128xbf16>, vector<64x128xf32> -> vector<64x128xf32>
      %53 = vector.broadcast %1 : vector<1x128xf32> to vector<64x128xf32>
      %54 = arith.addf %52, %53 : vector<64x128xf32>
      %cst_38 = arith.constant 0.000000e+00 : f32
      %55 = vector.broadcast %cst_38 : f32 to vector<64x128xf32>
      %56 = arith.maximumf %54, %55 : vector<64x128xf32>
      %57 = vector.extract_strided_slice %56 {offsets = [0, 0], sizes = [32, 128], strides = [1, 1]} : vector<64x128xf32> to vector<32x128xf32>
      %58 = vector.extract_strided_slice %56 {offsets = [32, 0], sizes = [32, 128], strides = [1, 1]} : vector<64x128xf32> to vector<32x128xf32>
      %59 = arith.maximumf %57, %58 : vector<32x128xf32>
      %c0_39 = arith.constant 0 : index
      %c0_40 = arith.constant 0 : index
      %60 = vector.load %arg6[%c0_39, %c0_40] : memref<32x128xf32, #tpu.memory_space<vmem>>, vector<32x128xf32>
      tpu.vector_store %arg6[%c0_39, %c0_40], %59 {strides = array<i32>} : memref<32x128xf32, #tpu.memory_space<vmem>>, vector<32x128xf32>,
      %c0_41 = arith.constant 0 : index
      %c0_42 = arith.constant 0 : index
      %61 = tpu.strided_load %arg6[%c0_41, %c0_42] {strides = array<i32: 2, 1>} : memref<32x128xf32, #tpu.memory_space<vmem>>, vector<16x128xf32>
      %c1_43 = arith.constant 1 : index
      %c0_44 = arith.constant 0 : index
      %62 = tpu.strided_load %arg6[%c1_43, %c0_44] {strides = array<i32: 2, 1>} : memref<32x128xf32, #tpu.memory_space<vmem>>, vector<16x128xf32>
      %63 = arith.maximumf %61, %62 : vector<16x128xf32>
      %64 = arith.truncf %63 : vector<16x128xf32> to vector<16x128xbf16>
      %c0_45 = arith.constant 0 : index
      %65 = arith.index_cast %arg7 : i32 to index
      %c0_46 = arith.constant 0 : index
      %c0_47 = arith.constant 0 : index
      %66 = vector.load %arg5[%c0_45, %65, %c0_46, %c0_47] : memref<1x8x16x128xbf16, #tpu.memory_space<vmem>>, vector<1x1x16x128xbf16>
      %67 = vector.shape_cast %66 : vector<1x1x16x128xbf16> to vector<16x128xbf16>
      %68 = vector.shape_cast %64 : vector<16x128xbf16> to vector<1x1x16x128xbf16>
      tpu.vector_store %arg5[%c0_45, %65, %c0_46, %c0_47], %68 {strides = array<i32>} : memref<1x8x16x128xbf16, #tpu.memory_space<vmem>>, vector<1x1x16x128xbf16>,
    }
    %c8_i32_3 = arith.constant 8 : i32
    return
  }
  func.func @transform_0(%arg0: i32, %arg1: i32) -> (i32, i32, i32, i32) {
    %c0_i32 = arith.constant 0 : i32
    %c0_i32_0 = arith.constant 0 : i32
    %c0_i32_1 = arith.constant 0 : i32
    %c0_i32_2 = arith.constant 0 : i32
    return %arg0, %c0_i32, %c0_i32_0, %c0_i32_1 : i32, i32, i32, i32
  }
  func.func @transform_1(%arg0: i32, %arg1: i32) -> (i32, i32) {
    %c0_i32 = arith.constant 0 : i32
    %c0_i32_0 = arith.constant 0 : i32
    %c0_i32_1 = arith.constant 0 : i32
    return %c0_i32, %c0_i32_0 : i32, i32
  }
  func.func @transform_2(%arg0: i32, %arg1: i32) -> (i32, i32) {
    %c0_i32 = arith.constant 0 : i32
    %c0_i32_0 = arith.constant 0 : i32
    %c0_i32_1 = arith.constant 0 : i32
    return %c0_i32, %c0_i32_0 : i32, i32
  }
  func.func @transform_3(%arg0: i32, %arg1: i32) -> (i32, i32, i32, i32) {
    %c0_i32 = arith.constant 0 : i32
    %c0_i32_0 = arith.constant 0 : i32
    %c0_i32_1 = arith.constant 0 : i32
    return %arg0, %arg1, %c0_i32, %c0_i32_0 : i32, i32, i32, i32
  }
}

module attributes {stable_mosaic.version = 11 : i64} {
  func.func @_conv_relu_pool_kernel(%arg0: i32, %arg1: i32, %arg2: memref<1x18x18x128xbf16, #tpu.memory_space<vmem>>, %arg3: memref<1152x128xbf16, #tpu.memory_space<vmem>>, %arg4: memref<1x128xf32, #tpu.memory_space<vmem>>, %arg5: memref<1x8x8x128xbf16, #tpu.memory_space<vmem>>, %arg6: memref<16x128xf32, #tpu.memory_space<vmem>>) attributes {dimension_semantics = [#tpu.dimension_semantics<parallel>, #tpu.dimension_semantics<parallel>], iteration_bounds = array<i64: 2, 1>, scalar_prefetch = 0 : i64, scratch_operands = 1 : i64, tpu.core_type = #tpu.core_type<tc>, window_params = [{transform_indices = @transform_0, window_bounds = array<i64: 1, 18, 18, 128>}, {pipeline_mode = #tpu.pipeline_mode<synchronous>, transform_indices = @transform_1, window_bounds = array<i64: 1152, 128>}, {pipeline_mode = #tpu.pipeline_mode<synchronous>, transform_indices = @transform_2, window_bounds = array<i64: 1, 128>}, {transform_indices = @transform_3, window_bounds = array<i64: 1, 8, 8, 128>}]} {
    %c16_i32 = arith.constant 16 : i32
    %0 = arith.muli %arg1, %c16_i32 : i32
    %c0 = arith.constant 0 : index
    %c0_0 = arith.constant 0 : index
    %1 = vector.load %arg4[%c0, %c0_0] : memref<1x128xf32, #tpu.memory_space<vmem>>, vector<1x128xf32>
    %c0_1 = arith.constant 0 : index
    %c0_2 = arith.constant 0 : index
    %2 = vector.load %arg3[%c0_1, %c0_2] : memref<1152x128xbf16, #tpu.memory_space<vmem>>, vector<1152x128xbf16>
    %c0_i32 = arith.constant 0 : i32
    %c8_i32 = arith.constant 8 : i32
    %3 = arith.addi %c0_i32, %c8_i32 : i32
    %c1_i32 = arith.constant 1 : i32
    scf.for %arg7 = %c0_i32 to %3 step %c1_i32  : i32 {
      %c2_i32 = arith.constant 2 : i32
      %4 = arith.muli %c2_i32, %arg7 : i32
      %5 = arith.addi %0, %4 : i32
      %c0_i32_4 = arith.constant 0 : i32
      %6 = arith.addi %5, %c0_i32_4 : i32
      %c0_5 = arith.constant 0 : index
      %7 = arith.index_cast %6 : i32 to index
      %c0_6 = arith.constant 0 : index
      %c0_7 = arith.constant 0 : index
      %8 = vector.load %arg2[%c0_5, %7, %c0_6, %c0_7] : memref<1x18x18x128xbf16, #tpu.memory_space<vmem>>, vector<1x2x16x128xbf16>
      %9 = vector.shape_cast %8 : vector<1x2x16x128xbf16> to vector<2x16x128xbf16>
      %10 = vector.shape_cast %9 : vector<2x16x128xbf16> to vector<32x128xbf16>
      %c0_i32_8 = arith.constant 0 : i32
      %11 = arith.addi %5, %c0_i32_8 : i32
      %c0_9 = arith.constant 0 : index
      %12 = arith.index_cast %11 : i32 to index
      %c1 = arith.constant 1 : index
      %c0_10 = arith.constant 0 : index
      %13 = vector.load %arg2[%c0_9, %12, %c1, %c0_10] : memref<1x18x18x128xbf16, #tpu.memory_space<vmem>>, vector<1x2x16x128xbf16>
      %14 = vector.shape_cast %13 : vector<1x2x16x128xbf16> to vector<2x16x128xbf16>
      %15 = vector.shape_cast %14 : vector<2x16x128xbf16> to vector<32x128xbf16>
      %c0_i32_11 = arith.constant 0 : i32
      %16 = arith.addi %5, %c0_i32_11 : i32
      %c0_12 = arith.constant 0 : index
      %17 = arith.index_cast %16 : i32 to index
      %c2 = arith.constant 2 : index
      %c0_13 = arith.constant 0 : index
      %18 = vector.load %arg2[%c0_12, %17, %c2, %c0_13] : memref<1x18x18x128xbf16, #tpu.memory_space<vmem>>, vector<1x2x16x128xbf16>
      %19 = vector.shape_cast %18 : vector<1x2x16x128xbf16> to vector<2x16x128xbf16>
      %20 = vector.shape_cast %19 : vector<2x16x128xbf16> to vector<32x128xbf16>
      %c1_i32_14 = arith.constant 1 : i32
      %21 = arith.addi %5, %c1_i32_14 : i32
      %c0_15 = arith.constant 0 : index
      %22 = arith.index_cast %21 : i32 to index
      %c0_16 = arith.constant 0 : index
      %c0_17 = arith.constant 0 : index
      %23 = vector.load %arg2[%c0_15, %22, %c0_16, %c0_17] : memref<1x18x18x128xbf16, #tpu.memory_space<vmem>>, vector<1x2x16x128xbf16>
      %24 = vector.shape_cast %23 : vector<1x2x16x128xbf16> to vector<2x16x128xbf16>
      %25 = vector.shape_cast %24 : vector<2x16x128xbf16> to vector<32x128xbf16>
      %c1_i32_18 = arith.constant 1 : i32
      %26 = arith.addi %5, %c1_i32_18 : i32
      %c0_19 = arith.constant 0 : index
      %27 = arith.index_cast %26 : i32 to index
      %c1_20 = arith.constant 1 : index
      %c0_21 = arith.constant 0 : index
      %28 = vector.load %arg2[%c0_19, %27, %c1_20, %c0_21] : memref<1x18x18x128xbf16, #tpu.memory_space<vmem>>, vector<1x2x16x128xbf16>
      %29 = vector.shape_cast %28 : vector<1x2x16x128xbf16> to vector<2x16x128xbf16>
      %30 = vector.shape_cast %29 : vector<2x16x128xbf16> to vector<32x128xbf16>
      %c1_i32_22 = arith.constant 1 : i32
      %31 = arith.addi %5, %c1_i32_22 : i32
      %c0_23 = arith.constant 0 : index
      %32 = arith.index_cast %31 : i32 to index
      %c2_24 = arith.constant 2 : index
      %c0_25 = arith.constant 0 : index
      %33 = vector.load %arg2[%c0_23, %32, %c2_24, %c0_25] : memref<1x18x18x128xbf16, #tpu.memory_space<vmem>>, vector<1x2x16x128xbf16>
      %34 = vector.shape_cast %33 : vector<1x2x16x128xbf16> to vector<2x16x128xbf16>
      %35 = vector.shape_cast %34 : vector<2x16x128xbf16> to vector<32x128xbf16>
      %c2_i32_26 = arith.constant 2 : i32
      %36 = arith.addi %5, %c2_i32_26 : i32
      %c0_27 = arith.constant 0 : index
      %37 = arith.index_cast %36 : i32 to index
      %c0_28 = arith.constant 0 : index
      %c0_29 = arith.constant 0 : index
      %38 = vector.load %arg2[%c0_27, %37, %c0_28, %c0_29] : memref<1x18x18x128xbf16, #tpu.memory_space<vmem>>, vector<1x2x16x128xbf16>
      %39 = vector.shape_cast %38 : vector<1x2x16x128xbf16> to vector<2x16x128xbf16>
      %40 = vector.shape_cast %39 : vector<2x16x128xbf16> to vector<32x128xbf16>
      %c2_i32_30 = arith.constant 2 : i32
      %41 = arith.addi %5, %c2_i32_30 : i32
      %c0_31 = arith.constant 0 : index
      %42 = arith.index_cast %41 : i32 to index
      %c1_32 = arith.constant 1 : index
      %c0_33 = arith.constant 0 : index
      %43 = vector.load %arg2[%c0_31, %42, %c1_32, %c0_33] : memref<1x18x18x128xbf16, #tpu.memory_space<vmem>>, vector<1x2x16x128xbf16>
      %44 = vector.shape_cast %43 : vector<1x2x16x128xbf16> to vector<2x16x128xbf16>
      %45 = vector.shape_cast %44 : vector<2x16x128xbf16> to vector<32x128xbf16>
      %c2_i32_34 = arith.constant 2 : i32
      %46 = arith.addi %5, %c2_i32_34 : i32
      %c0_35 = arith.constant 0 : index
      %47 = arith.index_cast %46 : i32 to index
      %c2_36 = arith.constant 2 : index
      %c0_37 = arith.constant 0 : index
      %48 = vector.load %arg2[%c0_35, %47, %c2_36, %c0_37] : memref<1x18x18x128xbf16, #tpu.memory_space<vmem>>, vector<1x2x16x128xbf16>
      %49 = vector.shape_cast %48 : vector<1x2x16x128xbf16> to vector<2x16x128xbf16>
      %50 = vector.shape_cast %49 : vector<2x16x128xbf16> to vector<32x128xbf16>
      %51 = tpu.concatenate %10, %15, %20, %25, %30, %35, %40, %45, %50 in 1 : vector<32x128xbf16>, vector<32x128xbf16>, vector<32x128xbf16>, vector<32x128xbf16>, vector<32x128xbf16>, vector<32x128xbf16>, vector<32x128xbf16>, vector<32x128xbf16>, vector<32x128xbf16> -> vector<32x1152xbf16>
      %cst = arith.constant dense<0.000000e+00> : vector<32x128xf32>
      %52 = tpu.matmul %51, %2, %cst {dimension_numbers = #tpu.dot_dimension_numbers<[1], [0], [0], [1], [0, 0, 1, 1], [], []>} : vector<32x1152xbf16>, vector<1152x128xbf16>, vector<32x128xf32> -> vector<32x128xf32>
      %53 = vector.broadcast %1 : vector<1x128xf32> to vector<32x128xf32>
      %54 = arith.addf %52, %53 : vector<32x128xf32>
      %cst_38 = arith.constant 0.000000e+00 : f32
      %55 = vector.broadcast %cst_38 : f32 to vector<32x128xf32>
      %56 = arith.maximumf %54, %55 : vector<32x128xf32>
      %57 = vector.extract_strided_slice %56 {offsets = [0, 0], sizes = [16, 128], strides = [1, 1]} : vector<32x128xf32> to vector<16x128xf32>
      %58 = vector.extract_strided_slice %56 {offsets = [16, 0], sizes = [16, 128], strides = [1, 1]} : vector<32x128xf32> to vector<16x128xf32>
      %59 = arith.maximumf %57, %58 : vector<16x128xf32>
      %c0_39 = arith.constant 0 : index
      %c0_40 = arith.constant 0 : index
      %60 = vector.load %arg6[%c0_39, %c0_40] : memref<16x128xf32, #tpu.memory_space<vmem>>, vector<16x128xf32>
      tpu.vector_store %arg6[%c0_39, %c0_40], %59 {strides = array<i32>} : memref<16x128xf32, #tpu.memory_space<vmem>>, vector<16x128xf32>,
      %c0_41 = arith.constant 0 : index
      %c0_42 = arith.constant 0 : index
      %61 = tpu.strided_load %arg6[%c0_41, %c0_42] {strides = array<i32: 2, 1>} : memref<16x128xf32, #tpu.memory_space<vmem>>, vector<8x128xf32>
      %c1_43 = arith.constant 1 : index
      %c0_44 = arith.constant 0 : index
      %62 = tpu.strided_load %arg6[%c1_43, %c0_44] {strides = array<i32: 2, 1>} : memref<16x128xf32, #tpu.memory_space<vmem>>, vector<8x128xf32>
      %63 = arith.maximumf %61, %62 : vector<8x128xf32>
      %64 = arith.truncf %63 : vector<8x128xf32> to vector<8x128xbf16>
      %c0_45 = arith.constant 0 : index
      %65 = arith.index_cast %arg7 : i32 to index
      %c0_46 = arith.constant 0 : index
      %c0_47 = arith.constant 0 : index
      %66 = vector.load %arg5[%c0_45, %65, %c0_46, %c0_47] : memref<1x8x8x128xbf16, #tpu.memory_space<vmem>>, vector<1x1x8x128xbf16>
      %67 = vector.shape_cast %66 : vector<1x1x8x128xbf16> to vector<8x128xbf16>
      %68 = vector.shape_cast %64 : vector<8x128xbf16> to vector<1x1x8x128xbf16>
      tpu.vector_store %arg5[%c0_45, %65, %c0_46, %c0_47], %68 {strides = array<i32>} : memref<1x8x8x128xbf16, #tpu.memory_space<vmem>>, vector<1x1x8x128xbf16>,
    }
    %c8_i32_3 = arith.constant 8 : i32
    return
  }
  func.func @transform_0(%arg0: i32, %arg1: i32) -> (i32, i32, i32, i32) {
    %c0_i32 = arith.constant 0 : i32
    %c0_i32_0 = arith.constant 0 : i32
    %c0_i32_1 = arith.constant 0 : i32
    %c0_i32_2 = arith.constant 0 : i32
    return %arg0, %c0_i32, %c0_i32_0, %c0_i32_1 : i32, i32, i32, i32
  }
  func.func @transform_1(%arg0: i32, %arg1: i32) -> (i32, i32) {
    %c0_i32 = arith.constant 0 : i32
    %c0_i32_0 = arith.constant 0 : i32
    %c0_i32_1 = arith.constant 0 : i32
    return %c0_i32, %c0_i32_0 : i32, i32
  }
  func.func @transform_2(%arg0: i32, %arg1: i32) -> (i32, i32) {
    %c0_i32 = arith.constant 0 : i32
    %c0_i32_0 = arith.constant 0 : i32
    %c0_i32_1 = arith.constant 0 : i32
    return %c0_i32, %c0_i32_0 : i32, i32
  }
  func.func @transform_3(%arg0: i32, %arg1: i32) -> (i32, i32, i32, i32) {
    %c0_i32 = arith.constant 0 : i32
    %c0_i32_0 = arith.constant 0 : i32
    %c0_i32_1 = arith.constant 0 : i32
    return %arg0, %arg1, %c0_i32, %c0_i32_0 : i32, i32, i32, i32
  }
}

module attributes {stable_mosaic.version = 11 : i64} {
  func.func @_conv_relu_pool_kernel(%arg0: i32, %arg1: i32, %arg2: memref<1x10x10x128xbf16, #tpu.memory_space<vmem>>, %arg3: memref<1152x128xbf16, #tpu.memory_space<vmem>>, %arg4: memref<1x128xf32, #tpu.memory_space<vmem>>, %arg5: memref<1x4x4x128xbf16, #tpu.memory_space<vmem>>, %arg6: memref<8x128xf32, #tpu.memory_space<vmem>>) attributes {dimension_semantics = [#tpu.dimension_semantics<parallel>, #tpu.dimension_semantics<parallel>], iteration_bounds = array<i64: 2, 1>, scalar_prefetch = 0 : i64, scratch_operands = 1 : i64, tpu.core_type = #tpu.core_type<tc>, window_params = [{transform_indices = @transform_0, window_bounds = array<i64: 1, 10, 10, 128>}, {pipeline_mode = #tpu.pipeline_mode<synchronous>, transform_indices = @transform_1, window_bounds = array<i64: 1152, 128>}, {pipeline_mode = #tpu.pipeline_mode<synchronous>, transform_indices = @transform_2, window_bounds = array<i64: 1, 128>}, {transform_indices = @transform_3, window_bounds = array<i64: 1, 4, 4, 128>}]} {
    %c8_i32 = arith.constant 8 : i32
    %0 = arith.muli %arg1, %c8_i32 : i32
    %c0 = arith.constant 0 : index
    %c0_0 = arith.constant 0 : index
    %1 = vector.load %arg4[%c0, %c0_0] : memref<1x128xf32, #tpu.memory_space<vmem>>, vector<1x128xf32>
    %c0_1 = arith.constant 0 : index
    %c0_2 = arith.constant 0 : index
    %2 = vector.load %arg3[%c0_1, %c0_2] : memref<1152x128xbf16, #tpu.memory_space<vmem>>, vector<1152x128xbf16>
    %c0_i32 = arith.constant 0 : i32
    %c4_i32 = arith.constant 4 : i32
    %3 = arith.addi %c0_i32, %c4_i32 : i32
    %c1_i32 = arith.constant 1 : i32
    scf.for %arg7 = %c0_i32 to %3 step %c1_i32  : i32 {
      %c2_i32 = arith.constant 2 : i32
      %4 = arith.muli %c2_i32, %arg7 : i32
      %5 = arith.addi %0, %4 : i32
      %c0_i32_4 = arith.constant 0 : i32
      %6 = arith.addi %5, %c0_i32_4 : i32
      %c0_5 = arith.constant 0 : index
      %7 = arith.index_cast %6 : i32 to index
      %c0_6 = arith.constant 0 : index
      %c0_7 = arith.constant 0 : index
      %8 = vector.load %arg2[%c0_5, %7, %c0_6, %c0_7] : memref<1x10x10x128xbf16, #tpu.memory_space<vmem>>, vector<1x2x8x128xbf16>
      %9 = vector.shape_cast %8 : vector<1x2x8x128xbf16> to vector<2x8x128xbf16>
      %10 = vector.shape_cast %9 : vector<2x8x128xbf16> to vector<16x128xbf16>
      %c0_i32_8 = arith.constant 0 : i32
      %11 = arith.addi %5, %c0_i32_8 : i32
      %c0_9 = arith.constant 0 : index
      %12 = arith.index_cast %11 : i32 to index
      %c1 = arith.constant 1 : index
      %c0_10 = arith.constant 0 : index
      %13 = vector.load %arg2[%c0_9, %12, %c1, %c0_10] : memref<1x10x10x128xbf16, #tpu.memory_space<vmem>>, vector<1x2x8x128xbf16>
      %14 = vector.shape_cast %13 : vector<1x2x8x128xbf16> to vector<2x8x128xbf16>
      %15 = vector.shape_cast %14 : vector<2x8x128xbf16> to vector<16x128xbf16>
      %c0_i32_11 = arith.constant 0 : i32
      %16 = arith.addi %5, %c0_i32_11 : i32
      %c0_12 = arith.constant 0 : index
      %17 = arith.index_cast %16 : i32 to index
      %c2 = arith.constant 2 : index
      %c0_13 = arith.constant 0 : index
      %18 = vector.load %arg2[%c0_12, %17, %c2, %c0_13] : memref<1x10x10x128xbf16, #tpu.memory_space<vmem>>, vector<1x2x8x128xbf16>
      %19 = vector.shape_cast %18 : vector<1x2x8x128xbf16> to vector<2x8x128xbf16>
      %20 = vector.shape_cast %19 : vector<2x8x128xbf16> to vector<16x128xbf16>
      %c1_i32_14 = arith.constant 1 : i32
      %21 = arith.addi %5, %c1_i32_14 : i32
      %c0_15 = arith.constant 0 : index
      %22 = arith.index_cast %21 : i32 to index
      %c0_16 = arith.constant 0 : index
      %c0_17 = arith.constant 0 : index
      %23 = vector.load %arg2[%c0_15, %22, %c0_16, %c0_17] : memref<1x10x10x128xbf16, #tpu.memory_space<vmem>>, vector<1x2x8x128xbf16>
      %24 = vector.shape_cast %23 : vector<1x2x8x128xbf16> to vector<2x8x128xbf16>
      %25 = vector.shape_cast %24 : vector<2x8x128xbf16> to vector<16x128xbf16>
      %c1_i32_18 = arith.constant 1 : i32
      %26 = arith.addi %5, %c1_i32_18 : i32
      %c0_19 = arith.constant 0 : index
      %27 = arith.index_cast %26 : i32 to index
      %c1_20 = arith.constant 1 : index
      %c0_21 = arith.constant 0 : index
      %28 = vector.load %arg2[%c0_19, %27, %c1_20, %c0_21] : memref<1x10x10x128xbf16, #tpu.memory_space<vmem>>, vector<1x2x8x128xbf16>
      %29 = vector.shape_cast %28 : vector<1x2x8x128xbf16> to vector<2x8x128xbf16>
      %30 = vector.shape_cast %29 : vector<2x8x128xbf16> to vector<16x128xbf16>
      %c1_i32_22 = arith.constant 1 : i32
      %31 = arith.addi %5, %c1_i32_22 : i32
      %c0_23 = arith.constant 0 : index
      %32 = arith.index_cast %31 : i32 to index
      %c2_24 = arith.constant 2 : index
      %c0_25 = arith.constant 0 : index
      %33 = vector.load %arg2[%c0_23, %32, %c2_24, %c0_25] : memref<1x10x10x128xbf16, #tpu.memory_space<vmem>>, vector<1x2x8x128xbf16>
      %34 = vector.shape_cast %33 : vector<1x2x8x128xbf16> to vector<2x8x128xbf16>
      %35 = vector.shape_cast %34 : vector<2x8x128xbf16> to vector<16x128xbf16>
      %c2_i32_26 = arith.constant 2 : i32
      %36 = arith.addi %5, %c2_i32_26 : i32
      %c0_27 = arith.constant 0 : index
      %37 = arith.index_cast %36 : i32 to index
      %c0_28 = arith.constant 0 : index
      %c0_29 = arith.constant 0 : index
      %38 = vector.load %arg2[%c0_27, %37, %c0_28, %c0_29] : memref<1x10x10x128xbf16, #tpu.memory_space<vmem>>, vector<1x2x8x128xbf16>
      %39 = vector.shape_cast %38 : vector<1x2x8x128xbf16> to vector<2x8x128xbf16>
      %40 = vector.shape_cast %39 : vector<2x8x128xbf16> to vector<16x128xbf16>
      %c2_i32_30 = arith.constant 2 : i32
      %41 = arith.addi %5, %c2_i32_30 : i32
      %c0_31 = arith.constant 0 : index
      %42 = arith.index_cast %41 : i32 to index
      %c1_32 = arith.constant 1 : index
      %c0_33 = arith.constant 0 : index
      %43 = vector.load %arg2[%c0_31, %42, %c1_32, %c0_33] : memref<1x10x10x128xbf16, #tpu.memory_space<vmem>>, vector<1x2x8x128xbf16>
      %44 = vector.shape_cast %43 : vector<1x2x8x128xbf16> to vector<2x8x128xbf16>
      %45 = vector.shape_cast %44 : vector<2x8x128xbf16> to vector<16x128xbf16>
      %c2_i32_34 = arith.constant 2 : i32
      %46 = arith.addi %5, %c2_i32_34 : i32
      %c0_35 = arith.constant 0 : index
      %47 = arith.index_cast %46 : i32 to index
      %c2_36 = arith.constant 2 : index
      %c0_37 = arith.constant 0 : index
      %48 = vector.load %arg2[%c0_35, %47, %c2_36, %c0_37] : memref<1x10x10x128xbf16, #tpu.memory_space<vmem>>, vector<1x2x8x128xbf16>
      %49 = vector.shape_cast %48 : vector<1x2x8x128xbf16> to vector<2x8x128xbf16>
      %50 = vector.shape_cast %49 : vector<2x8x128xbf16> to vector<16x128xbf16>
      %51 = tpu.concatenate %10, %15, %20, %25, %30, %35, %40, %45, %50 in 1 : vector<16x128xbf16>, vector<16x128xbf16>, vector<16x128xbf16>, vector<16x128xbf16>, vector<16x128xbf16>, vector<16x128xbf16>, vector<16x128xbf16>, vector<16x128xbf16>, vector<16x128xbf16> -> vector<16x1152xbf16>
      %cst = arith.constant dense<0.000000e+00> : vector<16x128xf32>
      %52 = tpu.matmul %51, %2, %cst {dimension_numbers = #tpu.dot_dimension_numbers<[1], [0], [0], [1], [0, 0, 1, 1], [], []>} : vector<16x1152xbf16>, vector<1152x128xbf16>, vector<16x128xf32> -> vector<16x128xf32>
      %53 = vector.broadcast %1 : vector<1x128xf32> to vector<16x128xf32>
      %54 = arith.addf %52, %53 : vector<16x128xf32>
      %cst_38 = arith.constant 0.000000e+00 : f32
      %55 = vector.broadcast %cst_38 : f32 to vector<16x128xf32>
      %56 = arith.maximumf %54, %55 : vector<16x128xf32>
      %57 = vector.extract_strided_slice %56 {offsets = [0, 0], sizes = [8, 128], strides = [1, 1]} : vector<16x128xf32> to vector<8x128xf32>
      %58 = vector.extract_strided_slice %56 {offsets = [8, 0], sizes = [8, 128], strides = [1, 1]} : vector<16x128xf32> to vector<8x128xf32>
      %59 = arith.maximumf %57, %58 : vector<8x128xf32>
      %c0_39 = arith.constant 0 : index
      %c0_40 = arith.constant 0 : index
      %60 = vector.load %arg6[%c0_39, %c0_40] : memref<8x128xf32, #tpu.memory_space<vmem>>, vector<8x128xf32>
      tpu.vector_store %arg6[%c0_39, %c0_40], %59 {strides = array<i32>} : memref<8x128xf32, #tpu.memory_space<vmem>>, vector<8x128xf32>,
      %c0_41 = arith.constant 0 : index
      %c0_42 = arith.constant 0 : index
      %61 = tpu.strided_load %arg6[%c0_41, %c0_42] {strides = array<i32: 2, 1>} : memref<8x128xf32, #tpu.memory_space<vmem>>, vector<4x128xf32>
      %c1_43 = arith.constant 1 : index
      %c0_44 = arith.constant 0 : index
      %62 = tpu.strided_load %arg6[%c1_43, %c0_44] {strides = array<i32: 2, 1>} : memref<8x128xf32, #tpu.memory_space<vmem>>, vector<4x128xf32>
      %63 = arith.maximumf %61, %62 : vector<4x128xf32>
      %64 = arith.truncf %63 : vector<4x128xf32> to vector<4x128xbf16>
      %c0_45 = arith.constant 0 : index
      %65 = arith.index_cast %arg7 : i32 to index
      %c0_46 = arith.constant 0 : index
      %c0_47 = arith.constant 0 : index
      %66 = vector.load %arg5[%c0_45, %65, %c0_46, %c0_47] : memref<1x4x4x128xbf16, #tpu.memory_space<vmem>>, vector<1x1x4x128xbf16>
      %67 = vector.shape_cast %66 : vector<1x1x4x128xbf16> to vector<4x128xbf16>
      %68 = vector.shape_cast %64 : vector<4x128xbf16> to vector<1x1x4x128xbf16>
      tpu.vector_store %arg5[%c0_45, %65, %c0_46, %c0_47], %68 {strides = array<i32>} : memref<1x4x4x128xbf16, #tpu.memory_space<vmem>>, vector<1x1x4x128xbf16>,
    }
    %c4_i32_3 = arith.constant 4 : i32
    return
  }
  func.func @transform_0(%arg0: i32, %arg1: i32) -> (i32, i32, i32, i32) {
    %c0_i32 = arith.constant 0 : i32
    %c0_i32_0 = arith.constant 0 : i32
    %c0_i32_1 = arith.constant 0 : i32
    %c0_i32_2 = arith.constant 0 : i32
    return %arg0, %c0_i32, %c0_i32_0, %c0_i32_1 : i32, i32, i32, i32
  }
  func.func @transform_1(%arg0: i32, %arg1: i32) -> (i32, i32) {
    %c0_i32 = arith.constant 0 : i32
    %c0_i32_0 = arith.constant 0 : i32
    %c0_i32_1 = arith.constant 0 : i32
    return %c0_i32, %c0_i32_0 : i32, i32
  }
  func.func @transform_2(%arg0: i32, %arg1: i32) -> (i32, i32) {
    %c0_i32 = arith.constant 0 : i32
    %c0_i32_0 = arith.constant 0 : i32
    %c0_i32_1 = arith.constant 0 : i32
    return %c0_i32, %c0_i32_0 : i32, i32
  }
  func.func @transform_3(%arg0: i32, %arg1: i32) -> (i32, i32, i32, i32) {
    %c0_i32 = arith.constant 0 : i32
    %c0_i32_0 = arith.constant 0 : i32
    %c0_i32_1 = arith.constant 0 : i32
    return %arg0, %arg1, %c0_i32, %c0_i32_0 : i32, i32, i32, i32
  }
}

module attributes {stable_mosaic.version = 11 : i64} {
  func.func @_conv_relu_pool_kernel(%arg0: i32, %arg1: i32, %arg2: memref<1x6x6x128xbf16, #tpu.memory_space<vmem>>, %arg3: memref<1152x128xbf16, #tpu.memory_space<vmem>>, %arg4: memref<1x128xf32, #tpu.memory_space<vmem>>, %arg5: memref<1x2x2x128xbf16, #tpu.memory_space<vmem>>, %arg6: memref<4x128xf32, #tpu.memory_space<vmem>>) attributes {dimension_semantics = [#tpu.dimension_semantics<parallel>, #tpu.dimension_semantics<parallel>], iteration_bounds = array<i64: 2, 1>, scalar_prefetch = 0 : i64, scratch_operands = 1 : i64, tpu.core_type = #tpu.core_type<tc>, window_params = [{transform_indices = @transform_0, window_bounds = array<i64: 1, 6, 6, 128>}, {pipeline_mode = #tpu.pipeline_mode<synchronous>, transform_indices = @transform_1, window_bounds = array<i64: 1152, 128>}, {pipeline_mode = #tpu.pipeline_mode<synchronous>, transform_indices = @transform_2, window_bounds = array<i64: 1, 128>}, {transform_indices = @transform_3, window_bounds = array<i64: 1, 2, 2, 128>}]} {
    %c4_i32 = arith.constant 4 : i32
    %0 = arith.muli %arg1, %c4_i32 : i32
    %c0 = arith.constant 0 : index
    %c0_0 = arith.constant 0 : index
    %1 = vector.load %arg4[%c0, %c0_0] : memref<1x128xf32, #tpu.memory_space<vmem>>, vector<1x128xf32>
    %c0_1 = arith.constant 0 : index
    %c0_2 = arith.constant 0 : index
    %2 = vector.load %arg3[%c0_1, %c0_2] : memref<1152x128xbf16, #tpu.memory_space<vmem>>, vector<1152x128xbf16>
    %c0_i32 = arith.constant 0 : i32
    %c2_i32 = arith.constant 2 : i32
    %3 = arith.addi %c0_i32, %c2_i32 : i32
    %c1_i32 = arith.constant 1 : i32
    scf.for %arg7 = %c0_i32 to %3 step %c1_i32  : i32 {
      %c2_i32_4 = arith.constant 2 : i32
      %4 = arith.muli %c2_i32_4, %arg7 : i32
      %5 = arith.addi %0, %4 : i32
      %c0_i32_5 = arith.constant 0 : i32
      %6 = arith.addi %5, %c0_i32_5 : i32
      %c0_6 = arith.constant 0 : index
      %7 = arith.index_cast %6 : i32 to index
      %c0_7 = arith.constant 0 : index
      %c0_8 = arith.constant 0 : index
      %8 = vector.load %arg2[%c0_6, %7, %c0_7, %c0_8] : memref<1x6x6x128xbf16, #tpu.memory_space<vmem>>, vector<1x2x4x128xbf16>
      %9 = vector.shape_cast %8 : vector<1x2x4x128xbf16> to vector<2x4x128xbf16>
      %10 = vector.shape_cast %9 : vector<2x4x128xbf16> to vector<8x128xbf16>
      %c0_i32_9 = arith.constant 0 : i32
      %11 = arith.addi %5, %c0_i32_9 : i32
      %c0_10 = arith.constant 0 : index
      %12 = arith.index_cast %11 : i32 to index
      %c1 = arith.constant 1 : index
      %c0_11 = arith.constant 0 : index
      %13 = vector.load %arg2[%c0_10, %12, %c1, %c0_11] : memref<1x6x6x128xbf16, #tpu.memory_space<vmem>>, vector<1x2x4x128xbf16>
      %14 = vector.shape_cast %13 : vector<1x2x4x128xbf16> to vector<2x4x128xbf16>
      %15 = vector.shape_cast %14 : vector<2x4x128xbf16> to vector<8x128xbf16>
      %c0_i32_12 = arith.constant 0 : i32
      %16 = arith.addi %5, %c0_i32_12 : i32
      %c0_13 = arith.constant 0 : index
      %17 = arith.index_cast %16 : i32 to index
      %c2 = arith.constant 2 : index
      %c0_14 = arith.constant 0 : index
      %18 = vector.load %arg2[%c0_13, %17, %c2, %c0_14] : memref<1x6x6x128xbf16, #tpu.memory_space<vmem>>, vector<1x2x4x128xbf16>
      %19 = vector.shape_cast %18 : vector<1x2x4x128xbf16> to vector<2x4x128xbf16>
      %20 = vector.shape_cast %19 : vector<2x4x128xbf16> to vector<8x128xbf16>
      %c1_i32_15 = arith.constant 1 : i32
      %21 = arith.addi %5, %c1_i32_15 : i32
      %c0_16 = arith.constant 0 : index
      %22 = arith.index_cast %21 : i32 to index
      %c0_17 = arith.constant 0 : index
      %c0_18 = arith.constant 0 : index
      %23 = vector.load %arg2[%c0_16, %22, %c0_17, %c0_18] : memref<1x6x6x128xbf16, #tpu.memory_space<vmem>>, vector<1x2x4x128xbf16>
      %24 = vector.shape_cast %23 : vector<1x2x4x128xbf16> to vector<2x4x128xbf16>
      %25 = vector.shape_cast %24 : vector<2x4x128xbf16> to vector<8x128xbf16>
      %c1_i32_19 = arith.constant 1 : i32
      %26 = arith.addi %5, %c1_i32_19 : i32
      %c0_20 = arith.constant 0 : index
      %27 = arith.index_cast %26 : i32 to index
      %c1_21 = arith.constant 1 : index
      %c0_22 = arith.constant 0 : index
      %28 = vector.load %arg2[%c0_20, %27, %c1_21, %c0_22] : memref<1x6x6x128xbf16, #tpu.memory_space<vmem>>, vector<1x2x4x128xbf16>
      %29 = vector.shape_cast %28 : vector<1x2x4x128xbf16> to vector<2x4x128xbf16>
      %30 = vector.shape_cast %29 : vector<2x4x128xbf16> to vector<8x128xbf16>
      %c1_i32_23 = arith.constant 1 : i32
      %31 = arith.addi %5, %c1_i32_23 : i32
      %c0_24 = arith.constant 0 : index
      %32 = arith.index_cast %31 : i32 to index
      %c2_25 = arith.constant 2 : index
      %c0_26 = arith.constant 0 : index
      %33 = vector.load %arg2[%c0_24, %32, %c2_25, %c0_26] : memref<1x6x6x128xbf16, #tpu.memory_space<vmem>>, vector<1x2x4x128xbf16>
      %34 = vector.shape_cast %33 : vector<1x2x4x128xbf16> to vector<2x4x128xbf16>
      %35 = vector.shape_cast %34 : vector<2x4x128xbf16> to vector<8x128xbf16>
      %c2_i32_27 = arith.constant 2 : i32
      %36 = arith.addi %5, %c2_i32_27 : i32
      %c0_28 = arith.constant 0 : index
      %37 = arith.index_cast %36 : i32 to index
      %c0_29 = arith.constant 0 : index
      %c0_30 = arith.constant 0 : index
      %38 = vector.load %arg2[%c0_28, %37, %c0_29, %c0_30] : memref<1x6x6x128xbf16, #tpu.memory_space<vmem>>, vector<1x2x4x128xbf16>
      %39 = vector.shape_cast %38 : vector<1x2x4x128xbf16> to vector<2x4x128xbf16>
      %40 = vector.shape_cast %39 : vector<2x4x128xbf16> to vector<8x128xbf16>
      %c2_i32_31 = arith.constant 2 : i32
      %41 = arith.addi %5, %c2_i32_31 : i32
      %c0_32 = arith.constant 0 : index
      %42 = arith.index_cast %41 : i32 to index
      %c1_33 = arith.constant 1 : index
      %c0_34 = arith.constant 0 : index
      %43 = vector.load %arg2[%c0_32, %42, %c1_33, %c0_34] : memref<1x6x6x128xbf16, #tpu.memory_space<vmem>>, vector<1x2x4x128xbf16>
      %44 = vector.shape_cast %43 : vector<1x2x4x128xbf16> to vector<2x4x128xbf16>
      %45 = vector.shape_cast %44 : vector<2x4x128xbf16> to vector<8x128xbf16>
      %c2_i32_35 = arith.constant 2 : i32
      %46 = arith.addi %5, %c2_i32_35 : i32
      %c0_36 = arith.constant 0 : index
      %47 = arith.index_cast %46 : i32 to index
      %c2_37 = arith.constant 2 : index
      %c0_38 = arith.constant 0 : index
      %48 = vector.load %arg2[%c0_36, %47, %c2_37, %c0_38] : memref<1x6x6x128xbf16, #tpu.memory_space<vmem>>, vector<1x2x4x128xbf16>
      %49 = vector.shape_cast %48 : vector<1x2x4x128xbf16> to vector<2x4x128xbf16>
      %50 = vector.shape_cast %49 : vector<2x4x128xbf16> to vector<8x128xbf16>
      %51 = tpu.concatenate %10, %15, %20, %25, %30, %35, %40, %45, %50 in 1 : vector<8x128xbf16>, vector<8x128xbf16>, vector<8x128xbf16>, vector<8x128xbf16>, vector<8x128xbf16>, vector<8x128xbf16>, vector<8x128xbf16>, vector<8x128xbf16>, vector<8x128xbf16> -> vector<8x1152xbf16>
      %cst = arith.constant dense<0.000000e+00> : vector<8x128xf32>
      %52 = tpu.matmul %51, %2, %cst {dimension_numbers = #tpu.dot_dimension_numbers<[1], [0], [0], [1], [0, 0, 1, 1], [], []>} : vector<8x1152xbf16>, vector<1152x128xbf16>, vector<8x128xf32> -> vector<8x128xf32>
      %53 = vector.broadcast %1 : vector<1x128xf32> to vector<8x128xf32>
      %54 = arith.addf %52, %53 : vector<8x128xf32>
      %cst_39 = arith.constant 0.000000e+00 : f32
      %55 = vector.broadcast %cst_39 : f32 to vector<8x128xf32>
      %56 = arith.maximumf %54, %55 : vector<8x128xf32>
      %57 = vector.extract_strided_slice %56 {offsets = [0, 0], sizes = [4, 128], strides = [1, 1]} : vector<8x128xf32> to vector<4x128xf32>
      %58 = vector.extract_strided_slice %56 {offsets = [4, 0], sizes = [4, 128], strides = [1, 1]} : vector<8x128xf32> to vector<4x128xf32>
      %59 = arith.maximumf %57, %58 : vector<4x128xf32>
      %c0_40 = arith.constant 0 : index
      %c0_41 = arith.constant 0 : index
      %60 = vector.load %arg6[%c0_40, %c0_41] : memref<4x128xf32, #tpu.memory_space<vmem>>, vector<4x128xf32>
      tpu.vector_store %arg6[%c0_40, %c0_41], %59 {strides = array<i32>} : memref<4x128xf32, #tpu.memory_space<vmem>>, vector<4x128xf32>,
      %c0_42 = arith.constant 0 : index
      %c0_43 = arith.constant 0 : index
      %61 = tpu.strided_load %arg6[%c0_42, %c0_43] {strides = array<i32: 2, 1>} : memref<4x128xf32, #tpu.memory_space<vmem>>, vector<2x128xf32>
      %c1_44 = arith.constant 1 : index
      %c0_45 = arith.constant 0 : index
      %62 = tpu.strided_load %arg6[%c1_44, %c0_45] {strides = array<i32: 2, 1>} : memref<4x128xf32, #tpu.memory_space<vmem>>, vector<2x128xf32>
      %63 = arith.maximumf %61, %62 : vector<2x128xf32>
      %64 = arith.truncf %63 : vector<2x128xf32> to vector<2x128xbf16>
      %c0_46 = arith.constant 0 : index
      %65 = arith.index_cast %arg7 : i32 to index
      %c0_47 = arith.constant 0 : index
      %c0_48 = arith.constant 0 : index
      %66 = vector.load %arg5[%c0_46, %65, %c0_47, %c0_48] : memref<1x2x2x128xbf16, #tpu.memory_space<vmem>>, vector<1x1x2x128xbf16>
      %67 = vector.shape_cast %66 : vector<1x1x2x128xbf16> to vector<2x128xbf16>
      %68 = vector.shape_cast %64 : vector<2x128xbf16> to vector<1x1x2x128xbf16>
      tpu.vector_store %arg5[%c0_46, %65, %c0_47, %c0_48], %68 {strides = array<i32>} : memref<1x2x2x128xbf16, #tpu.memory_space<vmem>>, vector<1x1x2x128xbf16>,
    }
    %c2_i32_3 = arith.constant 2 : i32
    return
  }
  func.func @transform_0(%arg0: i32, %arg1: i32) -> (i32, i32, i32, i32) {
    %c0_i32 = arith.constant 0 : i32
    %c0_i32_0 = arith.constant 0 : i32
    %c0_i32_1 = arith.constant 0 : i32
    %c0_i32_2 = arith.constant 0 : i32
    return %arg0, %c0_i32, %c0_i32_0, %c0_i32_1 : i32, i32, i32, i32
  }
  func.func @transform_1(%arg0: i32, %arg1: i32) -> (i32, i32) {
    %c0_i32 = arith.constant 0 : i32
    %c0_i32_0 = arith.constant 0 : i32
    %c0_i32_1 = arith.constant 0 : i32
    return %c0_i32, %c0_i32_0 : i32, i32
  }
  func.func @transform_2(%arg0: i32, %arg1: i32) -> (i32, i32) {
    %c0_i32 = arith.constant 0 : i32
    %c0_i32_0 = arith.constant 0 : i32
    %c0_i32_1 = arith.constant 0 : i32
    return %c0_i32, %c0_i32_0 : i32, i32
  }
  func.func @transform_3(%arg0: i32, %arg1: i32) -> (i32, i32, i32, i32) {
    %c0_i32 = arith.constant 0 : i32
    %c0_i32_0 = arith.constant 0 : i32
    %c0_i32_1 = arith.constant 0 : i32
    return %arg0, %arg1, %c0_i32, %c0_i32_0 : i32, i32, i32, i32
  }
}

module attributes {stable_mosaic.version = 11 : i64} {
  func.func @_conv_relu_pool_kernel(%arg0: i32, %arg1: i32, %arg2: memref<1x4x4x128xbf16, #tpu.memory_space<vmem>>, %arg3: memref<1152x128xbf16, #tpu.memory_space<vmem>>, %arg4: memref<1x128xf32, #tpu.memory_space<vmem>>, %arg5: memref<1x1x1x128xbf16, #tpu.memory_space<vmem>>, %arg6: memref<2x128xf32, #tpu.memory_space<vmem>>) attributes {dimension_semantics = [#tpu.dimension_semantics<parallel>, #tpu.dimension_semantics<parallel>], iteration_bounds = array<i64: 2, 1>, scalar_prefetch = 0 : i64, scratch_operands = 1 : i64, tpu.core_type = #tpu.core_type<tc>, window_params = [{transform_indices = @transform_0, window_bounds = array<i64: 1, 4, 4, 128>}, {pipeline_mode = #tpu.pipeline_mode<synchronous>, transform_indices = @transform_1, window_bounds = array<i64: 1152, 128>}, {pipeline_mode = #tpu.pipeline_mode<synchronous>, transform_indices = @transform_2, window_bounds = array<i64: 1, 128>}, {transform_indices = @transform_3, window_bounds = array<i64: 1, 1, 1, 128>}]} {
    %c2_i32 = arith.constant 2 : i32
    %0 = arith.muli %arg1, %c2_i32 : i32
    %c0 = arith.constant 0 : index
    %c0_0 = arith.constant 0 : index
    %1 = vector.load %arg4[%c0, %c0_0] : memref<1x128xf32, #tpu.memory_space<vmem>>, vector<1x128xf32>
    %c0_1 = arith.constant 0 : index
    %c0_2 = arith.constant 0 : index
    %2 = vector.load %arg3[%c0_1, %c0_2] : memref<1152x128xbf16, #tpu.memory_space<vmem>>, vector<1152x128xbf16>
    %c0_i32 = arith.constant 0 : i32
    %c2_i32_3 = arith.constant 2 : i32
    %3 = arith.muli %c2_i32_3, %c0_i32 : i32
    %4 = arith.addi %0, %3 : i32
    %c0_i32_4 = arith.constant 0 : i32
    %5 = arith.addi %4, %c0_i32_4 : i32
    %c0_5 = arith.constant 0 : index
    %6 = arith.index_cast %5 : i32 to index
    %c0_6 = arith.constant 0 : index
    %c0_7 = arith.constant 0 : index
    %7 = vector.load %arg2[%c0_5, %6, %c0_6, %c0_7] : memref<1x4x4x128xbf16, #tpu.memory_space<vmem>>, vector<1x2x2x128xbf16>
    %8 = vector.shape_cast %7 : vector<1x2x2x128xbf16> to vector<2x2x128xbf16>
    %9 = vector.shape_cast %8 : vector<2x2x128xbf16> to vector<4x128xbf16>
    %c0_i32_8 = arith.constant 0 : i32
    %10 = arith.addi %4, %c0_i32_8 : i32
    %c0_9 = arith.constant 0 : index
    %11 = arith.index_cast %10 : i32 to index
    %c1 = arith.constant 1 : index
    %c0_10 = arith.constant 0 : index
    %12 = vector.load %arg2[%c0_9, %11, %c1, %c0_10] : memref<1x4x4x128xbf16, #tpu.memory_space<vmem>>, vector<1x2x2x128xbf16>
    %13 = vector.shape_cast %12 : vector<1x2x2x128xbf16> to vector<2x2x128xbf16>
    %14 = vector.shape_cast %13 : vector<2x2x128xbf16> to vector<4x128xbf16>
    %c0_i32_11 = arith.constant 0 : i32
    %15 = arith.addi %4, %c0_i32_11 : i32
    %c0_12 = arith.constant 0 : index
    %16 = arith.index_cast %15 : i32 to index
    %c2 = arith.constant 2 : index
    %c0_13 = arith.constant 0 : index
    %17 = vector.load %arg2[%c0_12, %16, %c2, %c0_13] : memref<1x4x4x128xbf16, #tpu.memory_space<vmem>>, vector<1x2x2x128xbf16>
    %18 = vector.shape_cast %17 : vector<1x2x2x128xbf16> to vector<2x2x128xbf16>
    %19 = vector.shape_cast %18 : vector<2x2x128xbf16> to vector<4x128xbf16>
    %c1_i32 = arith.constant 1 : i32
    %20 = arith.addi %4, %c1_i32 : i32
    %c0_14 = arith.constant 0 : index
    %21 = arith.index_cast %20 : i32 to index
    %c0_15 = arith.constant 0 : index
    %c0_16 = arith.constant 0 : index
    %22 = vector.load %arg2[%c0_14, %21, %c0_15, %c0_16] : memref<1x4x4x128xbf16, #tpu.memory_space<vmem>>, vector<1x2x2x128xbf16>
    %23 = vector.shape_cast %22 : vector<1x2x2x128xbf16> to vector<2x2x128xbf16>
    %24 = vector.shape_cast %23 : vector<2x2x128xbf16> to vector<4x128xbf16>
    %c1_i32_17 = arith.constant 1 : i32
    %25 = arith.addi %4, %c1_i32_17 : i32
    %c0_18 = arith.constant 0 : index
    %26 = arith.index_cast %25 : i32 to index
    %c1_19 = arith.constant 1 : index
    %c0_20 = arith.constant 0 : index
    %27 = vector.load %arg2[%c0_18, %26, %c1_19, %c0_20] : memref<1x4x4x128xbf16, #tpu.memory_space<vmem>>, vector<1x2x2x128xbf16>
    %28 = vector.shape_cast %27 : vector<1x2x2x128xbf16> to vector<2x2x128xbf16>
    %29 = vector.shape_cast %28 : vector<2x2x128xbf16> to vector<4x128xbf16>
    %c1_i32_21 = arith.constant 1 : i32
    %30 = arith.addi %4, %c1_i32_21 : i32
    %c0_22 = arith.constant 0 : index
    %31 = arith.index_cast %30 : i32 to index
    %c2_23 = arith.constant 2 : index
    %c0_24 = arith.constant 0 : index
    %32 = vector.load %arg2[%c0_22, %31, %c2_23, %c0_24] : memref<1x4x4x128xbf16, #tpu.memory_space<vmem>>, vector<1x2x2x128xbf16>
    %33 = vector.shape_cast %32 : vector<1x2x2x128xbf16> to vector<2x2x128xbf16>
    %34 = vector.shape_cast %33 : vector<2x2x128xbf16> to vector<4x128xbf16>
    %c2_i32_25 = arith.constant 2 : i32
    %35 = arith.addi %4, %c2_i32_25 : i32
    %c0_26 = arith.constant 0 : index
    %36 = arith.index_cast %35 : i32 to index
    %c0_27 = arith.constant 0 : index
    %c0_28 = arith.constant 0 : index
    %37 = vector.load %arg2[%c0_26, %36, %c0_27, %c0_28] : memref<1x4x4x128xbf16, #tpu.memory_space<vmem>>, vector<1x2x2x128xbf16>
    %38 = vector.shape_cast %37 : vector<1x2x2x128xbf16> to vector<2x2x128xbf16>
    %39 = vector.shape_cast %38 : vector<2x2x128xbf16> to vector<4x128xbf16>
    %c2_i32_29 = arith.constant 2 : i32
    %40 = arith.addi %4, %c2_i32_29 : i32
    %c0_30 = arith.constant 0 : index
    %41 = arith.index_cast %40 : i32 to index
    %c1_31 = arith.constant 1 : index
    %c0_32 = arith.constant 0 : index
    %42 = vector.load %arg2[%c0_30, %41, %c1_31, %c0_32] : memref<1x4x4x128xbf16, #tpu.memory_space<vmem>>, vector<1x2x2x128xbf16>
    %43 = vector.shape_cast %42 : vector<1x2x2x128xbf16> to vector<2x2x128xbf16>
    %44 = vector.shape_cast %43 : vector<2x2x128xbf16> to vector<4x128xbf16>
    %c2_i32_33 = arith.constant 2 : i32
    %45 = arith.addi %4, %c2_i32_33 : i32
    %c0_34 = arith.constant 0 : index
    %46 = arith.index_cast %45 : i32 to index
    %c2_35 = arith.constant 2 : index
    %c0_36 = arith.constant 0 : index
    %47 = vector.load %arg2[%c0_34, %46, %c2_35, %c0_36] : memref<1x4x4x128xbf16, #tpu.memory_space<vmem>>, vector<1x2x2x128xbf16>
    %48 = vector.shape_cast %47 : vector<1x2x2x128xbf16> to vector<2x2x128xbf16>
    %49 = vector.shape_cast %48 : vector<2x2x128xbf16> to vector<4x128xbf16>
    %50 = tpu.concatenate %9, %14, %19, %24, %29, %34, %39, %44, %49 in 1 : vector<4x128xbf16>, vector<4x128xbf16>, vector<4x128xbf16>, vector<4x128xbf16>, vector<4x128xbf16>, vector<4x128xbf16>, vector<4x128xbf16>, vector<4x128xbf16>, vector<4x128xbf16> -> vector<4x1152xbf16>
    %cst = arith.constant dense<0.000000e+00> : vector<4x128xf32>
    %51 = tpu.matmul %50, %2, %cst {dimension_numbers = #tpu.dot_dimension_numbers<[1], [0], [0], [1], [0, 0, 1, 1], [], []>} : vector<4x1152xbf16>, vector<1152x128xbf16>, vector<4x128xf32> -> vector<4x128xf32>
    %52 = vector.broadcast %1 : vector<1x128xf32> to vector<4x128xf32>
    %53 = arith.addf %51, %52 : vector<4x128xf32>
    %cst_37 = arith.constant 0.000000e+00 : f32
    %54 = vector.broadcast %cst_37 : f32 to vector<4x128xf32>
    %55 = arith.maximumf %53, %54 : vector<4x128xf32>
    %56 = vector.extract_strided_slice %55 {offsets = [0, 0], sizes = [2, 128], strides = [1, 1]} : vector<4x128xf32> to vector<2x128xf32>
    %57 = vector.extract_strided_slice %55 {offsets = [2, 0], sizes = [2, 128], strides = [1, 1]} : vector<4x128xf32> to vector<2x128xf32>
    %58 = arith.maximumf %56, %57 : vector<2x128xf32>
    %c0_38 = arith.constant 0 : index
    %c0_39 = arith.constant 0 : index
    %59 = vector.load %arg6[%c0_38, %c0_39] : memref<2x128xf32, #tpu.memory_space<vmem>>, vector<2x128xf32>
    tpu.vector_store %arg6[%c0_38, %c0_39], %58 {strides = array<i32>} : memref<2x128xf32, #tpu.memory_space<vmem>>, vector<2x128xf32>,
    %c0_40 = arith.constant 0 : index
    %c0_41 = arith.constant 0 : index
    %60 = tpu.strided_load %arg6[%c0_40, %c0_41] {strides = array<i32: 2, 1>} : memref<2x128xf32, #tpu.memory_space<vmem>>, vector<1x128xf32>
    %c1_42 = arith.constant 1 : index
    %c0_43 = arith.constant 0 : index
    %61 = tpu.strided_load %arg6[%c1_42, %c0_43] {strides = array<i32: 2, 1>} : memref<2x128xf32, #tpu.memory_space<vmem>>, vector<1x128xf32>
    %62 = arith.maximumf %60, %61 : vector<1x128xf32>
    %63 = arith.truncf %62 : vector<1x128xf32> to vector<1x128xbf16>
    %c0_44 = arith.constant 0 : index
    %64 = arith.index_cast %c0_i32 : i32 to index
    %c0_45 = arith.constant 0 : index
    %c0_46 = arith.constant 0 : index
    %65 = vector.load %arg5[%c0_44, %64, %c0_45, %c0_46] : memref<1x1x1x128xbf16, #tpu.memory_space<vmem>>, vector<1x1x1x128xbf16>
    %66 = vector.shape_cast %65 : vector<1x1x1x128xbf16> to vector<1x128xbf16>
    %67 = vector.shape_cast %63 : vector<1x128xbf16> to vector<1x1x1x128xbf16>
    tpu.vector_store %arg5[%c0_44, %64, %c0_45, %c0_46], %67 {strides = array<i32>} : memref<1x1x1x128xbf16, #tpu.memory_space<vmem>>, vector<1x1x1x128xbf16>,
    %c1_i32_47 = arith.constant 1 : i32
    return
  }
  func.func @transform_0(%arg0: i32, %arg1: i32) -> (i32, i32, i32, i32) {
    %c0_i32 = arith.constant 0 : i32
    %c0_i32_0 = arith.constant 0 : i32
    %c0_i32_1 = arith.constant 0 : i32
    %c0_i32_2 = arith.constant 0 : i32
    return %arg0, %c0_i32, %c0_i32_0, %c0_i32_1 : i32, i32, i32, i32
  }
  func.func @transform_1(%arg0: i32, %arg1: i32) -> (i32, i32) {
    %c0_i32 = arith.constant 0 : i32
    %c0_i32_0 = arith.constant 0 : i32
    %c0_i32_1 = arith.constant 0 : i32
    return %c0_i32, %c0_i32_0 : i32, i32
  }
  func.func @transform_2(%arg0: i32, %arg1: i32) -> (i32, i32) {
    %c0_i32 = arith.constant 0 : i32
    %c0_i32_0 = arith.constant 0 : i32
    %c0_i32_1 = arith.constant 0 : i32
    return %c0_i32, %c0_i32_0 : i32, i32
  }
  func.func @transform_3(%arg0: i32, %arg1: i32) -> (i32, i32, i32, i32) {
    %c0_i32 = arith.constant 0 : i32
    %c0_i32_0 = arith.constant 0 : i32
    %c0_i32_1 = arith.constant 0 : i32
    return %arg0, %arg1, %c0_i32, %c0_i32_0 : i32, i32, i32, i32
  }
}

module attributes {stable_mosaic.version = 11 : i64} {
  func.func @_mlp_head_kernel(%arg0: i32, %arg1: memref<2x128xbf16, #tpu.memory_space<vmem>>, %arg2: memref<128x128xbf16, #tpu.memory_space<vmem>>, %arg3: memref<1x128xf32, #tpu.memory_space<vmem>>, %arg4: memref<128x128xbf16, #tpu.memory_space<vmem>>, %arg5: memref<1x128xf32, #tpu.memory_space<vmem>>, %arg6: memref<2x128xf32, #tpu.memory_space<vmem>>) attributes {dimension_semantics = [#tpu.dimension_semantics<arbitrary>], iteration_bounds = array<i64: 1>, scalar_prefetch = 0 : i64, scratch_operands = 0 : i64, tpu.core_type = #tpu.core_type<tc>, window_params = [{pipeline_mode = #tpu.pipeline_mode<synchronous>, transform_indices = @transform_0, window_bounds = array<i64: 2, 128>}, {pipeline_mode = #tpu.pipeline_mode<synchronous>, transform_indices = @transform_1, window_bounds = array<i64: 128, 128>}, {pipeline_mode = #tpu.pipeline_mode<synchronous>, transform_indices = @transform_2, window_bounds = array<i64: 1, 128>}, {pipeline_mode = #tpu.pipeline_mode<synchronous>, transform_indices = @transform_3, window_bounds = array<i64: 128, 128>}, {pipeline_mode = #tpu.pipeline_mode<synchronous>, transform_indices = @transform_4, window_bounds = array<i64: 1, 128>}, {pipeline_mode = #tpu.pipeline_mode<synchronous>, transform_indices = @transform_5, window_bounds = array<i64: 2, 128>}]} {
    %c0 = arith.constant 0 : index
    %c0_0 = arith.constant 0 : index
    %0 = vector.load %arg1[%c0, %c0_0] : memref<2x128xbf16, #tpu.memory_space<vmem>>, vector<2x128xbf16>
    %c0_1 = arith.constant 0 : index
    %c0_2 = arith.constant 0 : index
    %1 = vector.load %arg2[%c0_1, %c0_2] : memref<128x128xbf16, #tpu.memory_space<vmem>>, vector<128x128xbf16>
    %cst = arith.constant dense<0.000000e+00> : vector<2x128xf32>
    %2 = tpu.matmul %0, %1, %cst {dimension_numbers = #tpu.dot_dimension_numbers<[1], [0], [0], [1], [0, 0, 1, 1], [], []>} : vector<2x128xbf16>, vector<128x128xbf16>, vector<2x128xf32> -> vector<2x128xf32>
    %c0_3 = arith.constant 0 : index
    %c0_4 = arith.constant 0 : index
    %3 = vector.load %arg3[%c0_3, %c0_4] : memref<1x128xf32, #tpu.memory_space<vmem>>, vector<1x128xf32>
    %4 = vector.broadcast %3 : vector<1x128xf32> to vector<2x128xf32>
    %5 = arith.addf %2, %4 : vector<2x128xf32>
    %cst_5 = arith.constant 0.000000e+00 : f32
    %6 = vector.broadcast %cst_5 : f32 to vector<2x128xf32>
    %7 = arith.maximumf %5, %6 : vector<2x128xf32>
    %8 = arith.truncf %7 : vector<2x128xf32> to vector<2x128xbf16>
    %c0_6 = arith.constant 0 : index
    %c0_7 = arith.constant 0 : index
    %9 = vector.load %arg4[%c0_6, %c0_7] : memref<128x128xbf16, #tpu.memory_space<vmem>>, vector<128x128xbf16>
    %cst_8 = arith.constant dense<0.000000e+00> : vector<2x128xf32>
    %10 = tpu.matmul %8, %9, %cst_8 {dimension_numbers = #tpu.dot_dimension_numbers<[1], [0], [0], [1], [0, 0, 1, 1], [], []>} : vector<2x128xbf16>, vector<128x128xbf16>, vector<2x128xf32> -> vector<2x128xf32>
    %c0_9 = arith.constant 0 : index
    %c0_10 = arith.constant 0 : index
    %11 = vector.load %arg5[%c0_9, %c0_10] : memref<1x128xf32, #tpu.memory_space<vmem>>, vector<1x128xf32>
    %12 = vector.broadcast %11 : vector<1x128xf32> to vector<2x128xf32>
    %13 = arith.addf %10, %12 : vector<2x128xf32>
    %c0_11 = arith.constant 0 : index
    %c0_12 = arith.constant 0 : index
    %14 = vector.load %arg6[%c0_11, %c0_12] : memref<2x128xf32, #tpu.memory_space<vmem>>, vector<2x128xf32>
    tpu.vector_store %arg6[%c0_11, %c0_12], %13 {strides = array<i32>} : memref<2x128xf32, #tpu.memory_space<vmem>>, vector<2x128xf32>,
    return
  }
  func.func @transform_0(%arg0: i32) -> (i32, i32) {
    %c0_i32 = arith.constant 0 : i32
    %c0_i32_0 = arith.constant 0 : i32
    %c0_i32_1 = arith.constant 0 : i32
    return %c0_i32, %c0_i32_0 : i32, i32
  }
  func.func @transform_1(%arg0: i32) -> (i32, i32) {
    %c0_i32 = arith.constant 0 : i32
    %c0_i32_0 = arith.constant 0 : i32
    %c0_i32_1 = arith.constant 0 : i32
    return %c0_i32, %c0_i32_0 : i32, i32
  }
  func.func @transform_2(%arg0: i32) -> (i32, i32) {
    %c0_i32 = arith.constant 0 : i32
    %c0_i32_0 = arith.constant 0 : i32
    %c0_i32_1 = arith.constant 0 : i32
    return %c0_i32, %c0_i32_0 : i32, i32
  }
  func.func @transform_3(%arg0: i32) -> (i32, i32) {
    %c0_i32 = arith.constant 0 : i32
    %c0_i32_0 = arith.constant 0 : i32
    %c0_i32_1 = arith.constant 0 : i32
    return %c0_i32, %c0_i32_0 : i32, i32
  }
  func.func @transform_4(%arg0: i32) -> (i32, i32) {
    %c0_i32 = arith.constant 0 : i32
    %c0_i32_0 = arith.constant 0 : i32
    %c0_i32_1 = arith.constant 0 : i32
    return %c0_i32, %c0_i32_0 : i32, i32
  }
  func.func @transform_5(%arg0: i32) -> (i32, i32) {
    %c0_i32 = arith.constant 0 : i32
    %c0_i32_0 = arith.constant 0 : i32
    %c0_i32_1 = arith.constant 0 : i32
    return %c0_i32, %c0_i32_0 : i32, i32
  }
}

</mosaic_0001>

<bundles_post_ra>
// kernel: cnn5_forward.6
= control target key start
LH: loop header
LB: loop body
LE: loop exit
PB: predicated region body
PF: predicated region fallthrough
CT: control target
= control target key end

     0   :  { %s2351_s12 = smov 0   ;;  %s2353_s13 = smov 0   ;;  %s3882_s0 = inlined_call_operand.vmem [shape: bf16[2,34,34,128], index: 0, kind: input, shape index: {}]   ;;  %s3883_s1 = inlined_call_operand.vmem [shape: bf16[1152,128], index: 1, kind: input, shape index: {}]   ;;  %s3884_s2 = inlined_call_operand.vmem [shape: f32[1,128], index: 2, kind: input, shape index: {}]   ;;  %s3885_s3 = inlined_call_operand.vmem [shape: bf16[2,16,16,128], index: 3, kind: output, shape index: {}]  }
   0x1   :  { %s2355_s14 = smov 0   ;;  %s2357_s15 = smov 0  }
   0x2   :  { %s2359_s16 = smov 0  }
   0x3 LB: > { %s22_s17 = sadd.s32 1, %s2317_s14  ;;  %s25_s18 = sadd.s32 1, %s2321_s15  ;;  %s2325_s16 = sphi %s2359_s16, %s13_s16   ;;  %s2321_s15 = sphi %s2357_s15, %s4404_s15   ;;  %s2317_s14 = sphi %s2355_s14, %s4403_s14   ;;  %s2313_s13 = sphi %s2353_s13, %s4402_s13   ;;  %s2309_s12 = sphi %s2351_s12, %s4401_s12  }
   0x4   : > { %p23_p0 = scmp.ge.s32.totalorder %s22_s17, 2  ;;  %p1844_p1 = scmp.ge.s32.totalorder %s2325_s16, 1 }
   0x5   : > { %p151_p2 = scmp.lt.s32.totalorder %s2325_s16, 5 }
   0x6   : > { %s4406_s17 = smov (%p23_p0, %s22_s17), 0  ;;  %s4408_s18 = smov (!%p23_p0, %s25_s18), %s2321_s15 }
   0x7   : > { %p152_p3 = pnand %p1844_p1, %p151_p2  ;;  %p27_p4 = scmp.ge.s32.totalorder %s4408_s18, 2 }
   0x8   : > { %p180_p5 = scmp.lt.s32.totalorder (!%p152_p3), %s2313_s13, 1  ;;  %s1846_s19 = sshll.u32 (!%p152_p3), %s2309_s12, 3  ;;  %v2387_v0 = vld [vmem:[%s3884_s2] ss:$0 sm:$0xff] (!%p152_p3)  ;;  %v2398_v2 = vld [vmem:[%s3883_s1 + $0x4] sm:$0xf] (!%p152_p3) }
   0x9   : > { %s4410_s18 = smov (%p27_p4, %s4408_s18), 0  ;;  %155 = sbr.rel (%p152_p3) target bundleno = 433 (0x1b1), region = 32 }
   0xa   : > { %4033 = vst [vmem:[#allocation3_spill] sm:$0xff] (!%p152_p3), %v2387_v0  ;;  %v2392_v1 = vld [vmem:[%s3883_s1] sm:$0xf] (!%p152_p3)  ;;  %p188_p6 = scmp.lt.s32.totalorder (!%p152_p3), %s1846_s19, 15  ;;  %s1850_s24 = sshll.u32 (!%p152_p3), %s2309_s12, 4  ;;  %4035 = vst [vmem:[#allocation5_spill] sm:$0xff] (!%p152_p3), %v2398_v2 }
   0xb   : > { %4034 = vst [vmem:[#allocation4_spill] sm:$0xff] (!%p152_p3), %v2392_v1  ;;  %v2403_v3 = vld [vmem:[%s3883_s1 + $0x8] sm:$0xf] (!%p152_p3)  ;;  %v2408_v4 = vld [vmem:[%s3883_s1 + $0xc] sm:$0xf] (!%p152_p3) }
   0xc   : > { %4036 = vst [vmem:[#allocation6_spill] sm:$0xff] (!%p152_p3), %v2403_v3  ;;  %4037 = vst [vmem:[#allocation7_spill] sm:$0xff] (!%p152_p3), %v2408_v4  ;;  %v2413_v5 = vld [vmem:[%s3883_s1 + $0x10] sm:$0xf] (!%p152_p3)  ;;  %v2418_v6 = vld [vmem:[%s3883_s1 + $0x14] sm:$0xf] (!%p152_p3) }
   0xd   : > { %4038 = vst [vmem:[#allocation8_spill] sm:$0xff] (!%p152_p3), %v2413_v5  ;;  %4039 = vst [vmem:[#allocation9_spill] sm:$0xff] (!%p152_p3), %v2418_v6  ;;  %v2423_v7 = vld [vmem:[%s3883_s1 + $0x18] sm:$0xf] (!%p152_p3)  ;;  %v2428_v8 = vld [vmem:[%s3883_s1 + $0x1c] sm:$0xf] (!%p152_p3) }
   0xe   : > { %4040 = vst [vmem:[#allocation10_spill] sm:$0xff] (!%p152_p3), %v2423_v7  ;;  %4041 = vst [vmem:[#allocation11_spill] sm:$0xff] (!%p152_p3), %v2428_v8  ;;  %v2433_v9 = vld [vmem:[%s3883_s1 + $0x20] sm:$0xf] (!%p152_p3)  ;;  %v2438_v10 = vld [vmem:[%s3883_s1 + $0x24] sm:$0xf] (!%p152_p3) }
   0xf   : > { %4042 = vst [vmem:[#allocation12_spill] sm:$0xff] (!%p152_p3), %v2433_v9  ;;  %4043 = vst [vmem:[#allocation13_spill] sm:$0xff] (!%p152_p3), %v2438_v10  ;;  %v2443_v11 = vld [vmem:[%s3883_s1 + $0x28] sm:$0xf] (!%p152_p3)  ;;  %v2453_v12 = vld [vmem:[%s3883_s1 + $0x2c] sm:$0xf] (!%p152_p3) }
  0x10   : > { %s4412_s13 = smov (!%p180_p5, %s2313_s13), 1  ;;  %s4414_s19 = smov (!%p188_p6, %s1846_s19), 15  ;;  %4044 = vst [vmem:[#allocation14_spill] sm:$0xff] %v2443_v11  ;;  %4045 = vst [vmem:[#allocation15_spill] sm:$0xff] %v2453_v12  ;;  %v2458_v13 = vld [vmem:[%s3883_s1 + $0x30] sm:$0xf] }
  0x11   : > { %s2222_s10 = smul.u32 680, %s4412_s13  ;;  %s1848_s11 = sshll.u32 %s4412_s13, 5  ;;  %4046 = vst [vmem:[#allocation16_spill] sm:$0xff] %v2458_v13  ;;  %v2463_v14 = vld [vmem:[%s3883_s1 + $0x34] sm:$0xf] }
  0x12   : > { %s1847_s25 = sshll.u32 %s4414_s19, 1  ;;  %4047 = vst [vmem:[#allocation17_spill] sm:$0xff] %v2463_v14  ;;  %v2468_v15 = vld [vmem:[%s3883_s1 + $0x38] sm:$0xf]  ;;  %v2473_v16 = vld [vmem:[%s3883_s1 + $0x3c] sm:$0xf] }
  0x13   : > { %s2448_s4 = scalar_lea.vmem %s3882_s0, %s2222_s10  ;;  %s192_s5 = sadd.s32 %s1848_s11, %s1847_s25  ;;  %4048 = vst [vmem:[#allocation18_spill] sm:$0xff] %v2468_v15  ;;  %4049 = vst [vmem:[#allocation19_spill] sm:$0xff] %v2473_v16  ;;  %v2483_v17 = vld [vmem:[%s3883_s1 + $0x40] sm:$0xf]  ;;  %v2488_v18 = vld [vmem:[%s3883_s1 + $0x44] sm:$0xf] }
  0x14   : > { %s1849_s21 = sshll.u32 %s192_s5, 2  ;;  %4050 = vst [vmem:[#allocation20_spill] sm:$0xff] %v2483_v17  ;;  %4051 = vst [vmem:[#allocation21_spill] sm:$0xff] %v2488_v18  ;;  %v2493_v19 = vld [vmem:[%s3883_s1 + $0x48] sm:$0xf]  ;;  %s3120_s5 = smov 0  }
  0x15   : > { %s2478_s27 = scalar_lea.vmem %s3885_s3, %s1849_s21  ;;  %4052 = vst [vmem:[#allocation22_spill] sm:$0xff] %v2493_v19  ;;  %v2498_v20 = vld [vmem:[%s3883_s1 + $0x4c] sm:$0xf]  ;;  %v2503_v21 = vld [vmem:[%s3883_s1 + $0x50] sm:$0xf] }
  0x16   : > { %4053 = vst [vmem:[#allocation23_spill] sm:$0xff] %v2498_v20  ;;  %4054 = vst [vmem:[#allocation24_spill] sm:$0xff] %v2503_v21  ;;  %v2508_v22 = vld [vmem:[%s3883_s1 + $0x54] sm:$0xf]  ;;  %v2513_v23 = vld [vmem:[%s3883_s1 + $0x58] sm:$0xf] }
  0x17   : > { %4055 = vst [vmem:[#allocation25_spill] sm:$0xff] %v2508_v22  ;;  %4056 = vst [vmem:[#allocation26_spill] sm:$0xff] %v2513_v23  ;;  %v2518_v24 = vld [vmem:[%s3883_s1 + $0x5c] sm:$0xf]  ;;  %v2523_v25 = vld [vmem:[%s3883_s1 + $0x60] sm:$0xf] }
  0x18   : > { %4057 = vst [vmem:[#allocation27_spill] sm:$0xff] %v2518_v24  ;;  %4058 = vst [vmem:[#allocation28_spill] sm:$0xff] %v2523_v25  ;;  %v2528_v26 = vld [vmem:[%s3883_s1 + $0x64] sm:$0xf]  ;;  %v2533_v27 = vld [vmem:[%s3883_s1 + $0x68] sm:$0xf] }
  0x19   : > { %4059 = vst [vmem:[#allocation29_spill] sm:$0xff] %v2528_v26  ;;  %4060 = vst [vmem:[#allocation30_spill] sm:$0xff] %v2533_v27  ;;  %v2538_v28 = vld [vmem:[%s3883_s1 + $0x6c] sm:$0xf]  ;;  %v2543_v29 = vld [vmem:[%s3883_s1 + $0x70] sm:$0xf] }
  0x1a   : > { %4061 = vst [vmem:[#allocation31_spill] sm:$0xff] %v2538_v28  ;;  %4062 = vst [vmem:[#allocation32_spill] sm:$0xff] %v2543_v29  ;;  %v2548_v30 = vld [vmem:[%s3883_s1 + $0x74] sm:$0xf]  ;;  %v2553_v31 = vld [vmem:[%s3883_s1 + $0x78] sm:$0xf] }
  0x1b   : > { %4063 = vst [vmem:[#allocation33_spill] sm:$0xff] %v2548_v30  ;;  %4064 = vst [vmem:[#allocation34_spill] sm:$0xff] %v2553_v31  ;;  %v2558_v32 = vld [vmem:[%s3883_s1 + $0x7c] sm:$0xf]  ;;  %v2563_v33 = vld [vmem:[%s3883_s1 + $0x80] sm:$0xf] }
  0x1c   : > { %4065 = vst [vmem:[#allocation35_spill] sm:$0xff] %v2558_v32  ;;  %4066 = vst [vmem:[#allocation36_spill] sm:$0xff] %v2563_v33  ;;  %v2568_v34 = vld [vmem:[%s3883_s1 + $0x84] sm:$0xf]  ;;  %v2573_v35 = vld [vmem:[%s3883_s1 + $0x88] sm:$0xf] }
  0x1d   : > { %4067 = vst [vmem:[#allocation37_spill] sm:$0xff] %v2568_v34  ;;  %4068 = vst [vmem:[#allocation38_spill] sm:$0xff] %v2573_v35  ;;  %v2578_v36 = vld [vmem:[%s3883_s1 + $0x8c] sm:$0xf]  ;;  %v2583_v37 = vld [vmem:[%s3883_s1 + $0x90] sm:$0xf] }
  0x1e   : > { %4069 = vst [vmem:[#allocation39_spill] sm:$0xff] %v2578_v36  ;;  %4070 = vst [vmem:[#allocation40_spill] sm:$0xff] %v2583_v37  ;;  %v2588_v38 = vld [vmem:[%s3883_s1 + $0x94] sm:$0xf]  ;;  %v2593_v39 = vld [vmem:[%s3883_s1 + $0x98] sm:$0xf] }
  0x1f   : > { %4071 = vst [vmem:[#allocation41_spill] sm:$0xff] %v2588_v38  ;;  %4072 = vst [vmem:[#allocation42_spill] sm:$0xff] %v2593_v39  ;;  %v2598_v40 = vld [vmem:[%s3883_s1 + $0x9c] sm:$0xf]  ;;  %v2603_v41 = vld [vmem:[%s3883_s1 + $0xa0] sm:$0xf] }
  0x20   : > { %4073 = vst [vmem:[#allocation43_spill] sm:$0xff] %v2598_v40  ;;  %4074 = vst [vmem:[#allocation44_spill] sm:$0xff] %v2603_v41  ;;  %v2608_v42 = vld [vmem:[%s3883_s1 + $0xa4] sm:$0xf]  ;;  %v2613_v43 = vld [vmem:[%s3883_s1 + $0xa8] sm:$0xf] }
  0x21   : > { %4075 = vst [vmem:[#allocation45_spill] sm:$0xff] %v2608_v42  ;;  %4076 = vst [vmem:[#allocation46_spill] sm:$0xff] %v2613_v43  ;;  %v2618_v44 = vld [vmem:[%s3883_s1 + $0xac] sm:$0xf]  ;;  %v2623_v45 = vld [vmem:[%s3883_s1 + $0xb0] sm:$0xf] }
  0x22   : > { %4077 = vst [vmem:[#allocation47_spill] sm:$0xff] %v2618_v44  ;;  %4078 = vst [vmem:[#allocation48_spill] sm:$0xff] %v2623_v45  ;;  %v2628_v46 = vld [vmem:[%s3883_s1 + $0xb4] sm:$0xf]  ;;  %v2633_v47 = vld [vmem:[%s3883_s1 + $0xb8] sm:$0xf] }
  0x23   : > { %4079 = vst [vmem:[#allocation49_spill] sm:$0xff] %v2628_v46  ;;  %4080 = vst [vmem:[#allocation50_spill] sm:$0xff] %v2633_v47  ;;  %v2638_v48 = vld [vmem:[%s3883_s1 + $0xbc] sm:$0xf]  ;;  %v2643_v49 = vld [vmem:[%s3883_s1 + $0xc0] sm:$0xf] }
  0x24   : > { %4081 = vst [vmem:[#allocation51_spill] sm:$0xff] %v2638_v48  ;;  %4082 = vst [vmem:[#allocation52_spill] sm:$0xff] %v2643_v49  ;;  %v2648_v50 = vld [vmem:[%s3883_s1 + $0xc4] sm:$0xf]  ;;  %v2653_v51 = vld [vmem:[%s3883_s1 + $0xc8] sm:$0xf] }
  0x25   : > { %4083 = vst [vmem:[#allocation53_spill] sm:$0xff] %v2648_v50  ;;  %4084 = vst [vmem:[#allocation54_spill] sm:$0xff] %v2653_v51  ;;  %v2658_v52 = vld [vmem:[%s3883_s1 + $0xcc] sm:$0xf]  ;;  %v2663_v53 = vld [vmem:[%s3883_s1 + $0xd0] sm:$0xf] }
  0x26   : > { %4085 = vst [vmem:[#allocation55_spill] sm:$0xff] %v2658_v52  ;;  %4086 = vst [vmem:[#allocation56_spill] sm:$0xff] %v2663_v53  ;;  %v2668_v54 = vld [vmem:[%s3883_s1 + $0xd4] sm:$0xf]  ;;  %v2673_v55 = vld [vmem:[%s3883_s1 + $0xd8] sm:$0xf] }
  0x27   : > { %4087 = vst [vmem:[#allocation57_spill] sm:$0xff] %v2668_v54  ;;  %4088 = vst [vmem:[#allocation58_spill] sm:$0xff] %v2673_v55  ;;  %v2678_v56 = vld [vmem:[%s3883_s1 + $0xdc] sm:$0xf]  ;;  %v2683_v57 = vld [vmem:[%s3883_s1 + $0xe0] sm:$0xf] }
  0x28   : > { %4089 = vst [vmem:[#allocation59_spill] sm:$0xff] %v2678_v56  ;;  %4090 = vst [vmem:[#allocation60_spill] sm:$0xff] %v2683_v57  ;;  %v2688_v58 = vld [vmem:[%s3883_s1 + $0xe4] sm:$0xf]  ;;  %v2693_v59 = vld [vmem:[%s3883_s1 + $0xe8] sm:$0xf] }
  0x29   : > { %4091 = vst [vmem:[#allocation61_spill] sm:$0xff] %v2688_v58  ;;  %4092 = vst [vmem:[#allocation62_spill] sm:$0xff] %v2693_v59  ;;  %v2698_v60 = vld [vmem:[%s3883_s1 + $0xec] sm:$0xf]  ;;  %v2703_v61 = vld [vmem:[%s3883_s1 + $0xf0] sm:$0xf] }
  0x2a   : > { %4093 = vst [vmem:[#allocation63_spill] sm:$0xff] %v2698_v60  ;;  %4094 = vst [vmem:[#allocation64_spill] sm:$0xff] %v2703_v61  ;;  %v2708_v62 = vld [vmem:[%s3883_s1 + $0xf4] sm:$0xf]  ;;  %v2713_v63 = vld [vmem:[%s3883_s1 + $0xf8] sm:$0xf] }
  0x2b   : > { %4095 = vst [vmem:[#allocation65_spill] sm:$0xff] %v2708_v62  ;;  %4096 = vst [vmem:[#allocation66_spill] sm:$0xff] %v2713_v63  ;;  %v2718_v0 = vld [vmem:[%s3883_s1 + $0xfc] sm:$0xf]  ;;  %v2723_v47 = vld [vmem:[%s3883_s1 + $0x100] sm:$0xf] }
  0x2c   : > { %4097 = vst [vmem:[#allocation67_spill] sm:$0xff] %v2718_v0  ;;  %4098 = vst [vmem:[#allocation68_spill] sm:$0xff] %v2723_v47  ;;  %v2728_v48 = vld [vmem:[%s3883_s1 + $0x104] sm:$0xf]  ;;  %v2733_v15 = vld [vmem:[%s3883_s1 + $0x108] sm:$0xf] }
  0x2d   : > { %4099 = vst [vmem:[#allocation69_spill] sm:$0xff] %v2728_v48  ;;  %4100 = vst [vmem:[#allocation70_spill] sm:$0xff] %v2733_v15  ;;  %v2738_v16 = vld [vmem:[%s3883_s1 + $0x10c] sm:$0xf]  ;;  %v2743_v63 = vld [vmem:[%s3883_s1 + $0x110] sm:$0xf] }
  0x2e   : > { %4101 = vst [vmem:[#allocation71_spill] sm:$0xff] %v2738_v16  ;;  %4102 = vst [vmem:[#allocation72_spill] sm:$0xff] %v2743_v63  ;;  %v2748_v47 = vld [vmem:[%s3883_s1 + $0x114] sm:$0xf]  ;;  %v2753_v48 = vld [vmem:[%s3883_s1 + $0x118] sm:$0xf] }
  0x2f   : > { %4103 = vst [vmem:[#allocation73_spill] sm:$0xff] %v2748_v47  ;;  %4104 = vst [vmem:[#allocation74_spill] sm:$0xff] %v2753_v48  ;;  %v2758_v15 = vld [vmem:[%s3883_s1 + $0x11c] sm:$0xf]  ;;  %v2763_v16 = vld [vmem:[%s3883_s1 + $0x120] sm:$0xf] }
  0x30   : > { %4105 = vst [vmem:[#allocation75_spill] sm:$0xff] %v2758_v15  ;;  %4106 = vst [vmem:[#allocation76_spill] sm:$0xff] %v2763_v16  ;;  %v2768_v63 = vld [vmem:[%s3883_s1 + $0x124] sm:$0xf]  ;;  %v2773_v47 = vld [vmem:[%s3883_s1 + $0x128] sm:$0xf] }
  0x31   : > { %4107 = vst [vmem:[#allocation77_spill] sm:$0xff] %v2768_v63  ;;  %4108 = vst [vmem:[#allocation78_spill] sm:$0xff] %v2773_v47  ;;  %v2778_v48 = vld [vmem:[%s3883_s1 + $0x12c] sm:$0xf]  ;;  %v2783_v15 = vld [vmem:[%s3883_s1 + $0x130] sm:$0xf] }
  0x32   : > { %4109 = vst [vmem:[#allocation79_spill] sm:$0xff] %v2778_v48  ;;  %4110 = vst [vmem:[#allocation80_spill] sm:$0xff] %v2783_v15  ;;  %v2788_v16 = vld [vmem:[%s3883_s1 + $0x134] sm:$0xf]  ;;  %v2793_v63 = vld [vmem:[%s3883_s1 + $0x138] sm:$0xf] }
  0x33   : > { %4111 = vst [vmem:[#allocation81_spill] sm:$0xff] %v2788_v16  ;;  %4112 = vst [vmem:[#allocation82_spill] sm:$0xff] %v2793_v63  ;;  %v2798_v47 = vld [vmem:[%s3883_s1 + $0x13c] sm:$0xf]  ;;  %v2803_v48 = vld [vmem:[%s3883_s1 + $0x140] sm:$0xf] }
  0x34   : > { %4113 = vst [vmem:[#allocation83_spill] sm:$0xff] %v2798_v47  ;;  %4114 = vst [vmem:[#allocation84_spill] sm:$0xff] %v2803_v48  ;;  %v2808_v15 = vld [vmem:[%s3883_s1 + $0x144] sm:$0xf]  ;;  %v2813_v16 = vld [vmem:[%s3883_s1 + $0x148] sm:$0xf] }
  0x35   : > { %4115 = vst [vmem:[#allocation85_spill] sm:$0xff] %v2808_v15  ;;  %4116 = vst [vmem:[#allocation86_spill] sm:$0xff] %v2813_v16  ;;  %v2818_v63 = vld [vmem:[%s3883_s1 + $0x14c] sm:$0xf]  ;;  %v2823_v47 = vld [vmem:[%s3883_s1 + $0x150] sm:$0xf] }
  0x36   : > { %4117 = vst [vmem:[#allocation87_spill] sm:$0xff] %v2818_v63  ;;  %4118 = vst [vmem:[#allocation88_spill] sm:$0xff] %v2823_v47  ;;  %v2828_v48 = vld [vmem:[%s3883_s1 + $0x154] sm:$0xf]  ;;  %v2833_v15 = vld [vmem:[%s3883_s1 + $0x158] sm:$0xf] }
  0x37   : > { %4119 = vst [vmem:[#allocation89_spill] sm:$0xff] %v2828_v48  ;;  %4120 = vst [vmem:[#allocation90_spill] sm:$0xff] %v2833_v15  ;;  %v2838_v16 = vld [vmem:[%s3883_s1 + $0x15c] sm:$0xf]  ;;  %v2843_v63 = vld [vmem:[%s3883_s1 + $0x160] sm:$0xf] }
  0x38   : > { %4121 = vst [vmem:[#allocation91_spill] sm:$0xff] %v2838_v16  ;;  %4122 = vst [vmem:[#allocation92_spill] sm:$0xff] %v2843_v63  ;;  %v2848_v47 = vld [vmem:[%s3883_s1 + $0x164] sm:$0xf]  ;;  %v2853_v48 = vld [vmem:[%s3883_s1 + $0x168] sm:$0xf] }
  0x39   : > { %4123 = vst [vmem:[#allocation93_spill] sm:$0xff] %v2848_v47  ;;  %4124 = vst [vmem:[#allocation94_spill] sm:$0xff] %v2853_v48  ;;  %v2858_v15 = vld [vmem:[%s3883_s1 + $0x16c] sm:$0xf]  ;;  %v2863_v16 = vld [vmem:[%s3883_s1 + $0x170] sm:$0xf] }
  0x3a   : > { %4125 = vst [vmem:[#allocation95_spill] sm:$0xff] %v2858_v15  ;;  %4126 = vst [vmem:[#allocation96_spill] sm:$0xff] %v2863_v16  ;;  %v2868_v63 = vld [vmem:[%s3883_s1 + $0x174] sm:$0xf]  ;;  %v2873_v47 = vld [vmem:[%s3883_s1 + $0x178] sm:$0xf] }
  0x3b   : > { %4127 = vst [vmem:[#allocation97_spill] sm:$0xff] %v2868_v63  ;;  %4128 = vst [vmem:[#allocation98_spill] sm:$0xff] %v2873_v47  ;;  %v2878_v48 = vld [vmem:[%s3883_s1 + $0x17c] sm:$0xf]  ;;  %v2883_v15 = vld [vmem:[%s3883_s1 + $0x180] sm:$0xf] }
  0x3c   : > { %4129 = vst [vmem:[#allocation99_spill] sm:$0xff] %v2878_v48  ;;  %4130 = vst [vmem:[#allocation100_spill] sm:$0xff] %v2883_v15  ;;  %v2888_v16 = vld [vmem:[%s3883_s1 + $0x184] sm:$0xf]  ;;  %v2893_v63 = vld [vmem:[%s3883_s1 + $0x188] sm:$0xf] }
  0x3d   : > { %4131 = vst [vmem:[#allocation101_spill] sm:$0xff] %v2888_v16  ;;  %4132 = vst [vmem:[#allocation102_spill] sm:$0xff] %v2893_v63  ;;  %v2898_v47 = vld [vmem:[%s3883_s1 + $0x18c] sm:$0xf]  ;;  %v2903_v48 = vld [vmem:[%s3883_s1 + $0x190] sm:$0xf] }
  0x3e   : > { %4133 = vst [vmem:[#allocation103_spill] sm:$0xff] %v2898_v47  ;;  %4134 = vst [vmem:[#allocation104_spill] sm:$0xff] %v2903_v48  ;;  %v2908_v15 = vld [vmem:[%s3883_s1 + $0x194] sm:$0xf]  ;;  %v2913_v16 = vld [vmem:[%s3883_s1 + $0x198] sm:$0xf] }
  0x3f   : > { %4135 = vst [vmem:[#allocation105_spill] sm:$0xff] %v2908_v15  ;;  %4136 = vst [vmem:[#allocation106_spill] sm:$0xff] %v2913_v16  ;;  %v2918_v63 = vld [vmem:[%s3883_s1 + $0x19c] sm:$0xf]  ;;  %v2923_v47 = vld [vmem:[%s3883_s1 + $0x1a0] sm:$0xf] }
  0x40   : > { %4137 = vst [vmem:[#allocation107_spill] sm:$0xff] %v2918_v63  ;;  %4138 = vst [vmem:[#allocation108_spill] sm:$0xff] %v2923_v47  ;;  %v2928_v48 = vld [vmem:[%s3883_s1 + $0x1a4] sm:$0xf]  ;;  %v2933_v15 = vld [vmem:[%s3883_s1 + $0x1a8] sm:$0xf] }
  0x41   : > { %4139 = vst [vmem:[#allocation109_spill] sm:$0xff] %v2928_v48  ;;  %4140 = vst [vmem:[#allocation110_spill] sm:$0xff] %v2933_v15  ;;  %v2938_v16 = vld [vmem:[%s3883_s1 + $0x1ac] sm:$0xf]  ;;  %v2943_v63 = vld [vmem:[%s3883_s1 + $0x1b0] sm:$0xf] }
  0x42   : > { %4141 = vst [vmem:[#allocation111_spill] sm:$0xff] %v2938_v16  ;;  %4142 = vst [vmem:[#allocation112_spill] sm:$0xff] %v2943_v63  ;;  %v2948_v47 = vld [vmem:[%s3883_s1 + $0x1b4] sm:$0xf]  ;;  %v2953_v48 = vld [vmem:[%s3883_s1 + $0x1b8] sm:$0xf] }
  0x43   : > { %4143 = vst [vmem:[#allocation113_spill] sm:$0xff] %v2948_v47  ;;  %4144 = vst [vmem:[#allocation114_spill] sm:$0xff] %v2953_v48  ;;  %v2958_v15 = vld [vmem:[%s3883_s1 + $0x1bc] sm:$0xf]  ;;  %v2963_v16 = vld [vmem:[%s3883_s1 + $0x1c0] sm:$0xf] }
  0x44   : > { %4145 = vst [vmem:[#allocation115_spill] sm:$0xff] %v2958_v15  ;;  %4146 = vst [vmem:[#allocation116_spill] sm:$0xff] %v2963_v16  ;;  %v2968_v63 = vld [vmem:[%s3883_s1 + $0x1c4] sm:$0xf]  ;;  %v2973_v47 = vld [vmem:[%s3883_s1 + $0x1c8] sm:$0xf] }
  0x45   : > { %4147 = vst [vmem:[#allocation117_spill] sm:$0xff] %v2968_v63  ;;  %4148 = vst [vmem:[#allocation118_spill] sm:$0xff] %v2973_v47  ;;  %v2978_v48 = vld [vmem:[%s3883_s1 + $0x1cc] sm:$0xf]  ;;  %v2983_v15 = vld [vmem:[%s3883_s1 + $0x1d0] sm:$0xf] }
  0x46   : > { %4149 = vst [vmem:[#allocation119_spill] sm:$0xff] %v2978_v48  ;;  %4150 = vst [vmem:[#allocation120_spill] sm:$0xff] %v2983_v15  ;;  %v2988_v16 = vld [vmem:[%s3883_s1 + $0x1d4] sm:$0xf]  ;;  %v2993_v63 = vld [vmem:[%s3883_s1 + $0x1d8] sm:$0xf] }
  0x47   : > { %4151 = vst [vmem:[#allocation121_spill] sm:$0xff] %v2988_v16  ;;  %4152 = vst [vmem:[#allocation122_spill] sm:$0xff] %v2993_v63  ;;  %v2998_v47 = vld [vmem:[%s3883_s1 + $0x1dc] sm:$0xf]  ;;  %v3003_v48 = vld [vmem:[%s3883_s1 + $0x1e0] sm:$0xf] }
  0x48   : > { %4153 = vst [vmem:[#allocation123_spill] sm:$0xff] %v2998_v47  ;;  %4154 = vst [vmem:[#allocation124_spill] sm:$0xff] %v3003_v48  ;;  %v3008_v15 = vld [vmem:[%s3883_s1 + $0x1e4] sm:$0xf]  ;;  %v3013_v16 = vld [vmem:[%s3883_s1 + $0x1e8] sm:$0xf] }
  0x49   : > { %4155 = vst [vmem:[#allocation125_spill] sm:$0xff] %v3008_v15  ;;  %4156 = vst [vmem:[#allocation126_spill] sm:$0xff] %v3013_v16  ;;  %v3018_v63 = vld [vmem:[%s3883_s1 + $0x1ec] sm:$0xf]  ;;  %v3023_v47 = vld [vmem:[%s3883_s1 + $0x1f0] sm:$0xf] }
  0x4a   : > { %4157 = vst [vmem:[#allocation127_spill] sm:$0xff] %v3018_v63  ;;  %4158 = vst [vmem:[#allocation128_spill] sm:$0xff] %v3023_v47  ;;  %v3028_v48 = vld [vmem:[%s3883_s1 + $0x1f4] sm:$0xf]  ;;  %v3033_v15 = vld [vmem:[%s3883_s1 + $0x1f8] sm:$0xf] }
  0x4b   : > { %4159 = vst [vmem:[#allocation129_spill] sm:$0xff] %v3028_v48  ;;  %4160 = vst [vmem:[#allocation130_spill] sm:$0xff] %v3033_v15  ;;  %v3038_v16 = vld [vmem:[%s3883_s1 + $0x1fc] sm:$0xf]  ;;  %v3043_v63 = vld [vmem:[%s3883_s1 + $0x200] sm:$0xf] }
  0x4c   : > { %4161 = vst [vmem:[#allocation131_spill] sm:$0xff] %v3038_v16  ;;  %4162 = vst [vmem:[#allocation132_spill] sm:$0xff] %v3043_v63  ;;  %v3048_v47 = vld [vmem:[%s3883_s1 + $0x204] sm:$0xf]  ;;  %v3053_v48 = vld [vmem:[%s3883_s1 + $0x208] sm:$0xf] }
  0x4d   : > { %4163 = vst [vmem:[#allocation133_spill] sm:$0xff] %v3048_v47  ;;  %4164 = vst [vmem:[#allocation134_spill] sm:$0xff] %v3053_v48  ;;  %v3058_v15 = vld [vmem:[%s3883_s1 + $0x20c] sm:$0xf]  ;;  %v3063_v16 = vld [vmem:[%s3883_s1 + $0x210] sm:$0xf] }
  0x4e   : > { %4165 = vst [vmem:[#allocation135_spill] sm:$0xff] %v3058_v15  ;;  %4166 = vst [vmem:[#allocation136_spill] sm:$0xff] %v3063_v16  ;;  %v3068_v63 = vld [vmem:[%s3883_s1 + $0x214] sm:$0xf]  ;;  %v3073_v47 = vld [vmem:[%s3883_s1 + $0x218] sm:$0xf] }
  0x4f   : > { %4167 = vst [vmem:[#allocation137_spill] sm:$0xff] %v3068_v63  ;;  %4168 = vst [vmem:[#allocation138_spill] sm:$0xff] %v3073_v47  ;;  %v3078_v48 = vld [vmem:[%s3883_s1 + $0x21c] sm:$0xf]  ;;  %v3083_v15 = vld [vmem:[%s3883_s1 + $0x220] sm:$0xf] }
  0x50   : > { %4169 = vst [vmem:[#allocation139_spill] sm:$0xff] %v3078_v48  ;;  %4170 = vst [vmem:[#allocation140_spill] sm:$0xff] %v3083_v15  ;;  %v3088_v16 = vld [vmem:[%s3883_s1 + $0x224] sm:$0xf]  ;;  %v3093_v63 = vld [vmem:[%s3883_s1 + $0x228] sm:$0xf] }
  0x51   : > { %4171 = vst [vmem:[#allocation141_spill] sm:$0xff] %v3088_v16  ;;  %4172 = vst [vmem:[#allocation142_spill] sm:$0xff] %v3093_v63  ;;  %v3098_v47 = vld [vmem:[%s3883_s1 + $0x22c] sm:$0xf]  ;;  %v3103_v48 = vld [vmem:[%s3883_s1 + $0x230] sm:$0xf] }
  0x52   : > { %4173 = vst [vmem:[#allocation143_spill] sm:$0xff] %v3098_v47  ;;  %4174 = vst [vmem:[#allocation144_spill] sm:$0xff] %v3103_v48  ;;  %v3108_v15 = vld [vmem:[%s3883_s1 + $0x234] sm:$0xf]  ;;  %v3113_v16 = vld [vmem:[%s3883_s1 + $0x238] sm:$0xf] }
  0x53   : > { %4175 = vst [vmem:[#allocation145_spill] sm:$0xff] %v3108_v15  ;;  %4176 = vst [vmem:[#allocation146_spill] sm:$0xff] %v3113_v16  ;;  %v3118_v63 = vld [vmem:[%s3883_s1 + $0x23c] sm:$0xf] }
  0x54   : > { %4177 = vst [vmem:[#allocation147_spill] sm:$0xff] %v3118_v63 }
  0x55 LB: >> { %v4178_v32 = vld [vmem:[#allocation35_spill] sm:$0xff]  ;;  %v4179_v62 = vld [vmem:[#allocation65_spill] sm:$0xff]  ;;  %v4180_v61 = vld [vmem:[#allocation64_spill] sm:$0xff]  ;;  %s1851_s6 = sshll.u32 %s2329_s5, 1  ;;  %vm364_vm0 = vsmask.f32 3328  ;;  %s2329_s5 = sphi %s3120_s5, %s348_s5  }
  0x56   : >> { %v4181_v46 = vld [vmem:[#allocation49_spill] sm:$0xff]  ;;  %v4182_v45 = vld [vmem:[#allocation48_spill] sm:$0xff]  ;;  %v4185_v44 = vld [vmem:[#allocation47_spill] sm:$0xff]  ;;  %s350_s7 = sadd.s32 %s1851_s6, %s1850_s24  ;;  %vm365_vm1 = vsmask.f32 7440  ;;  %vm467_vm2 = vcmask 1042432  }
  0x57   : >> { %v4183_v14 = vld [vmem:[#allocation17_spill] sm:$0xff]  ;;  %v4184_v13 = vld [vmem:[#allocation16_spill] sm:$0xff]  ;;  %v4186_v43 = vld [vmem:[#allocation46_spill] sm:$0xff]  ;;  %s2001_s19 = smul.u32 20, %s350_s7  ;;  %vm468_vm4 = vcmask 1046532   ;;  %s2004_s9 = sshll.u32 %s2329_s5, 3 }
  0x58   : >> { %v4187_v30 = vld [vmem:[#allocation33_spill] sm:$0xff]  ;;  %v4188_v29 = vld [vmem:[#allocation32_spill] sm:$0xff]  ;;  %v4189_v12 = vld [vmem:[#allocation15_spill] sm:$0xff]  ;;  %s1723_s20 = scalar_lea.vmem %s2478_s27, %s2004_s9  ;;  %s348_s5 = sadd.s32 1, %s2329_s5  }
  0x59   : >> { %v4190_v11 = vld [vmem:[#allocation14_spill] sm:$0xff]  ;;  %v4191_v60 = vld [vmem:[#allocation63_spill] sm:$0xff]  ;;  %v4193_v42 = vld [vmem:[#allocation45_spill] sm:$0xff]  ;;  %s3177_s8 = scalar_lea.vmem %s2448_s4, %s2001_s19  ;;  %p345_p7 = scmp.ge.s32.totalorder %s348_s5, 8  }
  0x5a   : >> { %v4192_v59 = vld [vmem:[#allocation62_spill] sm:$0xff]  ;;  %v4194_v41 = vld [vmem:[#allocation44_spill] sm:$0xff]  ;;  %v4195_v28 = vld [vmem:[#allocation31_spill] sm:$0xff] }
  0x5b   : >> { %v4196_v27 = vld [vmem:[#allocation30_spill] sm:$0xff]  ;;  %v4197_v10 = vld [vmem:[#allocation13_spill] sm:$0xff]  ;;  %v4198_v9 = vld [vmem:[#allocation12_spill] sm:$0xff] }
  0x5c   : >> { %v4199_v18 = vld [vmem:[#allocation21_spill] sm:$0xff]  ;;  %v4200_v17 = vld [vmem:[#allocation20_spill] sm:$0xff]  ;;  %v4207_v20 = vld [vmem:[#allocation23_spill] sm:$0xff] }
  0x5d   : >> { %v1932_v48 = vcombine.low %v4200_v17, %v4199_v18  ;;  %v4201_v50 = vld [vmem:[#allocation53_spill] sm:$0xff]  ;;  %v4202_v49 = vld [vmem:[#allocation52_spill] sm:$0xff]  ;;  %v4208_v19 = vld [vmem:[#allocation22_spill] sm:$0xff] }
  0x5e   : >> { %v1948_v15 = vcombine.low %v4202_v49, %v4201_v50  ;;  %v4203_v2 = vld [vmem:[#allocation5_spill] sm:$0xff]  ;;  %v4204_v1 = vld [vmem:[#allocation4_spill] sm:$0xff]  ;;  %v1933_v47 = vcombine.low %v4208_v19, %v4207_v20  ;;  %v4209_v52 = vld [vmem:[#allocation55_spill] sm:$0xff] }
  0x5f   : >> { %v1924_v16 = vcombine.low %v4204_v1, %v4203_v2  ;;  %v4205_v34 = vld [vmem:[#allocation37_spill] sm:$0xff]  ;;  %v4206_v33 = vld [vmem:[#allocation36_spill] sm:$0xff]  ;;  %v4210_v51 = vld [vmem:[#allocation54_spill] sm:$0xff]  ;;  %2010 = vmatprep.subr.bf16.mxu0 %v1932_v48 }
  0x60   : >> { %v1940_v63 = vcombine.low %v4206_v33, %v4205_v34  ;;  %v1949_v0 = vcombine.low %v4210_v51, %v4209_v52  ;;  %v4211_v4 = vld [vmem:[#allocation7_spill] sm:$0xff]  ;;  %v4212_v3 = vld [vmem:[#allocation6_spill] sm:$0xff]  ;;  %2050 = vmatprep.subr.bf16.mxu1 %v1948_v15  ;;  %v4215_v22 = vld [vmem:[#allocation25_spill] sm:$0xff] }
  0x61   : >> { %v1925_v31 = vcombine.low %v4212_v3, %v4211_v4  ;;  %v4213_v36 = vld [vmem:[#allocation39_spill] sm:$0xff]  ;;  %v4214_v35 = vld [vmem:[#allocation38_spill] sm:$0xff]  ;;  %v4216_v21 = vld [vmem:[#allocation24_spill] sm:$0xff]  ;;  %2011 = vmatpush3.bf16.msra.mxu0 %v1924_v16 }
  0x62   : >> { %v1941_v17 = vcombine.low %v4214_v35, %v4213_v36  ;;  %v1934_v1 = vcombine.low %v4216_v21, %v4215_v22  ;;  %v4217_v54 = vld [vmem:[#allocation57_spill] sm:$0xff]  ;;  %v4218_v53 = vld [vmem:[#allocation56_spill] sm:$0xff]  ;;  %2051 = vmatpush3.bf16.msra.mxu1 %v1940_v63  ;;  %v4223_v24 = vld [vmem:[#allocation27_spill] sm:$0xff]  ;;  %2012 = vmatprep.subr.bf16.mxu0 %v1933_v47 }
  0x63   : >> { %v1950_v2 = vcombine.low %v4218_v53, %v4217_v54  ;;  %v4219_v6 = vld [vmem:[#allocation9_spill] sm:$0xff]  ;;  %v4220_v5 = vld [vmem:[#allocation8_spill] sm:$0xff]  ;;  %v4224_v23 = vld [vmem:[#allocation26_spill] sm:$0xff]  ;;  %2052 = vmatprep.subr.bf16.mxu1 %v1949_v0  ;;  %v4269_v53 = vcombine.low %v4186_v43, %v4185_v44 }
  0x64   : >> { %v1926_v18 = vcombine.low %v4220_v5, %v4219_v6  ;;  %v4221_v38 = vld [vmem:[#allocation41_spill] sm:$0xff]  ;;  %v4222_v37 = vld [vmem:[#allocation40_spill] sm:$0xff]  ;;  %v1935_v15 = vcombine.low %v4224_v23, %v4223_v24  ;;  %v4225_v56 = vld [vmem:[#allocation59_spill] sm:$0xff] }
  0x65   : >> { %v1942_v3 = vcombine.low %v4222_v37, %v4221_v38  ;;  %v4226_v55 = vld [vmem:[#allocation58_spill] sm:$0xff]  ;;  %v4227_v8 = vld [vmem:[#allocation11_spill] sm:$0xff]  ;;  %v4231_v26 = vld [vmem:[#allocation29_spill] sm:$0xff]  ;;  %2013 = vmatpush3.bf16.msra.mxu0 %v1925_v31 }
  0x66   : >> { %v1951_v48 = vcombine.low %v4226_v55, %v4225_v56  ;;  %v4228_v7 = vld [vmem:[#allocation10_spill] sm:$0xff]  ;;  %v4229_v40 = vld [vmem:[#allocation43_spill] sm:$0xff]  ;;  %v4232_v25 = vld [vmem:[#allocation28_spill] sm:$0xff]  ;;  %2053 = vmatpush3.bf16.msra.mxu1 %v1941_v17  ;;  %2014 = vmatprep.subr.bf16.mxu0 %v1934_v1 }
  0x67   : >> { %v1927_v16 = vcombine.low %v4228_v7, %v4227_v8  ;;  %v4230_v39 = vld [vmem:[#allocation42_spill] sm:$0xff]  ;;  %v1936_v4 = vcombine.low %v4232_v25, %v4231_v26  ;;  %v4233_v58 = vld [vmem:[#allocation61_spill] sm:$0xff]  ;;  %v4234_v57 = vld [vmem:[#allocation60_spill] sm:$0xff]  ;;  %2054 = vmatprep.subr.bf16.mxu1 %v1950_v2 }
  0x68   : >> { %v1943_v63 = vcombine.low %v4230_v39, %v4229_v40  ;;  %v1952_v5 = vcombine.low %v4234_v57, %v4233_v58  ;;  %v3186_v47 = vld [vmem:[%s3177_s8] sm:$0xf]  ;;  %v3189_v19 = vld [vmem:[%s3177_s8 + $0x4] sm:$0xf]  ;;  %v3192_v0 = vld [vmem:[%s3177_s8 + $0x8] sm:$0xf] }
  0x69   : >> { %v4235_v31 = vld [vmem:[#allocation34_spill] sm:$0xff]  ;;  %v4236_v20 = vld [vmem:[#allocation67_spill] sm:$0xff]  ;;  %v368_v8 = vshrl.u32 %v3186_v47, 16  ;;  %v371_v25 = vshll.u32 %v3186_v47, 16  ;;  %v377_v1 = vshll.u32 %v3189_v19, 16  ;;  %v381_v2 = vshrl.u32 %v3189_v19, 16  ;;  %2015 = vmatpush3.bf16.msra.mxu0 %v1926_v18  ;;  %vm3219_vm3 = vmor %vm364_vm0, %vm365_vm1 }
  0x6a   : >> { %v4237_v21 = vld [vmem:[#allocation66_spill] sm:$0xff]  ;;  %v4238_v22 = vld [vmem:[#allocation19_spill] sm:$0xff]  ;;  %v1857_v26 = vld [vmem:[%s3177_s8 + $0x14] sm:$0xf]  ;;  %v387_v33 = vshll.u32 %v3192_v0, 16  ;;  %v391_v6 = vshrl.u32 %v3192_v0, 16  ;;  %2055 = vmatpush3.bf16.msra.mxu1 %v1942_v3  ;;  %2016 = vmatprep.subr.bf16.mxu0 %v1935_v15 }
  0x6b   : >> { %v4239_v23 = vld [vmem:[#allocation18_spill] sm:$0xff]  ;;  %v370_v17 = vrot.slane %v368_v8, 4  ;;  %v511_v34 = vshrl.u32 %v1857_v26, 16  ;;  %v373_v7 = vrot.slane %v371_v25, 5  ;;  %v379_v35 = vrot.slane %v377_v1, 5  ;;  %2056 = vmatprep.subr.bf16.mxu1 %v1951_v48  ;;  %v4241_v52 = vld [vmem:[#allocation51_spill] sm:$0xff]  ;;  %vm3237_vm5 = vmor %vm467_vm2, %vm468_vm4 }
  0x6c   : >> { %v383_v36 = vrot.slane %v381_v2, 4  ;;  %v3210_v24 = vld [vmem:[%s3177_s8 + $0x18] sm:$0xf]  ;;  %v514_v37 = vshll.u32 %v1857_v26, 16  ;;  %v389_v38 = vrot.slane %v387_v33, 5  ;;  %v393_v39 = vrot.slane %v391_v6, 4 }
  0x6d   : >> { %4240 = vst [vmem:[#allocation148_spill] sm:$0xff] %v3210_v24  ;;  %v513_v40 = vrot.slane %v511_v34, 4  ;;  %v520_v8 = vshll.u32 %v3210_v24, 16  ;;  %v374_v49 = vor.u32 %v373_v7, %v370_v17  ;;  %v524_v18 = vshrl.u32 %v3210_v24, 16  ;;  %v455_v3 = vld [vmem:[%s3177_s8] sm:$0xe]  ;;  %2017 = vmatpush3.bf16.msra.mxu0 %v1927_v16 }
  0x6e   : >> { %v384_v50 = vor.u32 %v383_v36, %v379_v35  ;;  %v516_v51 = vrot.slane %v514_v37, 5  ;;  %v4242_v25 = vld [vmem:[#allocation50_spill] sm:$0xff]  ;;  %v394_v33 = vor.u32 %v393_v39, %v389_v38  ;;  %v1899_v34 = vcombine.low %v1857_v26, %v3210_v24  ;;  %2057 = vmatpush3.bf16.msra.mxu1 %v1943_v63  ;;  %2018 = vmatprep.subr.bf16.mxu0 %v1936_v4  ;;  %v3295_v17 = vld [vmem:[%s3177_s8 + $0x20] sm:$0xf]  ;;  %v3390_v24 = vld [vmem:[%s3177_s8 + $0x2c] sm:$0xf] }
  0x6f   : >> { %v3223_v6 = vrot.slane %v520_v8, 5  ;;  %v375_v7 = vrot.slane %v374_v49, 4  ;;  %v526_v15 = vrot.slane %v524_v18, 4  ;;  %2058 = vmatprep.subr.bf16.mxu1 %v1952_v5  ;;  %v1853_v1 = vrot.slane %v455_v3, 9  ;;  %v4252_v3 = vld [vmem:[#allocation85_spill] sm:$0xff]  ;;  %v4259_v8 = vld [vmem:[#allocation68_spill] sm:$0xff] }
  0x70   : >> { %v385_v36 = vrot.slane %v384_v50, 4  ;;  %v517_v37 = vor.u32 %v516_v51, %v513_v40  ;;  %v3226_v48 = vrot.slane %v394_v33, 4  ;;  %1461 = vmatprep.mubr.bf16.mxu1 %v1899_v34  ;;  %v475_v51 = vrot.slane %v3192_v0, 5  ;;  %v4253_v33 = vld [vmem:[#allocation84_spill] sm:$0xff]  ;;  %v4260_v50 = vld [vmem:[#allocation101_spill] sm:$0xff]  ;;  %v4271_v56 = vld [vmem:[#allocation102_spill] sm:$0xff] }
  0x71   : >> { %4245 = vst [vmem:[#allocation149_spill] sm:$0xff] %v3223_v6  ;;  %v380_v39 = vsel %vm3219_vm3, %v375_v7, %v379_v35  ;;  %v527_v40 = vor.u32 %v526_v15, %v3223_v6  ;;  %v472_v35 = vrot.slane %v3189_v19, 5  ;;  %v4249_v16 = vcombine.low %v4198_v9, %v4197_v10  ;;  %v4254_v7 = vld [vmem:[#allocation117_spill] sm:$0xff]  ;;  %v4262_v9 = vld [vmem:[#allocation87_spill] sm:$0xff]  ;;  %v4263_v10 = vld [vmem:[#allocation86_spill] sm:$0xff] }
  0x72   : >> { %v390_v26 = vsel %vm3219_vm3, %v385_v36, %v389_v38  ;;  %v3233_v49 = vrot.slane %v517_v37, 4  ;;  %v3246_v38 = vld [vmem:[%s3177_s8 + $0xc] sm:$0xf]  ;;  %v4250_v63 = vcombine.low %v4194_v41, %v4193_v42  ;;  %v362_v15 = vld [vmem:[%s3177_s8 + $0x10] sm:$0x1]  ;;  %v4266_v42 = vld [vmem:[#allocation71_spill] sm:$0xff]  ;;  %v4268_v41 = vcombine.low %v4190_v11, %v4189_v12 }
  0x73   : >> { %v1891_v5 = vcombine.low %v380_v39, %v390_v26  ;;  %2019 = vmatpush3.bf16.msra.mxu0 %v4249_v16  ;;  %v3258_v18 = vrot.slane %v527_v40, 4  ;;  %v4255_v36 = vld [vmem:[#allocation116_spill] sm:$0xff]  ;;  %v4256_v39 = vcombine.low %v4196_v27, %v4195_v28  ;;  %v4257_v26 = vcombine.low %v4192_v59, %v4191_v60  ;;  %v4265_v28 = vld [vmem:[#allocation118_spill] sm:$0xff] }
  0x74   : >> { %4246 = vst [vmem:[#allocation150_spill] sm:$0xff] %v3233_v49  ;;  %2059 = vmatpush3.bf16.msra.mxu1 %v4250_v63  ;;  %v3273_v40 = vsel %vm3237_vm5, %v1853_v1, %v472_v35  ;;  %v474_v16 = vrot.slane %v472_v35, 4  ;;  %v4258_v63 = vld [vmem:[#allocation69_spill] sm:$0xff]  ;;  %v4261_v37 = vld [vmem:[#allocation100_spill] sm:$0xff]  ;;  %v397_v1 = vshll.u32 %v3246_v38, 16  ;;  %v401_v34 = vshrl.u32 %v3246_v38, 16 }
  0x75   : >> { %4251 = vst [vmem:[#allocation151_spill] sm:$0xff] %v3258_v18  ;;  %2020 = vmatprep.subr.bf16.mxu0 %v4256_v39  ;;  %2060 = vmatprep.subr.bf16.mxu1 %v4257_v26  ;;  %v4264_v39 = vld [vmem:[#allocation119_spill] sm:$0xff]  ;;  %v4267_v26 = vld [vmem:[#allocation70_spill] sm:$0xff]  ;;  %v4272_v60 = vcombine.low %v4188_v29, %v4187_v30  ;;  %v477_v59 = vrot.slane %v475_v51, 4  ;;  %v3329_v29 = vld [vmem:[%s3177_s8 + $0x14] sm:$0xf] }
  0x76   : >> { %1396 = vmatprep.mubr.bf16.mxu0 %v1891_v5  ;;  %v3287_v54 = vld [vmem:[%s3177_s8 + $0x1c] sm:$0xf]  ;;  %v3291_v35 = vsel %vm3237_vm5, %v474_v16, %v475_v51  ;;  %v407_v5 = vshll.u32 %v362_v15, 16  ;;  %v4270_v16 = vld [vmem:[#allocation103_spill] sm:$0xff]  ;;  %v399_v58 = vrot.slane %v397_v1, 5  ;;  %v403_v11 = vrot.slane %v401_v34, 4 }
  0x77   : >> { %v530_v27 = vshll.u32 %v3287_v54, 16  ;;  %2021 = vmatpush3.bf16.msra.mxu0 %v4268_v41  ;;  %v1895_v55 = vcombine.low %v3273_v40, %v3291_v35  ;;  %v4273_v41 = vcombine.low %v4180_v61, %v4179_v62  ;;  %v4278_v51 = vcombine.low %v4182_v45, %v4181_v46  ;;  %v4280_v34 = vld [vmem:[#allocation120_spill] sm:$0xff]  ;;  %v4281_v30 = vld [vmem:[#allocation73_spill] sm:$0xff]  ;;  %v3346_v44 = vld [vmem:[%s3177_s8 + $0x18] sm:$0xf] }
  0x78   : >> { %2061 = vmatpush3.bf16.msra.mxu1 %v4269_v53  ;;  %2022 = vmatprep.subr.bf16.mxu0 %v4272_v60  ;;  %v409_v53 = vrot.slane %v407_v5, 5  ;;  %v400_v1 = vsel %vm3219_vm3, %v3226_v48, %v399_v58  ;;  %v478_v60 = vrot.slane %v3246_v38, 5  ;;  %v404_v57 = vor.u32 %v403_v11, %v399_v58  ;;  %v4282_v40 = vld [vmem:[#allocation72_spill] sm:$0xff]  ;;  %v4287_v45 = vld [vmem:[#allocation91_spill] sm:$0xff]  ;;  %v4288_v35 = vld [vmem:[#allocation90_spill] sm:$0xff] }
  0x79   : >> { %2062 = vmatprep.subr.bf16.mxu1 %v4273_v41  ;;  %v3315_v12 = vrot.slane %v530_v27, 5  ;;  %v481_v5 = vrot.slane %v362_v15, 5  ;;  %v4275_v27 = vld [vmem:[#allocation89_spill] sm:$0xff]  ;;  %v4276_v41 = vld [vmem:[#allocation88_spill] sm:$0xff]  ;;  %v4277_v48 = vcombine.low %v4184_v13, %v4183_v14  ;;  %v4289_v61 = vld [vmem:[#allocation123_spill] sm:$0xff]  ;;  %v415_v14 = vshll.u32 %v3329_v29, 16 }
  0x7a   : >> { %v3339_v11 = vsel %vm3237_vm5, %v477_v59, %v478_v60  ;;  %v480_v58 = vrot.slane %v478_v60, 4  ;;  %v4279_v15 = vld [vmem:[#allocation121_spill] sm:$0xff]  ;;  %v405_v59 = vrot.slane %v404_v57, 4  ;;  %v4286_v60 = vld [vmem:[#allocation104_spill] sm:$0xff]  ;;  %v4290_v43 = vld [vmem:[#allocation122_spill] sm:$0xff]  ;;  %v412_v57 = vshrl.u32 %v3329_v29, 16 }
  0x7b   : >> { %4274 = vst [vmem:[#allocation152_spill] sm:$0xff] %v3315_v12  ;;  %2023 = vmatpush3.bf16.msra.mxu0 %v4277_v48  ;;  %v4283_v48 = vcombine.low %v4235_v31, %v4178_v32  ;;  %v4285_v13 = vld [vmem:[#allocation105_spill] sm:$0xff]  ;;  %v3361_v6 = vld [vmem:[%s3177_s8 + $0x1c] sm:$0xf]  ;;  %v4291_v31 = vld [vmem:[#allocation75_spill] sm:$0xff]  ;;  %v421_v49 = vshll.u32 %v3346_v44, 16 }
  0x7c   : >> { %2063 = vmatpush3.bf16.msra.mxu1 %v4278_v51  ;;  %v4284_v51 = vcombine.low %v4237_v21, %v4236_v20  ;;  %v4292_v20 = vld [vmem:[#allocation74_spill] sm:$0xff]  ;;  %v410_v46 = vsel %vm3219_vm3, %v405_v59, %v409_v53  ;;  %v425_v18 = vshrl.u32 %v3346_v44, 16  ;;  %v414_v59 = vrot.slane %v412_v57, 4  ;;  %v456_v57 = vld [vmem:[%s3177_s8 + $0x14] sm:$0xe] }
  0x7d   : >> { %2024 = vmatprep.subr.bf16.mxu0 %v4283_v48  ;;  %v3365_v48 = vsel %vm3237_vm5, %v480_v58, %v481_v5  ;;  %v3378_v5 = vld [vmem:[%s3177_s8 + $0x28] sm:$0xf]  ;;  %v4295_v58 = vcombine.low %v4239_v23, %v4238_v22  ;;  %v417_v62 = vrot.slane %v415_v14, 5  ;;  %v431_v12 = vshll.u32 %v3361_v6, 16  ;;  %v4309_v32 = vld [vmem:[#allocation77_spill] sm:$0xff] }
  0x7e   : >> { %2064 = vmatprep.subr.bf16.mxu1 %v4284_v51  ;;  %v4296_v51 = vcombine.low %v4242_v25, %v4241_v52  ;;  %v4297_v21 = vcombine.low %v4253_v33, %v4252_v3  ;;  %v423_v22 = vrot.slane %v421_v49, 5  ;;  %v427_v23 = vrot.slane %v425_v18, 4  ;;  %v3474_v33 = vld [vmem:[%s3177_s8 + $0x34] sm:$0xf] }
  0x7f   : >> { %2025 = vmatpush3.bf16.msra.mxu0 %v4295_v58  ;;  %v4298_v58 = vcombine.low %v4255_v36, %v4254_v7  ;;  %v558_v53 = vshll.u32 %v3378_v5, 16  ;;  %v1892_v14 = vcombine.low %v400_v1, %v410_v46  ;;  %v418_v25 = vor.u32 %v417_v62, %v414_v59  ;;  %v4305_v59 = vld [vmem:[#allocation92_spill] sm:$0xff]  ;;  %v3445_v7 = vld [vmem:[%s3177_s8 + $0x20] sm:$0xf] }
  0x80   : >> { %2065 = vmatpush3.bf16.msra.mxu1 %v4296_v51  ;;  %2090 = vmatprep.subr.bf16.mxu0 %v4297_v21  ;;  %v555_v51 = vshrl.u32 %v3378_v5, 16  ;;  %v3401_v52 = vrot.slane %v431_v12, 5  ;;  %v4299_v21 = vcombine.low %v3186_v47, %v3189_v19  ;;  %v428_v3 = vor.u32 %v427_v23, %v423_v22 }
  0x81   : >> { %2130 = vmatprep.subr.bf16.mxu1 %v4298_v58  ;;  %v3409_v49 = vrot.slane %v558_v53, 5  ;;  %v1901_v18 = vcombine.low %v3378_v5, %v3390_v24  ;;  %v4300_v46 = vcombine.low %v4259_v8, %v4258_v63  ;;  %v4301_v12 = vcombine.low %v4261_v37, %v4260_v50  ;;  %v4310_v53 = vld [vmem:[#allocation76_spill] sm:$0xff]  ;;  %v4320_v37 = vld [vmem:[#allocation78_spill] sm:$0xff]  ;;  %v3471_v50 = vld [vmem:[%s3177_s8 + $0x30] sm:$0xf] }
  0x82   : >> { %1397 = vmatmul.mubr.bf16.vlgmr.msra.gmra.mrb[0].mxu0 %v4299_v21  ;;  %v3407_v58 = vrot.slane %v555_v51, 4  ;;  %v419_v62 = vrot.slane %v418_v25, 4  ;;  %v1854_v19 = vrot.slane %v456_v57, 9  ;;  %v485_v23 = vrot.slane %v3346_v44, 5  ;;  %v4304_v25 = vld [vmem:[#allocation93_spill] sm:$0xff]  ;;  %v4307_v21 = vld [vmem:[#allocation124_spill] sm:$0xff] }
  0x83   : >> { %1462 = vmatmul.mubr.bf16.vlgmr.msra.gmra.mrb[0].mxu1 %v1895_v55  ;;  %2091 = vmatpush3.bf16.msra.mxu0 %v4300_v46  ;;  %v488_v55 = vrot.slane %v3361_v6, 5  ;;  %v4302_v47 = vcombine.low %v4263_v10, %v4262_v9  ;;  %v4303_v1 = vcombine.low %v4265_v28, %v4264_v39  ;;  %v429_v5 = vrot.slane %v428_v3, 4  ;;  %v4306_v57 = vld [vmem:[#allocation125_spill] sm:$0xff]  ;;  %v4312_v8 = vld [vmem:[#allocation108_spill] sm:$0xff]  ;;  %v4314_v9 = vld [vmem:[#allocation94_spill] sm:$0xff] }
  0x84   : >> { %2131 = vmatpush3.bf16.msra.mxu1 %v4301_v12  ;;  %1404 = vmatprep.mubr.bf16.mxu0 %v1892_v14  ;;  %v4308_v12 = vcombine.low %v3287_v54, %v3295_v17  ;;  %v3440_v3 = vsel %vm3237_vm5, %v1854_v19, %v485_v23  ;;  %v363_v14 = vld [vmem:[%s3177_s8 + $0x24] sm:$0x1]  ;;  %v4311_v46 = vld [vmem:[#allocation109_spill] sm:$0xff]  ;;  %v4316_v28 = vld [vmem:[#allocation126_spill] sm:$0xff]  ;;  %v4318_v51 = vcombine.low %v4271_v56, %v4270_v16  ;;  %v435_v10 = vshrl.u32 %v3361_v6, 16 }
  0x85   : >> { %2092 = vmatprep.subr.bf16.mxu0 %v4302_v47  ;;  %2132 = vmatprep.subr.bf16.mxu1 %v4303_v1  ;;  %v424_v47 = vsel %vm3219_vm3, %v419_v62, %v423_v22  ;;  %v487_v1 = vrot.slane %v485_v23, 4  ;;  %v4313_v62 = vld [vmem:[#allocation95_spill] sm:$0xff]  ;;  %v4317_v23 = vcombine.low %v4267_v26, %v4266_v42  ;;  %v441_v39 = vshll.u32 %v3445_v7, 16  ;;  %v3549_v63 = vld [vmem:[%s3177_s8 + $0x2c] sm:$0xf] }
  0x86   : >> { %1469 = vmatprep.mubr.bf16.mxu1 %v4308_v12  ;;  %v434_v12 = vsel %vm3219_vm3, %v429_v5, %v3401_v52  ;;  %v4315_v19 = vld [vmem:[#allocation127_spill] sm:$0xff]  ;;  %v445_v16 = vshrl.u32 %v3445_v7, 16  ;;  %v451_v26 = vshll.u32 %v363_v14, 16  ;;  %v437_v56 = vrot.slane %v435_v10, 4  ;;  %v4333_v10 = vld [vmem:[#allocation129_spill] sm:$0xff] }
  0x87   : >> { %2093 = vmatpush3.bf16.msra.mxu0 %v4317_v23  ;;  %v1893_v36 = vcombine.low %v424_v47, %v434_v12  ;;  %v3465_v5 = vsel %vm3237_vm5, %v487_v1, %v488_v55  ;;  %v4319_v22 = vld [vmem:[#allocation79_spill] sm:$0xff]  ;;  %v4321_v23 = vcombine.low %v4276_v41, %v4275_v27  ;;  %v4324_v1 = vld [vmem:[#allocation110_spill] sm:$0xff]  ;;  %v443_v12 = vrot.slane %v441_v39, 5  ;;  %v4332_v27 = vld [vmem:[#allocation96_spill] sm:$0xff] }
  0x88   : >> { %2133 = vmatpush3.bf16.msra.mxu1 %v4318_v51  ;;  %v4322_v51 = vcombine.low %v4280_v34, %v4279_v15  ;;  %v4323_v47 = vld [vmem:[#allocation111_spill] sm:$0xff]  ;;  %v1897_v42 = vcombine.low %v3440_v3, %v3465_v5  ;;  %v4325_v15 = vcombine.low %v3192_v0, %v3246_v38  ;;  %v447_v34 = vrot.slane %v445_v16, 4  ;;  %v1867_v3 = vld [vmem:[%s3177_s8 + $0x14] sm:$0xe] }
  0x89   : >> { %2094 = vmatprep.subr.bf16.mxu0 %v4321_v23  ;;  %v4327_v5 = vcombine.low %v4282_v40, %v4281_v30  ;;  %v4328_v0 = vcombine.low %v4286_v60, %v4285_v13  ;;  %v438_v38 = vor.u32 %v437_v56, %v3401_v52  ;;  %v491_v39 = vrot.slane %v3445_v7, 5  ;;  %v4331_v23 = vld [vmem:[#allocation97_spill] sm:$0xff]  ;;  %v4334_v52 = vld [vmem:[#allocation128_spill] sm:$0xff]  ;;  %v4339_v40 = vld [vmem:[#allocation99_spill] sm:$0xff] }
  0x8a   : >> { %2134 = vmatprep.subr.bf16.mxu1 %v4322_v51  ;;  %1405 = vmatmul.mubr.bf16.gmra.mrb[4].mxu0 %v4325_v15  ;;  %v4326_v51 = vcombine.low %v3339_v11, %v3365_v48  ;;  %v490_v11 = vrot.slane %v488_v55, 4  ;;  %v494_v16 = vrot.slane %v363_v14, 5  ;;  %v4329_v15 = vcombine.low %v4288_v35, %v4287_v45  ;;  %v4337_v30 = vld [vmem:[#allocation113_spill] sm:$0xff]  ;;  %v4340_v56 = vld [vmem:[#allocation98_spill] sm:$0xff]  ;;  %v4345_v35 = vld [vmem:[#allocation131_spill] sm:$0xff] }
  0x8b   : >> { %2095 = vmatpush3.bf16.msra.mxu0 %v4327_v5  ;;  %v4330_v48 = vcombine.low %v4290_v43, %v4289_v61  ;;  %v453_v5 = vrot.slane %v451_v26, 5  ;;  %1412 = vmatprep.mubr.bf16.mxu0 %v1893_v36  ;;  %v439_v55 = vrot.slane %v438_v38, 4  ;;  %v1869_v41 = vrot.slane %v1867_v3, 9  ;;  %v4336_v26 = vld [vmem:[#allocation80_spill] sm:$0xff]  ;;  %v4343_v43 = vld [vmem:[#allocation107_spill] sm:$0xff]  ;;  %v4346_v13 = vld [vmem:[#allocation130_spill] sm:$0xff] }
  0x8c   : >> { %1470 = vmatmul.mubr.bf16.gmra.mrb[4].mxu1 %v4326_v51  ;;  %2096 = vmatprep.subr.bf16.mxu0 %v4329_v15  ;;  %v448_v51 = vor.u32 %v447_v34, %v443_v12  ;;  %v3521_v14 = vsel %vm3237_vm5, %v490_v11, %v491_v39  ;;  %v493_v15 = vrot.slane %v491_v39, 4  ;;  %v4335_v34 = vld [vmem:[#allocation81_spill] sm:$0xff]  ;;  %v4341_v38 = vcombine.low %v4292_v20, %v4291_v31  ;;  %v4342_v11 = vld [vmem:[#allocation106_spill] sm:$0xff]  ;;  %v4347_v45 = vld [vmem:[#allocation148_spill] sm:$0xff] }
  0x8d   : >> { %2135 = vmatpush3.bf16.msra.mxu1 %v4328_v0  ;;  %1477 = vmatprep.mubr.bf16.mxu1 %v1901_v18  ;;  %v4338_v0 = vld [vmem:[#allocation112_spill] sm:$0xff]  ;;  %v4344_v39 = vcombine.low %v4342_v11, %v4343_v43  ;;  %v444_v3 = vsel %vm3219_vm3, %v439_v55, %v443_v12  ;;  %v4348_v60 = vrot.slane %v4347_v45, 5  ;;  %v4349_v43 = vcombine.low %v4305_v59, %v4304_v25  ;;  %v4360_v11 = vld [vmem:[#allocation151_spill] sm:$0xff]  ;;  %v4364_v31 = vld [vmem:[#allocation149_spill] sm:$0xff] }
  0x8e   : >> { %2136 = vmatprep.subr.bf16.mxu1 %v4330_v48  ;;  %v449_v48 = vrot.slane %v448_v51, 4  ;;  %v3530_v18 = vld [vmem:[%s3177_s8 + $0x28] sm:$0xf]  ;;  %v3542_v51 = vsel %vm3237_vm5, %v493_v15, %v494_v16  ;;  %v4350_v12 = vcombine.low %v4307_v21, %v4306_v57  ;;  %v4351_v15 = vld [vmem:[#allocation83_spill] sm:$0xff]  ;;  %v4353_v20 = vrot.slane %v4347_v45, 5 }
  0x8f   : >> { %2097 = vmatpush3.bf16.msra.mxu0 %v4341_v38  ;;  %v614_v61 = vrot.slane %v4348_v60, 4  ;;  %v3552_v38 = vld [vmem:[%s3177_s8 + $0x30] sm:$0xf]  ;;  %v1898_v55 = vcombine.low %v3521_v14, %v3542_v51  ;;  %v4352_v60 = vld [vmem:[#allocation82_spill] sm:$0xff]  ;;  %v4354_v14 = vcombine.low %v3329_v29, %v3346_v44  ;;  %v660_v45 = vshll.u32 %v3549_v63, 16 }
  0x90   : >> { %2098 = vmatprep.subr.bf16.mxu0 %v4349_v43  ;;  %v454_v16 = vsel %vm3219_vm3, %v449_v48, %v453_v5  ;;  %v3571_v43 = vsel %vm3237_vm5, %v1869_v41, %v4353_v20  ;;  %v654_v5 = vshll.u32 %v3530_v18, 16  ;;  %v670_v20 = vshll.u32 %v3552_v38, 16  ;;  %v4358_v44 = vld [vmem:[#allocation114_spill] sm:$0xff]  ;;  %v3598_v25 = vld [vmem:[%s3177_s8 + $0x24] sm:$0x1] }
  0x91   : >> { %2137 = vmatpush3.bf16.msra.mxu1 %v4344_v39  ;;  %v615_v39 = vrot.slane %v3287_v54, 5  ;;  %v1894_v36 = vcombine.low %v444_v3, %v454_v16  ;;  %v664_v3 = vshrl.u32 %v3549_v63, 16  ;;  %v4355_v41 = vcombine.low %v4310_v53, %v4309_v32 }
  0x92   : >> { %2138 = vmatprep.subr.bf16.mxu1 %v4350_v12  ;;  %v651_v12 = vshrl.u32 %v3530_v18, 16  ;;  %1413 = vmatmul.mubr.bf16.gmra.mrb[8].mxu0 %v4354_v14  ;;  %v4356_v29 = vcombine.low %v4312_v8, %v4311_v46  ;;  %v656_v16 = vrot.slane %v654_v5, 5  ;;  %v4359_v14 = vld [vmem:[#allocation152_spill] sm:$0xff]  ;;  %v662_v5 = vrot.slane %v660_v45, 5  ;;  %v4363_v8 = vld [vmem:[#allocation150_spill] sm:$0xff] }
  0x93   : >> { %v3580_v48 = vsel %vm3237_vm5, %v614_v61, %v615_v39  ;;  %2099 = vmatpush3.bf16.msra.mxu0 %v4355_v41  ;;  %v533_v21 = vsel %vm3219_vm3, %v4360_v11, %v4359_v14  ;;  %v4361_v41 = vcombine.low %v4314_v9, %v4313_v62  ;;  %v666_v51 = vrot.slane %v664_v3, 4  ;;  %v3616_v46 = vld [vmem:[%s3177_s8 + $0x34] sm:$0xf]  ;;  %1420 = vmatprep.mubr.bf16.mxu0 %v1894_v36  ;;  %v4368_v45 = vld [vmem:[#allocation132_spill] sm:$0xff] }
  0x94   : >> { %1478 = vmatmul.mubr.bf16.gmra.mrb[8].mxu1 %v1897_v42  ;;  %v4357_v42 = vld [vmem:[#allocation115_spill] sm:$0xff]  ;;  %v653_v61 = vrot.slane %v651_v12, 4  ;;  %v1907_v12 = vcombine.low %v3571_v43, %v3580_v48  ;;  %v4365_v11 = vsel %vm3219_vm3, %v4363_v8, %v4364_v31  ;;  %v672_v9 = vrot.slane %v670_v20, 5  ;;  %v4367_v48 = vld [vmem:[#allocation133_spill] sm:$0xff]  ;;  %v4374_v43 = vld [vmem:[#allocation134_spill] sm:$0xff] }
  0x95   : >> { %2139 = vmatpush3.bf16.msra.mxu1 %v4356_v29  ;;  %2100 = vmatprep.subr.bf16.mxu0 %v4361_v41  ;;  %v4362_v29 = vcombine.low %v4316_v28, %v4315_v19  ;;  %v3613_v32 = vcombine.low %v4365_v11, %v533_v21  ;;  %v4366_v41 = vcombine.low %v3471_v50, %v3474_v33  ;;  %v3628_v19 = vld [vmem:[%s3177_s8 + $0x38] sm:$0x1]  ;;  %v617_v8 = vrot.slane %v615_v39, 4 }
  0x96   : >> { %v3625_v3 = vcombine.low %v4368_v45, %v4367_v48  ;;  %v667_v31 = vor.u32 %v666_v51, %v662_v5  ;;  %v618_v21 = vrot.slane %v3295_v17, 5  ;;  %v621_v36 = vrot.slane %v3598_v25, 5 }
  0x97   : >> { %2140 = vmatprep.subr.bf16.mxu1 %v4362_v29  ;;  %1485 = vmatprep.mubr.bf16.mxu1 %v4366_v41  ;;  %v657_v29 = vor.u32 %v656_v16, %v653_v61  ;;  %v4369_v11 = vcombine.low %v4320_v37, %v4319_v22  ;;  %v4370_v20 = vcombine.low %v4324_v1, %v4323_v47  ;;  %v674_v16 = vshrl.u32 %v3552_v38, 16 }
  0x98   : >> { %v680_v41 = vshll.u32 %v3616_v46, 16  ;;  %v684_v51 = vshrl.u32 %v3616_v46, 16  ;;  %v4371_v39 = vcombine.low %v4332_v27, %v4331_v23  ;;  %v4372_v48 = vcombine.low %v4334_v52, %v4333_v10 }
  0x99   : >> { %2101 = vmatpush3.bf16.msra.mxu0 %v4369_v11  ;;  %2141 = vmatpush3.bf16.msra.mxu1 %v4370_v20  ;;  %v658_v61 = vrot.slane %v657_v29, 4  ;;  %v668_v45 = vrot.slane %v667_v31, 4  ;;  %v4373_v11 = vld [vmem:[#allocation135_spill] sm:$0xff]  ;;  %v620_v29 = vrot.slane %v618_v21, 4  ;;  %v690_v20 = vshll.u32 %v3628_v19, 16 }
  0x9a   : >> { %2102 = vmatprep.subr.bf16.mxu0 %v4371_v39  ;;  %2142 = vmatprep.subr.bf16.mxu1 %v4372_v48  ;;  %v3649_v1 = vcombine.low %v4374_v43, %v4373_v11  ;;  %v676_v28 = vrot.slane %v674_v16, 4  ;;  %v682_v37 = vrot.slane %v680_v41, 5  ;;  %v686_v47 = vrot.slane %v684_v51, 4  ;;  %v1868_v11 = vld [vmem:[%s3177_s8 + $0x28] sm:$0xe] }
  0x9b   : >> { %v663_v22 = vsel %vm3219_vm3, %v658_v61, %v662_v5  ;;  %v4375_v39 = vcombine.low %v3361_v6, %v3445_v7  ;;  %v673_v31 = vsel %vm3219_vm3, %v668_v45, %v672_v9  ;;  %v3661_v43 = vsel %vm3237_vm5, %v617_v8, %v618_v21 }
  0x9c   : >> { %1486 = vmatmul.mubr.bf16.gmra.mrb[12].mxu1 %v1898_v55  ;;  %v622_v48 = vsel %vm3237_vm5, %v620_v29, %v621_v36  ;;  %v692_v5 = vrot.slane %v690_v20, 5  ;;  %v4376_v61 = vcombine.low %v4336_v26, %v4335_v34  ;;  %v4377_v6 = vcombine.low %v4338_v0, %v4337_v30 }
  0x9d   : >> { %1421 = vmatmul.mubr.bf16.gmra.mrb[12].mxu0 %v4375_v39  ;;  %v1915_v7 = vcombine.low %v663_v22, %v673_v31  ;;  %v677_v55 = vor.u32 %v676_v28, %v672_v9  ;;  %v761_v16 = vrot.slane %v3628_v19, 5  ;;  %v4378_v8 = vshrl.u32 %v3287_v54, 16 }
  0x9e   : >> { %2103 = vmatpush3.bf16.msra.mxu0 %v4376_v61  ;;  %2143 = vmatpush3.bf16.msra.mxu1 %v4377_v6  ;;  %v4379_v36 = vcombine.low %v4340_v56, %v4339_v40  ;;  %v4380_v41 = vcombine.low %v4346_v13, %v4345_v35  ;;  %v687_v51 = vor.u32 %v686_v47, %v682_v37  ;;  %v540_v45 = vshll.u32 %v3295_v17, 16  ;;  %v3690_v47 = vld [vmem:[%s3177_s8 + $0x3c] sm:$0xf]  ;;  %v4382_v6 = vld [vmem:[#allocation137_spill] sm:$0xff] }
  0x9f   : >> { %v536_v21 = vrot.slane %v4378_v8, 4  ;;  %v4381_v22 = vshrl.u32 %v3295_v17, 16  ;;  %v550_v28 = vshll.u32 %v3598_v25, 16  ;;  %1526 = vmatprep.mubr.bf16.mxu0 %v1907_v12  ;;  %1591 = vmatprep.mubr.bf16.mxu1 %v1915_v7  ;;  %v1908_v54 = vcombine.low %v3661_v43, %v622_v48  ;;  %v4383_v25 = vld [vmem:[#allocation136_spill] sm:$0xff] }
  0xa0   : >> { %2104 = vmatprep.subr.bf16.mxu0 %v4379_v36  ;;  %2144 = vmatprep.subr.bf16.mxu1 %v4380_v41  ;;  %v678_v29 = vrot.slane %v677_v55, 4  ;;  %v1912_v39 = vcombine.low %v3552_v38, %v3616_v46  ;;  %v688_v31 = vrot.slane %v687_v51, 4  ;;  %v542_v17 = vrot.slane %v540_v45, 5  ;;  %v3714_v45 = vld [vmem:[%s3177_s8 + $0x44] sm:$0xf] }
  0xa1   : >> { %v546_v9 = vrot.slane %v4381_v22, 4  ;;  %v537_v20 = vor.u32 %v536_v21, %v4359_v14  ;;  %v552_v61 = vrot.slane %v550_v28, 5  ;;  %v3694_v8 = vcombine.low %v4383_v25, %v4382_v6  ;;  %v3706_v21 = vld [vmem:[%s3177_s8 + $0x40] sm:$0xf] }
  0xa2   : >> { %v4384_v12 = vcombine.low %v4352_v60, %v4351_v15  ;;  %v4385_v14 = vcombine.low %v4358_v44, %v4357_v42  ;;  %v683_v43 = vsel %vm3219_vm3, %v678_v29, %v682_v37  ;;  %v1870_v7 = vrot.slane %v1868_v11, 9 }
  0xa3   : >> { %v538_v48 = vrot.slane %v537_v20, 4  ;;  %v625_v55 = vrot.slane %v3390_v24, 5  ;;  %v693_v36 = vsel %vm3219_vm3, %v688_v31, %v692_v5  ;;  %v547_v41 = vor.u32 %v546_v9, %v542_v17 }
  0xa4   : >> { %2105 = vmatpush3.bf16.msra.mxu0 %v4384_v12  ;;  %2145 = vmatpush3.bf16.msra.mxu1 %v4385_v14  ;;  %v628_v51 = vrot.slane %v3471_v50, 5  ;;  %v695_v37 = vshrl.u32 %v3690_v47, 16  ;;  %v1916_v22 = vcombine.low %v683_v43, %v693_v36  ;;  %v4386_v5 = vcombine.low %v3530_v18, %v3549_v63  ;;  %v4387_v14 = vld [vmem:[#allocation139_spill] sm:$0xff] }
  0xa5   : >> { %2182 = vmatprep.subr.bf16.mxu0 %v3625_v3  ;;  %2206 = vmatprep.subr.bf16.mxu1 %v3625_v3  ;;  %v543_v28 = vsel %vm3219_vm3, %v538_v48, %v542_v17  ;;  %v3721_v11 = vsel %vm3237_vm5, %v1870_v7, %v625_v55  ;;  %v627_v29 = vrot.slane %v625_v55, 4  ;;  %v548_v9 = vrot.slane %v547_v41, 4 }
  0xa6   : >> { %v697_v20 = vrot.slane %v695_v37, 4  ;;  %v698_v31 = vshll.u32 %v3690_v47, 16  ;;  %v704_v6 = vshll.u32 %v3706_v21, 16  ;;  %v708_v25 = vshrl.u32 %v3706_v21, 16 }
  0xa7   : >> { %1527 = vmatmul.mubr.bf16.vlgmr.msra.gmra.mrb[16].mxu0 %v3613_v32  ;;  %1592 = vmatmul.mubr.bf16.vlgmr.msra.gmra.mrb[16].mxu1 %v4386_v5  ;;  %v629_v17 = vsel %vm3237_vm5, %v627_v29, %v628_v51  ;;  %v714_v32 = vshll.u32 %v3714_v45, 16  ;;  %v561_v18 = vor.u32 %v3409_v49, %v3407_v58  ;;  %v553_v12 = vsel %vm3219_vm3, %v548_v9, %v552_v61  ;;  %v3749_v9 = vld [vmem:[%s3177_s8 + $0x38] sm:$0x1] }
  0xa8   : >> { %2183 = vmatpush3.bf16.msra.mxu0 %v3625_v3  ;;  %2214 = vmatpush3.bf16.msra.mxu1 %v3625_v3  ;;  %v4388_v3 = vld [vmem:[#allocation138_spill] sm:$0xff]  ;;  %v700_v48 = vrot.slane %v698_v31, 5  ;;  %v706_v7 = vrot.slane %v704_v6, 5  ;;  %v1904_v55 = vcombine.low %v543_v28, %v553_v12  ;;  %v1909_v36 = vcombine.low %v3721_v11, %v629_v17  ;;  %v4390_v11 = vld [vmem:[#allocation141_spill] sm:$0xff]  ;;  %v3760_v6 = vld [vmem:[%s3177_s8 + $0x48] sm:$0xf] }
  0xa9   : >> { %2184 = vmatprep.subr.bf16.mxu0 %v3649_v1  ;;  %2207 = vmatprep.subr.bf16.mxu1 %v3649_v1  ;;  %v1991_v43 = vcombine.low %v4388_v3, %v4387_v14  ;;  %v710_v58 = vrot.slane %v708_v25, 4  ;;  %v716_v49 = vrot.slane %v714_v32, 5  ;;  %v564_v37 = vshll.u32 %v3390_v24, 16 }
  0xaa   : >> { %1534 = vmatprep.mubr.bf16.mxu0 %v1908_v54  ;;  %1599 = vmatprep.mubr.bf16.mxu1 %v1916_v22  ;;  %v701_v41 = vor.u32 %v700_v48, %v697_v20  ;;  %v4389_v29 = vshrl.u32 %v3390_v24, 16  ;;  %v574_v61 = vshll.u32 %v3471_v50, 16  ;;  %v562_v22 = vrot.slane %v561_v18, 4  ;;  %v4391_v20 = vld [vmem:[#allocation140_spill] sm:$0xff]  ;;  %v4392_v48 = vld [vmem:[#allocation143_spill] sm:$0xff] }
  0xab   : >> { %v711_v54 = vor.u32 %v710_v58, %v706_v7  ;;  %v1913_v28 = vcombine.low %v3690_v47, %v3706_v21  ;;  %v3757_v31 = vcombine.low %v4391_v20, %v4390_v11  ;;  %v566_v17 = vrot.slane %v564_v37, 5  ;;  %v4393_v58 = vld [vmem:[#allocation142_spill] sm:$0xff] }
  0xac   : >> { %v570_v5 = vrot.slane %v4389_v29, 4  ;;  %2185 = vmatpush3.bf16.msra.mxu0 %v3649_v1  ;;  %2215 = vmatpush3.bf16.msra.mxu1 %v3649_v1  ;;  %v702_v24 = vrot.slane %v701_v41, 4  ;;  %v576_v25 = vrot.slane %v574_v61, 5  ;;  %v630_v1 = vrot.slane %v628_v51, 4  ;;  %v3777_v51 = vld [vmem:[%s3177_s8 + $0x4c] sm:$0x1] }
  0xad   : >> { %2186 = vmatprep.subr.bf16.mxu0 %v3694_v8  ;;  %2208 = vmatprep.subr.bf16.mxu1 %v3694_v8  ;;  %v712_v32 = vrot.slane %v711_v54, 4  ;;  %v631_v18 = vrot.slane %v3474_v33, 5  ;;  %v634_v47 = vrot.slane %v3749_v9, 5  ;;  %v718_v12 = vshrl.u32 %v3714_v45, 16 }
  0xae   : >> { %v707_v14 = vsel %vm3219_vm3, %v702_v24, %v706_v7  ;;  %v571_v3 = vor.u32 %v570_v5, %v566_v17  ;;  %v3774_v41 = vcombine.low %v4393_v58, %v4392_v48  ;;  %v724_v37 = vshll.u32 %v3760_v6, 16 }
  0xaf   : >> { %1535 = vmatmul.mubr.bf16.gmra.mrb[20].mxu0 %v1904_v55  ;;  %1600 = vmatmul.mubr.bf16.gmra.mrb[20].mxu1 %v1912_v39  ;;  %v717_v55 = vsel %vm3219_vm3, %v712_v32, %v716_v49  ;;  %v567_v39 = vsel %vm3219_vm3, %v562_v22, %v566_v17  ;;  %v633_v7 = vrot.slane %v631_v18, 4  ;;  %v720_v29 = vrot.slane %v718_v12, 4 }
  0xb0   : >> { %2187 = vmatpush3.bf16.msra.mxu0 %v3694_v8  ;;  %2216 = vmatpush3.bf16.msra.mxu1 %v3694_v8  ;;  %v1917_v5 = vcombine.low %v707_v14, %v717_v55  ;;  %v572_v61 = vrot.slane %v571_v3, 4  ;;  %v726_v54 = vrot.slane %v724_v37, 5  ;;  %v728_v11 = vshrl.u32 %v3760_v6, 16  ;;  %v1883_v55 = vld [vmem:[%s3177_s8 + $0x28] sm:$0xe] }
  0xb1   : >> { %2188 = vmatprep.subr.bf16.mxu0 %v1991_v43  ;;  %2209 = vmatprep.subr.bf16.mxu1 %v1991_v43  ;;  %v632_v20 = vsel %vm3237_vm5, %v630_v1, %v631_v18  ;;  %v635_v8 = vsel %vm3237_vm5, %v633_v7, %v634_v47  ;;  %v721_v24 = vor.u32 %v720_v29, %v716_v49  ;;  %v734_v32 = vshll.u32 %v3777_v51, 16 }
  0xb2   : >> { %1542 = vmatprep.mubr.bf16.mxu0 %v1909_v36  ;;  %1607 = vmatprep.mubr.bf16.mxu1 %v1917_v5  ;;  %v577_v22 = vsel %vm3219_vm3, %v572_v61, %v576_v25  ;;  %v730_v17 = vrot.slane %v728_v11, 4  ;;  %v774_v12 = vrot.slane %v3777_v51, 5  ;;  %v4394_v14 = vshrl.u32 %v3471_v50, 16  ;;  %v1884_v5 = vld [vmem:[%s3177_s8 + $0x3c] sm:$0xe] }
  0xb3   : >> { %v1905_v1 = vcombine.low %v567_v39, %v577_v22  ;;  %v722_v18 = vrot.slane %v721_v24, 4  ;;  %v736_v47 = vrot.slane %v734_v32, 5  ;;  %v584_v49 = vshll.u32 %v3474_v33, 16  ;;  %v4396_v24 = vld [vmem:[#allocation145_spill] sm:$0xff] }
  0xb4   : >> { %v580_v36 = vrot.slane %v4394_v14, 4  ;;  %2189 = vmatpush3.bf16.msra.mxu0 %v1991_v43  ;;  %2217 = vmatpush3.bf16.msra.mxu1 %v1991_v43  ;;  %v731_v3 = vor.u32 %v730_v17, %v726_v54  ;;  %v4395_v58 = vshrl.u32 %v3474_v33, 16  ;;  %v594_v50 = vshll.u32 %v3749_v9, 16  ;;  %v4397_v33 = vld [vmem:[#allocation144_spill] sm:$0xff] }
  0xb5   : >> { %2190 = vmatprep.subr.bf16.mxu0 %v3757_v31  ;;  %2210 = vmatprep.subr.bf16.mxu1 %v3757_v31  ;;  %v1910_v7 = vcombine.low %v632_v20, %v635_v8  ;;  %v727_v43 = vsel %vm3219_vm3, %v722_v18, %v726_v54  ;;  %v586_v39 = vrot.slane %v584_v49, 5  ;;  %v1914_v29 = vcombine.low %v3714_v45, %v3760_v6 }
  0xb6   : >> { %v581_v48 = vor.u32 %v580_v36, %v576_v25  ;;  %v590_v37 = vrot.slane %v4395_v58, 4  ;;  %v732_v61 = vrot.slane %v731_v3, 4  ;;  %v596_v25 = vrot.slane %v594_v50, 5  ;;  %v4398_v50 = vld [vmem:[#allocation147_spill] sm:$0xff] }
  0xb7   : >> { %1543 = vmatmul.mubr.bf16.gmra.mrb[24].mxu0 %v1905_v1  ;;  %1608 = vmatmul.mubr.bf16.gmra.mrb[24].mxu1 %v1913_v28  ;;  %v1994_v32 = vcombine.low %v4397_v33, %v4396_v24  ;;  %v1885_v20 = vrot.slane %v1883_v55, 9  ;;  %v752_v54 = vrot.slane %v3549_v63, 5  ;;  %v755_v8 = vrot.slane %v3552_v38, 5  ;;  %v4399_v55 = vld [vmem:[#allocation146_spill] sm:$0xff] }
  0xb8   : >> { %v582_v11 = vrot.slane %v581_v48, 4  ;;  %2191 = vmatpush3.bf16.msra.mxu0 %v3757_v31  ;;  %2218 = vmatpush3.bf16.msra.mxu1 %v3757_v31  ;;  %v591_v9 = vor.u32 %v590_v37, %v586_v39  ;;  %v737_v28 = vsel %vm3219_vm3, %v732_v61, %v736_v47  ;;  %v1886_v17 = vrot.slane %v1884_v5, 9 }
  0xb9   : >> { %2192 = vmatprep.subr.bf16.mxu0 %v3774_v41  ;;  %2211 = vmatprep.subr.bf16.mxu1 %v3774_v41  ;;  %v765_v14 = vrot.slane %v3706_v21, 5  ;;  %v1918_v31 = vcombine.low %v727_v43, %v737_v28  ;;  %v753_v63 = vsel %vm3237_vm5, %v1885_v20, %v752_v54  ;;  %v754_v38 = vrot.slane %v752_v54, 4  ;;  %v4400_v54 = vld [vmem:[#allocation3_spill] sm:$0xff] }
  0xba   : >> { %v587_v22 = vsel %vm3219_vm3, %v582_v11, %v586_v39  ;;  %1550 = vmatprep.mubr.bf16.mxu0 %v1910_v7  ;;  %v592_v36 = vrot.slane %v591_v9, 4  ;;  %v757_v1 = vrot.slane %v755_v8, 4  ;;  %v768_v47 = vrot.slane %v3714_v45, 5 }
  0xbb   : >> { %v766_v18 = vsel %vm3237_vm5, %v1886_v17, %v765_v14  ;;  %v767_v49 = vrot.slane %v765_v14, 4  ;;  %v756_v3 = vsel %vm3237_vm5, %v754_v38, %v755_v8  ;;  %v758_v48 = vrot.slane %v3616_v46, 5  ;;  %1615 = vmatprep.mubr.bf16.mxu1 %v1918_v31 }
  0xbc   : >> { %2193 = vmatpush3.bf16.msra.mxu0 %v3774_v41  ;;  %2219 = vmatpush3.bf16.msra.mxu1 %v3774_v41  ;;  %v597_v21 = vsel %vm3219_vm3, %v592_v36, %v596_v25  ;;  %v771_v58 = vrot.slane %v3760_v6, 5  ;;  %v1995_v45 = vcombine.low %v4399_v55, %v4398_v50  ;;  %v770_v41 = vrot.slane %v768_v47, 4 }
  0xbd   : >> { %v1906_v37 = vcombine.low %v587_v22, %v597_v21  ;;  %2194 = vmatprep.subr.bf16.mxu0 %v1994_v32  ;;  %v769_v7 = vsel %vm3237_vm5, %v767_v49, %v768_v47  ;;  %2212 = vmatprep.subr.bf16.mxu1 %v1994_v32  ;;  %v1919_v2 = vcombine.low %v753_v63, %v756_v3  ;;  %v760_v39 = vrot.slane %v758_v48, 4 }
  0xbe   : >> { %v1921_v43 = vcombine.low %v766_v18, %v769_v7  ;;  %v773_v5 = vrot.slane %v771_v58, 4  ;;  %v772_v46 = vsel %vm3237_vm5, %v770_v41, %v771_v58  ;;  %v759_v6 = vsel %vm3237_vm5, %v757_v1, %v758_v48 }
  0xbf   : >> { %1551 = vmatmul.mubr.bf16.gmra.mrb[28].mxu0 %v1906_v37  ;;  %1616 = vmatmul.mubr.bf16.gmra.mrb[28].mxu1 %v1914_v29  ;;  %v762_v61 = vsel %vm3237_vm5, %v760_v39, %v761_v16 }
  0xc0   : >> { %2195 = vmatpush3.bf16.msra.mxu0 %v1994_v32  ;;  %2220 = vmatpush3.bf16.msra.mxu1 %v1994_v32  ;;  %v775_v11 = vsel %vm3237_vm5, %v773_v5, %v774_v12  ;;  %v1920_v25 = vcombine.low %v759_v6, %v762_v61 }
  0xc1   : >> { %2196 = vmatprep.subr.bf16.mxu0 %v1995_v45  ;;  %2213 = vmatprep.subr.bf16.mxu1 %v1995_v45  ;;  %v1922_v29 = vcombine.low %v772_v46, %v775_v11 }
  0xc2   : >> { %2198 = vmatprep.mubr.bf16.mxu0 %v1919_v2  ;;  %2202 = vmatprep.mubr.bf16.mxu1 %v1921_v43 }
  0xc4   : >> { %2197 = vmatpush3.bf16.msra.mxu0 %v1995_v45  ;;  %2221 = vmatpush3.bf16.msra.mxu1 %v1995_v45 }
  0xc7   : >> { %2199 = vmatmul.mubr.bf16.vlgmr.msra.gmra.mrb[32].mxu0 %v1920_v25  ;;  %2203 = vmatmul.mubr.bf16.vlgmr.msra.gmra.mrb[32].mxu1 %v1922_v29 }
 0x155   : >> { %v2026_v24 = vpop.f32.mrb[0].mxu0 }
 0x156   : >> { %v2066_v19 = vpop.f32.mrb[0].mxu1  ;;  %v2027_v33 = vpop.f32.mrb[1].mxu0 }
 0x157   : >> { %v2067_v32 = vpop.f32.mrb[1].mxu1  ;;  %v2028_v16 = vadd.f32 %v2027_v33, %v2026_v24  ;;  %v2029_v51 = vpop.f32.mrb[2].mxu0 }
 0x158   : >> { %v2068_v9 = vadd.f32 %v2067_v32, %v2066_v19  ;;  %v2069_v20 = vpop.f32.mrb[2].mxu1  ;;  %v2030_v4 = vpop.f32.mrb[3].mxu0 }
 0x159   : >> { %v2070_v12 = vpop.f32.mrb[3].mxu1  ;;  %v1399_v8 = vadd.f32 %v2028_v16, %v4400_v54  ;;  %v2031_v28 = vadd.f32 %v2030_v4, %v2029_v51 }
 0x15a   : >> { %v2071_v22 = vadd.f32 %v2070_v12, %v2069_v20 }
 0x15b   : >> { %v1464_v17 = vadd.f32 %v2068_v9, %v1399_v8  ;;  %v1402_v14 = vadd.f32 %v2031_v28, %v4400_v54 }
 0x15d   : >> { %v1467_v31 = vadd.f32 %v2071_v22, %v1402_v14  ;;  %v2032_v36 = vpop.f32.mrb[4].mxu0 }
 0x15e   : >> { %v2033_v38 = vpop.f32.mrb[5].mxu0 }
 0x15f   : >> { %v2072_v63 = vpop.f32.mrb[4].mxu1  ;;  %v2034_v18 = vadd.f32 %v2033_v38, %v2032_v36  ;;  %v2035_v47 = vpop.f32.mrb[6].mxu0 }
 0x160   : >> { %v2073_v1 = vpop.f32.mrb[5].mxu1  ;;  %v2036_v3 = vpop.f32.mrb[7].mxu0 }
 0x161   : >> { %v2074_v49 = vadd.f32 %v2073_v1, %v2072_v63  ;;  %v2075_v21 = vpop.f32.mrb[6].mxu1  ;;  %v1407_v58 = vadd.f32 %v2034_v18, %v4400_v54  ;;  %v2037_v37 = vadd.f32 %v2036_v3, %v2035_v47 }
 0x162   : >> { %v2076_v48 = vpop.f32.mrb[7].mxu1 }
 0x163   : >> { %v2077_v50 = vadd.f32 %v2076_v48, %v2075_v21  ;;  %v1472_v55 = vadd.f32 %v2074_v49, %v1407_v58  ;;  %v1410_v45 = vadd.f32 %v2037_v37, %v4400_v54 }
 0x165   : >> { %v1475_v7 = vadd.f32 %v2077_v50, %v1410_v45  ;;  %v2038_v41 = vpop.f32.mrb[8].mxu0 }
 0x166   : >> { %v2039_v43 = vpop.f32.mrb[9].mxu0 }
 0x167   : >> { %v2078_v2 = vpop.f32.mrb[8].mxu1  ;;  %v2040_v5 = vadd.f32 %v2039_v43, %v2038_v41  ;;  %v2041_v6 = vpop.f32.mrb[10].mxu0 }
 0x168   : >> { %v2079_v39 = vpop.f32.mrb[9].mxu1  ;;  %v2042_v11 = vpop.f32.mrb[11].mxu0 }
 0x169   : >> { %v2080_v46 = vadd.f32 %v2079_v39, %v2078_v2  ;;  %v2081_v61 = vpop.f32.mrb[10].mxu1  ;;  %v1415_v25 = vadd.f32 %v2040_v5, %v4400_v54  ;;  %v2043_v24 = vadd.f32 %v2042_v11, %v2041_v6 }
 0x16a   : >> { %v2082_v29 = vpop.f32.mrb[11].mxu1 }
 0x16b   : >> { %v2083_v19 = vadd.f32 %v2082_v29, %v2081_v61  ;;  %v1480_v33 = vadd.f32 %v2080_v46, %v1415_v25  ;;  %v1418_v32 = vadd.f32 %v2043_v24, %v4400_v54 }
 0x16d   : >> { %v1483_v16 = vadd.f32 %v2083_v19, %v1418_v32 }
 0x16f   : >> { %v2084_v51 = vpop.f32.mrb[12].mxu1 }
 0x170   : >> { %v2044_v9 = vpop.f32.mrb[12].mxu0  ;;  %v2085_v4 = vpop.f32.mrb[13].mxu1 }
 0x171   : >> { %v2045_v20 = vpop.f32.mrb[13].mxu0  ;;  %v2086_v8 = vadd.f32 %v2085_v4, %v2084_v51  ;;  %v2087_v22 = vpop.f32.mrb[14].mxu1 }
 0x172   : >> { %v2046_v12 = vadd.f32 %v2045_v20, %v2044_v9  ;;  %v2047_v28 = vpop.f32.mrb[14].mxu0  ;;  %v2088_v36 = vpop.f32.mrb[15].mxu1 }
 0x173   : >> { %v2048_v14 = vpop.f32.mrb[15].mxu0  ;;  %v2089_v1 = vadd.f32 %v2088_v36, %v2087_v22 }
 0x174   : >> { %v1423_v63 = vadd.f32 %v2046_v12, %v4400_v54  ;;  %v2049_v38 = vadd.f32 %v2048_v14, %v2047_v28 }
 0x176   : >> { %v1488_v18 = vadd.f32 %v2086_v8, %v1423_v63  ;;  %v1426_v49 = vadd.f32 %v2049_v38, %v4400_v54 }
 0x178   : >> { %v1491_v47 = vadd.f32 %v2089_v1, %v1426_v49 }
 0x17a   : >> { %v2106_v21 = vpop.f32.mrb[16].mxu0  ;;  %v2146_v3 = vpop.f32.mrb[16].mxu1 }
 0x17b   : >> { %v2107_v48 = vpop.f32.mrb[17].mxu0  ;;  %v2147_v58 = vpop.f32.mrb[17].mxu1 }
 0x17c   : >> { %v2108_v37 = vadd.f32 %v2107_v48, %v2106_v21  ;;  %v2148_v50 = vadd.f32 %v2147_v58, %v2146_v3  ;;  %v2109_v45 = vpop.f32.mrb[18].mxu0  ;;  %v2149_v41 = vpop.f32.mrb[18].mxu1 }
 0x17d   : >> { %v2110_v2 = vpop.f32.mrb[19].mxu0  ;;  %v2150_v43 = vpop.f32.mrb[19].mxu1 }
 0x17e   : >> { %v1529_v39 = vadd.f32 %v2108_v37, %v1464_v17  ;;  %v2111_v5 = vadd.f32 %v2110_v2, %v2109_v45  ;;  %v2151_v46 = vadd.f32 %v2150_v43, %v2149_v41 }
 0x180   : >> { %v1532_v6 = vadd.f32 %v2111_v5, %v1467_v31  ;;  %v1594_v61 = vadd.f32 %v2148_v50, %v1529_v39 }
 0x182   : >> { %v2112_v11 = vpop.f32.mrb[20].mxu0  ;;  %v2152_v29 = vpop.f32.mrb[20].mxu1  ;;  %v3859_v25 = vadd.f32 %v2151_v46, %v1532_v6 }
 0x183   : >> { %v2113_v24 = vpop.f32.mrb[21].mxu0  ;;  %v2153_v19 = vpop.f32.mrb[21].mxu1 }
 0x184   : >> { %v2114_v32 = vadd.f32 %v2113_v24, %v2112_v11  ;;  %v2154_v9 = vadd.f32 %v2153_v19, %v2152_v29  ;;  %v2115_v51 = vpop.f32.mrb[22].mxu0  ;;  %v2155_v20 = vpop.f32.mrb[22].mxu1 }
 0x185   : >> { %v2116_v4 = vpop.f32.mrb[23].mxu0  ;;  %v2156_v12 = vpop.f32.mrb[23].mxu1 }
 0x186   : >> { %v1537_v8 = vadd.f32 %v2114_v32, %v1472_v55  ;;  %v2117_v28 = vadd.f32 %v2116_v4, %v2115_v51  ;;  %v2157_v22 = vadd.f32 %v2156_v12, %v2155_v20 }
 0x188   : >> { %v1540_v17 = vadd.f32 %v2117_v28, %v1475_v7  ;;  %v1602_v14 = vadd.f32 %v2154_v9, %v1537_v8 }
 0x18a   : >> { %v2118_v36 = vpop.f32.mrb[24].mxu0  ;;  %v2158_v31 = vpop.f32.mrb[24].mxu1  ;;  %v1605_v63 = vadd.f32 %v2157_v22, %v1540_v17 }
 0x18b   : >> { %v2119_v38 = vpop.f32.mrb[25].mxu0  ;;  %v2159_v1 = vpop.f32.mrb[25].mxu1 }
 0x18c   : >> { %v2120_v49 = vadd.f32 %v2119_v38, %v2118_v36  ;;  %v2160_v21 = vadd.f32 %v2159_v1, %v2158_v31  ;;  %v2121_v3 = vpop.f32.mrb[26].mxu0  ;;  %v2161_v48 = vpop.f32.mrb[26].mxu1 }
 0x18d   : >> { %v2122_v58 = vpop.f32.mrb[27].mxu0  ;;  %v2162_v37 = vpop.f32.mrb[27].mxu1 }
 0x18e   : >> { %v1545_v50 = vadd.f32 %v2120_v49, %v1480_v33  ;;  %v2123_v45 = vadd.f32 %v2122_v58, %v2121_v3  ;;  %v2163_v41 = vadd.f32 %v2162_v37, %v2161_v48 }
 0x190   : >> { %v1548_v2 = vadd.f32 %v2123_v45, %v1483_v16  ;;  %v1610_v55 = vadd.f32 %v2160_v21, %v1545_v50 }
 0x192   : >> { %v2124_v43 = vpop.f32.mrb[28].mxu0  ;;  %v2164_v39 = vpop.f32.mrb[28].mxu1  ;;  %v1613_v7 = vadd.f32 %v2163_v41, %v1548_v2 }
 0x193   : >> { %v2125_v5 = vpop.f32.mrb[29].mxu0  ;;  %v2165_v46 = vpop.f32.mrb[29].mxu1 }
 0x194   : >> { %v2126_v6 = vadd.f32 %v2125_v5, %v2124_v43  ;;  %v2166_v11 = vadd.f32 %v2165_v46, %v2164_v39  ;;  %v2127_v29 = vpop.f32.mrb[30].mxu0  ;;  %v2167_v24 = vpop.f32.mrb[30].mxu1 }
 0x195   : >> { %v2128_v19 = vpop.f32.mrb[31].mxu0  ;;  %v2168_v32 = vpop.f32.mrb[31].mxu1 }
 0x196   : >> { %v1553_v9 = vadd.f32 %v2126_v6, %v1488_v18  ;;  %v2129_v51 = vadd.f32 %v2128_v19, %v2127_v29  ;;  %v2169_v20 = vadd.f32 %v2168_v32, %v2167_v24 }
 0x198   : >> { %v1556_v4 = vadd.f32 %v2129_v51, %v1491_v47  ;;  %v1618_v33 = vadd.f32 %v2166_v11, %v1553_v9 }
 0x19a   : >> { %v2200_v12 = vpop.f32.mrb[32].mxu0  ;;  %v2204_v8 = vpop.f32.mrb[32].mxu1  ;;  %v1621_v16 = vadd.f32 %v2169_v20, %v1556_v4 }
 0x19b   : >> { %v1667_v28 = vadd.f32 %v2200_v12, %v1602_v14  ;;  %v1683_v22 = vadd.f32 %v2204_v8, %v1618_v33  ;;  %v1658_v17 = vpop.f32.mrb[33].mxu0  ;;  %v1674_v36 = vpop.f32.mrb[33].mxu1 }
 0x19c   : >> { %v1659_v31 = vadd.f32 %v1658_v17, %v1594_v61  ;;  %v1675_v38 = vadd.f32 %v1674_v36, %v1610_v55  ;;  %v2201_v1 = vpop.f32.mrb[34].mxu0  ;;  %v2205_v49 = vpop.f32.mrb[34].mxu1 }
 0x19d   : >> { %v1691_v21 = vmax.f32 %v1667_v28, 0.0  ;;  %v1695_v3 = vmax.f32 %v1683_v22, 0.0  ;;  %v1670_v48 = vadd.f32 %v2201_v1, %v1605_v63  ;;  %v1686_v58 = vadd.f32 %v2205_v49, %v1621_v16  ;;  %v1661_v18 = vpop.f32.mrb[35].mxu0  ;;  %v1677_v37 = vpop.f32.mrb[35].mxu1 }
 0x19e   : >> { %v1689_v50 = vmax.f32 %v1659_v31, 0.0  ;;  %v1693_v47 = vmax.f32 %v1675_v38, 0.0  ;;  %v1662_v45 = vadd.f32 %v1661_v18, %v3859_v25  ;;  %v1678_v41 = vadd.f32 %v1677_v37, %v1613_v7 }
 0x19f   : >> { %v1699_v14 = vmax.f32 %v1691_v21, %v1695_v3  ;;  %v1692_v2 = vmax.f32 %v1670_v48, 0.0  ;;  %v1696_v43 = vmax.f32 %v1686_v58, 0.0 }
 0x1a0   : >> { %v1697_v39 = vmax.f32 %v1689_v50, %v1693_v47  ;;  %v1690_v61 = vmax.f32 %v1662_v45, 0.0  ;;  %v1694_v55 = vmax.f32 %v1678_v41, 0.0 }
 0x1a1   : >> { %1703 = vst [vmem:[#allocation2 + $0x10] sm:$0xff] %v1699_v14  ;;  %v1700_v5 = vmax.f32 %v1692_v2, %v1696_v43 }
 0x1a2   : >> { %1701 = vst [vmem:[#allocation2] sm:$0xff] %v1697_v39  ;;  %v1698_v63 = vmax.f32 %v1690_v61, %v1694_v55 }
 0x1a3   : >> { %1704 = vst [vmem:[#allocation2 + $0x18] sm:$0xff] %v1700_v5 }
 0x1a4   : >> { %1702 = vst [vmem:[#allocation2 + $0x8] sm:$0xff] %v1698_v63 }
 0x1aa   : >> { %v1707_v46 = vld [vmem:[#allocation2 + $0x10] ss:$2 sm:$0xff]  ;;  %v1711_v6 = vld [vmem:[#allocation2 + $0x11] ss:$2 sm:$0xff]  ;;  %347 = sbr.rel (!%p345_p7) target bundleno = 85 (0x55), region = 76 }
 0x1ab   : >> { %v1713_v11 = vmax.f32 %v1707_v46, %v1711_v6  ;;  %v1705_v25 = vld [vmem:[#allocation2] ss:$2 sm:$0xff]  ;;  %v1709_v29 = vld [vmem:[#allocation2 + $0x1] ss:$2 sm:$0xff] }
 0x1ac   : >> { %v1712_v7 = vmax.f32 %v1705_v25, %v1709_v29 }
 0x1ae   : >> { %v2008_v24 = vpack.c.bf16 %v1713_v11, %v1712_v7 }
 0x1b0   : >> { %2009 = vst [vmem:[%s1723_s20] sm:$0xff] %v2008_v24  }
 0x1b1 PF: > { %s13_s16 = sadd.s32 1, %s2325_s16   ;;  %s4401_s12 = smov %s2317_s14 }
 0x1b2   : > { %p10_p8 = scmp.ge.s32.totalorder %s13_s16, 6   ;;  %s4402_s13 = smov %s2321_s15 }
 0x1b3   : > { %s4403_s14 = smov %s4406_s17  ;;  %s4404_s15 = smov %s4410_s18 }
 0x1b4   :  { %12 = sbr.rel (!%p10_p8) target bundleno = 3 (0x3), region = 87 }

// kernel: cnn5_forward.7
= control target key start
LH: loop header
LB: loop body
LE: loop exit
PB: predicated region body
PF: predicated region fallthrough
CT: control target
= control target key end

     0   :  { %s1842_s12 = smov 0   ;;  %s1844_s13 = smov 0   ;;  %s2967_s0 = inlined_call_operand.vmem [shape: bf16[2,18,18,128], index: 0, kind: input, shape index: {}]   ;;  %s2968_s1 = inlined_call_operand.vmem [shape: bf16[1152,128], index: 1, kind: input, shape index: {}]   ;;  %s2969_s2 = inlined_call_operand.vmem [shape: f32[1,128], index: 2, kind: input, shape index: {}]   ;;  %s2970_s3 = inlined_call_operand.vmem [shape: bf16[2,8,8,128], index: 3, kind: output, shape index: {}]  }
   0x1   :  { %s1846_s14 = smov 0  }
   0x2 LB: > { %s25_s15 = sadd.s32 1, %s1812_s13  ;;  %p1480_p0 = scmp.ge.s32.totalorder %s1816_s14, 1  ;;  %s1816_s14 = sphi %s1846_s14, %s13_s14   ;;  %s1812_s13 = sphi %s1844_s13, %s3231_s13   ;;  %s1808_s12 = sphi %s1842_s12, %s3230_s12  }
   0x3   : > { %p27_p1 = scmp.ge.s32.totalorder %s25_s15, 2  ;;  %p151_p2 = scmp.lt.s32.totalorder %s1816_s14, 3 }
   0x5   : > { %s3233_s15 = smov (%p27_p1, %s25_s15), 0  ;;  %p152_p3 = pnand %p1480_p0, %p151_p2 }
   0x6   : > { %p179_p4 = scmp.lt.s32.totalorder (!%p152_p3), %s1808_s12, 1  ;;  %v1863_v0 = vld [vmem:[%s2969_s2] ss:$0 sm:$0xff] (!%p152_p3)  ;;  %v1873_v2 = vld [vmem:[%s2968_s1 + $0x4] sm:$0xf] (!%p152_p3)  ;;  %s2595_s25 = smov (!%p152_p3), 0  }
   0x7   : > { %155 = sbr.rel (%p152_p3) target bundleno = 412 (0x19c), region = 32  ;;  %2972 = vst [vmem:[#allocation3_spill] sm:$0xff] (!%p152_p3), %v1863_v0  ;;  %v1868_v1 = vld [vmem:[%s2968_s1] sm:$0xf] (!%p152_p3)  ;;  %2974 = vst [vmem:[#allocation5_spill] sm:$0xff] (!%p152_p3), %v1873_v2 }
   0x8   : > { %2973 = vst [vmem:[#allocation4_spill] sm:$0xff] (!%p152_p3), %v1868_v1  ;;  %v1878_v3 = vld [vmem:[%s2968_s1 + $0x8] sm:$0xf] (!%p152_p3)  ;;  %v1883_v4 = vld [vmem:[%s2968_s1 + $0xc] sm:$0xf] (!%p152_p3) }
   0x9   : > { %2975 = vst [vmem:[#allocation6_spill] sm:$0xff] (!%p152_p3), %v1878_v3  ;;  %2976 = vst [vmem:[#allocation7_spill] sm:$0xff] (!%p152_p3), %v1883_v4  ;;  %v1888_v5 = vld [vmem:[%s2968_s1 + $0x10] sm:$0xf] (!%p152_p3)  ;;  %v1893_v6 = vld [vmem:[%s2968_s1 + $0x14] sm:$0xf] (!%p152_p3) }
   0xa   : > { %2977 = vst [vmem:[#allocation8_spill] sm:$0xff] (!%p152_p3), %v1888_v5  ;;  %2978 = vst [vmem:[#allocation9_spill] sm:$0xff] (!%p152_p3), %v1893_v6  ;;  %v1898_v7 = vld [vmem:[%s2968_s1 + $0x18] sm:$0xf] (!%p152_p3)  ;;  %v1903_v8 = vld [vmem:[%s2968_s1 + $0x1c] sm:$0xf] (!%p152_p3) }
   0xb   : > { %2979 = vst [vmem:[#allocation10_spill] sm:$0xff] (!%p152_p3), %v1898_v7  ;;  %2980 = vst [vmem:[#allocation11_spill] sm:$0xff] (!%p152_p3), %v1903_v8  ;;  %v1908_v9 = vld [vmem:[%s2968_s1 + $0x20] sm:$0xf] (!%p152_p3)  ;;  %v1913_v10 = vld [vmem:[%s2968_s1 + $0x24] sm:$0xf] (!%p152_p3) }
   0xc   : > { %2981 = vst [vmem:[#allocation12_spill] sm:$0xff] (!%p152_p3), %v1908_v9  ;;  %2982 = vst [vmem:[#allocation13_spill] sm:$0xff] (!%p152_p3), %v1913_v10  ;;  %v1918_v11 = vld [vmem:[%s2968_s1 + $0x28] sm:$0xf] (!%p152_p3)  ;;  %v1928_v12 = vld [vmem:[%s2968_s1 + $0x2c] sm:$0xf] (!%p152_p3) }
   0xd   : > { %2983 = vst [vmem:[#allocation14_spill] sm:$0xff] (!%p152_p3), %v1918_v11  ;;  %2984 = vst [vmem:[#allocation15_spill] sm:$0xff] (!%p152_p3), %v1928_v12  ;;  %v1933_v13 = vld [vmem:[%s2968_s1 + $0x30] sm:$0xf] (!%p152_p3)  ;;  %v1938_v14 = vld [vmem:[%s2968_s1 + $0x34] sm:$0xf] (!%p152_p3) }
   0xe   : > { %s3235_s12 = smov (!%p179_p4, %s1808_s12), 1  ;;  %2985 = vst [vmem:[#allocation16_spill] sm:$0xff] %v1933_v13  ;;  %2986 = vst [vmem:[#allocation17_spill] sm:$0xff] %v1938_v14  ;;  %v1948_v15 = vld [vmem:[%s2968_s1 + $0x38] sm:$0xf] }
   0xf   : > { %s1751_s9 = smul.u32 216, %s3235_s12  ;;  %s1607_s10 = sshll.u32 %s3235_s12, 5  ;;  %2987 = vst [vmem:[#allocation18_spill] sm:$0xff] %v1948_v15  ;;  %v1953_v16 = vld [vmem:[%s2968_s1 + $0x3c] sm:$0xf] }
  0x10   : > { %s1923_s21 = scalar_lea.vmem %s2970_s3, %s1607_s10  ;;  %2988 = vst [vmem:[#allocation19_spill] sm:$0xff] %v1953_v16  ;;  %v1958_v17 = vld [vmem:[%s2968_s1 + $0x40] sm:$0xf]  ;;  %v1963_v18 = vld [vmem:[%s2968_s1 + $0x44] sm:$0xf] }
  0x11   : > { %s1943_s29 = scalar_lea.vmem %s2967_s0, %s1751_s9  ;;  %2989 = vst [vmem:[#allocation20_spill] sm:$0xff] %v1958_v17  ;;  %2990 = vst [vmem:[#allocation21_spill] sm:$0xff] %v1963_v18  ;;  %v1968_v19 = vld [vmem:[%s2968_s1 + $0x48] sm:$0xf]  ;;  %v1973_v20 = vld [vmem:[%s2968_s1 + $0x4c] sm:$0xf] }
  0x12   : > { %2991 = vst [vmem:[#allocation22_spill] sm:$0xff] %v1968_v19  ;;  %2992 = vst [vmem:[#allocation23_spill] sm:$0xff] %v1973_v20  ;;  %v1978_v21 = vld [vmem:[%s2968_s1 + $0x50] sm:$0xf]  ;;  %v1983_v22 = vld [vmem:[%s2968_s1 + $0x54] sm:$0xf] }
  0x13   : > { %2993 = vst [vmem:[#allocation24_spill] sm:$0xff] %v1978_v21  ;;  %2994 = vst [vmem:[#allocation25_spill] sm:$0xff] %v1983_v22  ;;  %v1988_v23 = vld [vmem:[%s2968_s1 + $0x58] sm:$0xf]  ;;  %v1993_v24 = vld [vmem:[%s2968_s1 + $0x5c] sm:$0xf] }
  0x14   : > { %2995 = vst [vmem:[#allocation26_spill] sm:$0xff] %v1988_v23  ;;  %2996 = vst [vmem:[#allocation27_spill] sm:$0xff] %v1993_v24  ;;  %v1998_v25 = vld [vmem:[%s2968_s1 + $0x60] sm:$0xf]  ;;  %v2003_v26 = vld [vmem:[%s2968_s1 + $0x64] sm:$0xf] }
  0x15   : > { %2997 = vst [vmem:[#allocation28_spill] sm:$0xff] %v1998_v25  ;;  %2998 = vst [vmem:[#allocation29_spill] sm:$0xff] %v2003_v26  ;;  %v2008_v27 = vld [vmem:[%s2968_s1 + $0x68] sm:$0xf]  ;;  %v2013_v28 = vld [vmem:[%s2968_s1 + $0x6c] sm:$0xf] }
  0x16   : > { %2999 = vst [vmem:[#allocation30_spill] sm:$0xff] %v2008_v27  ;;  %3000 = vst [vmem:[#allocation31_spill] sm:$0xff] %v2013_v28  ;;  %v2018_v29 = vld [vmem:[%s2968_s1 + $0x70] sm:$0xf]  ;;  %v2023_v30 = vld [vmem:[%s2968_s1 + $0x74] sm:$0xf] }
  0x17   : > { %3001 = vst [vmem:[#allocation32_spill] sm:$0xff] %v2018_v29  ;;  %3002 = vst [vmem:[#allocation33_spill] sm:$0xff] %v2023_v30  ;;  %v2028_v31 = vld [vmem:[%s2968_s1 + $0x78] sm:$0xf]  ;;  %v2033_v32 = vld [vmem:[%s2968_s1 + $0x7c] sm:$0xf] }
  0x18   : > { %3003 = vst [vmem:[#allocation34_spill] sm:$0xff] %v2028_v31  ;;  %3004 = vst [vmem:[#allocation35_spill] sm:$0xff] %v2033_v32  ;;  %v2038_v33 = vld [vmem:[%s2968_s1 + $0x80] sm:$0xf]  ;;  %v2043_v34 = vld [vmem:[%s2968_s1 + $0x84] sm:$0xf] }
  0x19   : > { %3005 = vst [vmem:[#allocation36_spill] sm:$0xff] %v2038_v33  ;;  %3006 = vst [vmem:[#allocation37_spill] sm:$0xff] %v2043_v34  ;;  %v2048_v35 = vld [vmem:[%s2968_s1 + $0x88] sm:$0xf]  ;;  %v2053_v36 = vld [vmem:[%s2968_s1 + $0x8c] sm:$0xf] }
  0x1a   : > { %3007 = vst [vmem:[#allocation38_spill] sm:$0xff] %v2048_v35  ;;  %3008 = vst [vmem:[#allocation39_spill] sm:$0xff] %v2053_v36  ;;  %v2058_v37 = vld [vmem:[%s2968_s1 + $0x90] sm:$0xf]  ;;  %v2063_v38 = vld [vmem:[%s2968_s1 + $0x94] sm:$0xf] }
  0x1b   : > { %3009 = vst [vmem:[#allocation40_spill] sm:$0xff] %v2058_v37  ;;  %3010 = vst [vmem:[#allocation41_spill] sm:$0xff] %v2063_v38  ;;  %v2068_v39 = vld [vmem:[%s2968_s1 + $0x98] sm:$0xf]  ;;  %v2073_v40 = vld [vmem:[%s2968_s1 + $0x9c] sm:$0xf] }
  0x1c   : > { %3011 = vst [vmem:[#allocation42_spill] sm:$0xff] %v2068_v39  ;;  %3012 = vst [vmem:[#allocation43_spill] sm:$0xff] %v2073_v40  ;;  %v2078_v41 = vld [vmem:[%s2968_s1 + $0xa0] sm:$0xf]  ;;  %v2083_v42 = vld [vmem:[%s2968_s1 + $0xa4] sm:$0xf] }
  0x1d   : > { %3013 = vst [vmem:[#allocation44_spill] sm:$0xff] %v2078_v41  ;;  %3014 = vst [vmem:[#allocation45_spill] sm:$0xff] %v2083_v42  ;;  %v2088_v43 = vld [vmem:[%s2968_s1 + $0xa8] sm:$0xf]  ;;  %v2093_v44 = vld [vmem:[%s2968_s1 + $0xac] sm:$0xf] }
  0x1e   : > { %v2098_v45 = vld [vmem:[%s2968_s1 + $0xb0] sm:$0xf]  ;;  %v2103_v46 = vld [vmem:[%s2968_s1 + $0xb4] sm:$0xf]  ;;  %v2108_v47 = vld [vmem:[%s2968_s1 + $0xb8] sm:$0xf] }
  0x1f   : > { %3015 = vst [vmem:[#allocation46_spill] sm:$0xff] %v2108_v47  ;;  %v2113_v48 = vld [vmem:[%s2968_s1 + $0xbc] sm:$0xf]  ;;  %v2118_v49 = vld [vmem:[%s2968_s1 + $0xc0] sm:$0xf] }
  0x20   : > { %3016 = vst [vmem:[#allocation47_spill] sm:$0xff] %v2113_v48  ;;  %v2123_v50 = vld [vmem:[%s2968_s1 + $0xc4] sm:$0xf]  ;;  %v2128_v51 = vld [vmem:[%s2968_s1 + $0xc8] sm:$0xf] }
  0x21   : > { %v2133_v52 = vld [vmem:[%s2968_s1 + $0xcc] sm:$0xf]  ;;  %v2138_v53 = vld [vmem:[%s2968_s1 + $0xd0] sm:$0xf]  ;;  %v2143_v54 = vld [vmem:[%s2968_s1 + $0xd4] sm:$0xf] }
  0x22   : > { %v2148_v55 = vld [vmem:[%s2968_s1 + $0xd8] sm:$0xf]  ;;  %v2153_v56 = vld [vmem:[%s2968_s1 + $0xdc] sm:$0xf]  ;;  %v2158_v57 = vld [vmem:[%s2968_s1 + $0xe0] sm:$0xf] }
  0x23   : > { %v2163_v58 = vld [vmem:[%s2968_s1 + $0xe4] sm:$0xf]  ;;  %v2168_v59 = vld [vmem:[%s2968_s1 + $0xe8] sm:$0xf]  ;;  %v2173_v60 = vld [vmem:[%s2968_s1 + $0xec] sm:$0xf] }
  0x24   : > { %v2178_v61 = vld [vmem:[%s2968_s1 + $0xf0] sm:$0xf]  ;;  %v2183_v62 = vld [vmem:[%s2968_s1 + $0xf4] sm:$0xf]  ;;  %v2188_v63 = vld [vmem:[%s2968_s1 + $0xf8] sm:$0xf] }
  0x25   : > { %3017 = vst [vmem:[#allocation48_spill] sm:$0xff] %v2188_v63  ;;  %v2193_v0 = vld [vmem:[%s2968_s1 + $0xfc] sm:$0xf]  ;;  %v2198_v47 = vld [vmem:[%s2968_s1 + $0x100] sm:$0xf] }
  0x26   : > { %3018 = vst [vmem:[#allocation49_spill] sm:$0xff] %v2193_v0  ;;  %3019 = vst [vmem:[#allocation50_spill] sm:$0xff] %v2198_v47  ;;  %v2203_v48 = vld [vmem:[%s2968_s1 + $0x104] sm:$0xf]  ;;  %v2208_v15 = vld [vmem:[%s2968_s1 + $0x108] sm:$0xf] }
  0x27   : > { %3020 = vst [vmem:[#allocation51_spill] sm:$0xff] %v2203_v48  ;;  %3021 = vst [vmem:[#allocation52_spill] sm:$0xff] %v2208_v15  ;;  %v2213_v63 = vld [vmem:[%s2968_s1 + $0x10c] sm:$0xf]  ;;  %v2218_v0 = vld [vmem:[%s2968_s1 + $0x110] sm:$0xf] }
  0x28   : > { %3022 = vst [vmem:[#allocation53_spill] sm:$0xff] %v2213_v63  ;;  %3023 = vst [vmem:[#allocation54_spill] sm:$0xff] %v2218_v0  ;;  %v2223_v47 = vld [vmem:[%s2968_s1 + $0x114] sm:$0xf]  ;;  %v2228_v48 = vld [vmem:[%s2968_s1 + $0x118] sm:$0xf] }
  0x29   : > { %3024 = vst [vmem:[#allocation55_spill] sm:$0xff] %v2223_v47  ;;  %3025 = vst [vmem:[#allocation56_spill] sm:$0xff] %v2228_v48  ;;  %v2233_v15 = vld [vmem:[%s2968_s1 + $0x11c] sm:$0xf]  ;;  %v2238_v63 = vld [vmem:[%s2968_s1 + $0x120] sm:$0xf] }
  0x2a   : > { %3026 = vst [vmem:[#allocation57_spill] sm:$0xff] %v2233_v15  ;;  %3027 = vst [vmem:[#allocation58_spill] sm:$0xff] %v2238_v63  ;;  %v2243_v0 = vld [vmem:[%s2968_s1 + $0x124] sm:$0xf]  ;;  %v2248_v47 = vld [vmem:[%s2968_s1 + $0x128] sm:$0xf] }
  0x2b   : > { %3028 = vst [vmem:[#allocation59_spill] sm:$0xff] %v2243_v0  ;;  %3029 = vst [vmem:[#allocation60_spill] sm:$0xff] %v2248_v47  ;;  %v2253_v48 = vld [vmem:[%s2968_s1 + $0x12c] sm:$0xf]  ;;  %v2258_v15 = vld [vmem:[%s2968_s1 + $0x130] sm:$0xf] }
  0x2c   : > { %3030 = vst [vmem:[#allocation61_spill] sm:$0xff] %v2253_v48  ;;  %3031 = vst [vmem:[#allocation62_spill] sm:$0xff] %v2258_v15  ;;  %v2263_v63 = vld [vmem:[%s2968_s1 + $0x134] sm:$0xf]  ;;  %v2268_v0 = vld [vmem:[%s2968_s1 + $0x138] sm:$0xf] }
  0x2d   : > { %3032 = vst [vmem:[#allocation63_spill] sm:$0xff] %v2263_v63  ;;  %3033 = vst [vmem:[#allocation64_spill] sm:$0xff] %v2268_v0  ;;  %v2273_v47 = vld [vmem:[%s2968_s1 + $0x13c] sm:$0xf]  ;;  %v2278_v48 = vld [vmem:[%s2968_s1 + $0x140] sm:$0xf] }
  0x2e   : > { %3034 = vst [vmem:[#allocation65_spill] sm:$0xff] %v2273_v47  ;;  %3035 = vst [vmem:[#allocation66_spill] sm:$0xff] %v2278_v48  ;;  %v2283_v15 = vld [vmem:[%s2968_s1 + $0x144] sm:$0xf]  ;;  %v2288_v63 = vld [vmem:[%s2968_s1 + $0x148] sm:$0xf] }
  0x2f   : > { %3036 = vst [vmem:[#allocation67_spill] sm:$0xff] %v2283_v15  ;;  %3037 = vst [vmem:[#allocation68_spill] sm:$0xff] %v2288_v63  ;;  %v2293_v0 = vld [vmem:[%s2968_s1 + $0x14c] sm:$0xf]  ;;  %v2298_v47 = vld [vmem:[%s2968_s1 + $0x150] sm:$0xf] }
  0x30   : > { %3038 = vst [vmem:[#allocation69_spill] sm:$0xff] %v2293_v0  ;;  %3039 = vst [vmem:[#allocation70_spill] sm:$0xff] %v2298_v47  ;;  %v2303_v48 = vld [vmem:[%s2968_s1 + $0x154] sm:$0xf]  ;;  %v2308_v15 = vld [vmem:[%s2968_s1 + $0x158] sm:$0xf] }
  0x31   : > { %3040 = vst [vmem:[#allocation71_spill] sm:$0xff] %v2303_v48  ;;  %3041 = vst [vmem:[#allocation72_spill] sm:$0xff] %v2308_v15  ;;  %v2313_v63 = vld [vmem:[%s2968_s1 + $0x15c] sm:$0xf]  ;;  %v2318_v0 = vld [vmem:[%s2968_s1 + $0x160] sm:$0xf] }
  0x32   : > { %3042 = vst [vmem:[#allocation73_spill] sm:$0xff] %v2313_v63  ;;  %3043 = vst [vmem:[#allocation74_spill] sm:$0xff] %v2318_v0  ;;  %v2323_v47 = vld [vmem:[%s2968_s1 + $0x164] sm:$0xf]  ;;  %v2328_v48 = vld [vmem:[%s2968_s1 + $0x168] sm:$0xf] }
  0x33   : > { %3044 = vst [vmem:[#allocation75_spill] sm:$0xff] %v2323_v47  ;;  %3045 = vst [vmem:[#allocation76_spill] sm:$0xff] %v2328_v48  ;;  %v2333_v15 = vld [vmem:[%s2968_s1 + $0x16c] sm:$0xf]  ;;  %v2338_v63 = vld [vmem:[%s2968_s1 + $0x170] sm:$0xf] }
  0x34   : > { %3046 = vst [vmem:[#allocation77_spill] sm:$0xff] %v2333_v15  ;;  %3047 = vst [vmem:[#allocation78_spill] sm:$0xff] %v2338_v63  ;;  %v2343_v0 = vld [vmem:[%s2968_s1 + $0x174] sm:$0xf]  ;;  %v2348_v47 = vld [vmem:[%s2968_s1 + $0x178] sm:$0xf] }
  0x35   : > { %3048 = vst [vmem:[#allocation79_spill] sm:$0xff] %v2343_v0  ;;  %3049 = vst [vmem:[#allocation80_spill] sm:$0xff] %v2348_v47  ;;  %v2353_v48 = vld [vmem:[%s2968_s1 + $0x17c] sm:$0xf]  ;;  %v2358_v15 = vld [vmem:[%s2968_s1 + $0x180] sm:$0xf] }
  0x36   : > { %3050 = vst [vmem:[#allocation81_spill] sm:$0xff] %v2353_v48  ;;  %3051 = vst [vmem:[#allocation82_spill] sm:$0xff] %v2358_v15  ;;  %v2363_v63 = vld [vmem:[%s2968_s1 + $0x184] sm:$0xf]  ;;  %v2368_v0 = vld [vmem:[%s2968_s1 + $0x188] sm:$0xf] }
  0x37   : > { %3052 = vst [vmem:[#allocation83_spill] sm:$0xff] %v2363_v63  ;;  %3053 = vst [vmem:[#allocation84_spill] sm:$0xff] %v2368_v0  ;;  %v2373_v47 = vld [vmem:[%s2968_s1 + $0x18c] sm:$0xf]  ;;  %v2378_v48 = vld [vmem:[%s2968_s1 + $0x190] sm:$0xf] }
  0x38   : > { %3054 = vst [vmem:[#allocation85_spill] sm:$0xff] %v2373_v47  ;;  %3055 = vst [vmem:[#allocation86_spill] sm:$0xff] %v2378_v48  ;;  %v2383_v15 = vld [vmem:[%s2968_s1 + $0x194] sm:$0xf]  ;;  %v2388_v63 = vld [vmem:[%s2968_s1 + $0x198] sm:$0xf] }
  0x39   : > { %3056 = vst [vmem:[#allocation87_spill] sm:$0xff] %v2383_v15  ;;  %3057 = vst [vmem:[#allocation88_spill] sm:$0xff] %v2388_v63  ;;  %v2393_v0 = vld [vmem:[%s2968_s1 + $0x19c] sm:$0xf]  ;;  %v2398_v47 = vld [vmem:[%s2968_s1 + $0x1a0] sm:$0xf] }
  0x3a   : > { %3058 = vst [vmem:[#allocation89_spill] sm:$0xff] %v2393_v0  ;;  %3059 = vst [vmem:[#allocation90_spill] sm:$0xff] %v2398_v47  ;;  %v2403_v48 = vld [vmem:[%s2968_s1 + $0x1a4] sm:$0xf]  ;;  %v2408_v15 = vld [vmem:[%s2968_s1 + $0x1a8] sm:$0xf] }
  0x3b   : > { %3060 = vst [vmem:[#allocation91_spill] sm:$0xff] %v2403_v48  ;;  %3061 = vst [vmem:[#allocation92_spill] sm:$0xff] %v2408_v15  ;;  %v2413_v63 = vld [vmem:[%s2968_s1 + $0x1ac] sm:$0xf]  ;;  %v2418_v0 = vld [vmem:[%s2968_s1 + $0x1b0] sm:$0xf] }
  0x3c   : > { %3062 = vst [vmem:[#allocation93_spill] sm:$0xff] %v2413_v63  ;;  %3063 = vst [vmem:[#allocation94_spill] sm:$0xff] %v2418_v0  ;;  %v2423_v47 = vld [vmem:[%s2968_s1 + $0x1b4] sm:$0xf]  ;;  %v2428_v48 = vld [vmem:[%s2968_s1 + $0x1b8] sm:$0xf] }
  0x3d   : > { %3064 = vst [vmem:[#allocation95_spill] sm:$0xff] %v2423_v47  ;;  %3065 = vst [vmem:[#allocation96_spill] sm:$0xff] %v2428_v48  ;;  %v2433_v15 = vld [vmem:[%s2968_s1 + $0x1bc] sm:$0xf]  ;;  %v2438_v63 = vld [vmem:[%s2968_s1 + $0x1c0] sm:$0xf] }
  0x3e   : > { %3066 = vst [vmem:[#allocation97_spill] sm:$0xff] %v2433_v15  ;;  %3067 = vst [vmem:[#allocation98_spill] sm:$0xff] %v2438_v63  ;;  %v2443_v0 = vld [vmem:[%s2968_s1 + $0x1c4] sm:$0xf]  ;;  %v2448_v47 = vld [vmem:[%s2968_s1 + $0x1c8] sm:$0xf] }
  0x3f   : > { %3068 = vst [vmem:[#allocation99_spill] sm:$0xff] %v2443_v0  ;;  %3069 = vst [vmem:[#allocation100_spill] sm:$0xff] %v2448_v47  ;;  %v2453_v48 = vld [vmem:[%s2968_s1 + $0x1cc] sm:$0xf]  ;;  %v2458_v15 = vld [vmem:[%s2968_s1 + $0x1d0] sm:$0xf] }
  0x40   : > { %3070 = vst [vmem:[#allocation101_spill] sm:$0xff] %v2453_v48  ;;  %3071 = vst [vmem:[#allocation102_spill] sm:$0xff] %v2458_v15  ;;  %v2463_v63 = vld [vmem:[%s2968_s1 + $0x1d4] sm:$0xf]  ;;  %v2468_v0 = vld [vmem:[%s2968_s1 + $0x1d8] sm:$0xf] }
  0x41   : > { %3072 = vst [vmem:[#allocation103_spill] sm:$0xff] %v2463_v63  ;;  %3073 = vst [vmem:[#allocation104_spill] sm:$0xff] %v2468_v0  ;;  %v2473_v47 = vld [vmem:[%s2968_s1 + $0x1dc] sm:$0xf]  ;;  %v2478_v48 = vld [vmem:[%s2968_s1 + $0x1e0] sm:$0xf] }
  0x42   : > { %3074 = vst [vmem:[#allocation105_spill] sm:$0xff] %v2473_v47  ;;  %3075 = vst [vmem:[#allocation106_spill] sm:$0xff] %v2478_v48  ;;  %v2483_v15 = vld [vmem:[%s2968_s1 + $0x1e4] sm:$0xf]  ;;  %v2488_v63 = vld [vmem:[%s2968_s1 + $0x1e8] sm:$0xf] }
  0x43   : > { %3076 = vst [vmem:[#allocation107_spill] sm:$0xff] %v2483_v15  ;;  %3077 = vst [vmem:[#allocation108_spill] sm:$0xff] %v2488_v63  ;;  %v2493_v0 = vld [vmem:[%s2968_s1 + $0x1ec] sm:$0xf]  ;;  %v2498_v47 = vld [vmem:[%s2968_s1 + $0x1f0] sm:$0xf] }
  0x44   : > { %3078 = vst [vmem:[#allocation109_spill] sm:$0xff] %v2493_v0  ;;  %3079 = vst [vmem:[#allocation110_spill] sm:$0xff] %v2498_v47  ;;  %v2503_v48 = vld [vmem:[%s2968_s1 + $0x1f4] sm:$0xf]  ;;  %v2508_v15 = vld [vmem:[%s2968_s1 + $0x1f8] sm:$0xf] }
  0x45   : > { %3080 = vst [vmem:[#allocation111_spill] sm:$0xff] %v2503_v48  ;;  %3081 = vst [vmem:[#allocation112_spill] sm:$0xff] %v2508_v15  ;;  %v2513_v63 = vld [vmem:[%s2968_s1 + $0x1fc] sm:$0xf]  ;;  %v2518_v0 = vld [vmem:[%s2968_s1 + $0x200] sm:$0xf] }
  0x46   : > { %3082 = vst [vmem:[#allocation113_spill] sm:$0xff] %v2513_v63  ;;  %3083 = vst [vmem:[#allocation114_spill] sm:$0xff] %v2518_v0  ;;  %v2523_v47 = vld [vmem:[%s2968_s1 + $0x204] sm:$0xf]  ;;  %v2528_v48 = vld [vmem:[%s2968_s1 + $0x208] sm:$0xf] }
  0x47   : > { %3084 = vst [vmem:[#allocation115_spill] sm:$0xff] %v2523_v47  ;;  %3085 = vst [vmem:[#allocation116_spill] sm:$0xff] %v2528_v48  ;;  %v2533_v15 = vld [vmem:[%s2968_s1 + $0x20c] sm:$0xf]  ;;  %v2538_v63 = vld [vmem:[%s2968_s1 + $0x210] sm:$0xf] }
  0x48   : > { %3086 = vst [vmem:[#allocation117_spill] sm:$0xff] %v2533_v15  ;;  %3087 = vst [vmem:[#allocation118_spill] sm:$0xff] %v2538_v63  ;;  %v2543_v0 = vld [vmem:[%s2968_s1 + $0x214] sm:$0xf]  ;;  %v2548_v47 = vld [vmem:[%s2968_s1 + $0x218] sm:$0xf] }
  0x49   : > { %3088 = vst [vmem:[#allocation119_spill] sm:$0xff] %v2543_v0  ;;  %3089 = vst [vmem:[#allocation120_spill] sm:$0xff] %v2548_v47  ;;  %v2553_v48 = vld [vmem:[%s2968_s1 + $0x21c] sm:$0xf]  ;;  %v2558_v15 = vld [vmem:[%s2968_s1 + $0x220] sm:$0xf] }
  0x4a   : > { %3090 = vst [vmem:[#allocation121_spill] sm:$0xff] %v2553_v48  ;;  %3091 = vst [vmem:[#allocation122_spill] sm:$0xff] %v2558_v15  ;;  %v2563_v63 = vld [vmem:[%s2968_s1 + $0x224] sm:$0xf]  ;;  %v2568_v0 = vld [vmem:[%s2968_s1 + $0x228] sm:$0xf] }
  0x4b   : > { %3092 = vst [vmem:[#allocation123_spill] sm:$0xff] %v2563_v63  ;;  %3093 = vst [vmem:[#allocation124_spill] sm:$0xff] %v2568_v0  ;;  %v2573_v47 = vld [vmem:[%s2968_s1 + $0x22c] sm:$0xf]  ;;  %v2578_v48 = vld [vmem:[%s2968_s1 + $0x230] sm:$0xf] }
  0x4c   : > { %3094 = vst [vmem:[#allocation125_spill] sm:$0xff] %v2573_v47  ;;  %3095 = vst [vmem:[#allocation126_spill] sm:$0xff] %v2578_v48  ;;  %v2583_v15 = vld [vmem:[%s2968_s1 + $0x234] sm:$0xf]  ;;  %v2588_v63 = vld [vmem:[%s2968_s1 + $0x238] sm:$0xf] }
  0x4d   : > { %3096 = vst [vmem:[#allocation127_spill] sm:$0xff] %v2583_v15  ;;  %3097 = vst [vmem:[#allocation128_spill] sm:$0xff] %v2588_v63  ;;  %v2593_v0 = vld [vmem:[%s2968_s1 + $0x23c] sm:$0xf] }
  0x4e   : > { %3098 = vst [vmem:[#allocation129_spill] sm:$0xff] %v2593_v0 }
  0x4f LB: >> { %v3099_v18 = vld [vmem:[#allocation21_spill] sm:$0xff]  ;;  %v3100_v17 = vld [vmem:[#allocation20_spill] sm:$0xff]  ;;  %v1556_v63 = vcombine.low %v2118_v49, %v2123_v50  ;;  %v3105_v20 = vld [vmem:[#allocation23_spill] sm:$0xff]  ;;  %v1557_v16 = vcombine.low %v2128_v51, %v2133_v52  ;;  %s1608_s26 = smul.u32 24, %s1820_s25  ;;  %vm358_vm0 = vsmask.f32 3328  ;;  %s1820_s25 = sphi %s2595_s25, %s346_s25  }
  0x50   : >> { %v1540_v48 = vcombine.low %v3100_v17, %v3099_v18  ;;  %v3101_v2 = vld [vmem:[#allocation5_spill] sm:$0xff]  ;;  %v3102_v1 = vld [vmem:[#allocation4_spill] sm:$0xff]  ;;  %v3106_v19 = vld [vmem:[#allocation22_spill] sm:$0xff]  ;;  %v1558_v18 = vcombine.low %v2138_v53, %v2143_v54  ;;  %vm359_vm1 = vsmask.f32 7440  ;;  %vm417_vm3 = vcmask 1042432  }
  0x51   : >> { %v1532_v15 = vcombine.low %v3102_v1, %v3101_v2  ;;  %v3103_v34 = vld [vmem:[#allocation37_spill] sm:$0xff]  ;;  %v3104_v33 = vld [vmem:[#allocation36_spill] sm:$0xff]  ;;  %v1541_v47 = vcombine.low %v3106_v19, %v3105_v20  ;;  %1637 = vmatprep.subr.bf16.mxu1 %v1556_v63  ;;  %v3107_v4 = vld [vmem:[#allocation7_spill] sm:$0xff]  ;;  %s2622_s27 = scalar_lea.vmem %s1943_s29, %s1608_s26  ;;  %vm418_vm4 = vcmask 1046532   ;;  %s1604_s28 = sshll.u32 %s1820_s25, 2 }
  0x52   : >> { %v1548_v0 = vcombine.low %v3104_v33, %v3103_v34  ;;  %1609 = vmatprep.subr.bf16.mxu0 %v1540_v48  ;;  %v3108_v3 = vld [vmem:[#allocation6_spill] sm:$0xff]  ;;  %v3109_v36 = vld [vmem:[#allocation39_spill] sm:$0xff]  ;;  %v3111_v22 = vld [vmem:[#allocation25_spill] sm:$0xff]  ;;  %s1369_s30 = scalar_lea.vmem %s1923_s21, %s1604_s28  ;;  %s346_s25 = sadd.s32 1, %s1820_s25  }
  0x53   : >> { %1610 = vmatpush3.bf16.msra.mxu0 %v1532_v15  ;;  %v1533_v1 = vcombine.low %v3108_v3, %v3107_v4  ;;  %v3110_v35 = vld [vmem:[#allocation38_spill] sm:$0xff]  ;;  %v3112_v21 = vld [vmem:[#allocation24_spill] sm:$0xff]  ;;  %v2628_v15 = vld [vmem:[%s2622_s27 + $0x4] sm:$0xf]  ;;  %p343_p5 = scmp.ge.s32.totalorder %s346_s25, 8  }
  0x54   : >> { %1638 = vmatpush3.bf16.msra.mxu1 %v1548_v0  ;;  %v1549_v2 = vcombine.low %v3110_v35, %v3109_v36  ;;  %1611 = vmatprep.subr.bf16.mxu0 %v1541_v47  ;;  %v1542_v17 = vcombine.low %v3112_v21, %v3111_v22  ;;  %v2625_v0 = vld [vmem:[%s2622_s27] sm:$0xf]  ;;  %v2631_v48 = vld [vmem:[%s2622_s27 + $0x8] sm:$0x1]  ;;  %v3114_v5 = vld [vmem:[#allocation8_spill] sm:$0xff] }
  0x55   : >> { %1639 = vmatprep.subr.bf16.mxu1 %v1557_v16  ;;  %v3113_v6 = vld [vmem:[#allocation9_spill] sm:$0xff]  ;;  %v3116_v37 = vld [vmem:[#allocation40_spill] sm:$0xff]  ;;  %v362_v63 = vshrl.u32 %v2625_v0, 16  ;;  %v3117_v24 = vld [vmem:[#allocation27_spill] sm:$0xff]  ;;  %v381_v19 = vshll.u32 %v2631_v48, 16 }
  0x56   : >> { %v1534_v16 = vcombine.low %v3114_v5, %v3113_v6  ;;  %v3115_v38 = vld [vmem:[#allocation41_spill] sm:$0xff]  ;;  %v3118_v23 = vld [vmem:[#allocation26_spill] sm:$0xff]  ;;  %v371_v5 = vshll.u32 %v2628_v15, 16  ;;  %v375_v6 = vshrl.u32 %v2628_v15, 16  ;;  %v3119_v8 = vld [vmem:[#allocation11_spill] sm:$0xff] }
  0x57   : >> { %1612 = vmatpush3.bf16.msra.mxu0 %v1533_v1  ;;  %v1550_v47 = vcombine.low %v3116_v37, %v3115_v38  ;;  %v1543_v3 = vcombine.low %v3118_v23, %v3117_v24  ;;  %v1559_v1 = vcombine.low %v2148_v55, %v2153_v56  ;;  %v364_v4 = vrot.slane %v362_v63, 4  ;;  %v2647_v21 = vld [vmem:[%s2622_s27 + $0xc] sm:$0xf]  ;;  %v3121_v40 = vld [vmem:[#allocation43_spill] sm:$0xff]  ;;  %v3123_v26 = vld [vmem:[#allocation29_spill] sm:$0xff] }
  0x58   : >> { %1640 = vmatpush3.bf16.msra.mxu1 %v1549_v2  ;;  %1613 = vmatprep.subr.bf16.mxu0 %v1542_v17  ;;  %v365_v2 = vshll.u32 %v2625_v0, 16  ;;  %v2650_v17 = vld [vmem:[%s2622_s27 + $0x10] sm:$0xf]  ;;  %v3120_v7 = vld [vmem:[#allocation10_spill] sm:$0xff]  ;;  %v373_v63 = vrot.slane %v371_v5, 5  ;;  %v377_v23 = vrot.slane %v375_v6, 4  ;;  %vm2662_vm2 = vmor %vm358_vm0, %vm359_vm1 }
  0x59   : >> { %1641 = vmatprep.subr.bf16.mxu1 %v1558_v18  ;;  %v1535_v18 = vcombine.low %v3120_v7, %v3119_v8  ;;  %v3122_v39 = vld [vmem:[#allocation42_spill] sm:$0xff]  ;;  %v3124_v25 = vld [vmem:[#allocation28_spill] sm:$0xff]  ;;  %v383_v7 = vrot.slane %v381_v19, 5  ;;  %v3127_v10 = vld [vmem:[#allocation13_spill] sm:$0xff]  ;;  %v1561_v19 = vcombine.low %v2168_v59, %v2173_v60 }
  0x5a   : >> { %v367_v20 = vrot.slane %v365_v2, 5  ;;  %v1551_v22 = vcombine.low %v3122_v39, %v3121_v40  ;;  %v1544_v24 = vcombine.low %v3124_v25, %v3123_v26  ;;  %v1560_v2 = vcombine.low %v2158_v57, %v2163_v58  ;;  %v3128_v9 = vld [vmem:[#allocation12_spill] sm:$0xff]  ;;  %v3129_v42 = vld [vmem:[#allocation45_spill] sm:$0xff]  ;;  %v3131_v28 = vld [vmem:[#allocation31_spill] sm:$0xff] }
  0x5b   : >> { %1614 = vmatpush3.bf16.msra.mxu0 %v1534_v16  ;;  %v1536_v6 = vcombine.low %v3128_v9, %v3127_v10  ;;  %v3130_v41 = vld [vmem:[#allocation44_spill] sm:$0xff]  ;;  %v3132_v27 = vld [vmem:[#allocation30_spill] sm:$0xff]  ;;  %v3133_v12 = vld [vmem:[#allocation15_spill] sm:$0xff] }
  0x5c   : >> { %1642 = vmatpush3.bf16.msra.mxu1 %v1550_v47  ;;  %1615 = vmatprep.subr.bf16.mxu0 %v1543_v3  ;;  %v368_v33 = vor.u32 %v367_v20, %v364_v4  ;;  %v378_v47 = vor.u32 %v377_v23, %v373_v63  ;;  %v1519_v3 = vcombine.low %v2647_v21, %v2650_v17  ;;  %v3134_v11 = vld [vmem:[#allocation14_spill] sm:$0xff]  ;;  %v3135_v30 = vld [vmem:[#allocation33_spill] sm:$0xff]  ;;  %v3136_v29 = vld [vmem:[#allocation32_spill] sm:$0xff] }
  0x5d   : >> { %1643 = vmatprep.subr.bf16.mxu1 %v1559_v1  ;;  %v1552_v4 = vcombine.low %v3130_v41, %v3129_v42  ;;  %v1545_v23 = vcombine.low %v3132_v27, %v3131_v28  ;;  %v2681_v1 = vld [vmem:[%s2622_s27 + $0xc] sm:$0xf]  ;;  %v3137_v14 = vld [vmem:[#allocation17_spill] sm:$0xff]  ;;  %v3138_v13 = vld [vmem:[#allocation16_spill] sm:$0xff] }
  0x5e   : >> { %v369_v5 = vrot.slane %v368_v33, 4  ;;  %v379_v20 = vrot.slane %v378_v47, 4  ;;  %1191 = vmatprep.mubr.bf16.mxu1 %v1519_v3  ;;  %v422_v47 = vrot.slane %v2628_v15, 5  ;;  %v409_v3 = vld [vmem:[%s2622_s27] sm:$0xe]  ;;  %v3139_v32 = vld [vmem:[#allocation35_spill] sm:$0xff]  ;;  %vm2718_vm5 = vmor %vm417_vm3, %vm418_vm4 }
  0x5f   : >> { %1616 = vmatpush3.bf16.msra.mxu0 %v1535_v18  ;;  %v3140_v31 = vld [vmem:[#allocation34_spill] sm:$0xff]  ;;  %v3144_v8 = vld [vmem:[#allocation48_spill] sm:$0xff]  ;;  %v2705_v10 = vld [vmem:[%s2622_s27 + $0x10] sm:$0xf]  ;;  %v1487_v25 = vrot.slane %v409_v3, 9 }
  0x60   : >> { %1644 = vmatpush3.bf16.msra.mxu1 %v1551_v22  ;;  %1617 = vmatprep.subr.bf16.mxu0 %v1544_v24  ;;  %v374_v33 = vsel %vm2662_vm2, %v369_v5, %v373_v63  ;;  %v384_v22 = vsel %vm2662_vm2, %v379_v20, %v383_v7  ;;  %v1537_v24 = vcombine.low %v3134_v11, %v3133_v12  ;;  %v386_v5 = vshrl.u32 %v2681_v1, 16  ;;  %v2708_v11 = vld [vmem:[%s2622_s27 + $0x14] sm:$0x1]  ;;  %v410_v28 = vld [vmem:[%s2622_s27 + $0xc] sm:$0xe]  ;;  %v3176_v36 = vld [vmem:[#allocation104_spill] sm:$0xff] }
  0x61   : >> { %1645 = vmatprep.subr.bf16.mxu1 %v1560_v2  ;;  %v1515_v18 = vcombine.low %v374_v33, %v384_v22  ;;  %v1553_v2 = vcombine.low %v2088_v43, %v2093_v44  ;;  %v1546_v7 = vcombine.low %v3136_v29, %v3135_v30  ;;  %v1562_v63 = vcombine.low %v2178_v61, %v2183_v62  ;;  %v3143_v22 = vld [vmem:[#allocation49_spill] sm:$0xff]  ;;  %v3145_v12 = vld [vmem:[#allocation47_spill] sm:$0xff]  ;;  %v2744_v34 = vld [vmem:[%s2622_s27 + $0x18] sm:$0xf] }
  0x62   : >> { %v1547_v20 = vcombine.low %v3140_v31, %v3139_v32  ;;  %v1563_v9 = vcombine.low %v3144_v8, %v3143_v22  ;;  %v424_v26 = vrot.slane %v422_v47, 4  ;;  %v445_v8 = vshrl.u32 %v2647_v21, 16  ;;  %v3152_v31 = vld [vmem:[#allocation98_spill] sm:$0xff]  ;;  %v2765_v35 = vld [vmem:[%s2622_s27 + $0x14] sm:$0x1]  ;;  %v3205_v40 = vld [vmem:[#allocation81_spill] sm:$0xff] }
  0x63   : >> { %1618 = vmatpush3.bf16.msra.mxu0 %v1536_v6  ;;  %v1538_v6 = vcombine.low %v3138_v13, %v3137_v14  ;;  %1142 = vmatprep.mubr.bf16.mxu0 %v1515_v18  ;;  %v425_v18 = vrot.slane %v2631_v48, 5  ;;  %v3146_v13 = vld [vmem:[#allocation46_spill] sm:$0xff]  ;;  %v388_v48 = vrot.slane %v386_v5, 4  ;;  %v458_v22 = vshrl.u32 %v2650_v17, 16  ;;  %v3219_v16 = vld [vmem:[#allocation121_spill] sm:$0xff] }
  0x64   : >> { %1646 = vmatpush3.bf16.msra.mxu1 %v1552_v4  ;;  %1619 = vmatprep.subr.bf16.mxu0 %v1545_v23  ;;  %v1554_v4 = vcombine.low %v2098_v45, %v2103_v46  ;;  %v3141_v23 = vld [vmem:[#allocation19_spill] sm:$0xff]  ;;  %v1555_v14 = vcombine.low %v3146_v13, %v3145_v12  ;;  %v448_v12 = vshll.u32 %v2647_v21, 16  ;;  %v395_v13 = vshll.u32 %v2705_v10, 16 }
  0x65   : >> { %1647 = vmatprep.subr.bf16.mxu1 %v1561_v19  ;;  %v3142_v19 = vld [vmem:[#allocation18_spill] sm:$0xff]  ;;  %v423_v21 = vsel %vm2718_vm5, %v1487_v25, %v422_v47  ;;  %v426_v5 = vsel %vm2718_vm5, %v424_v26, %v425_v18  ;;  %v1488_v26 = vrot.slane %v410_v28, 9 }
  0x66   : >> { %v1539_v33 = vcombine.low %v3142_v19, %v3141_v23  ;;  %v1513_v23 = vcombine.low %v2625_v0, %v2628_v15  ;;  %v3149_v0 = vld [vmem:[#allocation67_spill] sm:$0xff]  ;;  %v3150_v15 = vld [vmem:[#allocation66_spill] sm:$0xff]  ;;  %v454_v19 = vshll.u32 %v2650_v17, 16  ;;  %v397_v29 = vrot.slane %v395_v13, 5 }
  0x67   : >> { %1620 = vmatpush3.bf16.msra.mxu0 %v1537_v24  ;;  %v1572_v3 = vcombine.low %v3150_v15, %v3149_v0  ;;  %v2736_v0 = vrot.slane %v445_v8, 4  ;;  %v502_v15 = vrot.slane %v2650_v17, 5  ;;  %v1517_v18 = vcombine.low %v423_v21, %v426_v5  ;;  %v3154_v8 = vld [vmem:[#allocation50_spill] sm:$0xff]  ;;  %v3157_v21 = vld [vmem:[#allocation69_spill] sm:$0xff]  ;;  %v3158_v5 = vld [vmem:[#allocation68_spill] sm:$0xff] }
  0x68   : >> { %1648 = vmatpush3.bf16.msra.mxu1 %v1553_v2  ;;  %1621 = vmatprep.subr.bf16.mxu0 %v1546_v7  ;;  %v389_v2 = vshll.u32 %v2681_v1, 16  ;;  %v399_v7 = vshrl.u32 %v2705_v10, 16  ;;  %v432_v17 = vrot.slane %v2708_v11, 5  ;;  %v3223_v24 = vld [vmem:[#allocation125_spill] sm:$0xff] }
  0x69   : >> { %1649 = vmatprep.subr.bf16.mxu1 %v1562_v63  ;;  %v405_v63 = vshll.u32 %v2708_v11, 16  ;;  %v3160_v11 = vld [vmem:[#allocation100_spill] sm:$0xff] }
  0x6a   : >> { %v391_v27 = vrot.slane %v389_v2, 5  ;;  %v401_v30 = vrot.slane %v399_v7, 4  ;;  %v3151_v2 = vld [vmem:[#allocation99_spill] sm:$0xff] }
  0x6b   : >> { %1622 = vmatpush3.bf16.msra.mxu0 %v1538_v6  ;;  %v1588_v32 = vcombine.low %v3152_v31, %v3151_v2  ;;  %v407_v47 = vrot.slane %v405_v63, 5  ;;  %v3153_v31 = vld [vmem:[#allocation51_spill] sm:$0xff]  ;;  %v1497_v63 = vld [vmem:[%s2622_s27 + $0xc] sm:$0xe]  ;;  %v1573_v2 = vcombine.low %v3158_v5, %v3157_v21  ;;  %v3163_v5 = vld [vmem:[#allocation85_spill] sm:$0xff] }
  0x6c   : >> { %1650 = vmatpush3.bf16.msra.mxu1 %v1554_v4  ;;  %1623 = vmatprep.subr.bf16.mxu0 %v1547_v20  ;;  %v392_v6 = vor.u32 %v391_v27, %v388_v48  ;;  %v2741_v4 = vrot.slane %v448_v12, 5  ;;  %v402_v25 = vor.u32 %v401_v30, %v397_v29  ;;  %v2747_v20 = vld [vmem:[%s2622_s27 + $0x1c] sm:$0xf]  ;;  %v2751_v27 = vrot.slane %v454_v19, 5  ;;  %v3155_v48 = vld [vmem:[#allocation83_spill] sm:$0xff]  ;;  %v3156_v12 = vld [vmem:[#allocation82_spill] sm:$0xff] }
  0x6d   : >> { %1651 = vmatprep.subr.bf16.mxu1 %v1563_v9  ;;  %v429_v9 = vrot.slane %v2705_v10, 5  ;;  %v1564_v30 = vcombine.low %v3154_v8, %v3153_v31  ;;  %v1580_v28 = vcombine.low %v3156_v12, %v3155_v48  ;;  %v2767_v31 = vrot.slane %v458_v22, 4  ;;  %v2776_v8 = vld [vmem:[%s2622_s27 + $0x18] sm:$0xf]  ;;  %v2781_v12 = vld [vmem:[%s2622_s27 + $0x1c] sm:$0xf] }
  0x6e   : >> { %v393_v13 = vrot.slane %v392_v6, 4  ;;  %v403_v7 = vrot.slane %v402_v25, 4  ;;  %v3159_v6 = vld [vmem:[#allocation101_spill] sm:$0xff]  ;;  %v1499_v22 = vrot.slane %v1497_v63, 9  ;;  %v504_v48 = vrot.slane %v502_v15, 4  ;;  %v3168_v63 = vld [vmem:[#allocation54_spill] sm:$0xff] }
  0x6f   : >> { %1624 = vmatpush3.bf16.msra.mxu0 %v1539_v33  ;;  %v431_v19 = vrot.slane %v429_v9, 4 }
  0x70   : >> { %1652 = vmatpush3.bf16.msra.mxu1 %v1555_v14  ;;  %1665 = vmatprep.subr.bf16.mxu0 %v1572_v3  ;;  %v1589_v14 = vcombine.low %v3160_v11, %v3159_v6  ;;  %v398_v33 = vsel %vm2662_vm2, %v393_v13, %v397_v29  ;;  %v408_v25 = vsel %vm2662_vm2, %v403_v7, %v407_v47  ;;  %v3161_v47 = vld [vmem:[#allocation53_spill] sm:$0xff]  ;;  %v3162_v7 = vld [vmem:[#allocation52_spill] sm:$0xff]  ;;  %v3165_v6 = vld [vmem:[#allocation71_spill] sm:$0xff]  ;;  %v505_v11 = vrot.slane %v2765_v35, 5 }
  0x71   : >> { %1693 = vmatprep.subr.bf16.mxu1 %v1588_v32  ;;  %v1520_v32 = vcombine.low %v2744_v34, %v2747_v20  ;;  %v430_v3 = vsel %vm2718_vm5, %v1488_v26, %v429_v9  ;;  %v1516_v29 = vcombine.low %v398_v33, %v408_v25  ;;  %v433_v13 = vsel %vm2718_vm5, %v431_v19, %v432_v17  ;;  %v3164_v26 = vld [vmem:[#allocation84_spill] sm:$0xff]  ;;  %v3167_v17 = vld [vmem:[#allocation55_spill] sm:$0xff]  ;;  %v3170_v25 = vld [vmem:[#allocation102_spill] sm:$0xff] }
  0x72   : >> { %1143 = vmatmul.mubr.bf16.vlgmr.msra.gmra.mrb[0].mxu0 %v1513_v23  ;;  %v1565_v21 = vcombine.low %v3162_v7, %v3161_v47  ;;  %v1581_v9 = vcombine.low %v3164_v26, %v3163_v5  ;;  %v3166_v23 = vld [vmem:[#allocation70_spill] sm:$0xff]  ;;  %v1566_v33 = vcombine.low %v3168_v63, %v3167_v17  ;;  %v3169_v19 = vld [vmem:[#allocation103_spill] sm:$0xff]  ;;  %v525_v47 = vshrl.u32 %v2776_v8, 16 }
  0x73   : >> { %1192 = vmatmul.mubr.bf16.vlgmr.msra.gmra.mrb[0].mxu1 %v1517_v18  ;;  %1666 = vmatpush3.bf16.msra.mxu0 %v1564_v30  ;;  %v1574_v18 = vcombine.low %v3166_v23, %v3165_v6  ;;  %v1590_v30 = vcombine.low %v3170_v25, %v3169_v19  ;;  %v528_v7 = vshll.u32 %v2776_v8, 16  ;;  %v1514_v5 = vcombine.low %v2681_v1, %v2705_v10  ;;  %v3172_v19 = vld [vmem:[#allocation86_spill] sm:$0xff] }
  0x74   : >> { %1694 = vmatpush3.bf16.msra.mxu1 %v1580_v28  ;;  %1667 = vmatprep.subr.bf16.mxu0 %v1573_v2  ;;  %v2795_v28 = vld [vmem:[%s2622_s27 + $0x20] sm:$0x1]  ;;  %v1518_v26 = vcombine.low %v430_v3, %v433_v13  ;;  %v534_v2 = vshll.u32 %v2781_v12, 16  ;;  %v503_v6 = vsel %vm2718_vm5, %v1499_v22, %v502_v15  ;;  %v506_v23 = vsel %vm2718_vm5, %v504_v48, %v505_v11  ;;  %v3174_v13 = vld [vmem:[#allocation72_spill] sm:$0xff] }
  0x75   : >> { %1695 = vmatprep.subr.bf16.mxu1 %v1589_v14  ;;  %1150 = vmatprep.mubr.bf16.mxu0 %v1516_v29  ;;  %v538_v14 = vshrl.u32 %v2781_v12, 16  ;;  %v527_v17 = vrot.slane %v525_v47, 4  ;;  %v530_v63 = vrot.slane %v528_v7, 5  ;;  %v3171_v29 = vld [vmem:[#allocation87_spill] sm:$0xff]  ;;  %v3173_v3 = vld [vmem:[#allocation73_spill] sm:$0xff]  ;;  %v1523_v47 = vcombine.low %v503_v6, %v506_v23  ;;  %v3180_v23 = vld [vmem:[#allocation88_spill] sm:$0xff] }
  0x76   : >> { %1199 = vmatprep.mubr.bf16.mxu1 %v1520_v32  ;;  %v1582_v25 = vcombine.low %v3172_v19, %v3171_v29  ;;  %v536_v10 = vrot.slane %v534_v2, 5  ;;  %v544_v32 = vshll.u32 %v2795_v28, 16  ;;  %v1575_v15 = vcombine.low %v3174_v13, %v3173_v3  ;;  %v3175_v22 = vld [vmem:[#allocation105_spill] sm:$0xff]  ;;  %v3184_v19 = vld [vmem:[#allocation106_spill] sm:$0xff]  ;;  %v3185_v3 = vld [vmem:[#allocation59_spill] sm:$0xff] }
  0x77   : >> { %1668 = vmatpush3.bf16.msra.mxu0 %v1565_v21  ;;  %v540_v1 = vrot.slane %v538_v14, 4  ;;  %v1591_v48 = vcombine.low %v3176_v36, %v3175_v22  ;;  %v531_v11 = vor.u32 %v530_v63, %v527_v17  ;;  %v451_v7 = vor.u32 %v2741_v4, %v2736_v0  ;;  %v2817_v14 = vld [vmem:[%s2622_s27 + $0x24] sm:$0xf]  ;;  %v3178_v36 = vld [vmem:[#allocation56_spill] sm:$0xff]  ;;  %v3181_v0 = vld [vmem:[#allocation75_spill] sm:$0xff] }
  0x78   : >> { %1696 = vmatpush3.bf16.msra.mxu1 %v1581_v9  ;;  %1669 = vmatprep.subr.bf16.mxu0 %v1574_v18  ;;  %v546_v9 = vrot.slane %v544_v32, 5  ;;  %v461_v18 = vor.u32 %v2767_v31, %v2751_v27  ;;  %v3179_v6 = vld [vmem:[#allocation89_spill] sm:$0xff]  ;;  %v3182_v4 = vld [vmem:[#allocation74_spill] sm:$0xff]  ;;  %v549_v32 = vshrl.u32 %v2817_v14, 16  ;;  %v469_v22 = vshrl.u32 %v2744_v34, 16 }
  0x79   : >> { %1697 = vmatprep.subr.bf16.mxu1 %v1590_v30  ;;  %v541_v21 = vor.u32 %v540_v1, %v536_v10  ;;  %v532_v2 = vrot.slane %v531_v11, 4  ;;  %v3177_v30 = vld [vmem:[#allocation57_spill] sm:$0xff]  ;;  %v1583_v63 = vcombine.low %v3180_v23, %v3179_v6  ;;  %v3186_v13 = vld [vmem:[#allocation58_spill] sm:$0xff]  ;;  %v552_v11 = vshll.u32 %v2817_v14, 16 }
  0x7a   : >> { %1151 = vmatmul.mubr.bf16.gmra.mrb[4].mxu0 %v1514_v5  ;;  %v1567_v17 = vcombine.low %v3178_v36, %v3177_v30  ;;  %v1576_v5 = vcombine.low %v3182_v4, %v3181_v0  ;;  %v2846_v36 = vrot.slane %v451_v7, 4  ;;  %v2848_v6 = vrot.slane %v461_v18, 4  ;;  %v3189_v23 = vld [vmem:[#allocation77_spill] sm:$0xff]  ;;  %v3192_v0 = vld [vmem:[#allocation108_spill] sm:$0xff] }
  0x7b   : >> { %1200 = vmatmul.mubr.bf16.gmra.mrb[4].mxu1 %v1518_v26  ;;  %1670 = vmatpush3.bf16.msra.mxu0 %v1566_v33  ;;  %v542_v29 = vrot.slane %v541_v21, 4  ;;  %v3183_v26 = vld [vmem:[#allocation107_spill] sm:$0xff]  ;;  %v537_v31 = vsel %vm2662_vm2, %v532_v2, %v536_v10  ;;  %v2832_v33 = vld [vmem:[%s2622_s27 + $0x28] sm:$0xf]  ;;  %v3193_v7 = vld [vmem:[#allocation61_spill] sm:$0xff]  ;;  %v2859_v18 = vrot.slane %v469_v22, 4 }
  0x7c   : >> { %1698 = vmatpush3.bf16.msra.mxu1 %v1582_v25  ;;  %1671 = vmatprep.subr.bf16.mxu0 %v1575_v15  ;;  %v1592_v1 = vcombine.low %v3184_v19, %v3183_v26  ;;  %v1568_v15 = vcombine.low %v3186_v13, %v3185_v3  ;;  %v3187_v10 = vld [vmem:[#allocation91_spill] sm:$0xff]  ;;  %v3188_v21 = vld [vmem:[#allocation90_spill] sm:$0xff]  ;;  %v562_v30 = vshrl.u32 %v2832_v33, 16  ;;  %v554_v19 = vrot.slane %v552_v11, 5  ;;  %v3194_v3 = vld [vmem:[#allocation60_spill] sm:$0xff] }
  0x7d   : >> { %1699 = vmatprep.subr.bf16.mxu1 %v1591_v48  ;;  %1240 = vmatprep.mubr.bf16.mxu0 %v1523_v47  ;;  %v547_v25 = vsel %vm2662_vm2, %v542_v29, %v546_v9  ;;  %v1584_v2 = vcombine.low %v3188_v21, %v3187_v10  ;;  %v472_v47 = vshll.u32 %v2744_v34, 16  ;;  %v558_v9 = vshll.u32 %v2832_v33, 16  ;;  %v3190_v29 = vld [vmem:[#allocation76_spill] sm:$0xff]  ;;  %v1508_v26 = vld [vmem:[%s2622_s27 + $0x2c] sm:$0x1]  ;;  %v3199_v22 = vld [vmem:[#allocation111_spill] sm:$0xff] }
  0x7e   : >> { %v1527_v48 = vcombine.low %v537_v31, %v547_v25  ;;  %v551_v34 = vrot.slane %v549_v32, 4  ;;  %v564_v25 = vrot.slane %v562_v30, 4  ;;  %v1569_v13 = vcombine.low %v3194_v3, %v3193_v7  ;;  %v1510_v10 = vld [vmem:[%s2622_s27 + $0x24] sm:$0xe]  ;;  %v3196_v11 = vld [vmem:[#allocation92_spill] sm:$0xff]  ;;  %v3198_v30 = vld [vmem:[#allocation78_spill] sm:$0xff] }
  0x7f   : >> { %1672 = vmatpush3.bf16.msra.mxu0 %v1567_v17  ;;  %v1577_v17 = vcombine.low %v3190_v29, %v3189_v23  ;;  %v2855_v31 = vrot.slane %v558_v9, 5  ;;  %v3195_v32 = vld [vmem:[#allocation93_spill] sm:$0xff]  ;;  %v3197_v9 = vld [vmem:[#allocation79_spill] sm:$0xff]  ;;  %v478_v29 = vshll.u32 %v2747_v20, 16  ;;  %v509_v7 = vrot.slane %v2747_v20, 5 }
  0x80   : >> { %1700 = vmatpush3.bf16.msra.mxu1 %v1583_v63  ;;  %1673 = vmatprep.subr.bf16.mxu0 %v1576_v5  ;;  %v3191_v63 = vld [vmem:[#allocation109_spill] sm:$0xff]  ;;  %v482_v5 = vshrl.u32 %v2747_v20, 16  ;;  %v1585_v21 = vcombine.low %v3196_v11, %v3195_v32  ;;  %v1578_v23 = vcombine.low %v3198_v30, %v3197_v9  ;;  %v592_v3 = vrot.slane %v1508_v26, 5  ;;  %v3201_v9 = vld [vmem:[#allocation63_spill] sm:$0xff]  ;;  %v3202_v30 = vld [vmem:[#allocation62_spill] sm:$0xff] }
  0x81   : >> { %1701 = vmatprep.subr.bf16.mxu1 %v1592_v1  ;;  %v1593_v4 = vcombine.low %v3192_v0, %v3191_v63  ;;  %1289 = vmatprep.mubr.bf16.mxu1 %v1527_v48  ;;  %v464_v1 = vshll.u32 %v2765_v35, 16  ;;  %v474_v48 = vrot.slane %v472_v47, 5  ;;  %v3200_v63 = vld [vmem:[#allocation110_spill] sm:$0xff]  ;;  %v568_v35 = vshll.u32 %v1508_v26, 16 }
  0x82   : >> { %v1594_v0 = vcombine.low %v3200_v63, %v3199_v22  ;;  %v555_v47 = vor.u32 %v554_v19, %v551_v34  ;;  %v565_v37 = vor.u32 %v564_v25, %v2855_v31  ;;  %v1512_v32 = vrot.slane %v1510_v10, 9  ;;  %v3206_v22 = vld [vmem:[#allocation80_spill] sm:$0xff]  ;;  %v3207_v25 = vld [vmem:[#allocation113_spill] sm:$0xff] }
  0x83   : >> { %1674 = vmatpush3.bf16.msra.mxu0 %v1568_v15  ;;  %v1496_v15 = vld [vmem:[%s2622_s27 + $0x20] sm:$0x1]  ;;  %v589_v11 = vrot.slane %v2832_v33, 5  ;;  %v1570_v38 = vcombine.low %v3202_v30, %v3201_v9  ;;  %v1579_v63 = vcombine.low %v3206_v22, %v3205_v40  ;;  %v466_v20 = vrot.slane %v464_v1, 5  ;;  %v3208_v10 = vld [vmem:[#allocation112_spill] sm:$0xff] }
  0x84   : >> { %1702 = vmatpush3.bf16.msra.mxu1 %v1584_v2  ;;  %1675 = vmatprep.subr.bf16.mxu0 %v1577_v17  ;;  %v1498_v2 = vld [vmem:[%s2622_s27 + $0x18] sm:$0xe]  ;;  %v3203_v17 = vld [vmem:[#allocation95_spill] sm:$0xff]  ;;  %v480_v26 = vrot.slane %v478_v29, 5  ;;  %v484_v41 = vrot.slane %v482_v5, 4  ;;  %v1595_v9 = vcombine.low %v3208_v10, %v3207_v25  ;;  %v556_v42 = vrot.slane %v555_v47, 4 }
  0x85   : >> { %1703 = vmatprep.subr.bf16.mxu1 %v1593_v4  ;;  %v3204_v4 = vld [vmem:[#allocation94_spill] sm:$0xff]  ;;  %v2884_v34 = vsel %vm2718_vm5, %v1512_v32, %v589_v11  ;;  %v591_v19 = vrot.slane %v589_v11, 4  ;;  %v1500_v30 = vrot.slane %v1498_v2, 9  ;;  %v566_v40 = vrot.slane %v565_v37, 4  ;;  %v3212_v32 = vld [vmem:[#allocation96_spill] sm:$0xff] }
  0x86   : >> { %v1586_v39 = vcombine.low %v3204_v4, %v3203_v17  ;;  %v511_v17 = vrot.slane %v509_v7, 4  ;;  %v512_v4 = vrot.slane %v1496_v15, 5  ;;  %v570_v1 = vrot.slane %v568_v35, 5  ;;  %v3214_v11 = vld [vmem:[#allocation114_spill] sm:$0xff] }
  0x87   : >> { %1676 = vmatpush3.bf16.msra.mxu0 %v1569_v13  ;;  %v2890_v13 = vsel %vm2718_vm5, %v591_v19, %v592_v3  ;;  %v457_v5 = vsel %vm2662_vm2, %v2846_v36, %v2751_v27  ;;  %v467_v35 = vsel %vm2662_vm2, %v2848_v6, %v466_v20  ;;  %v475_v3 = vor.u32 %v474_v48, %v2859_v18  ;;  %v3213_v36 = vld [vmem:[#allocation115_spill] sm:$0xff]  ;;  %v1509_v18 = vld [vmem:[%s2622_s27 + $0x18] sm:$0xe] }
  0x88   : >> { %1704 = vmatpush3.bf16.msra.mxu1 %v1585_v21  ;;  %1677 = vmatprep.subr.bf16.mxu0 %v1578_v23  ;;  %v3209_v21 = vld [vmem:[#allocation65_spill] sm:$0xff]  ;;  %v3210_v23 = vld [vmem:[#allocation64_spill] sm:$0xff]  ;;  %v1530_v37 = vcombine.low %v2884_v34, %v2890_v13  ;;  %v485_v47 = vor.u32 %v484_v41, %v480_v26  ;;  %v488_v27 = vshll.u32 %v1496_v15, 16  ;;  %v1596_v22 = vcombine.low %v3214_v11, %v3213_v36 }
  0x89   : >> { %1705 = vmatprep.subr.bf16.mxu1 %v1594_v0  ;;  %v1571_v29 = vcombine.low %v3210_v23, %v3209_v21  ;;  %v3211_v0 = vld [vmem:[#allocation97_spill] sm:$0xff]  ;;  %v510_v19 = vsel %vm2718_vm5, %v1500_v30, %v509_v7  ;;  %v561_v6 = vsel %vm2662_vm2, %v556_v42, %v2855_v31  ;;  %v571_v41 = vsel %vm2662_vm2, %v566_v40, %v570_v1  ;;  %v3216_v20 = vld [vmem:[#allocation116_spill] sm:$0xff]  ;;  %v3217_v40 = vld [vmem:[#allocation119_spill] sm:$0xff] }
  0x8a   : >> { %v1587_v2 = vcombine.low %v3212_v32, %v3211_v0  ;;  %v1521_v48 = vcombine.low %v457_v5, %v467_v35  ;;  %v1525_v15 = vcombine.low %v2776_v8, %v2781_v12  ;;  %v476_v10 = vrot.slane %v475_v3, 4  ;;  %v3218_v1 = vld [vmem:[#allocation118_spill] sm:$0xff]  ;;  %v3220_v0 = vld [vmem:[#allocation120_spill] sm:$0xff]  ;;  %v3227_v11 = vld [vmem:[#allocation129_spill] sm:$0xff] }
  0x8b   : >> { %1678 = vmatpush3.bf16.msra.mxu0 %v1570_v38  ;;  %v513_v38 = vsel %vm2718_vm5, %v511_v17, %v512_v4  ;;  %v490_v30 = vrot.slane %v488_v27, 5  ;;  %v1528_v17 = vcombine.low %v561_v6, %v571_v41  ;;  %v1511_v42 = vrot.slane %v1509_v18, 9  ;;  %v3222_v35 = vld [vmem:[#allocation122_spill] sm:$0xff] }
  0x8c   : >> { %1706 = vmatpush3.bf16.msra.mxu1 %v1586_v39  ;;  %1679 = vmatprep.subr.bf16.mxu0 %v1579_v63  ;;  %v582_v39 = vrot.slane %v2781_v12, 5  ;;  %v3215_v63 = vld [vmem:[#allocation117_spill] sm:$0xff]  ;;  %v1524_v25 = vcombine.low %v510_v19, %v513_v38  ;;  %v585_v4 = vrot.slane %v2795_v28, 5  ;;  %v481_v8 = vsel %vm2662_vm2, %v476_v10, %v480_v26 }
  0x8d   : >> { %1707 = vmatprep.subr.bf16.mxu1 %v1595_v9  ;;  %v1597_v7 = vcombine.low %v3216_v20, %v3215_v63  ;;  %v486_v9 = vrot.slane %v485_v47, 4  ;;  %v1598_v5 = vcombine.low %v3218_v1, %v3217_v40  ;;  %v1599_v32 = vcombine.low %v3220_v0, %v3219_v16  ;;  %v3224_v47 = vld [vmem:[#allocation124_spill] sm:$0xff] }
  0x8e   : >> { %v584_v31 = vrot.slane %v582_v39, 4  ;;  %v583_v21 = vsel %vm2718_vm5, %v1511_v42, %v582_v39  ;;  %v1601_v27 = vcombine.low %v3224_v47, %v3223_v24 }
  0x8f   : >> { %1680 = vmatpush3.bf16.msra.mxu0 %v1571_v29  ;;  %v491_v12 = vsel %vm2662_vm2, %v486_v9, %v490_v30  ;;  %v1526_v29 = vcombine.low %v2817_v14, %v2832_v33  ;;  %v3225_v14 = vld [vmem:[#allocation127_spill] sm:$0xff]  ;;  %v3226_v33 = vld [vmem:[#allocation126_spill] sm:$0xff] }
  0x90   : >> { %1708 = vmatpush3.bf16.msra.mxu1 %v1587_v2  ;;  %1731 = vmatprep.subr.bf16.mxu0 %v1596_v22  ;;  %v586_v28 = vsel %vm2718_vm5, %v584_v31, %v585_v4  ;;  %v1522_v23 = vcombine.low %v481_v8, %v491_v12  ;;  %v3221_v2 = vld [vmem:[#allocation123_spill] sm:$0xff]  ;;  %v1602_v36 = vcombine.low %v3226_v33, %v3225_v14 }
  0x91   : >> { %v1529_v26 = vcombine.low %v583_v21, %v586_v28  ;;  %v1600_v3 = vcombine.low %v3222_v35, %v3221_v2 }
  0x92   : >> { %1241 = vmatmul.mubr.bf16.vlgmr.msra.gmra.mrb[8].mxu0 %v1521_v48 }
  0x93   : >> { %1290 = vmatmul.mubr.bf16.vlgmr.msra.gmra.mrb[8].mxu1 %v1525_v15  ;;  %1732 = vmatpush3.bf16.msra.mxu0 %v1596_v22  ;;  %v3228_v22 = vld [vmem:[#allocation128_spill] sm:$0xff] }
  0x94   : >> { %1248 = vmatprep.mubr.bf16.mxu0 %v1524_v25  ;;  %1733 = vmatprep.subr.bf16.mxu0 %v1597_v7  ;;  %v1603_v19 = vcombine.low %v3228_v22, %v3227_v11  ;;  %v3229_v25 = vld [vmem:[#allocation3_spill] sm:$0xff] }
  0x95   : >> { %1297 = vmatprep.mubr.bf16.mxu1 %v1528_v17 }
  0x97   : >> { %1734 = vmatpush3.bf16.msra.mxu0 %v1597_v7 }
  0x98   : >> { %1735 = vmatprep.subr.bf16.mxu0 %v1598_v5 }
  0x9a   : >> { %1249 = vmatmul.mubr.bf16.gmra.mrb[12].mxu0 %v1522_v23 }
  0x9b   : >> { %1298 = vmatmul.mubr.bf16.gmra.mrb[12].mxu1 %v1526_v29  ;;  %1736 = vmatpush3.bf16.msra.mxu0 %v1598_v5 }
  0x9c   : >> { %1747 = vmatprep.mubr.bf16.mxu0 %v1529_v26  ;;  %1737 = vmatprep.subr.bf16.mxu0 %v1599_v32 }
  0x9f   : >> { %1738 = vmatpush3.bf16.msra.mxu0 %v1599_v32 }
  0xa0   : >> { %1739 = vmatprep.subr.bf16.mxu0 %v1600_v3 }
  0xa3   : >> { %1740 = vmatpush3.bf16.msra.mxu0 %v1600_v3 }
  0xa4   : >> { %1741 = vmatprep.subr.bf16.mxu0 %v1601_v27 }
  0xa7   : >> { %1742 = vmatpush3.bf16.msra.mxu0 %v1601_v27 }
  0xa8   : >> { %1743 = vmatprep.subr.bf16.mxu0 %v1602_v36 }
  0xab   : >> { %1744 = vmatpush3.bf16.msra.mxu0 %v1602_v36 }
  0xac   : >> { %1745 = vmatprep.subr.bf16.mxu0 %v1603_v19 }
  0xaf   : >> { %1746 = vmatpush3.bf16.msra.mxu0 %v1603_v19 }
  0xb2   : >> { %1748 = vmatmul.mubr.bf16.vlgmr.msra.gmra.mrb[16].mxu0 %v1530_v37 }
 0x145   : >> { %v1625_v38 = vpop.f32.mrb[0].mxu0 }
 0x146   : >> { %v1653_v39 = vpop.f32.mrb[0].mxu1  ;;  %v1626_v6 = vpop.f32.mrb[1].mxu0 }
 0x147   : >> { %v1654_v41 = vpop.f32.mrb[1].mxu1  ;;  %v1627_v18 = vadd.f32 %v1626_v6, %v1625_v38  ;;  %v1628_v48 = vpop.f32.mrb[2].mxu0 }
 0x148   : >> { %v1655_v15 = vadd.f32 %v1654_v41, %v1653_v39  ;;  %v1656_v63 = vpop.f32.mrb[2].mxu1  ;;  %v1629_v20 = vpop.f32.mrb[3].mxu0 }
 0x149   : >> { %v1657_v7 = vpop.f32.mrb[3].mxu1  ;;  %v1145_v10 = vadd.f32 %v1627_v18, %v3229_v25  ;;  %v1630_v9 = vadd.f32 %v1629_v20, %v1628_v48 }
 0x14a   : >> { %v1658_v30 = vadd.f32 %v1657_v7, %v1656_v63 }
 0x14b   : >> { %v1148_v17 = vadd.f32 %v1630_v9, %v3229_v25  ;;  %v1194_v42 = vadd.f32 %v1655_v15, %v1145_v10 }
 0x14d   : >> { %v1197_v31 = vadd.f32 %v1658_v30, %v1148_v17  ;;  %v1631_v34 = vpop.f32.mrb[4].mxu0 }
 0x14e   : >> { %v1659_v13 = vpop.f32.mrb[4].mxu1  ;;  %v1632_v37 = vpop.f32.mrb[5].mxu0 }
 0x14f   : >> { %v1660_v4 = vpop.f32.mrb[5].mxu1  ;;  %v1633_v8 = vadd.f32 %v1632_v37, %v1631_v34  ;;  %v1634_v12 = vpop.f32.mrb[6].mxu0 }
 0x150   : >> { %v1661_v40 = vadd.f32 %v1660_v4, %v1659_v13  ;;  %v1662_v1 = vpop.f32.mrb[6].mxu1  ;;  %v1635_v5 = vpop.f32.mrb[7].mxu0 }
 0x151   : >> { %v1663_v21 = vpop.f32.mrb[7].mxu1  ;;  %v1153_v28 = vadd.f32 %v1633_v8, %v3229_v25  ;;  %v1636_v23 = vadd.f32 %v1635_v5, %v1634_v12 }
 0x152   : >> { %v1664_v29 = vadd.f32 %v1663_v21, %v1662_v1 }
 0x153   : >> { %v1156_v26 = vadd.f32 %v1636_v23, %v3229_v25  ;;  %v1202_v16 = vadd.f32 %v1661_v40, %v1153_v28 }
 0x155   : >> { %v1205_v0 = vadd.f32 %v1664_v29, %v1156_v26 }
 0x165   : >> { %v1681_v32 = vpop.f32.mrb[8].mxu0 }
 0x166   : >> { %v1709_v2 = vpop.f32.mrb[8].mxu1  ;;  %v1682_v35 = vpop.f32.mrb[9].mxu0 }
 0x167   : >> { %v1710_v3 = vpop.f32.mrb[9].mxu1  ;;  %v1683_v24 = vadd.f32 %v1682_v35, %v1681_v32  ;;  %v1684_v47 = vpop.f32.mrb[10].mxu0 }
 0x168   : >> { %v1711_v27 = vadd.f32 %v1710_v3, %v1709_v2  ;;  %v1712_v14 = vpop.f32.mrb[10].mxu1  ;;  %v1685_v33 = vpop.f32.mrb[11].mxu0 }
 0x169   : >> { %v1713_v36 = vpop.f32.mrb[11].mxu1  ;;  %v1243_v11 = vadd.f32 %v1683_v24, %v1194_v42  ;;  %v1686_v22 = vadd.f32 %v1685_v33, %v1684_v47 }
 0x16a   : >> { %v1714_v19 = vadd.f32 %v1713_v36, %v1712_v14 }
 0x16b   : >> { %v1246_v38 = vadd.f32 %v1686_v22, %v1197_v31  ;;  %v1292_v39 = vadd.f32 %v1711_v27, %v1243_v11 }
 0x16d   : >> { %v1687_v6 = vpop.f32.mrb[12].mxu0  ;;  %v1295_v18 = vadd.f32 %v1714_v19, %v1246_v38 }
 0x16e   : >> { %v1715_v41 = vpop.f32.mrb[12].mxu1  ;;  %v1688_v48 = vpop.f32.mrb[13].mxu0 }
 0x16f   : >> { %v1716_v15 = vpop.f32.mrb[13].mxu1  ;;  %v1689_v63 = vadd.f32 %v1688_v48, %v1687_v6  ;;  %v1690_v20 = vpop.f32.mrb[14].mxu0 }
 0x170   : >> { %v1717_v7 = vadd.f32 %v1716_v15, %v1715_v41  ;;  %v1718_v10 = vpop.f32.mrb[14].mxu1  ;;  %v1691_v9 = vpop.f32.mrb[15].mxu0 }
 0x171   : >> { %v1719_v30 = vpop.f32.mrb[15].mxu1  ;;  %v1251_v17 = vadd.f32 %v1689_v63, %v1202_v16  ;;  %v1692_v34 = vadd.f32 %v1691_v9, %v1690_v20 }
 0x172   : >> { %v1720_v13 = vadd.f32 %v1719_v30, %v1718_v10 }
 0x173   : >> { %v1254_v37 = vadd.f32 %v1692_v34, %v1205_v0  ;;  %v1300_v42 = vadd.f32 %v1717_v7, %v1251_v17 }
 0x175   : >> { %v1303_v4 = vadd.f32 %v1720_v13, %v1254_v37 }
 0x185   : >> { %v1749_v8 = vpop.f32.mrb[16].mxu0 }
 0x186   : >> { %v1349_v31 = vadd.f32 %v1749_v8, %v1300_v42  ;;  %v1340_v12 = vpop.f32.mrb[17].mxu0 }
 0x187   : >> { %v1341_v40 = vadd.f32 %v1340_v12, %v1292_v39  ;;  %v1750_v1 = vpop.f32.mrb[18].mxu0 }
 0x188   : >> { %v1357_v5 = vmax.f32 %v1349_v31, 0.0  ;;  %v1352_v21 = vadd.f32 %v1750_v1, %v1303_v4  ;;  %v1343_v28 = vpop.f32.mrb[19].mxu0 }
 0x189   : >> { %v1355_v23 = vmax.f32 %v1341_v40, 0.0  ;;  %v1344_v29 = vadd.f32 %v1343_v28, %v1295_v18 }
 0x18a   : >> { %v1358_v26 = vmax.f32 %v1352_v21, 0.0 }
 0x18b   : >> { %v1359_v32 = vmax.f32 %v1355_v23, %v1357_v5  ;;  %v1356_v16 = vmax.f32 %v1344_v29, 0.0 }
 0x18d   : >> { %1361 = vst [vmem:[#allocation2] sm:$0xff] %v1359_v32  ;;  %v1360_v2 = vmax.f32 %v1356_v16, %v1358_v26 }
 0x18f   : >> { %1362 = vst [vmem:[#allocation2 + $0x8] sm:$0xff] %v1360_v2 }
 0x195   : > { %345 = sbr.rel (!%p343_p5) target bundleno = 79 (0x4f), region = 74 }
 0x196   : >> { %v1363_v0 = vld [vmem:[#allocation2] ss:$2 sm:$0xff]  ;;  %v1365_v35 = vld [vmem:[#allocation2 + $0x1] ss:$2 sm:$0xff] }
 0x197   : >> { %v1366_v3 = vmax.f32 %v1363_v0, %v1365_v35 }
 0x199   : >> { %v1367_v24 = vpack.c.bf16 %v1366_v3, %v1366_v3 }
 0x19b   : >> { %1370 = vst [vmem:[%s1369_s30] sm:$0xf] %v1367_v24 }
 0x19c PF: > { %s13_s14 = sadd.s32 1, %s1816_s14   ;;  %s3230_s12 = smov %s1812_s13 }
 0x19d   : > { %p10_p6 = scmp.ge.s32.totalorder %s13_s14, 4   ;;  %s3231_s13 = smov %s3233_s15 }
 0x19f   :  { %12 = sbr.rel (!%p10_p6) target bundleno = 2 (0x2), region = 85 }

// kernel: cnn5_forward.8
= control target key start
LH: loop header
LB: loop body
LE: loop exit
PB: predicated region body
PF: predicated region fallthrough
CT: control target
= control target key end

     0   :  { %s1638_s12 = smov 0   ;;  %s1640_s13 = smov 0   ;;  %s2667_s0 = inlined_call_operand.vmem [shape: bf16[2,10,10,128], index: 0, kind: input, shape index: {}]   ;;  %s2668_s1 = inlined_call_operand.vmem [shape: bf16[1152,128], index: 1, kind: input, shape index: {}]   ;;  %s2669_s2 = inlined_call_operand.vmem [shape: f32[1,128], index: 2, kind: input, shape index: {}]   ;;  %s2670_s3 = inlined_call_operand.vmem [shape: bf16[2,4,4,128], index: 3, kind: output, shape index: {}]  }
   0x1   :  { %s1642_s14 = smov 0  }
   0x2 LB: > { %s25_s15 = sadd.s32 1, %s1606_s13  ;;  %p1310_p0 = scmp.ge.s32.totalorder %s1610_s14, 1  ;;  %s1610_s14 = sphi %s1642_s14, %s13_s14   ;;  %s1606_s13 = sphi %s1640_s13, %s2921_s13   ;;  %s1602_s12 = sphi %s1638_s12, %s2920_s12  }
   0x3   : > { %p27_p1 = scmp.ge.s32.totalorder %s25_s15, 2  ;;  %p151_p2 = scmp.lt.s32.totalorder %s1610_s14, 3 }
   0x5   : > { %s2923_s15 = smov (%p27_p1, %s25_s15), 0  ;;  %p152_p3 = pnand %p1310_p0, %p151_p2 }
   0x6   : > { %p179_p4 = scmp.lt.s32.totalorder (!%p152_p3), %s1602_s12, 1  ;;  %v1659_v0 = vld [vmem:[%s2669_s2] ss:$0 sm:$0xff] (!%p152_p3)  ;;  %v1669_v2 = vld [vmem:[%s2668_s1 + $0x4] sm:$0xf] (!%p152_p3)  ;;  %s2391_s25 = smov (!%p152_p3), 0  }
   0x7   : > { %155 = sbr.rel (%p152_p3) target bundleno = 410 (0x19a), region = 32  ;;  %2672 = vst [vmem:[#allocation3_spill] sm:$0xff] (!%p152_p3), %v1659_v0  ;;  %v1664_v1 = vld [vmem:[%s2668_s1] sm:$0xf] (!%p152_p3)  ;;  %2674 = vst [vmem:[#allocation5_spill] sm:$0xff] (!%p152_p3), %v1669_v2 }
   0x8   : > { %2673 = vst [vmem:[#allocation4_spill] sm:$0xff] (!%p152_p3), %v1664_v1  ;;  %v1674_v3 = vld [vmem:[%s2668_s1 + $0x8] sm:$0xf] (!%p152_p3)  ;;  %v1679_v4 = vld [vmem:[%s2668_s1 + $0xc] sm:$0xf] (!%p152_p3) }
   0x9   : > { %2675 = vst [vmem:[#allocation6_spill] sm:$0xff] (!%p152_p3), %v1674_v3  ;;  %2676 = vst [vmem:[#allocation7_spill] sm:$0xff] (!%p152_p3), %v1679_v4  ;;  %v1684_v5 = vld [vmem:[%s2668_s1 + $0x10] sm:$0xf] (!%p152_p3)  ;;  %v1689_v6 = vld [vmem:[%s2668_s1 + $0x14] sm:$0xf] (!%p152_p3) }
   0xa   : > { %2677 = vst [vmem:[#allocation8_spill] sm:$0xff] (!%p152_p3), %v1684_v5  ;;  %2678 = vst [vmem:[#allocation9_spill] sm:$0xff] (!%p152_p3), %v1689_v6  ;;  %v1694_v7 = vld [vmem:[%s2668_s1 + $0x18] sm:$0xf] (!%p152_p3)  ;;  %v1699_v8 = vld [vmem:[%s2668_s1 + $0x1c] sm:$0xf] (!%p152_p3) }
   0xb   : > { %2679 = vst [vmem:[#allocation10_spill] sm:$0xff] (!%p152_p3), %v1694_v7  ;;  %2680 = vst [vmem:[#allocation11_spill] sm:$0xff] (!%p152_p3), %v1699_v8  ;;  %v1704_v9 = vld [vmem:[%s2668_s1 + $0x20] sm:$0xf] (!%p152_p3)  ;;  %v1709_v10 = vld [vmem:[%s2668_s1 + $0x24] sm:$0xf] (!%p152_p3) }
   0xc   : > { %2681 = vst [vmem:[#allocation12_spill] sm:$0xff] (!%p152_p3), %v1704_v9  ;;  %2682 = vst [vmem:[#allocation13_spill] sm:$0xff] (!%p152_p3), %v1709_v10  ;;  %v1714_v11 = vld [vmem:[%s2668_s1 + $0x28] sm:$0xf] (!%p152_p3)  ;;  %v1724_v12 = vld [vmem:[%s2668_s1 + $0x2c] sm:$0xf] (!%p152_p3) }
   0xd   : > { %2683 = vst [vmem:[#allocation14_spill] sm:$0xff] (!%p152_p3), %v1714_v11  ;;  %2684 = vst [vmem:[#allocation15_spill] sm:$0xff] (!%p152_p3), %v1724_v12  ;;  %v1729_v13 = vld [vmem:[%s2668_s1 + $0x30] sm:$0xf] (!%p152_p3)  ;;  %v1734_v14 = vld [vmem:[%s2668_s1 + $0x34] sm:$0xf] (!%p152_p3) }
   0xe   : > { %s2925_s12 = smov (!%p179_p4, %s1602_s12), 1  ;;  %2685 = vst [vmem:[#allocation16_spill] sm:$0xff] %v1729_v13  ;;  %2686 = vst [vmem:[#allocation17_spill] sm:$0xff] %v1734_v14  ;;  %v1744_v15 = vld [vmem:[%s2668_s1 + $0x38] sm:$0xf] }
   0xf   : > { %s1546_s9 = smul.u32 80, %s2925_s12  ;;  %s1424_s10 = sshll.u32 %s2925_s12, 3  ;;  %2687 = vst [vmem:[#allocation18_spill] sm:$0xff] %v1744_v15  ;;  %v1749_v16 = vld [vmem:[%s2668_s1 + $0x3c] sm:$0xf] }
  0x10   : > { %s1719_s21 = scalar_lea.vmem %s2670_s3, %s1424_s10  ;;  %2688 = vst [vmem:[#allocation19_spill] sm:$0xff] %v1749_v16  ;;  %v1754_v17 = vld [vmem:[%s2668_s1 + $0x40] sm:$0xf]  ;;  %v1759_v18 = vld [vmem:[%s2668_s1 + $0x44] sm:$0xf] }
  0x11   : > { %s1739_s29 = scalar_lea.vmem %s2667_s0, %s1546_s9  ;;  %2689 = vst [vmem:[#allocation20_spill] sm:$0xff] %v1754_v17  ;;  %2690 = vst [vmem:[#allocation21_spill] sm:$0xff] %v1759_v18  ;;  %v1764_v19 = vld [vmem:[%s2668_s1 + $0x48] sm:$0xf]  ;;  %v1769_v20 = vld [vmem:[%s2668_s1 + $0x4c] sm:$0xf] }
  0x12   : > { %2691 = vst [vmem:[#allocation22_spill] sm:$0xff] %v1764_v19  ;;  %2692 = vst [vmem:[#allocation23_spill] sm:$0xff] %v1769_v20  ;;  %v1774_v21 = vld [vmem:[%s2668_s1 + $0x50] sm:$0xf]  ;;  %v1779_v22 = vld [vmem:[%s2668_s1 + $0x54] sm:$0xf] }
  0x13   : > { %2693 = vst [vmem:[#allocation24_spill] sm:$0xff] %v1774_v21  ;;  %2694 = vst [vmem:[#allocation25_spill] sm:$0xff] %v1779_v22  ;;  %v1784_v23 = vld [vmem:[%s2668_s1 + $0x58] sm:$0xf]  ;;  %v1789_v24 = vld [vmem:[%s2668_s1 + $0x5c] sm:$0xf] }
  0x14   : > { %2695 = vst [vmem:[#allocation26_spill] sm:$0xff] %v1784_v23  ;;  %2696 = vst [vmem:[#allocation27_spill] sm:$0xff] %v1789_v24  ;;  %v1794_v25 = vld [vmem:[%s2668_s1 + $0x60] sm:$0xf]  ;;  %v1799_v26 = vld [vmem:[%s2668_s1 + $0x64] sm:$0xf] }
  0x15   : > { %2697 = vst [vmem:[#allocation28_spill] sm:$0xff] %v1794_v25  ;;  %2698 = vst [vmem:[#allocation29_spill] sm:$0xff] %v1799_v26  ;;  %v1804_v27 = vld [vmem:[%s2668_s1 + $0x68] sm:$0xf]  ;;  %v1809_v28 = vld [vmem:[%s2668_s1 + $0x6c] sm:$0xf] }
  0x16   : > { %2699 = vst [vmem:[#allocation30_spill] sm:$0xff] %v1804_v27  ;;  %2700 = vst [vmem:[#allocation31_spill] sm:$0xff] %v1809_v28  ;;  %v1814_v29 = vld [vmem:[%s2668_s1 + $0x70] sm:$0xf]  ;;  %v1819_v30 = vld [vmem:[%s2668_s1 + $0x74] sm:$0xf] }
  0x17   : > { %2701 = vst [vmem:[#allocation32_spill] sm:$0xff] %v1814_v29  ;;  %2702 = vst [vmem:[#allocation33_spill] sm:$0xff] %v1819_v30  ;;  %v1824_v31 = vld [vmem:[%s2668_s1 + $0x78] sm:$0xf]  ;;  %v1829_v32 = vld [vmem:[%s2668_s1 + $0x7c] sm:$0xf] }
  0x18   : > { %2703 = vst [vmem:[#allocation34_spill] sm:$0xff] %v1824_v31  ;;  %2704 = vst [vmem:[#allocation35_spill] sm:$0xff] %v1829_v32  ;;  %v1834_v33 = vld [vmem:[%s2668_s1 + $0x80] sm:$0xf]  ;;  %v1839_v34 = vld [vmem:[%s2668_s1 + $0x84] sm:$0xf] }
  0x19   : > { %2705 = vst [vmem:[#allocation36_spill] sm:$0xff] %v1834_v33  ;;  %2706 = vst [vmem:[#allocation37_spill] sm:$0xff] %v1839_v34  ;;  %v1844_v35 = vld [vmem:[%s2668_s1 + $0x88] sm:$0xf]  ;;  %v1849_v36 = vld [vmem:[%s2668_s1 + $0x8c] sm:$0xf] }
  0x1a   : > { %2707 = vst [vmem:[#allocation38_spill] sm:$0xff] %v1844_v35  ;;  %2708 = vst [vmem:[#allocation39_spill] sm:$0xff] %v1849_v36  ;;  %v1854_v37 = vld [vmem:[%s2668_s1 + $0x90] sm:$0xf]  ;;  %v1859_v38 = vld [vmem:[%s2668_s1 + $0x94] sm:$0xf] }
  0x1b   : > { %2709 = vst [vmem:[#allocation40_spill] sm:$0xff] %v1854_v37  ;;  %v1864_v39 = vld [vmem:[%s2668_s1 + $0x98] sm:$0xf]  ;;  %v1869_v40 = vld [vmem:[%s2668_s1 + $0x9c] sm:$0xf] }
  0x1c   : > { %v1874_v41 = vld [vmem:[%s2668_s1 + $0xa0] sm:$0xf]  ;;  %v1879_v42 = vld [vmem:[%s2668_s1 + $0xa4] sm:$0xf]  ;;  %v1884_v43 = vld [vmem:[%s2668_s1 + $0xa8] sm:$0xf] }
  0x1d   : > { %v1889_v44 = vld [vmem:[%s2668_s1 + $0xac] sm:$0xf]  ;;  %v1894_v45 = vld [vmem:[%s2668_s1 + $0xb0] sm:$0xf]  ;;  %v1899_v46 = vld [vmem:[%s2668_s1 + $0xb4] sm:$0xf] }
  0x1e   : > { %v1904_v47 = vld [vmem:[%s2668_s1 + $0xb8] sm:$0xf]  ;;  %v1909_v48 = vld [vmem:[%s2668_s1 + $0xbc] sm:$0xf]  ;;  %v1914_v49 = vld [vmem:[%s2668_s1 + $0xc0] sm:$0xf] }
  0x1f   : > { %2710 = vst [vmem:[#allocation41_spill] sm:$0xff] %v1904_v47  ;;  %2711 = vst [vmem:[#allocation42_spill] sm:$0xff] %v1909_v48  ;;  %v1919_v50 = vld [vmem:[%s2668_s1 + $0xc4] sm:$0xf]  ;;  %v1924_v51 = vld [vmem:[%s2668_s1 + $0xc8] sm:$0xf] }
  0x20   : > { %v1929_v52 = vld [vmem:[%s2668_s1 + $0xcc] sm:$0xf]  ;;  %v1934_v53 = vld [vmem:[%s2668_s1 + $0xd0] sm:$0xf]  ;;  %v1939_v54 = vld [vmem:[%s2668_s1 + $0xd4] sm:$0xf] }
  0x21   : > { %v1944_v55 = vld [vmem:[%s2668_s1 + $0xd8] sm:$0xf]  ;;  %v1949_v56 = vld [vmem:[%s2668_s1 + $0xdc] sm:$0xf]  ;;  %v1954_v57 = vld [vmem:[%s2668_s1 + $0xe0] sm:$0xf] }
  0x22   : > { %v1959_v58 = vld [vmem:[%s2668_s1 + $0xe4] sm:$0xf]  ;;  %v1964_v59 = vld [vmem:[%s2668_s1 + $0xe8] sm:$0xf]  ;;  %v1969_v60 = vld [vmem:[%s2668_s1 + $0xec] sm:$0xf] }
  0x23   : > { %v1974_v61 = vld [vmem:[%s2668_s1 + $0xf0] sm:$0xf]  ;;  %v1979_v62 = vld [vmem:[%s2668_s1 + $0xf4] sm:$0xf]  ;;  %v1984_v63 = vld [vmem:[%s2668_s1 + $0xf8] sm:$0xf] }
  0x24   : > { %2712 = vst [vmem:[#allocation43_spill] sm:$0xff] %v1984_v63  ;;  %v1989_v0 = vld [vmem:[%s2668_s1 + $0xfc] sm:$0xf]  ;;  %v1994_v47 = vld [vmem:[%s2668_s1 + $0x100] sm:$0xf] }
  0x25   : > { %2713 = vst [vmem:[#allocation44_spill] sm:$0xff] %v1989_v0  ;;  %2714 = vst [vmem:[#allocation45_spill] sm:$0xff] %v1994_v47  ;;  %v1999_v48 = vld [vmem:[%s2668_s1 + $0x104] sm:$0xf]  ;;  %v2004_v15 = vld [vmem:[%s2668_s1 + $0x108] sm:$0xf] }
  0x26   : > { %2715 = vst [vmem:[#allocation46_spill] sm:$0xff] %v1999_v48  ;;  %2716 = vst [vmem:[#allocation47_spill] sm:$0xff] %v2004_v15  ;;  %v2009_v16 = vld [vmem:[%s2668_s1 + $0x10c] sm:$0xf]  ;;  %v2014_v63 = vld [vmem:[%s2668_s1 + $0x110] sm:$0xf] }
  0x27   : > { %2717 = vst [vmem:[#allocation48_spill] sm:$0xff] %v2009_v16  ;;  %2718 = vst [vmem:[#allocation49_spill] sm:$0xff] %v2014_v63  ;;  %v2019_v47 = vld [vmem:[%s2668_s1 + $0x114] sm:$0xf]  ;;  %v2024_v48 = vld [vmem:[%s2668_s1 + $0x118] sm:$0xf] }
  0x28   : > { %2719 = vst [vmem:[#allocation50_spill] sm:$0xff] %v2019_v47  ;;  %2720 = vst [vmem:[#allocation51_spill] sm:$0xff] %v2024_v48  ;;  %v2029_v15 = vld [vmem:[%s2668_s1 + $0x11c] sm:$0xf]  ;;  %v2034_v16 = vld [vmem:[%s2668_s1 + $0x120] sm:$0xf] }
  0x29   : > { %2721 = vst [vmem:[#allocation52_spill] sm:$0xff] %v2029_v15  ;;  %2722 = vst [vmem:[#allocation53_spill] sm:$0xff] %v2034_v16  ;;  %v2039_v63 = vld [vmem:[%s2668_s1 + $0x124] sm:$0xf]  ;;  %v2044_v47 = vld [vmem:[%s2668_s1 + $0x128] sm:$0xf] }
  0x2a   : > { %2723 = vst [vmem:[#allocation54_spill] sm:$0xff] %v2039_v63  ;;  %2724 = vst [vmem:[#allocation55_spill] sm:$0xff] %v2044_v47  ;;  %v2049_v48 = vld [vmem:[%s2668_s1 + $0x12c] sm:$0xf]  ;;  %v2054_v15 = vld [vmem:[%s2668_s1 + $0x130] sm:$0xf] }
  0x2b   : > { %2725 = vst [vmem:[#allocation56_spill] sm:$0xff] %v2049_v48  ;;  %2726 = vst [vmem:[#allocation57_spill] sm:$0xff] %v2054_v15  ;;  %v2059_v16 = vld [vmem:[%s2668_s1 + $0x134] sm:$0xf]  ;;  %v2064_v63 = vld [vmem:[%s2668_s1 + $0x138] sm:$0xf] }
  0x2c   : > { %2727 = vst [vmem:[#allocation58_spill] sm:$0xff] %v2059_v16  ;;  %2728 = vst [vmem:[#allocation59_spill] sm:$0xff] %v2064_v63  ;;  %v2069_v47 = vld [vmem:[%s2668_s1 + $0x13c] sm:$0xf]  ;;  %v2074_v48 = vld [vmem:[%s2668_s1 + $0x140] sm:$0xf] }
  0x2d   : > { %2729 = vst [vmem:[#allocation60_spill] sm:$0xff] %v2069_v47  ;;  %2730 = vst [vmem:[#allocation61_spill] sm:$0xff] %v2074_v48  ;;  %v2079_v15 = vld [vmem:[%s2668_s1 + $0x144] sm:$0xf]  ;;  %v2084_v16 = vld [vmem:[%s2668_s1 + $0x148] sm:$0xf] }
  0x2e   : > { %2731 = vst [vmem:[#allocation62_spill] sm:$0xff] %v2079_v15  ;;  %2732 = vst [vmem:[#allocation63_spill] sm:$0xff] %v2084_v16  ;;  %v2089_v63 = vld [vmem:[%s2668_s1 + $0x14c] sm:$0xf]  ;;  %v2094_v47 = vld [vmem:[%s2668_s1 + $0x150] sm:$0xf] }
  0x2f   : > { %2733 = vst [vmem:[#allocation64_spill] sm:$0xff] %v2089_v63  ;;  %2734 = vst [vmem:[#allocation65_spill] sm:$0xff] %v2094_v47  ;;  %v2099_v48 = vld [vmem:[%s2668_s1 + $0x154] sm:$0xf]  ;;  %v2104_v15 = vld [vmem:[%s2668_s1 + $0x158] sm:$0xf] }
  0x30   : > { %2735 = vst [vmem:[#allocation66_spill] sm:$0xff] %v2099_v48  ;;  %2736 = vst [vmem:[#allocation67_spill] sm:$0xff] %v2104_v15  ;;  %v2109_v16 = vld [vmem:[%s2668_s1 + $0x15c] sm:$0xf]  ;;  %v2114_v63 = vld [vmem:[%s2668_s1 + $0x160] sm:$0xf] }
  0x31   : > { %2737 = vst [vmem:[#allocation68_spill] sm:$0xff] %v2109_v16  ;;  %2738 = vst [vmem:[#allocation69_spill] sm:$0xff] %v2114_v63  ;;  %v2119_v47 = vld [vmem:[%s2668_s1 + $0x164] sm:$0xf]  ;;  %v2124_v48 = vld [vmem:[%s2668_s1 + $0x168] sm:$0xf] }
  0x32   : > { %2739 = vst [vmem:[#allocation70_spill] sm:$0xff] %v2119_v47  ;;  %2740 = vst [vmem:[#allocation71_spill] sm:$0xff] %v2124_v48  ;;  %v2129_v15 = vld [vmem:[%s2668_s1 + $0x16c] sm:$0xf]  ;;  %v2134_v16 = vld [vmem:[%s2668_s1 + $0x170] sm:$0xf] }
  0x33   : > { %2741 = vst [vmem:[#allocation72_spill] sm:$0xff] %v2129_v15  ;;  %2742 = vst [vmem:[#allocation73_spill] sm:$0xff] %v2134_v16  ;;  %v2139_v63 = vld [vmem:[%s2668_s1 + $0x174] sm:$0xf]  ;;  %v2144_v47 = vld [vmem:[%s2668_s1 + $0x178] sm:$0xf] }
  0x34   : > { %2743 = vst [vmem:[#allocation74_spill] sm:$0xff] %v2139_v63  ;;  %2744 = vst [vmem:[#allocation75_spill] sm:$0xff] %v2144_v47  ;;  %v2149_v48 = vld [vmem:[%s2668_s1 + $0x17c] sm:$0xf]  ;;  %v2154_v15 = vld [vmem:[%s2668_s1 + $0x180] sm:$0xf] }
  0x35   : > { %2745 = vst [vmem:[#allocation76_spill] sm:$0xff] %v2149_v48  ;;  %2746 = vst [vmem:[#allocation77_spill] sm:$0xff] %v2154_v15  ;;  %v2159_v16 = vld [vmem:[%s2668_s1 + $0x184] sm:$0xf]  ;;  %v2164_v63 = vld [vmem:[%s2668_s1 + $0x188] sm:$0xf] }
  0x36   : > { %2747 = vst [vmem:[#allocation78_spill] sm:$0xff] %v2159_v16  ;;  %2748 = vst [vmem:[#allocation79_spill] sm:$0xff] %v2164_v63  ;;  %v2169_v47 = vld [vmem:[%s2668_s1 + $0x18c] sm:$0xf]  ;;  %v2174_v48 = vld [vmem:[%s2668_s1 + $0x190] sm:$0xf] }
  0x37   : > { %2749 = vst [vmem:[#allocation80_spill] sm:$0xff] %v2169_v47  ;;  %2750 = vst [vmem:[#allocation81_spill] sm:$0xff] %v2174_v48  ;;  %v2179_v15 = vld [vmem:[%s2668_s1 + $0x194] sm:$0xf]  ;;  %v2184_v16 = vld [vmem:[%s2668_s1 + $0x198] sm:$0xf] }
  0x38   : > { %2751 = vst [vmem:[#allocation82_spill] sm:$0xff] %v2179_v15  ;;  %2752 = vst [vmem:[#allocation83_spill] sm:$0xff] %v2184_v16  ;;  %v2189_v63 = vld [vmem:[%s2668_s1 + $0x19c] sm:$0xf]  ;;  %v2194_v47 = vld [vmem:[%s2668_s1 + $0x1a0] sm:$0xf] }
  0x39   : > { %2753 = vst [vmem:[#allocation84_spill] sm:$0xff] %v2189_v63  ;;  %2754 = vst [vmem:[#allocation85_spill] sm:$0xff] %v2194_v47  ;;  %v2199_v48 = vld [vmem:[%s2668_s1 + $0x1a4] sm:$0xf]  ;;  %v2204_v15 = vld [vmem:[%s2668_s1 + $0x1a8] sm:$0xf] }
  0x3a   : > { %2755 = vst [vmem:[#allocation86_spill] sm:$0xff] %v2199_v48  ;;  %2756 = vst [vmem:[#allocation87_spill] sm:$0xff] %v2204_v15  ;;  %v2209_v16 = vld [vmem:[%s2668_s1 + $0x1ac] sm:$0xf]  ;;  %v2214_v63 = vld [vmem:[%s2668_s1 + $0x1b0] sm:$0xf] }
  0x3b   : > { %2757 = vst [vmem:[#allocation88_spill] sm:$0xff] %v2209_v16  ;;  %2758 = vst [vmem:[#allocation89_spill] sm:$0xff] %v2214_v63  ;;  %v2219_v47 = vld [vmem:[%s2668_s1 + $0x1b4] sm:$0xf]  ;;  %v2224_v48 = vld [vmem:[%s2668_s1 + $0x1b8] sm:$0xf] }
  0x3c   : > { %2759 = vst [vmem:[#allocation90_spill] sm:$0xff] %v2219_v47  ;;  %2760 = vst [vmem:[#allocation91_spill] sm:$0xff] %v2224_v48  ;;  %v2229_v15 = vld [vmem:[%s2668_s1 + $0x1bc] sm:$0xf]  ;;  %v2234_v16 = vld [vmem:[%s2668_s1 + $0x1c0] sm:$0xf] }
  0x3d   : > { %2761 = vst [vmem:[#allocation92_spill] sm:$0xff] %v2229_v15  ;;  %2762 = vst [vmem:[#allocation93_spill] sm:$0xff] %v2234_v16  ;;  %v2239_v63 = vld [vmem:[%s2668_s1 + $0x1c4] sm:$0xf]  ;;  %v2244_v47 = vld [vmem:[%s2668_s1 + $0x1c8] sm:$0xf] }
  0x3e   : > { %2763 = vst [vmem:[#allocation94_spill] sm:$0xff] %v2239_v63  ;;  %2764 = vst [vmem:[#allocation95_spill] sm:$0xff] %v2244_v47  ;;  %v2249_v48 = vld [vmem:[%s2668_s1 + $0x1cc] sm:$0xf]  ;;  %v2254_v15 = vld [vmem:[%s2668_s1 + $0x1d0] sm:$0xf] }
  0x3f   : > { %2765 = vst [vmem:[#allocation96_spill] sm:$0xff] %v2249_v48  ;;  %2766 = vst [vmem:[#allocation97_spill] sm:$0xff] %v2254_v15  ;;  %v2259_v16 = vld [vmem:[%s2668_s1 + $0x1d4] sm:$0xf]  ;;  %v2264_v63 = vld [vmem:[%s2668_s1 + $0x1d8] sm:$0xf] }
  0x40   : > { %2767 = vst [vmem:[#allocation98_spill] sm:$0xff] %v2259_v16  ;;  %2768 = vst [vmem:[#allocation99_spill] sm:$0xff] %v2264_v63  ;;  %v2269_v47 = vld [vmem:[%s2668_s1 + $0x1dc] sm:$0xf]  ;;  %v2274_v48 = vld [vmem:[%s2668_s1 + $0x1e0] sm:$0xf] }
  0x41   : > { %2769 = vst [vmem:[#allocation100_spill] sm:$0xff] %v2269_v47  ;;  %2770 = vst [vmem:[#allocation101_spill] sm:$0xff] %v2274_v48  ;;  %v2279_v15 = vld [vmem:[%s2668_s1 + $0x1e4] sm:$0xf]  ;;  %v2284_v16 = vld [vmem:[%s2668_s1 + $0x1e8] sm:$0xf] }
  0x42   : > { %2771 = vst [vmem:[#allocation102_spill] sm:$0xff] %v2279_v15  ;;  %2772 = vst [vmem:[#allocation103_spill] sm:$0xff] %v2284_v16  ;;  %v2289_v63 = vld [vmem:[%s2668_s1 + $0x1ec] sm:$0xf]  ;;  %v2294_v47 = vld [vmem:[%s2668_s1 + $0x1f0] sm:$0xf] }
  0x43   : > { %2773 = vst [vmem:[#allocation104_spill] sm:$0xff] %v2289_v63  ;;  %2774 = vst [vmem:[#allocation105_spill] sm:$0xff] %v2294_v47  ;;  %v2299_v48 = vld [vmem:[%s2668_s1 + $0x1f4] sm:$0xf]  ;;  %v2304_v15 = vld [vmem:[%s2668_s1 + $0x1f8] sm:$0xf] }
  0x44   : > { %2775 = vst [vmem:[#allocation106_spill] sm:$0xff] %v2299_v48  ;;  %2776 = vst [vmem:[#allocation107_spill] sm:$0xff] %v2304_v15  ;;  %v2309_v16 = vld [vmem:[%s2668_s1 + $0x1fc] sm:$0xf]  ;;  %v2314_v63 = vld [vmem:[%s2668_s1 + $0x200] sm:$0xf] }
  0x45   : > { %2777 = vst [vmem:[#allocation108_spill] sm:$0xff] %v2309_v16  ;;  %2778 = vst [vmem:[#allocation109_spill] sm:$0xff] %v2314_v63  ;;  %v2319_v47 = vld [vmem:[%s2668_s1 + $0x204] sm:$0xf]  ;;  %v2324_v48 = vld [vmem:[%s2668_s1 + $0x208] sm:$0xf] }
  0x46   : > { %2779 = vst [vmem:[#allocation110_spill] sm:$0xff] %v2319_v47  ;;  %2780 = vst [vmem:[#allocation111_spill] sm:$0xff] %v2324_v48  ;;  %v2329_v15 = vld [vmem:[%s2668_s1 + $0x20c] sm:$0xf]  ;;  %v2334_v16 = vld [vmem:[%s2668_s1 + $0x210] sm:$0xf] }
  0x47   : > { %2781 = vst [vmem:[#allocation112_spill] sm:$0xff] %v2329_v15  ;;  %2782 = vst [vmem:[#allocation113_spill] sm:$0xff] %v2334_v16  ;;  %v2339_v63 = vld [vmem:[%s2668_s1 + $0x214] sm:$0xf]  ;;  %v2344_v47 = vld [vmem:[%s2668_s1 + $0x218] sm:$0xf] }
  0x48   : > { %2783 = vst [vmem:[#allocation114_spill] sm:$0xff] %v2339_v63  ;;  %2784 = vst [vmem:[#allocation115_spill] sm:$0xff] %v2344_v47  ;;  %v2349_v48 = vld [vmem:[%s2668_s1 + $0x21c] sm:$0xf]  ;;  %v2354_v15 = vld [vmem:[%s2668_s1 + $0x220] sm:$0xf] }
  0x49   : > { %2785 = vst [vmem:[#allocation116_spill] sm:$0xff] %v2349_v48  ;;  %2786 = vst [vmem:[#allocation117_spill] sm:$0xff] %v2354_v15  ;;  %v2359_v16 = vld [vmem:[%s2668_s1 + $0x224] sm:$0xf]  ;;  %v2364_v63 = vld [vmem:[%s2668_s1 + $0x228] sm:$0xf] }
  0x4a   : > { %2787 = vst [vmem:[#allocation118_spill] sm:$0xff] %v2359_v16  ;;  %2788 = vst [vmem:[#allocation119_spill] sm:$0xff] %v2364_v63  ;;  %v2369_v47 = vld [vmem:[%s2668_s1 + $0x22c] sm:$0xf]  ;;  %v2374_v48 = vld [vmem:[%s2668_s1 + $0x230] sm:$0xf] }
  0x4b   : > { %2789 = vst [vmem:[#allocation120_spill] sm:$0xff] %v2369_v47  ;;  %2790 = vst [vmem:[#allocation121_spill] sm:$0xff] %v2374_v48  ;;  %v2379_v15 = vld [vmem:[%s2668_s1 + $0x234] sm:$0xf]  ;;  %v2384_v16 = vld [vmem:[%s2668_s1 + $0x238] sm:$0xf] }
  0x4c   : > { %2791 = vst [vmem:[#allocation122_spill] sm:$0xff] %v2379_v15  ;;  %2792 = vst [vmem:[#allocation123_spill] sm:$0xff] %v2384_v16  ;;  %v2389_v63 = vld [vmem:[%s2668_s1 + $0x23c] sm:$0xf] }
  0x4d   : > { %2793 = vst [vmem:[#allocation124_spill] sm:$0xff] %v2389_v63 }
  0x4e LB: >> { %v2794_v18 = vld [vmem:[#allocation21_spill] sm:$0xff]  ;;  %v2795_v17 = vld [vmem:[#allocation20_spill] sm:$0xff]  ;;  %v1373_v15 = vcombine.low %v1914_v49, %v1919_v50  ;;  %v2800_v20 = vld [vmem:[#allocation23_spill] sm:$0xff]  ;;  %v1374_v0 = vcombine.low %v1924_v51, %v1929_v52  ;;  %s1426_s26 = sshll.u32 %s1614_s25, 4  ;;  %vm356_vm0 = vsmask.f32 3328  ;;  %s1614_s25 = sphi %s2391_s25, %s346_s25  }
  0x4f   : >> { %v1357_v48 = vcombine.low %v2795_v17, %v2794_v18  ;;  %v2796_v2 = vld [vmem:[#allocation5_spill] sm:$0xff]  ;;  %v2797_v1 = vld [vmem:[#allocation4_spill] sm:$0xff]  ;;  %v2801_v19 = vld [vmem:[#allocation22_spill] sm:$0xff]  ;;  %s2414_s27 = scalar_lea.vmem %s1739_s29, %s1426_s26  ;;  %vm357_vm1 = vsmask.f32 7440  ;;  %vm393_vm3 = vcmask 1042432  }
  0x50   : >> { %v1349_v16 = vcombine.low %v2797_v1, %v2796_v2  ;;  %v2798_v34 = vld [vmem:[#allocation37_spill] sm:$0xff]  ;;  %v2799_v33 = vld [vmem:[#allocation36_spill] sm:$0xff]  ;;  %v1358_v47 = vcombine.low %v2801_v19, %v2800_v20  ;;  %1451 = vmatprep.subr.bf16.mxu1 %v1373_v15  ;;  %v2802_v4 = vld [vmem:[#allocation7_spill] sm:$0xff]  ;;  %v1376_v19 = vcombine.low %v1944_v55, %v1949_v56  ;;  %vm394_vm4 = vcmask 1046532   ;;  %s1421_s28 = sshll.u32 %s1614_s25, 1  ;;  %s346_s25 = sadd.s32 1, %s1614_s25  }
  0x51   : >> { %v1365_v63 = vcombine.low %v2799_v33, %v2798_v34  ;;  %1429 = vmatprep.subr.bf16.mxu0 %v1357_v48  ;;  %v2803_v3 = vld [vmem:[#allocation6_spill] sm:$0xff]  ;;  %v2804_v36 = vld [vmem:[#allocation39_spill] sm:$0xff]  ;;  %v2806_v22 = vld [vmem:[#allocation25_spill] sm:$0xff]  ;;  %vm1617_vm6 = vmmov 0   ;;  %s1199_s30 = scalar_lea.vmem %s1719_s21, %s1421_s28  ;;  %p343_p5 = scmp.ge.s32.totalorder %s346_s25, 4  }
  0x52   : >> { %1430 = vmatpush3.bf16.msra.mxu0 %v1349_v16  ;;  %v1350_v1 = vcombine.low %v2803_v3, %v2802_v4  ;;  %v2805_v35 = vld [vmem:[#allocation38_spill] sm:$0xff]  ;;  %v2807_v21 = vld [vmem:[#allocation24_spill] sm:$0xff]  ;;  %v1375_v16 = vcombine.low %v1934_v53, %v1939_v54  ;;  %v2808_v6 = vld [vmem:[#allocation9_spill] sm:$0xff] }
  0x53   : >> { %1452 = vmatpush3.bf16.msra.mxu1 %v1365_v63  ;;  %v1366_v2 = vcombine.low %v2805_v35, %v2804_v36  ;;  %1431 = vmatprep.subr.bf16.mxu0 %v1358_v47  ;;  %v1359_v15 = vcombine.low %v2807_v21, %v2806_v22  ;;  %v2421_v48 = vld [vmem:[%s2414_s27] sm:$0xf]  ;;  %v2424_v63 = vld [vmem:[%s2414_s27 + $0x8] sm:$0xf]  ;;  %v2427_v3 = vld [vmem:[%s2414_s27 + $0x4] sm:$0x1]  ;;  %v1368_v22 = vcombine.low %v1864_v39, %v1869_v40 }
  0x54   : >> { %1453 = vmatprep.subr.bf16.mxu1 %v1374_v0  ;;  %v2809_v5 = vld [vmem:[#allocation8_spill] sm:$0xff]  ;;  %v2434_v47 = vld [vmem:[%s2414_s27 + $0xc] sm:$0x1]  ;;  %v360_v17 = vshrl.u32 %v2421_v48, 16  ;;  %v2812_v23 = vld [vmem:[#allocation26_spill] sm:$0xff]  ;;  %v377_v20 = vshll.u32 %v2424_v63, 16 }
  0x55   : >> { %v1351_v4 = vcombine.low %v2809_v5, %v2808_v6  ;;  %v2810_v37 = vld [vmem:[#allocation40_spill] sm:$0xff]  ;;  %v2811_v24 = vld [vmem:[#allocation27_spill] sm:$0xff]  ;;  %v369_v5 = vshll.u32 %v2427_v3, 16  ;;  %v374_v6 = vshrl.u32 %v2424_v63, 16  ;;  %v2814_v7 = vld [vmem:[#allocation10_spill] sm:$0xff] }
  0x56   : >> { %1432 = vmatpush3.bf16.msra.mxu0 %v1350_v1  ;;  %v1367_v0 = vcombine.low %v2810_v37, %v1859_v38  ;;  %v1360_v18 = vcombine.low %v2812_v23, %v2811_v24  ;;  %v363_v1 = vshll.u32 %v2421_v48, 16  ;;  %v2813_v8 = vld [vmem:[#allocation11_spill] sm:$0xff]  ;;  %v379_v23 = vrot.slane %v377_v20, 5  ;;  %v2454_v33 = vld [vmem:[%s2414_s27 + $0x10] sm:$0xf]  ;;  %v2815_v26 = vld [vmem:[#allocation29_spill] sm:$0xff] }
  0x57   : >> { %1454 = vmatpush3.bf16.msra.mxu1 %v1366_v2  ;;  %1433 = vmatprep.subr.bf16.mxu0 %v1359_v15  ;;  %v362_v2 = vrot.slane %v360_v17, 4  ;;  %v1352_v21 = vcombine.low %v2814_v7, %v2813_v8  ;;  %v376_v17 = vrot.slane %v374_v6, 4  ;;  %v2451_v24 = vld [vmem:[%s2414_s27 + $0x8] sm:$0xf]  ;;  %v2816_v25 = vld [vmem:[#allocation28_spill] sm:$0xff]  ;;  %v371_v34 = vrot.slane %v369_v5, 5  ;;  %vm2462_vm2 = vmor %vm356_vm0, %vm357_vm1 }
  0x58   : >> { %1455 = vmatprep.subr.bf16.mxu1 %v1375_v16  ;;  %v365_v15 = vrot.slane %v363_v1, 5  ;;  %v383_v16 = vshll.u32 %v2434_v47, 16  ;;  %v1361_v1 = vcombine.low %v2816_v25, %v2815_v26  ;;  %v2819_v10 = vld [vmem:[#allocation13_spill] sm:$0xff]  ;;  %v2820_v9 = vld [vmem:[#allocation12_spill] sm:$0xff]  ;;  %v1369_v5 = vcombine.low %v1874_v41, %v1879_v42  ;;  %v2821_v28 = vld [vmem:[#allocation31_spill] sm:$0xff] }
  0x59   : >> { %v380_v6 = vor.u32 %v379_v23, %v376_v17  ;;  %v2822_v27 = vld [vmem:[#allocation30_spill] sm:$0xff]  ;;  %v2823_v12 = vld [vmem:[#allocation15_spill] sm:$0xff]  ;;  %v2825_v30 = vld [vmem:[#allocation33_spill] sm:$0xff] }
  0x5a   : >> { %1434 = vmatpush3.bf16.msra.mxu0 %v1351_v4  ;;  %v1377_v4 = vcombine.low %v1954_v57, %v1959_v58  ;;  %v385_v20 = vrot.slane %v383_v16, 5  ;;  %v1362_v23 = vcombine.low %v2822_v27, %v2821_v28  ;;  %v2824_v11 = vld [vmem:[#allocation14_spill] sm:$0xff]  ;;  %v2826_v29 = vld [vmem:[#allocation32_spill] sm:$0xff]  ;;  %v2827_v14 = vld [vmem:[#allocation17_spill] sm:$0xff] }
  0x5b   : >> { %1456 = vmatpush3.bf16.msra.mxu1 %v1367_v0  ;;  %1435 = vmatprep.subr.bf16.mxu0 %v1360_v18  ;;  %v366_v0 = vor.u32 %v365_v15, %v362_v2  ;;  %v1342_v18 = vcombine.low %v2451_v24, %v2454_v33  ;;  %v381_v2 = vrot.slane %v380_v6, 4  ;;  %v1378_v15 = vcombine.low %v1964_v59, %v1969_v60  ;;  %v2828_v13 = vld [vmem:[#allocation16_spill] sm:$0xff]  ;;  %v2829_v32 = vld [vmem:[#allocation35_spill] sm:$0xff]  ;;  %v2830_v31 = vld [vmem:[#allocation34_spill] sm:$0xff] }
  0x5c   : >> { %1457 = vmatprep.subr.bf16.mxu1 %v1376_v19  ;;  %v1353_v19 = vcombine.low %v2820_v9, %v2819_v10  ;;  %v1354_v17 = vcombine.low %v2824_v11, %v2823_v12  ;;  %v1355_v6 = vcombine.low %v2828_v13, %v2827_v14  ;;  %vm2500_vm5 = vmor %vm393_vm3, %vm394_vm4  ;;  %v2838_v9 = vld [vmem:[#allocation41_spill] sm:$0xff]  ;;  %v2839_v11 = vld [vmem:[#allocation62_spill] sm:$0xff] }
  0x5d   : >> { %v367_v8 = vrot.slane %v366_v0, 4  ;;  %1057 = vmatprep.mubr.bf16.mxu1 %v1342_v18  ;;  %v388_v0 = vld [vmem:[%s2414_s27 + $0x8] sm:$0xe]  ;;  %v398_v18 = vrot.slane %v2427_v3, 5  ;;  %v2508_v3 = vld [vmem:[%s2414_s27 + $0x14] sm:$0x1] }
  0x5e   : >> { %1436 = vmatpush3.bf16.msra.mxu0 %v1352_v21  ;;  %v2840_v12 = vld [vmem:[#allocation61_spill] sm:$0xff]  ;;  %v2841_v14 = vld [vmem:[#allocation94_spill] sm:$0xff] }
  0x5f   : >> { %1458 = vmatpush3.bf16.msra.mxu1 %v1368_v22  ;;  %1437 = vmatprep.subr.bf16.mxu0 %v1361_v1  ;;  %v372_v21 = vsel %vm2462_vm2, %v367_v8, %v371_v34  ;;  %v386_v22 = vsel %vm2462_vm2, %v381_v2, %v385_v20  ;;  %v1370_v1 = vcombine.low %v1884_v43, %v1889_v44  ;;  %v387_v34 = vld [vmem:[%s2414_s27] sm:$0xe]  ;;  %v1318_v2 = vrot.slane %v388_v0, 9  ;;  %v2842_v25 = vld [vmem:[#allocation93_spill] sm:$0xff] }
  0x60   : >> { %1459 = vmatprep.subr.bf16.mxu1 %v1377_v4  ;;  %v1340_v16 = vcombine.low %v372_v21, %v386_v22  ;;  %v1363_v4 = vcombine.low %v2826_v29, %v2825_v30  ;;  %v1379_v8 = vcombine.low %v1974_v61, %v1979_v62  ;;  %v1371_v20 = vcombine.low %v1894_v45, %v1899_v46  ;;  %v2832_v21 = vld [vmem:[#allocation43_spill] sm:$0xff]  ;;  %v2837_v0 = vld [vmem:[#allocation42_spill] sm:$0xff]  ;;  %v1334_v27 = vld [vmem:[%s2414_s27 + $0x1c] sm:$0x1] }
  0x61   : >> { %v1372_v10 = vcombine.low %v2838_v9, %v2837_v0  ;;  %v1405_v26 = vcombine.low %v2842_v25, %v2841_v14  ;;  %v2845_v14 = vld [vmem:[#allocation78_spill] sm:$0xff]  ;;  %v2846_v25 = vld [vmem:[#allocation77_spill] sm:$0xff]  ;;  %v1335_v29 = vld [vmem:[%s2414_s27 + $0x10] sm:$0xe] }
  0x62   : >> { %1438 = vmatpush3.bf16.msra.mxu0 %v1353_v19  ;;  %1016 = vmatprep.mubr.bf16.mxu0 %v1340_v16  ;;  %v402_v19 = vrot.slane %v2434_v47, 5  ;;  %v1325_v47 = vld [vmem:[%s2414_s27 + $0x8] sm:$0xe]  ;;  %v1397_v0 = vcombine.low %v2846_v25, %v2845_v14  ;;  %v1337_v37 = vrot.slane %v1335_v29, 9  ;;  %v2869_v16 = vld [vmem:[#allocation84_spill] sm:$0xff] }
  0x63   : >> { %1460 = vmatpush3.bf16.msra.mxu1 %v1369_v5  ;;  %1439 = vmatprep.subr.bf16.mxu0 %v1362_v23  ;;  %v1317_v5 = vrot.slane %v387_v34, 9  ;;  %v1364_v23 = vcombine.low %v2830_v31, %v2829_v32  ;;  %v1327_v9 = vrot.slane %v1325_v47, 9  ;;  %v2853_v31 = vld [vmem:[#allocation80_spill] sm:$0xff] }
  0x64   : >> { %1461 = vmatprep.subr.bf16.mxu1 %v1378_v15  ;;  %v2831_v15 = vld [vmem:[#allocation44_spill] sm:$0xff]  ;;  %v403_v13 = vsel %vm2500_vm5, %v1318_v2, %v402_v19  ;;  %v2843_v19 = vld [vmem:[#allocation46_spill] sm:$0xff] }
  0x65   : >> { %v1380_v22 = vcombine.low %v2832_v21, %v2831_v15  ;;  %v1389_v15 = vcombine.low %v2840_v12, %v2839_v11  ;;  %v399_v21 = vsel %vm2500_vm5, %v1317_v5, %v398_v18  ;;  %v1339_v18 = vcombine.low %v2421_v48, %v2424_v63  ;;  %v2844_v5 = vld [vmem:[#allocation45_spill] sm:$0xff]  ;;  %v2847_v48 = vld [vmem:[#allocation64_spill] sm:$0xff]  ;;  %v2848_v63 = vld [vmem:[#allocation63_spill] sm:$0xff] }
  0x66   : >> { %1440 = vmatpush3.bf16.msra.mxu0 %v1354_v17  ;;  %v2505_v17 = vld [vmem:[%s2414_s27 + $0xc] sm:$0x1]  ;;  %v1381_v2 = vcombine.low %v2844_v5, %v2843_v19  ;;  %v1341_v28 = vcombine.low %v399_v21, %v403_v13  ;;  %v2849_v13 = vld [vmem:[#allocation96_spill] sm:$0xff] }
  0x67   : >> { %1462 = vmatpush3.bf16.msra.mxu1 %v1370_v1  ;;  %1441 = vmatprep.subr.bf16.mxu0 %v1363_v4  ;;  %v1326_v1 = vld [vmem:[%s2414_s27 + $0x10] sm:$0xe]  ;;  %v2835_v4 = vld [vmem:[#allocation19_spill] sm:$0xff]  ;;  %v448_v11 = vrot.slane %v2505_v17, 5 }
  0x68   : >> { %1463 = vmatprep.subr.bf16.mxu1 %v1379_v8  ;;  %v2836_v8 = vld [vmem:[#allocation18_spill] sm:$0xff]  ;;  %v1328_v12 = vrot.slane %v1326_v1, 9  ;;  %v1390_v1 = vcombine.low %v2848_v63, %v2847_v48  ;;  %v2850_v21 = vld [vmem:[#allocation95_spill] sm:$0xff]  ;;  %v2851_v48 = vld [vmem:[#allocation48_spill] sm:$0xff] }
  0x69   : >> { %v1356_v34 = vcombine.low %v2836_v8, %v2835_v4  ;;  %v2525_v4 = vld [vmem:[%s2414_s27 + $0x10] sm:$0xf]  ;;  %v2528_v8 = vld [vmem:[%s2414_s27 + $0x18] sm:$0xf]  ;;  %v2852_v63 = vld [vmem:[#allocation47_spill] sm:$0xff] }
  0x6a   : >> { %1442 = vmatpush3.bf16.msra.mxu0 %v1355_v6  ;;  %v452_v6 = vrot.slane %v2508_v3, 5  ;;  %v463_v47 = vshrl.u32 %v2525_v4, 16  ;;  %v466_v19 = vshll.u32 %v2525_v4, 16  ;;  %v477_v14 = vshrl.u32 %v2528_v8, 16 }
  0x6b   : >> { %1464 = vmatpush3.bf16.msra.mxu1 %v1371_v20  ;;  %1443 = vmatprep.subr.bf16.mxu0 %v1364_v23  ;;  %v1333_v20 = vld [vmem:[%s2414_s27 + $0x14] sm:$0x1]  ;;  %v449_v23 = vsel %vm2500_vm5, %v1327_v9, %v448_v11  ;;  %v1406_v9 = vcombine.low %v2850_v21, %v2849_v13  ;;  %v1382_v30 = vcombine.low %v2852_v63, %v2851_v48  ;;  %v2856_v13 = vld [vmem:[#allocation65_spill] sm:$0xff]  ;;  %v502_v63 = vrot.slane %v1334_v27, 5 }
  0x6c   : >> { %1465 = vmatprep.subr.bf16.mxu1 %v1380_v22  ;;  %v453_v22 = vsel %vm2500_vm5, %v1328_v12, %v452_v6  ;;  %v472_v5 = vshll.u32 %v1333_v20, 16  ;;  %v465_v11 = vrot.slane %v463_v47, 4  ;;  %v480_v12 = vshll.u32 %v2528_v8, 16  ;;  %v2855_v47 = vld [vmem:[#allocation66_spill] sm:$0xff] }
  0x6d   : >> { %v486_v6 = vshll.u32 %v1334_v27, 16  ;;  %v1344_v25 = vcombine.low %v449_v23, %v453_v22  ;;  %v498_v35 = vrot.slane %v1333_v20, 5  ;;  %v1391_v21 = vcombine.low %v2856_v13, %v2855_v47  ;;  %v2857_v23 = vld [vmem:[#allocation98_spill] sm:$0xff]  ;;  %v2858_v22 = vld [vmem:[#allocation97_spill] sm:$0xff] }
  0x6e   : >> { %1444 = vmatpush3.bf16.msra.mxu0 %v1356_v34  ;;  %v479_v34 = vrot.slane %v477_v14, 4  ;;  %v482_v32 = vrot.slane %v480_v12, 5  ;;  %v474_v36 = vrot.slane %v472_v5, 5  ;;  %v2859_v20 = vld [vmem:[#allocation50_spill] sm:$0xff]  ;;  %v427_v13 = vshrl.u32 %v2454_v33, 16 }
  0x6f   : >> { %1466 = vmatpush3.bf16.msra.mxu1 %v1372_v10  ;;  %1473 = vmatprep.subr.bf16.mxu0 %v1389_v15  ;;  %v468_v10 = vrot.slane %v466_v19, 5  ;;  %v2854_v15 = vld [vmem:[#allocation79_spill] sm:$0xff]  ;;  %v1407_v19 = vcombine.low %v2858_v22, %v2857_v23  ;;  %v488_v48 = vrot.slane %v486_v6, 5  ;;  %v2861_v5 = vld [vmem:[#allocation82_spill] sm:$0xff]  ;;  %v2865_v6 = vld [vmem:[#allocation100_spill] sm:$0xff] }
  0x70   : >> { %1495 = vmatprep.subr.bf16.mxu1 %v1405_v26  ;;  %v1398_v26 = vcombine.low %v2854_v15, %v2853_v31  ;;  %v2566_v15 = vsel %vm2500_vm5, %v1337_v37, %v498_v35  ;;  %v2867_v23 = vld [vmem:[#allocation52_spill] sm:$0xff]  ;;  %v2868_v22 = vld [vmem:[#allocation51_spill] sm:$0xff] }
  0x71   : >> { %1017 = vmatmul.mubr.bf16.vlgmr.msra.gmra.mrb[0].mxu0 %v1339_v18  ;;  %v469_v14 = vor.u32 %v468_v10, %v465_v11  ;;  %v1336_v18 = vld [vmem:[%s2414_s27 + $0x18] sm:$0xe]  ;;  %v2864_v11 = vld [vmem:[#allocation67_spill] sm:$0xff] }
  0x72   : >> { %1058 = vmatmul.mubr.bf16.vlgmr.msra.gmra.mrb[0].mxu1 %v1341_v28  ;;  %1474 = vmatpush3.bf16.msra.mxu0 %v1381_v2  ;;  %v483_v28 = vor.u32 %v482_v32, %v479_v34  ;;  %v2860_v2 = vld [vmem:[#allocation49_spill] sm:$0xff]  ;;  %v1338_v47 = vrot.slane %v1336_v18, 9  ;;  %v2863_v32 = vld [vmem:[#allocation68_spill] sm:$0xff] }
  0x73   : >> { %1496 = vmatpush3.bf16.msra.mxu1 %v1397_v0  ;;  %1475 = vmatprep.subr.bf16.mxu0 %v1390_v1  ;;  %v470_v31 = vrot.slane %v469_v14, 4  ;;  %v1383_v0 = vcombine.low %v2860_v2, %v2859_v20  ;;  %v2862_v1 = vld [vmem:[#allocation81_spill] sm:$0xff]  ;;  %v1392_v27 = vcombine.low %v2864_v11, %v2863_v32  ;;  %v2870_v14 = vld [vmem:[#allocation83_spill] sm:$0xff] }
  0x74   : >> { %1497 = vmatprep.subr.bf16.mxu1 %v1406_v9  ;;  %1098 = vmatprep.mubr.bf16.mxu0 %v1344_v25  ;;  %v484_v12 = vrot.slane %v483_v28, 4  ;;  %v1399_v9 = vcombine.low %v2862_v1, %v2861_v5  ;;  %v2866_v25 = vld [vmem:[#allocation99_spill] sm:$0xff]  ;;  %v1400_v18 = vcombine.low %v2870_v14, %v2869_v16  ;;  %v2871_v28 = vld [vmem:[#allocation70_spill] sm:$0xff]  ;;  %v2874_v20 = vld [vmem:[#allocation101_spill] sm:$0xff]  ;;  %v422_v16 = vshll.u32 %v2505_v17, 16 }
  0x75   : >> { %v475_v29 = vsel %vm2462_vm2, %v470_v31, %v474_v36  ;;  %v1408_v10 = vcombine.low %v2866_v25, %v2865_v6  ;;  %v416_v36 = vshll.u32 %v2451_v24, 16  ;;  %v2873_v31 = vld [vmem:[#allocation102_spill] sm:$0xff]  ;;  %v2876_v5 = vld [vmem:[#allocation53_spill] sm:$0xff]  ;;  %v2881_v25 = vld [vmem:[#allocation104_spill] sm:$0xff]  ;;  %v436_v14 = vshll.u32 %v2508_v3, 16 }
  0x76   : >> { %1476 = vmatpush3.bf16.msra.mxu0 %v1382_v30  ;;  %v489_v35 = vsel %vm2462_vm2, %v484_v12, %v488_v48  ;;  %v2580_v30 = vsel %vm2500_vm5, %v1338_v47, %v502_v63  ;;  %v2872_v48 = vld [vmem:[#allocation69_spill] sm:$0xff]  ;;  %v2875_v47 = vld [vmem:[#allocation54_spill] sm:$0xff] }
  0x77   : >> { %1498 = vmatpush3.bf16.msra.mxu1 %v1398_v26  ;;  %1477 = vmatprep.subr.bf16.mxu0 %v1391_v21  ;;  %v1346_v37 = vcombine.low %v475_v29, %v489_v35  ;;  %v1347_v34 = vcombine.low %v2566_v15, %v2580_v30  ;;  %v413_v26 = vshrl.u32 %v2451_v24, 16  ;;  %v430_v21 = vshll.u32 %v2454_v33, 16  ;;  %v2878_v32 = vld [vmem:[#allocation85_spill] sm:$0xff]  ;;  %v2880_v29 = vld [vmem:[#allocation71_spill] sm:$0xff] }
  0x78   : >> { %1499 = vmatprep.subr.bf16.mxu1 %v1407_v19  ;;  %v1384_v19 = vcombine.low %v2868_v22, %v2867_v23  ;;  %v1393_v63 = vcombine.low %v2872_v48, %v2871_v28  ;;  %v1409_v24 = vcombine.low %v2874_v20, %v2873_v31  ;;  %v418_v12 = vrot.slane %v416_v36, 5  ;;  %v2883_v36 = vld [vmem:[#allocation56_spill] sm:$0xff]  ;;  %v2886_v22 = vld [vmem:[#allocation87_spill] sm:$0xff]  ;;  %v2888_v28 = vld [vmem:[#allocation73_spill] sm:$0xff] }
  0x79   : >> { %1139 = vmatprep.mubr.bf16.mxu1 %v1346_v37  ;;  %v415_v2 = vrot.slane %v413_v26, 4  ;;  %v429_v33 = vrot.slane %v427_v13, 4  ;;  %v1385_v1 = vcombine.low %v2876_v5, %v2875_v47  ;;  %v2884_v13 = vld [vmem:[#allocation55_spill] sm:$0xff]  ;;  %v2885_v23 = vld [vmem:[#allocation88_spill] sm:$0xff]  ;;  %v2890_v31 = vld [vmem:[#allocation105_spill] sm:$0xff]  ;;  %v438_v3 = vrot.slane %v436_v14, 5 }
  0x7a   : >> { %1478 = vmatpush3.bf16.msra.mxu0 %v1383_v0  ;;  %v432_v0 = vrot.slane %v430_v21, 5  ;;  %v1386_v21 = vcombine.low %v2884_v13, %v2883_v36  ;;  %v2893_v47 = vld [vmem:[#allocation90_spill] sm:$0xff]  ;;  %v2894_v5 = vld [vmem:[#allocation89_spill] sm:$0xff] }
  0x7b   : >> { %1500 = vmatpush3.bf16.msra.mxu1 %v1399_v9  ;;  %1479 = vmatprep.subr.bf16.mxu0 %v1392_v27  ;;  %v2877_v9 = vld [vmem:[#allocation86_spill] sm:$0xff]  ;;  %v2879_v27 = vld [vmem:[#allocation72_spill] sm:$0xff]  ;;  %v419_v37 = vor.u32 %v418_v12, %v415_v2  ;;  %v1403_v17 = vcombine.low %v2894_v5, %v2893_v47  ;;  %v2914_v47 = vld [vmem:[#allocation119_spill] sm:$0xff] }
  0x7c   : >> { %1501 = vmatprep.subr.bf16.mxu1 %v1408_v10  ;;  %v1401_v11 = vcombine.low %v2878_v32, %v2877_v9  ;;  %v1394_v6 = vcombine.low %v2880_v29, %v2879_v27  ;;  %v2882_v10 = vld [vmem:[#allocation103_spill] sm:$0xff]  ;;  %v433_v26 = vor.u32 %v432_v0, %v429_v33  ;;  %v2891_v12 = vld [vmem:[#allocation58_spill] sm:$0xff]  ;;  %v2892_v33 = vld [vmem:[#allocation57_spill] sm:$0xff] }
  0x7d   : >> { %v1410_v35 = vcombine.low %v2882_v10, %v2881_v25  ;;  %v1387_v0 = vcombine.low %v2892_v33, %v2891_v12  ;;  %v2895_v9 = vld [vmem:[#allocation76_spill] sm:$0xff]  ;;  %v2896_v32 = vld [vmem:[#allocation75_spill] sm:$0xff]  ;;  %v2912_v12 = vld [vmem:[#allocation117_spill] sm:$0xff] }
  0x7e   : >> { %1480 = vmatpush3.bf16.msra.mxu0 %v1384_v19  ;;  %v1402_v19 = vcombine.low %v2886_v22, %v2885_v23  ;;  %v434_v2 = vrot.slane %v433_v26, 4  ;;  %v2897_v27 = vld [vmem:[#allocation108_spill] sm:$0xff]  ;;  %v2898_v29 = vld [vmem:[#allocation107_spill] sm:$0xff]  ;;  %v1345_v22 = vcombine.low %v2525_v4, %v2528_v8 }
  0x7f   : >> { %1502 = vmatpush3.bf16.msra.mxu1 %v1400_v18  ;;  %1481 = vmatprep.subr.bf16.mxu0 %v1393_v63  ;;  %v2887_v18 = vld [vmem:[#allocation74_spill] sm:$0xff]  ;;  %v2899_v25 = vld [vmem:[#allocation60_spill] sm:$0xff]  ;;  %v2900_v10 = vld [vmem:[#allocation59_spill] sm:$0xff] }
  0x80   : >> { %1503 = vmatprep.subr.bf16.mxu1 %v1409_v24  ;;  %v1395_v48 = vcombine.low %v2888_v28, %v2887_v18  ;;  %v2889_v63 = vld [vmem:[#allocation106_spill] sm:$0xff]  ;;  %v420_v24 = vrot.slane %v419_v37, 4  ;;  %v2901_v37 = vld [vmem:[#allocation92_spill] sm:$0xff]  ;;  %v2902_v26 = vld [vmem:[#allocation91_spill] sm:$0xff]  ;;  %v1616_v18 = vmov 0.0  }
  0x81   : >> { %v1411_v20 = vcombine.low %v2890_v31, %v2889_v63  ;;  %v1404_v36 = vcombine.low %v2902_v26, %v2901_v37  ;;  %v2905_v28 = vld [vmem:[#allocation112_spill] sm:$0xff]  ;;  %v2907_v63 = vld [vmem:[#allocation114_spill] sm:$0xff]  ;;  %v2908_v31 = vld [vmem:[#allocation113_spill] sm:$0xff] }
  0x82   : >> { %1482 = vmatpush3.bf16.msra.mxu0 %v1385_v1  ;;  %v424_v1 = vrot.slane %v422_v16, 5  ;;  %v2904_v16 = vld [vmem:[#allocation109_spill] sm:$0xff]  ;;  %v1415_v4 = vcombine.low %v2908_v31, %v2907_v63  ;;  %v2909_v8 = vld [vmem:[#allocation116_spill] sm:$0xff] }
  0x83   : >> { %1504 = vmatpush3.bf16.msra.mxu1 %v1401_v11  ;;  %1483 = vmatprep.subr.bf16.mxu0 %v1394_v6  ;;  %v1396_v11 = vcombine.low %v2896_v32, %v2895_v9  ;;  %v1412_v6 = vcombine.low %v2898_v29, %v2897_v27  ;;  %v2917_v9 = vld [vmem:[#allocation124_spill] sm:$0xff]  ;;  %v2918_v32 = vld [vmem:[#allocation123_spill] sm:$0xff] }
  0x84   : >> { %1505 = vmatprep.subr.bf16.mxu1 %v1410_v35  ;;  %v1388_v35 = vcombine.low %v2900_v10, %v2899_v25  ;;  %v425_v13 = vsel %vm2462_vm2, %v420_v24, %v424_v1  ;;  %v2916_v1 = vld [vmem:[#allocation121_spill] sm:$0xff] }
  0x86   : >> { %1484 = vmatpush3.bf16.msra.mxu0 %v1386_v21  ;;  %v439_v21 = vsel %vm2462_vm2, %v434_v2, %v438_v3  ;;  %v2911_v2 = vld [vmem:[#allocation118_spill] sm:$0xff] }
  0x87   : >> { %1506 = vmatpush3.bf16.msra.mxu1 %v1402_v19  ;;  %1485 = vmatprep.subr.bf16.mxu0 %v1395_v48  ;;  %v1343_v23 = vcombine.low %v425_v13, %v439_v21  ;;  %v2903_v19 = vld [vmem:[#allocation110_spill] sm:$0xff]  ;;  %v2906_v48 = vld [vmem:[#allocation111_spill] sm:$0xff]  ;;  %v1417_v33 = vcombine.low %v2912_v12, %v2911_v2 }
  0x88   : >> { %1507 = vmatprep.subr.bf16.mxu1 %v1411_v20  ;;  %v1413_v14 = vcombine.low %v2904_v16, %v2903_v19  ;;  %v1414_v7 = vcombine.low %v2906_v48, %v2905_v28  ;;  %v2910_v20 = vld [vmem:[#allocation115_spill] sm:$0xff] }
  0x89   : >> { %v1416_v24 = vcombine.low %v2910_v20, %v2909_v8  ;;  %v2919_v21 = vld [vmem:[#allocation3_spill] sm:$0xff] }
  0x8a   : >> { %1486 = vmatpush3.bf16.msra.mxu0 %v1387_v0  ;;  %v2913_v0 = vld [vmem:[#allocation120_spill] sm:$0xff] }
  0x8b   : >> { %1508 = vmatpush3.bf16.msra.mxu1 %v1403_v17  ;;  %1487 = vmatprep.subr.bf16.mxu0 %v1396_v11  ;;  %v1418_v5 = vcombine.low %v2914_v47, %v2913_v0  ;;  %v2915_v17 = vld [vmem:[#allocation122_spill] sm:$0xff]  ;;  %v1420_v11 = vcombine.low %v2918_v32, %v2917_v9 }
  0x8c   : >> { %1509 = vmatprep.subr.bf16.mxu1 %v1412_v6  ;;  %v1419_v3 = vcombine.low %v2916_v1, %v2915_v17 }
  0x8e   : >> { %1488 = vmatpush3.bf16.msra.mxu0 %v1388_v35 }
  0x8f   : >> { %1510 = vmatpush3.bf16.msra.mxu1 %v1404_v36  ;;  %1526 = vmatprep.subr.bf16.mxu0 %v1616_v18 }
  0x91   : >> { %1099 = vmatmul.mubr.bf16.vlgmr.msra.gmra.mrb[4].mxu0 %v1343_v23 }
  0x92   : >> { %1140 = vmatmul.mubr.bf16.vlgmr.msra.gmra.mrb[4].mxu1 %v1345_v22  ;;  %1527 = vmatpush3.bf16.msra.mxu0 %v1413_v14 }
  0x93   : >> { %1542 = vmatprep.mubr.msk.bf16.mxu0 %vm1617_vm6, %v1616_v18  ;;  %1528 = vmatprep.subr.bf16.mxu0 %v1616_v18 }
  0x96   : >> { %1529 = vmatpush3.bf16.msra.mxu0 %v1414_v7 }
  0x97   : >> { %1530 = vmatprep.subr.bf16.mxu0 %v1616_v18 }
  0x9a   : >> { %1531 = vmatpush3.bf16.msra.mxu0 %v1415_v4 }
  0x9b   : >> { %1532 = vmatprep.subr.bf16.mxu0 %v1616_v18 }
  0x9e   : >> { %1533 = vmatpush3.bf16.msra.mxu0 %v1416_v24 }
  0x9f   : >> { %1534 = vmatprep.subr.bf16.mxu0 %v1616_v18 }
  0xa2   : >> { %1535 = vmatpush3.bf16.msra.mxu0 %v1417_v33 }
  0xa3   : >> { %1536 = vmatprep.subr.bf16.mxu0 %v1616_v18 }
  0xa6   : >> { %1537 = vmatpush3.bf16.msra.mxu0 %v1418_v5 }
  0xa7   : >> { %1538 = vmatprep.subr.bf16.mxu0 %v1616_v18 }
  0xaa   : >> { %1539 = vmatpush3.bf16.msra.mxu0 %v1419_v3 }
  0xab   : >> { %1540 = vmatprep.subr.bf16.mxu0 %v1616_v18 }
  0xae   : >> { %1541 = vmatpush3.bf16.msra.mxu0 %v1420_v11 }
  0xb1   : >> { %1543 = vmatmul.mubr.bf16.vlgmr.msra.gmra.mrb[8].mxu0 %v1347_v34 }
 0x144   : >> { %v1445_v27 = vpop.f32.mrb[0].mxu0 }
 0x145   : >> { %v1467_v29 = vpop.f32.mrb[0].mxu1  ;;  %v1446_v6 = vpop.f32.mrb[1].mxu0 }
 0x146   : >> { %v1468_v25 = vpop.f32.mrb[1].mxu1  ;;  %v1447_v10 = vadd.f32 %v1446_v6, %v1445_v27  ;;  %v1448_v35 = vpop.f32.mrb[2].mxu0 }
 0x147   : >> { %v1469_v37 = vadd.f32 %v1468_v25, %v1467_v29  ;;  %v1470_v26 = vpop.f32.mrb[2].mxu1  ;;  %v1449_v36 = vpop.f32.mrb[3].mxu0 }
 0x148   : >> { %v1471_v13 = vpop.f32.mrb[3].mxu1  ;;  %v1019_v23 = vadd.f32 %v1447_v10, %v2919_v21  ;;  %v1450_v22 = vadd.f32 %v1449_v36, %v1448_v35 }
 0x149   : >> { %v1472_v19 = vadd.f32 %v1471_v13, %v1470_v26 }
 0x14a   : >> { %v1022_v16 = vadd.f32 %v1450_v22, %v2919_v21  ;;  %v1060_v14 = vadd.f32 %v1469_v37, %v1019_v23 }
 0x14c   : >> { %v1063_v18 = vadd.f32 %v1472_v19, %v1022_v16 }
 0x164   : >> { %v1489_v15 = vpop.f32.mrb[4].mxu0 }
 0x165   : >> { %v1511_v30 = vpop.f32.mrb[4].mxu1  ;;  %v1490_v34 = vpop.f32.mrb[5].mxu0 }
 0x166   : >> { %v1512_v28 = vpop.f32.mrb[5].mxu1  ;;  %v1491_v48 = vadd.f32 %v1490_v34, %v1489_v15  ;;  %v1492_v7 = vpop.f32.mrb[6].mxu0 }
 0x167   : >> { %v1513_v63 = vadd.f32 %v1512_v28, %v1511_v30  ;;  %v1514_v31 = vpop.f32.mrb[6].mxu1  ;;  %v1493_v4 = vpop.f32.mrb[7].mxu0 }
 0x168   : >> { %v1515_v8 = vpop.f32.mrb[7].mxu1  ;;  %v1101_v20 = vadd.f32 %v1491_v48, %v1060_v14  ;;  %v1494_v24 = vadd.f32 %v1493_v4, %v1492_v7 }
 0x169   : >> { %v1516_v2 = vadd.f32 %v1515_v8, %v1514_v31 }
 0x16a   : >> { %v1104_v12 = vadd.f32 %v1494_v24, %v1063_v18  ;;  %v1142_v33 = vadd.f32 %v1513_v63, %v1101_v20 }
 0x16c   : >> { %v1145_v0 = vadd.f32 %v1516_v2, %v1104_v12 }
 0x184   : >> { %v1182_v47 = vpop.f32.mrb[8].mxu0 }
 0x185   : >> { %v1183_v5 = vadd.f32 %v1182_v47, %v1142_v33  ;;  %v1544_v17 = vpop.f32.mrb[9].mxu0 }
 0x186   : >> { %v1185_v1 = vpop.f32.mrb[10].mxu0 }
 0x187   : >> { %v1186_v3 = vadd.f32 %v1185_v1, %v1145_v0  ;;  %v1545_v9 = vpop.f32.mrb[11].mxu0  ;;  %v1189_v32 = vmax.f32 %v1183_v5, 0.0 }
 0x189   : >> { %v1190_v11 = vmax.f32 %v1186_v3, 0.0 }
 0x18b   : >> { %v1191_v27 = vmax.f32 %v1189_v32, %v1190_v11 }
 0x18d   : >> { %1192 = vst [vmem:[#allocation2] sm:$0xff] %v1191_v27 }
 0x193   : > { %345 = sbr.rel (!%p343_p5) target bundleno = 78 (0x4e), region = 74 }
 0x194   : >> { %v1193_v29 = vld [vmem:[#allocation2] ss:$2 sm:$0xf]  ;;  %v1195_v6 = vld [vmem:[#allocation2 + $0x1] ss:$2 sm:$0xf] }
 0x195   : >> { %v1196_v25 = vmax.f32 %v1193_v29, %v1195_v6 }
 0x197   : >> { %v1197_v10 = vpack.c.bf16 %v1196_v25, %v1196_v25 }
 0x199   : >> { %1200 = vst [vmem:[%s1199_s30] sm:$0x3] %v1197_v10 }
 0x19a PF: > { %s13_s14 = sadd.s32 1, %s1610_s14   ;;  %s2920_s12 = smov %s1606_s13 }
 0x19b   : > { %p10_p6 = scmp.ge.s32.totalorder %s13_s14, 4   ;;  %s2921_s13 = smov %s2923_s15 }
 0x19d   :  { %12 = sbr.rel (!%p10_p6) target bundleno = 2 (0x2), region = 85 }

// kernel: cnn5_forward.9
= control target key start
LH: loop header
LB: loop body
LE: loop exit
PB: predicated region body
PF: predicated region fallthrough
CT: control target
= control target key end

     0   :  { %s1774_s12 = smov 0   ;;  %s1776_s13 = smov 0   ;;  %s2764_s0 = inlined_call_operand.vmem [shape: bf16[2,6,6,128], index: 0, kind: input, shape index: {}]   ;;  %s2765_s1 = inlined_call_operand.vmem [shape: bf16[1152,128], index: 1, kind: input, shape index: {}]   ;;  %s2766_s2 = inlined_call_operand.vmem [shape: f32[1,128], index: 2, kind: input, shape index: {}]   ;;  %s2767_s3 = inlined_call_operand.vmem [shape: bf16[2,2,2,128], index: 3, kind: output, shape index: {}]  }
   0x1   :  { %s1778_s14 = smov 0  }
   0x2 LB: > { %s25_s15 = sadd.s32 1, %s1741_s13  ;;  %p1443_p0 = scmp.ge.s32.totalorder %s1745_s14, 1  ;;  %s1745_s14 = sphi %s1778_s14, %s13_s14   ;;  %s1741_s13 = sphi %s1776_s13, %s3007_s13   ;;  %s1737_s12 = sphi %s1774_s12, %s3006_s12  }
   0x3   : > { %p27_p1 = scmp.ge.s32.totalorder %s25_s15, 2  ;;  %p151_p2 = scmp.lt.s32.totalorder %s1745_s14, 3 }
   0x5   : > { %s3009_s15 = smov (%p27_p1, %s25_s15), 0  ;;  %p152_p3 = pnand %p1443_p0, %p151_p2 }
   0x6   : > { %p178_p4 = scmp.lt.s32.totalorder (!%p152_p3), %s1737_s12, 1  ;;  %v1795_v0 = vld [vmem:[%s2766_s2] ss:$0 sm:$0xff] (!%p152_p3)  ;;  %v1805_v2 = vld [vmem:[%s2765_s1 + $0x4] sm:$0xf] (!%p152_p3)  ;;  %s2527_s25 = smov (!%p152_p3), 0  }
   0x7   : > { %155 = sbr.rel (%p152_p3) target bundleno = 409 (0x199), region = 32  ;;  %2768 = vst [vmem:[#allocation3_spill] sm:$0xff] (!%p152_p3), %v1795_v0  ;;  %v1800_v1 = vld [vmem:[%s2765_s1] sm:$0xf] (!%p152_p3)  ;;  %2770 = vst [vmem:[#allocation5_spill] sm:$0xff] (!%p152_p3), %v1805_v2 }
   0x8   : > { %2769 = vst [vmem:[#allocation4_spill] sm:$0xff] (!%p152_p3), %v1800_v1  ;;  %v1810_v3 = vld [vmem:[%s2765_s1 + $0x8] sm:$0xf] (!%p152_p3)  ;;  %v1815_v4 = vld [vmem:[%s2765_s1 + $0xc] sm:$0xf] (!%p152_p3) }
   0x9   : > { %2771 = vst [vmem:[#allocation6_spill] sm:$0xff] (!%p152_p3), %v1810_v3  ;;  %2772 = vst [vmem:[#allocation7_spill] sm:$0xff] (!%p152_p3), %v1815_v4  ;;  %v1820_v5 = vld [vmem:[%s2765_s1 + $0x10] sm:$0xf] (!%p152_p3)  ;;  %v1825_v6 = vld [vmem:[%s2765_s1 + $0x14] sm:$0xf] (!%p152_p3) }
   0xa   : > { %2773 = vst [vmem:[#allocation8_spill] sm:$0xff] (!%p152_p3), %v1820_v5  ;;  %2774 = vst [vmem:[#allocation9_spill] sm:$0xff] (!%p152_p3), %v1825_v6  ;;  %v1830_v7 = vld [vmem:[%s2765_s1 + $0x18] sm:$0xf] (!%p152_p3)  ;;  %v1835_v8 = vld [vmem:[%s2765_s1 + $0x1c] sm:$0xf] (!%p152_p3) }
   0xb   : > { %2775 = vst [vmem:[#allocation10_spill] sm:$0xff] (!%p152_p3), %v1830_v7  ;;  %2776 = vst [vmem:[#allocation11_spill] sm:$0xff] (!%p152_p3), %v1835_v8  ;;  %v1840_v9 = vld [vmem:[%s2765_s1 + $0x20] sm:$0xf] (!%p152_p3)  ;;  %v1845_v10 = vld [vmem:[%s2765_s1 + $0x24] sm:$0xf] (!%p152_p3) }
   0xc   : > { %2777 = vst [vmem:[#allocation12_spill] sm:$0xff] (!%p152_p3), %v1840_v9  ;;  %2778 = vst [vmem:[#allocation13_spill] sm:$0xff] (!%p152_p3), %v1845_v10  ;;  %v1850_v11 = vld [vmem:[%s2765_s1 + $0x28] sm:$0xf] (!%p152_p3)  ;;  %v1860_v12 = vld [vmem:[%s2765_s1 + $0x2c] sm:$0xf] (!%p152_p3) }
   0xd   : > { %2779 = vst [vmem:[#allocation14_spill] sm:$0xff] (!%p152_p3), %v1850_v11  ;;  %2780 = vst [vmem:[#allocation15_spill] sm:$0xff] (!%p152_p3), %v1860_v12  ;;  %v1865_v13 = vld [vmem:[%s2765_s1 + $0x30] sm:$0xf] (!%p152_p3)  ;;  %v1870_v14 = vld [vmem:[%s2765_s1 + $0x34] sm:$0xf] (!%p152_p3) }
   0xe   : > { %s3011_s12 = smov (!%p178_p4, %s1737_s12), 1  ;;  %2781 = vst [vmem:[#allocation16_spill] sm:$0xff] %v1865_v13  ;;  %2782 = vst [vmem:[#allocation17_spill] sm:$0xff] %v1870_v14  ;;  %v1880_v15 = vld [vmem:[%s2765_s1 + $0x38] sm:$0xf] }
   0xf   : > { %s1677_s9 = smul.u32 24, %s3011_s12  ;;  %s1445_s10 = sshll.u32 %s3011_s12, 1  ;;  %2783 = vst [vmem:[#allocation18_spill] sm:$0xff] %v1880_v15  ;;  %v1885_v16 = vld [vmem:[%s2765_s1 + $0x3c] sm:$0xf] }
  0x10   : > { %s1855_s21 = scalar_lea.vmem %s2767_s3, %s1445_s10  ;;  %2784 = vst [vmem:[#allocation19_spill] sm:$0xff] %v1885_v16  ;;  %v1890_v17 = vld [vmem:[%s2765_s1 + $0x40] sm:$0xf]  ;;  %v1895_v18 = vld [vmem:[%s2765_s1 + $0x44] sm:$0xf] }
  0x11   : > { %s1875_s29 = scalar_lea.vmem %s2764_s0, %s1677_s9  ;;  %2785 = vst [vmem:[#allocation20_spill] sm:$0xff] %v1890_v17  ;;  %2786 = vst [vmem:[#allocation21_spill] sm:$0xff] %v1895_v18  ;;  %v1900_v19 = vld [vmem:[%s2765_s1 + $0x48] sm:$0xf]  ;;  %v1905_v20 = vld [vmem:[%s2765_s1 + $0x4c] sm:$0xf] }
  0x12   : > { %2787 = vst [vmem:[#allocation22_spill] sm:$0xff] %v1900_v19  ;;  %2788 = vst [vmem:[#allocation23_spill] sm:$0xff] %v1905_v20  ;;  %v1910_v21 = vld [vmem:[%s2765_s1 + $0x50] sm:$0xf]  ;;  %v1915_v22 = vld [vmem:[%s2765_s1 + $0x54] sm:$0xf] }
  0x13   : > { %2789 = vst [vmem:[#allocation24_spill] sm:$0xff] %v1910_v21  ;;  %2790 = vst [vmem:[#allocation25_spill] sm:$0xff] %v1915_v22  ;;  %v1920_v23 = vld [vmem:[%s2765_s1 + $0x58] sm:$0xf]  ;;  %v1925_v24 = vld [vmem:[%s2765_s1 + $0x5c] sm:$0xf] }
  0x14   : > { %2791 = vst [vmem:[#allocation26_spill] sm:$0xff] %v1920_v23  ;;  %2792 = vst [vmem:[#allocation27_spill] sm:$0xff] %v1925_v24  ;;  %v1930_v25 = vld [vmem:[%s2765_s1 + $0x60] sm:$0xf]  ;;  %v1935_v26 = vld [vmem:[%s2765_s1 + $0x64] sm:$0xf] }
  0x15   : > { %2793 = vst [vmem:[#allocation28_spill] sm:$0xff] %v1930_v25  ;;  %2794 = vst [vmem:[#allocation29_spill] sm:$0xff] %v1935_v26  ;;  %v1940_v27 = vld [vmem:[%s2765_s1 + $0x68] sm:$0xf]  ;;  %v1945_v28 = vld [vmem:[%s2765_s1 + $0x6c] sm:$0xf] }
  0x16   : > { %2795 = vst [vmem:[#allocation30_spill] sm:$0xff] %v1940_v27  ;;  %2796 = vst [vmem:[#allocation31_spill] sm:$0xff] %v1945_v28  ;;  %v1950_v29 = vld [vmem:[%s2765_s1 + $0x70] sm:$0xf]  ;;  %v1955_v30 = vld [vmem:[%s2765_s1 + $0x74] sm:$0xf] }
  0x17   : > { %2797 = vst [vmem:[#allocation32_spill] sm:$0xff] %v1950_v29  ;;  %2798 = vst [vmem:[#allocation33_spill] sm:$0xff] %v1955_v30  ;;  %v1960_v31 = vld [vmem:[%s2765_s1 + $0x78] sm:$0xf]  ;;  %v1965_v32 = vld [vmem:[%s2765_s1 + $0x7c] sm:$0xf] }
  0x18   : > { %v1970_v33 = vld [vmem:[%s2765_s1 + $0x80] sm:$0xf]  ;;  %v1975_v34 = vld [vmem:[%s2765_s1 + $0x84] sm:$0xf]  ;;  %v1980_v35 = vld [vmem:[%s2765_s1 + $0x88] sm:$0xf] }
  0x19   : > { %2799 = vst [vmem:[#allocation34_spill] sm:$0xff] %v1970_v33  ;;  %v1985_v36 = vld [vmem:[%s2765_s1 + $0x8c] sm:$0xf]  ;;  %v1990_v37 = vld [vmem:[%s2765_s1 + $0x90] sm:$0xf] }
  0x1a   : > { %v1995_v38 = vld [vmem:[%s2765_s1 + $0x94] sm:$0xf]  ;;  %v2000_v39 = vld [vmem:[%s2765_s1 + $0x98] sm:$0xf]  ;;  %v2005_v40 = vld [vmem:[%s2765_s1 + $0x9c] sm:$0xf] }
  0x1b   : > { %v2010_v41 = vld [vmem:[%s2765_s1 + $0xa0] sm:$0xf]  ;;  %v2015_v42 = vld [vmem:[%s2765_s1 + $0xa4] sm:$0xf]  ;;  %v2020_v43 = vld [vmem:[%s2765_s1 + $0xa8] sm:$0xf] }
  0x1c   : > { %v2025_v44 = vld [vmem:[%s2765_s1 + $0xac] sm:$0xf]  ;;  %v2030_v45 = vld [vmem:[%s2765_s1 + $0xb0] sm:$0xf]  ;;  %v2035_v46 = vld [vmem:[%s2765_s1 + $0xb4] sm:$0xf] }
  0x1d   : > { %v2040_v47 = vld [vmem:[%s2765_s1 + $0xb8] sm:$0xf]  ;;  %v2045_v48 = vld [vmem:[%s2765_s1 + $0xbc] sm:$0xf]  ;;  %v2050_v49 = vld [vmem:[%s2765_s1 + $0xc0] sm:$0xf] }
  0x1e   : > { %2800 = vst [vmem:[#allocation35_spill] sm:$0xff] %v2040_v47  ;;  %2801 = vst [vmem:[#allocation36_spill] sm:$0xff] %v2045_v48  ;;  %v2055_v50 = vld [vmem:[%s2765_s1 + $0xc4] sm:$0xf]  ;;  %v2060_v51 = vld [vmem:[%s2765_s1 + $0xc8] sm:$0xf] }
  0x1f   : > { %v2065_v52 = vld [vmem:[%s2765_s1 + $0xcc] sm:$0xf]  ;;  %v2070_v53 = vld [vmem:[%s2765_s1 + $0xd0] sm:$0xf]  ;;  %v2075_v54 = vld [vmem:[%s2765_s1 + $0xd4] sm:$0xf] }
  0x20   : > { %v2080_v55 = vld [vmem:[%s2765_s1 + $0xd8] sm:$0xf]  ;;  %v2085_v56 = vld [vmem:[%s2765_s1 + $0xdc] sm:$0xf]  ;;  %v2090_v57 = vld [vmem:[%s2765_s1 + $0xe0] sm:$0xf] }
  0x21   : > { %v2095_v58 = vld [vmem:[%s2765_s1 + $0xe4] sm:$0xf]  ;;  %v2100_v59 = vld [vmem:[%s2765_s1 + $0xe8] sm:$0xf]  ;;  %v2105_v60 = vld [vmem:[%s2765_s1 + $0xec] sm:$0xf] }
  0x22   : > { %v2110_v61 = vld [vmem:[%s2765_s1 + $0xf0] sm:$0xf]  ;;  %v2115_v62 = vld [vmem:[%s2765_s1 + $0xf4] sm:$0xf]  ;;  %v2120_v63 = vld [vmem:[%s2765_s1 + $0xf8] sm:$0xf] }
  0x23   : > { %2802 = vst [vmem:[#allocation37_spill] sm:$0xff] %v2120_v63  ;;  %v2125_v0 = vld [vmem:[%s2765_s1 + $0xfc] sm:$0xf]  ;;  %v2130_v47 = vld [vmem:[%s2765_s1 + $0x100] sm:$0xf] }
  0x24   : > { %2803 = vst [vmem:[#allocation38_spill] sm:$0xff] %v2125_v0  ;;  %2804 = vst [vmem:[#allocation39_spill] sm:$0xff] %v2130_v47  ;;  %v2135_v48 = vld [vmem:[%s2765_s1 + $0x104] sm:$0xf]  ;;  %v2140_v15 = vld [vmem:[%s2765_s1 + $0x108] sm:$0xf] }
  0x25   : > { %2805 = vst [vmem:[#allocation40_spill] sm:$0xff] %v2135_v48  ;;  %2806 = vst [vmem:[#allocation41_spill] sm:$0xff] %v2140_v15  ;;  %v2145_v16 = vld [vmem:[%s2765_s1 + $0x10c] sm:$0xf]  ;;  %v2150_v63 = vld [vmem:[%s2765_s1 + $0x110] sm:$0xf] }
  0x26   : > { %2807 = vst [vmem:[#allocation42_spill] sm:$0xff] %v2145_v16  ;;  %2808 = vst [vmem:[#allocation43_spill] sm:$0xff] %v2150_v63  ;;  %v2155_v47 = vld [vmem:[%s2765_s1 + $0x114] sm:$0xf]  ;;  %v2160_v48 = vld [vmem:[%s2765_s1 + $0x118] sm:$0xf] }
  0x27   : > { %2809 = vst [vmem:[#allocation44_spill] sm:$0xff] %v2155_v47  ;;  %2810 = vst [vmem:[#allocation45_spill] sm:$0xff] %v2160_v48  ;;  %v2165_v15 = vld [vmem:[%s2765_s1 + $0x11c] sm:$0xf]  ;;  %v2170_v16 = vld [vmem:[%s2765_s1 + $0x120] sm:$0xf] }
  0x28   : > { %2811 = vst [vmem:[#allocation46_spill] sm:$0xff] %v2165_v15  ;;  %2812 = vst [vmem:[#allocation47_spill] sm:$0xff] %v2170_v16  ;;  %v2175_v63 = vld [vmem:[%s2765_s1 + $0x124] sm:$0xf]  ;;  %v2180_v47 = vld [vmem:[%s2765_s1 + $0x128] sm:$0xf] }
  0x29   : > { %2813 = vst [vmem:[#allocation48_spill] sm:$0xff] %v2175_v63  ;;  %2814 = vst [vmem:[#allocation49_spill] sm:$0xff] %v2180_v47  ;;  %v2185_v48 = vld [vmem:[%s2765_s1 + $0x12c] sm:$0xf]  ;;  %v2190_v15 = vld [vmem:[%s2765_s1 + $0x130] sm:$0xf] }
  0x2a   : > { %2815 = vst [vmem:[#allocation50_spill] sm:$0xff] %v2185_v48  ;;  %2816 = vst [vmem:[#allocation51_spill] sm:$0xff] %v2190_v15  ;;  %v2195_v16 = vld [vmem:[%s2765_s1 + $0x134] sm:$0xf]  ;;  %v2200_v63 = vld [vmem:[%s2765_s1 + $0x138] sm:$0xf] }
  0x2b   : > { %2817 = vst [vmem:[#allocation52_spill] sm:$0xff] %v2195_v16  ;;  %2818 = vst [vmem:[#allocation53_spill] sm:$0xff] %v2200_v63  ;;  %v2205_v47 = vld [vmem:[%s2765_s1 + $0x13c] sm:$0xf]  ;;  %v2210_v48 = vld [vmem:[%s2765_s1 + $0x140] sm:$0xf] }
  0x2c   : > { %2819 = vst [vmem:[#allocation54_spill] sm:$0xff] %v2205_v47  ;;  %2820 = vst [vmem:[#allocation55_spill] sm:$0xff] %v2210_v48  ;;  %v2215_v15 = vld [vmem:[%s2765_s1 + $0x144] sm:$0xf]  ;;  %v2220_v16 = vld [vmem:[%s2765_s1 + $0x148] sm:$0xf] }
  0x2d   : > { %2821 = vst [vmem:[#allocation56_spill] sm:$0xff] %v2215_v15  ;;  %2822 = vst [vmem:[#allocation57_spill] sm:$0xff] %v2220_v16  ;;  %v2225_v63 = vld [vmem:[%s2765_s1 + $0x14c] sm:$0xf]  ;;  %v2230_v47 = vld [vmem:[%s2765_s1 + $0x150] sm:$0xf] }
  0x2e   : > { %2823 = vst [vmem:[#allocation58_spill] sm:$0xff] %v2225_v63  ;;  %2824 = vst [vmem:[#allocation59_spill] sm:$0xff] %v2230_v47  ;;  %v2235_v48 = vld [vmem:[%s2765_s1 + $0x154] sm:$0xf]  ;;  %v2240_v15 = vld [vmem:[%s2765_s1 + $0x158] sm:$0xf] }
  0x2f   : > { %2825 = vst [vmem:[#allocation60_spill] sm:$0xff] %v2235_v48  ;;  %2826 = vst [vmem:[#allocation61_spill] sm:$0xff] %v2240_v15  ;;  %v2245_v16 = vld [vmem:[%s2765_s1 + $0x15c] sm:$0xf]  ;;  %v2250_v63 = vld [vmem:[%s2765_s1 + $0x160] sm:$0xf] }
  0x30   : > { %2827 = vst [vmem:[#allocation62_spill] sm:$0xff] %v2245_v16  ;;  %2828 = vst [vmem:[#allocation63_spill] sm:$0xff] %v2250_v63  ;;  %v2255_v47 = vld [vmem:[%s2765_s1 + $0x164] sm:$0xf]  ;;  %v2260_v48 = vld [vmem:[%s2765_s1 + $0x168] sm:$0xf] }
  0x31   : > { %2829 = vst [vmem:[#allocation64_spill] sm:$0xff] %v2255_v47  ;;  %2830 = vst [vmem:[#allocation65_spill] sm:$0xff] %v2260_v48  ;;  %v2265_v15 = vld [vmem:[%s2765_s1 + $0x16c] sm:$0xf]  ;;  %v2270_v16 = vld [vmem:[%s2765_s1 + $0x170] sm:$0xf] }
  0x32   : > { %2831 = vst [vmem:[#allocation66_spill] sm:$0xff] %v2265_v15  ;;  %2832 = vst [vmem:[#allocation67_spill] sm:$0xff] %v2270_v16  ;;  %v2275_v63 = vld [vmem:[%s2765_s1 + $0x174] sm:$0xf]  ;;  %v2280_v47 = vld [vmem:[%s2765_s1 + $0x178] sm:$0xf] }
  0x33   : > { %2833 = vst [vmem:[#allocation68_spill] sm:$0xff] %v2275_v63  ;;  %2834 = vst [vmem:[#allocation69_spill] sm:$0xff] %v2280_v47  ;;  %v2285_v48 = vld [vmem:[%s2765_s1 + $0x17c] sm:$0xf]  ;;  %v2290_v15 = vld [vmem:[%s2765_s1 + $0x180] sm:$0xf] }
  0x34   : > { %2835 = vst [vmem:[#allocation70_spill] sm:$0xff] %v2285_v48  ;;  %2836 = vst [vmem:[#allocation71_spill] sm:$0xff] %v2290_v15  ;;  %v2295_v16 = vld [vmem:[%s2765_s1 + $0x184] sm:$0xf]  ;;  %v2300_v63 = vld [vmem:[%s2765_s1 + $0x188] sm:$0xf] }
  0x35   : > { %2837 = vst [vmem:[#allocation72_spill] sm:$0xff] %v2295_v16  ;;  %2838 = vst [vmem:[#allocation73_spill] sm:$0xff] %v2300_v63  ;;  %v2305_v47 = vld [vmem:[%s2765_s1 + $0x18c] sm:$0xf]  ;;  %v2310_v48 = vld [vmem:[%s2765_s1 + $0x190] sm:$0xf] }
  0x36   : > { %2839 = vst [vmem:[#allocation74_spill] sm:$0xff] %v2305_v47  ;;  %2840 = vst [vmem:[#allocation75_spill] sm:$0xff] %v2310_v48  ;;  %v2315_v15 = vld [vmem:[%s2765_s1 + $0x194] sm:$0xf]  ;;  %v2320_v16 = vld [vmem:[%s2765_s1 + $0x198] sm:$0xf] }
  0x37   : > { %2841 = vst [vmem:[#allocation76_spill] sm:$0xff] %v2315_v15  ;;  %2842 = vst [vmem:[#allocation77_spill] sm:$0xff] %v2320_v16  ;;  %v2325_v63 = vld [vmem:[%s2765_s1 + $0x19c] sm:$0xf]  ;;  %v2330_v47 = vld [vmem:[%s2765_s1 + $0x1a0] sm:$0xf] }
  0x38   : > { %2843 = vst [vmem:[#allocation78_spill] sm:$0xff] %v2325_v63  ;;  %2844 = vst [vmem:[#allocation79_spill] sm:$0xff] %v2330_v47  ;;  %v2335_v48 = vld [vmem:[%s2765_s1 + $0x1a4] sm:$0xf]  ;;  %v2340_v15 = vld [vmem:[%s2765_s1 + $0x1a8] sm:$0xf] }
  0x39   : > { %2845 = vst [vmem:[#allocation80_spill] sm:$0xff] %v2335_v48  ;;  %2846 = vst [vmem:[#allocation81_spill] sm:$0xff] %v2340_v15  ;;  %v2345_v16 = vld [vmem:[%s2765_s1 + $0x1ac] sm:$0xf]  ;;  %v2350_v63 = vld [vmem:[%s2765_s1 + $0x1b0] sm:$0xf] }
  0x3a   : > { %2847 = vst [vmem:[#allocation82_spill] sm:$0xff] %v2345_v16  ;;  %2848 = vst [vmem:[#allocation83_spill] sm:$0xff] %v2350_v63  ;;  %v2355_v47 = vld [vmem:[%s2765_s1 + $0x1b4] sm:$0xf]  ;;  %v2360_v48 = vld [vmem:[%s2765_s1 + $0x1b8] sm:$0xf] }
  0x3b   : > { %2849 = vst [vmem:[#allocation84_spill] sm:$0xff] %v2355_v47  ;;  %2850 = vst [vmem:[#allocation85_spill] sm:$0xff] %v2360_v48  ;;  %v2365_v15 = vld [vmem:[%s2765_s1 + $0x1bc] sm:$0xf]  ;;  %v2370_v16 = vld [vmem:[%s2765_s1 + $0x1c0] sm:$0xf] }
  0x3c   : > { %2851 = vst [vmem:[#allocation86_spill] sm:$0xff] %v2365_v15  ;;  %2852 = vst [vmem:[#allocation87_spill] sm:$0xff] %v2370_v16  ;;  %v2375_v63 = vld [vmem:[%s2765_s1 + $0x1c4] sm:$0xf]  ;;  %v2380_v47 = vld [vmem:[%s2765_s1 + $0x1c8] sm:$0xf] }
  0x3d   : > { %2853 = vst [vmem:[#allocation88_spill] sm:$0xff] %v2375_v63  ;;  %2854 = vst [vmem:[#allocation89_spill] sm:$0xff] %v2380_v47  ;;  %v2385_v48 = vld [vmem:[%s2765_s1 + $0x1cc] sm:$0xf]  ;;  %v2390_v15 = vld [vmem:[%s2765_s1 + $0x1d0] sm:$0xf] }
  0x3e   : > { %2855 = vst [vmem:[#allocation90_spill] sm:$0xff] %v2385_v48  ;;  %2856 = vst [vmem:[#allocation91_spill] sm:$0xff] %v2390_v15  ;;  %v2395_v16 = vld [vmem:[%s2765_s1 + $0x1d4] sm:$0xf]  ;;  %v2400_v63 = vld [vmem:[%s2765_s1 + $0x1d8] sm:$0xf] }
  0x3f   : > { %2857 = vst [vmem:[#allocation92_spill] sm:$0xff] %v2395_v16  ;;  %2858 = vst [vmem:[#allocation93_spill] sm:$0xff] %v2400_v63  ;;  %v2405_v47 = vld [vmem:[%s2765_s1 + $0x1dc] sm:$0xf]  ;;  %v2410_v48 = vld [vmem:[%s2765_s1 + $0x1e0] sm:$0xf] }
  0x40   : > { %2859 = vst [vmem:[#allocation94_spill] sm:$0xff] %v2405_v47  ;;  %2860 = vst [vmem:[#allocation95_spill] sm:$0xff] %v2410_v48  ;;  %v2415_v15 = vld [vmem:[%s2765_s1 + $0x1e4] sm:$0xf]  ;;  %v2420_v16 = vld [vmem:[%s2765_s1 + $0x1e8] sm:$0xf] }
  0x41   : > { %2861 = vst [vmem:[#allocation96_spill] sm:$0xff] %v2415_v15  ;;  %2862 = vst [vmem:[#allocation97_spill] sm:$0xff] %v2420_v16  ;;  %v2425_v63 = vld [vmem:[%s2765_s1 + $0x1ec] sm:$0xf]  ;;  %v2430_v47 = vld [vmem:[%s2765_s1 + $0x1f0] sm:$0xf] }
  0x42   : > { %2863 = vst [vmem:[#allocation98_spill] sm:$0xff] %v2425_v63  ;;  %2864 = vst [vmem:[#allocation99_spill] sm:$0xff] %v2430_v47  ;;  %v2435_v48 = vld [vmem:[%s2765_s1 + $0x1f4] sm:$0xf]  ;;  %v2440_v15 = vld [vmem:[%s2765_s1 + $0x1f8] sm:$0xf] }
  0x43   : > { %2865 = vst [vmem:[#allocation100_spill] sm:$0xff] %v2435_v48  ;;  %2866 = vst [vmem:[#allocation101_spill] sm:$0xff] %v2440_v15  ;;  %v2445_v16 = vld [vmem:[%s2765_s1 + $0x1fc] sm:$0xf]  ;;  %v2450_v63 = vld [vmem:[%s2765_s1 + $0x200] sm:$0xf] }
  0x44   : > { %2867 = vst [vmem:[#allocation102_spill] sm:$0xff] %v2445_v16  ;;  %2868 = vst [vmem:[#allocation103_spill] sm:$0xff] %v2450_v63  ;;  %v2455_v47 = vld [vmem:[%s2765_s1 + $0x204] sm:$0xf]  ;;  %v2460_v48 = vld [vmem:[%s2765_s1 + $0x208] sm:$0xf] }
  0x45   : > { %2869 = vst [vmem:[#allocation104_spill] sm:$0xff] %v2455_v47  ;;  %2870 = vst [vmem:[#allocation105_spill] sm:$0xff] %v2460_v48  ;;  %v2465_v15 = vld [vmem:[%s2765_s1 + $0x20c] sm:$0xf]  ;;  %v2470_v16 = vld [vmem:[%s2765_s1 + $0x210] sm:$0xf] }
  0x46   : > { %2871 = vst [vmem:[#allocation106_spill] sm:$0xff] %v2465_v15  ;;  %2872 = vst [vmem:[#allocation107_spill] sm:$0xff] %v2470_v16  ;;  %v2475_v63 = vld [vmem:[%s2765_s1 + $0x214] sm:$0xf]  ;;  %v2480_v47 = vld [vmem:[%s2765_s1 + $0x218] sm:$0xf] }
  0x47   : > { %2873 = vst [vmem:[#allocation108_spill] sm:$0xff] %v2475_v63  ;;  %2874 = vst [vmem:[#allocation109_spill] sm:$0xff] %v2480_v47  ;;  %v2485_v48 = vld [vmem:[%s2765_s1 + $0x21c] sm:$0xf]  ;;  %v2490_v15 = vld [vmem:[%s2765_s1 + $0x220] sm:$0xf] }
  0x48   : > { %2875 = vst [vmem:[#allocation110_spill] sm:$0xff] %v2485_v48  ;;  %2876 = vst [vmem:[#allocation111_spill] sm:$0xff] %v2490_v15  ;;  %v2495_v16 = vld [vmem:[%s2765_s1 + $0x224] sm:$0xf]  ;;  %v2500_v63 = vld [vmem:[%s2765_s1 + $0x228] sm:$0xf] }
  0x49   : > { %2877 = vst [vmem:[#allocation112_spill] sm:$0xff] %v2495_v16  ;;  %2878 = vst [vmem:[#allocation113_spill] sm:$0xff] %v2500_v63  ;;  %v2505_v47 = vld [vmem:[%s2765_s1 + $0x22c] sm:$0xf]  ;;  %v2510_v48 = vld [vmem:[%s2765_s1 + $0x230] sm:$0xf] }
  0x4a   : > { %2879 = vst [vmem:[#allocation114_spill] sm:$0xff] %v2505_v47  ;;  %2880 = vst [vmem:[#allocation115_spill] sm:$0xff] %v2510_v48  ;;  %v2515_v15 = vld [vmem:[%s2765_s1 + $0x234] sm:$0xf]  ;;  %v2520_v16 = vld [vmem:[%s2765_s1 + $0x238] sm:$0xf] }
  0x4b   : > { %2881 = vst [vmem:[#allocation116_spill] sm:$0xff] %v2515_v15  ;;  %2882 = vst [vmem:[#allocation117_spill] sm:$0xff] %v2520_v16  ;;  %v2525_v63 = vld [vmem:[%s2765_s1 + $0x23c] sm:$0xf] }
  0x4c   : > { %2883 = vst [vmem:[#allocation118_spill] sm:$0xff] %v2525_v63 }
  0x4d LB: >> { %v2884_v18 = vld [vmem:[#allocation21_spill] sm:$0xff]  ;;  %v2885_v17 = vld [vmem:[#allocation20_spill] sm:$0xff]  ;;  %v1507_v15 = vcombine.low %v2050_v49, %v2055_v50  ;;  %v2888_v33 = vld [vmem:[#allocation34_spill] sm:$0xff]  ;;  %v1508_v0 = vcombine.low %v2060_v51, %v2065_v52  ;;  %s1557_s26 = sshll.u32 %s1749_s25, 3  ;;  %vm371_vm0 = vsmask.f32 1280  ;;  %s1339_s28 = scalar_lea.vmem %s1855_s21, %s1749_s25  ;;  %s1749_s25 = sphi %s2527_s25, %s344_s25  }
  0x4e   : >> { %v1491_v48 = vcombine.low %v2885_v17, %v2884_v18  ;;  %v2886_v2 = vld [vmem:[#allocation5_spill] sm:$0xff]  ;;  %v2887_v1 = vld [vmem:[#allocation4_spill] sm:$0xff]  ;;  %v1499_v63 = vcombine.low %v2888_v33, %v1975_v34  ;;  %v2889_v20 = vld [vmem:[#allocation23_spill] sm:$0xff]  ;;  %s2550_s27 = scalar_lea.vmem %s1875_s29, %s1557_s26  ;;  %vm372_vm1 = vsmask.f32 3336  ;;  %v1502_v18 = vcombine.low %v2000_v39, %v2005_v40  ;;  %s344_s25 = sadd.s32 1, %s1749_s25  }
  0x4f   : >> { %v1483_v16 = vcombine.low %v2887_v1, %v2886_v2  ;;  %v2890_v19 = vld [vmem:[#allocation22_spill] sm:$0xff]  ;;  %1582 = vmatprep.subr.bf16.mxu1 %v1507_v15  ;;  %v2891_v4 = vld [vmem:[#allocation7_spill] sm:$0xff]  ;;  %v1500_v2 = vcombine.low %v1980_v35, %v1985_v36  ;;  %v2893_v22 = vld [vmem:[#allocation25_spill] sm:$0xff]  ;;  %v1509_v15 = vcombine.low %v2070_v53, %v2075_v54  ;;  %vm374_vm2 = vsmask.f32 5392  ;;  %p341_p5 = scmp.ge.s32.totalorder %s344_s25, 2  }
  0x50   : >> { %v1492_v47 = vcombine.low %v2890_v19, %v2889_v20  ;;  %1560 = vmatprep.subr.bf16.mxu0 %v1491_v48  ;;  %1583 = vmatpush3.bf16.msra.mxu1 %v1499_v63  ;;  %v2892_v3 = vld [vmem:[#allocation6_spill] sm:$0xff]  ;;  %v2894_v21 = vld [vmem:[#allocation24_spill] sm:$0xff]  ;;  %v1449_v63 = vld.sshfl [vmem:[%s2550_s27 + $0x4] sm:$0x13 pattern:$0x76325410] }
  0x51   : >> { %1561 = vmatpush3.bf16.msra.mxu0 %v1483_v16  ;;  %v1484_v1 = vcombine.low %v2892_v3, %v2891_v4  ;;  %1584 = vmatprep.subr.bf16.mxu1 %v1508_v0  ;;  %v1493_v48 = vcombine.low %v2894_v21, %v2893_v22  ;;  %v1448_v16 = vld.sshfl [vmem:[%s2550_s27] sm:$0x13 pattern:$0x76325410]  ;;  %v2895_v6 = vld [vmem:[#allocation9_spill] sm:$0xff]  ;;  %v2896_v5 = vld [vmem:[#allocation8_spill] sm:$0xff]  ;;  %v1501_v4 = vcombine.low %v1990_v37, %v1995_v38 }
  0x52   : >> { %1562 = vmatprep.subr.bf16.mxu0 %v1492_v47  ;;  %v1485_v3 = vcombine.low %v2896_v5, %v2895_v6  ;;  %v2897_v24 = vld [vmem:[#allocation27_spill] sm:$0xff]  ;;  %v2898_v23 = vld [vmem:[#allocation26_spill] sm:$0xff]  ;;  %v1510_v47 = vcombine.low %v2080_v55, %v2085_v56  ;;  %v2901_v26 = vld [vmem:[#allocation29_spill] sm:$0xff]  ;;  %vm376_vm4 = vsmask.f32 7448  ;;  %v382_v19 = vshll.u32 %v1448_v16, 16 }
  0x53   : >> { %v1494_v17 = vcombine.low %v2898_v23, %v2897_v24  ;;  %v2899_v8 = vld [vmem:[#allocation11_spill] sm:$0xff]  ;;  %v2900_v7 = vld [vmem:[#allocation10_spill] sm:$0xff]  ;;  %v2902_v25 = vld [vmem:[#allocation28_spill] sm:$0xff]  ;;  %v393_v20 = vshrl.u32 %v1449_v63, 16  ;;  %vm426_vm7 = vcmask 1040384   ;;  %vm427_vm8 = vcmask 1042434  }
  0x54   : >> { %v1486_v0 = vcombine.low %v2900_v7, %v2899_v8  ;;  %1585 = vmatpush3.bf16.msra.mxu1 %v1500_v2  ;;  %v1495_v5 = vcombine.low %v2902_v25, %v2901_v26  ;;  %v2903_v10 = vld [vmem:[#allocation13_spill] sm:$0xff]  ;;  %v2904_v9 = vld [vmem:[#allocation12_spill] sm:$0xff]  ;;  %vm373_vm3 = vmor %vm371_vm0, %vm372_vm1  ;;  %v379_v2 = vshrl.u32 %v1448_v16, 16  ;;  %v362_v7 = vcombine.high %v1448_v16, %v1448_v16 }
  0x55   : >> { %1563 = vmatpush3.bf16.msra.mxu0 %v1484_v1  ;;  %1586 = vmatprep.subr.bf16.mxu1 %v1509_v15  ;;  %v1487_v6 = vcombine.low %v2904_v9, %v2903_v10  ;;  %v1511_v1 = vcombine.low %v2090_v57, %v2095_v58  ;;  %v370_v8 = vcombine.high %v1449_v63, %v1449_v63  ;;  %v2579_v21 = vld.sshfl [vmem:[%s2550_s27] sm:$0x12 pattern:$0x76325410]  ;;  %v609_v15 = vlaneseq  ;;  %vm2582_vm5 = vmor %vm373_vm3, %vm374_vm2  ;;  %v2907_v28 = vld [vmem:[#allocation31_spill] sm:$0xff] }
  0x56   : >> { %1564 = vmatprep.subr.bf16.mxu0 %v1493_v48  ;;  %v381_v22 = vrot.slane %v379_v2, 6  ;;  %v396_v48 = vshll.u32 %v1449_v63, 16  ;;  %v384_v10 = vrot.slane %v382_v19, 7  ;;  %v388_v23 = vshll.u32 %v362_v7, 16  ;;  %v2908_v27 = vld [vmem:[#allocation30_spill] sm:$0xff]  ;;  %vm2596_vm6 = vmor %vm2582_vm5, %vm376_vm4  ;;  %v2911_v12 = vld [vmem:[#allocation15_spill] sm:$0xff] }
  0x57   : >> { %v395_v24 = vrot.slane %v393_v20, 6  ;;  %v402_v25 = vshll.u32 %v370_v8, 16  ;;  %v1503_v16 = vcombine.low %v2010_v41, %v2015_v42  ;;  %v1751_v2 = vmov 1983009808   ;;  %vm428_vm9 = vmor %vm426_vm7, %vm427_vm8  ;;  %v2912_v11 = vld [vmem:[#allocation14_spill] sm:$0xff]  ;;  %v2915_v30 = vld [vmem:[#allocation33_spill] sm:$0xff] }
  0x58   : >> { %1587 = vmatpush3.bf16.msra.mxu1 %v1501_v4  ;;  %v398_v63 = vrot.slane %v396_v48, 7  ;;  %v607_v26 = vunpack.c.l.s4 %v1751_v2  ;;  %v1451_v4 = vld.sshfl [vmem:[%s2550_s27 + $0x4] sm:$0x12 pattern:$0x76325410]  ;;  %v1496_v33 = vcombine.low %v2908_v27, %v2907_v28  ;;  %v1512_v19 = vcombine.low %v2100_v59, %v2105_v60  ;;  %v2916_v29 = vld [vmem:[#allocation32_spill] sm:$0xff] }
  0x59   : >> { %1565 = vmatpush3.bf16.msra.mxu0 %v1485_v3  ;;  %1588 = vmatprep.subr.bf16.mxu1 %v1510_v47  ;;  %v610_v3 = vshrl.u32 %v609_v15, 7  ;;  %v385_v7 = vor.u32 %v384_v10, %v381_v22  ;;  %v390_v20 = vrot.slane %v388_v23, 7  ;;  %v404_v47 = vrot.slane %v402_v25, 7  ;;  %v2917_v14 = vld [vmem:[#allocation17_spill] sm:$0xff]  ;;  %v2918_v13 = vld [vmem:[#allocation16_spill] sm:$0xff] }
  0x5a   : >> { %1566 = vmatprep.subr.bf16.mxu0 %v1494_v17  ;;  %v399_v17 = vor.u32 %v398_v63, %v395_v24  ;;  %v608_v48 = vunpack.c.0.s8 %v607_v26  ;;  %v1716_v15 = vld.sshfl [vmem:[%s2550_s27 + $0x4] sm:$0xf pattern:$0x76325410]  ;;  %v417_v2 = vcombine.high %v2579_v21, %v2579_v21  ;;  %v425_v28 = vcombine.high %v1451_v4, %v1451_v4 }
  0x5b   : >> { %v386_v27 = vrot.slane %v385_v7, 2  ;;  %vm429_vm10 = vcmask 1044484   ;;  %vm431_vm11 = vcmask 1046534   ;;  %v1452_v23 = vrot.slane %v2579_v21, 9  ;;  %1200 = vmatprep.mubr.bf16.mxu1 %v1716_v15 }
  0x5c   : >> { %1589 = vmatpush3.bf16.msra.mxu1 %v1502_v18  ;;  %v400_v9 = vrot.slane %v399_v17, 2  ;;  %v2603_v10 = vsub.s32 %v608_v48, %v610_v3  ;;  %vm430_vm12 = vmor %vm428_vm9, %vm429_vm10  ;;  %v435_v18 = vrot.slane %v417_v2, 7  ;;  %v439_v25 = vrot.slane %v425_v28, 7  ;;  %v2920_v17 = vld [vmem:[#allocation37_spill] sm:$0xff] }
  0x5d   : >> { %1567 = vmatpush3.bf16.msra.mxu0 %v1486_v0  ;;  %1590 = vmatprep.subr.bf16.mxu1 %v1511_v1  ;;  %v391_v22 = vsel %vm2596_vm6, %v386_v27, %v390_v20  ;;  %v1488_v26 = vcombine.low %v2912_v11, %v2911_v12  ;;  %v1504_v0 = vcombine.low %v2020_v43, %v2025_v44  ;;  %vm2617_vm13 = vmor %vm430_vm12, %vm431_vm11  ;;  %v1461_v21 = vld.sshfl [vmem:[%s2550_s27 + $0x8] sm:$0x13 pattern:$0x76325410]  ;;  %v2919_v20 = vld [vmem:[#allocation38_spill] sm:$0xff]  ;;  %vm1753_vm14 = vmmov 0  }
  0x5e   : >> { %1568 = vmatprep.subr.bf16.mxu0 %v1495_v5  ;;  %v2610_v24 = vsel %vm2596_vm6, %v400_v9, %v404_v47  ;;  %v1453_v5 = vrot.slane %v1451_v4, 9  ;;  %v1513_v28 = vcombine.low %v2110_v61, %v2115_v62  ;;  %v436_v63 = vsel %vm2617_vm13, %v1452_v23, %v435_v18  ;;  %v1717_v48 = vld.sshfl [vmem:[%s2550_s27] sm:$0xf pattern:$0x76325410]  ;;  %v2929_v12 = vld [vmem:[#allocation88_spill] sm:$0xff] }
  0x5f   : >> { %v614_v27 = vcombine.low %v391_v22, %v2610_v24  ;;  %v1489_v4 = vcombine.low %v2918_v13, %v2917_v14  ;;  %v1498_v7 = vcombine.low %v1960_v31, %v1965_v32  ;;  %v1514_v47 = vcombine.low %v2920_v17, %v2919_v20  ;;  %v1465_v9 = vld.sshfl [vmem:[%s2550_s27 + $0x8] sm:$0x12 pattern:$0x76325410]  ;;  %v2922_v18 = vld [vmem:[#allocation18_spill] sm:$0xff] }
  0x60   : >> { %1591 = vmatpush3.bf16.msra.mxu1 %v1503_v16  ;;  %v2631_v3 = vsel %vm2617_vm13, %v1453_v5, %v439_v25  ;;  %v484_v15 = vshll.u32 %v1461_v21, 16  ;;  %v2921_v23 = vld [vmem:[#allocation19_spill] sm:$0xff]  ;;  %v2923_v25 = vld [vmem:[#allocation36_spill] sm:$0xff] }
  0x61   : >> { %1569 = vmatpush3.bf16.msra.mxu0 %v1487_v6  ;;  %1592 = vmatprep.subr.bf16.mxu1 %v1512_v19  ;;  %v1497_v6 = vcombine.low %v2916_v29, %v2915_v30  ;;  %v621_v16 = vrot.slane %v614_v27, %v2603_v10  ;;  %v1505_v19 = vcombine.low %v2030_v45, %v2035_v46  ;;  %v2925_v27 = vld [vmem:[#allocation56_spill] sm:$0xff]  ;;  %v2928_v17 = vld [vmem:[#allocation39_spill] sm:$0xff]  ;;  %v2936_v30 = vld [vmem:[#allocation89_spill] sm:$0xff] }
  0x62   : >> { %1570 = vmatprep.subr.bf16.mxu0 %v1496_v33  ;;  %v481_v33 = vshrl.u32 %v1461_v21, 16  ;;  %v623_v2 = vcombine.low %v436_v63, %v2631_v3  ;;  %v1490_v5 = vcombine.low %v2922_v18, %v2921_v23  ;;  %v486_v11 = vrot.slane %v484_v15, 7  ;;  %v1475_v20 = vld.sshfl [vmem:[%s2550_s27 + $0xc] sm:$0x13 pattern:$0x76325410] }
  0x63   : >> { %1160 = vmatprep.mubr.bf16.mxu0 %v621_v16  ;;  %v2927_v16 = vld [vmem:[#allocation40_spill] sm:$0xff]  ;;  %v2932_v18 = vld [vmem:[#allocation71_spill] sm:$0xff]  ;;  %v562_v15 = vshrl.u32 %v1475_v20, 16 }
  0x64   : >> { %1593 = vmatpush3.bf16.msra.mxu1 %v1504_v0  ;;  %v483_v22 = vrot.slane %v481_v33, 6  ;;  %v1515_v63 = vcombine.low %v2928_v17, %v2927_v16  ;;  %v2930_v33 = vld [vmem:[#allocation87_spill] sm:$0xff]  ;;  %v630_v13 = vrot.slane %v623_v2, %v2603_v10  ;;  %v2931_v23 = vld [vmem:[#allocation72_spill] sm:$0xff]  ;;  %v2935_v17 = vld [vmem:[#allocation90_spill] sm:$0xff] }
  0x65   : >> { %1571 = vmatpush3.bf16.msra.mxu0 %v1488_v26  ;;  %1594 = vmatprep.subr.bf16.mxu1 %v1513_v28  ;;  %v2924_v26 = vld [vmem:[#allocation35_spill] sm:$0xff]  ;;  %v1531_v14 = vcombine.low %v2932_v18, %v2931_v23 }
  0x66   : >> { %1572 = vmatprep.subr.bf16.mxu0 %v1497_v6  ;;  %v1506_v0 = vcombine.low %v2924_v26, %v2923_v25  ;;  %v2926_v6 = vld [vmem:[#allocation55_spill] sm:$0xff]  ;;  %v513_v25 = vcombine.high %v1465_v9, %v1465_v9  ;;  %v465_v26 = vcombine.high %v1461_v21, %v1461_v21  ;;  %v487_v29 = vor.u32 %v486_v11, %v483_v22 }
  0x67   : >> { %v1523_v28 = vcombine.low %v2926_v6, %v2925_v27  ;;  %v546_v27 = vcombine.high %v1475_v20, %v1475_v20  ;;  %v565_v6 = vshll.u32 %v1475_v20, 16 }
  0x68   : >> { %1595 = vmatpush3.bf16.msra.mxu1 %v1505_v19  ;;  %v1467_v19 = vrot.slane %v1465_v9, 9  ;;  %v490_v2 = vshll.u32 %v465_v26, 16  ;;  %v488_v23 = vrot.slane %v487_v29, 2  ;;  %v564_v9 = vrot.slane %v562_v15, 6  ;;  %v2939_v29 = vld [vmem:[#allocation74_spill] sm:$0xff]  ;;  %v2940_v26 = vld [vmem:[#allocation73_spill] sm:$0xff] }
  0x69   : >> { %1573 = vmatpush3.bf16.msra.mxu0 %v1489_v4  ;;  %1596 = vmatprep.subr.bf16.mxu1 %v1514_v47  ;;  %v1539_v4 = vcombine.low %v2930_v33, %v2929_v12  ;;  %v2934_v47 = vld [vmem:[#allocation57_spill] sm:$0xff]  ;;  %v1540_v12 = vcombine.low %v2936_v30, %v2935_v17  ;;  %v520_v33 = vrot.slane %v513_v25, 7  ;;  %v567_v21 = vrot.slane %v565_v6, 7  ;;  %v2937_v25 = vld [vmem:[#allocation42_spill] sm:$0xff]  ;;  %v2942_v6 = vld [vmem:[#allocation59_spill] sm:$0xff] }
  0x6a   : >> { %1574 = vmatprep.subr.bf16.mxu0 %v1498_v7  ;;  %v2933_v7 = vld [vmem:[#allocation58_spill] sm:$0xff]  ;;  %v571_v11 = vshll.u32 %v546_v27, 16  ;;  %v1479_v30 = vld.sshfl [vmem:[%s2550_s27 + $0xc] sm:$0x12 pattern:$0x76325410]  ;;  %v1532_v15 = vcombine.low %v2940_v26, %v2939_v29 }
  0x6b   : >> { %v1524_v16 = vcombine.low %v2934_v47, %v2933_v7  ;;  %v521_v22 = vsel %vm2617_vm13, %v1467_v19, %v520_v33  ;;  %v568_v20 = vor.u32 %v567_v21, %v564_v9  ;;  %v2941_v27 = vld [vmem:[#allocation60_spill] sm:$0xff]  ;;  %v594_v47 = vcombine.high %v1479_v30, %v1479_v30  ;;  %v2948_v21 = vld [vmem:[#allocation75_spill] sm:$0xff]  ;;  %v2953_v26 = vld [vmem:[#allocation46_spill] sm:$0xff] }
  0x6c   : >> { %1597 = vmatpush3.bf16.msra.mxu1 %v1506_v0  ;;  %v652_v0 = vcombine.low %v2631_v3, %v521_v22  ;;  %v573_v18 = vrot.slane %v571_v11, 7  ;;  %v1525_v7 = vcombine.low %v2942_v6, %v2941_v27  ;;  %v1481_v17 = vrot.slane %v1479_v30, 9  ;;  %v2947_v9 = vld [vmem:[#allocation76_spill] sm:$0xff]  ;;  %v2951_v30 = vld [vmem:[#allocation94_spill] sm:$0xff] }
  0x6d   : >> { %1575 = vmatpush3.bf16.msra.mxu0 %v1490_v5  ;;  %1626 = vmatprep.subr.bf16.mxu1 %v1539_v4  ;;  %v492_v5 = vrot.slane %v490_v2, 7  ;;  %v2945_v2 = vld [vmem:[#allocation44_spill] sm:$0xff]  ;;  %v1533_v11 = vcombine.low %v2948_v21, %v2947_v9  ;;  %v2955_v6 = vld [vmem:[#allocation78_spill] sm:$0xff] }
  0x6e   : >> { %1604 = vmatprep.subr.bf16.mxu0 %v1523_v28  ;;  %v2938_v28 = vld [vmem:[#allocation41_spill] sm:$0xff]  ;;  %v659_v3 = vrot.slane %v652_v0, %v2603_v10  ;;  %v601_v0 = vrot.slane %v594_v47, 7  ;;  %v2960_v47 = vld [vmem:[#allocation95_spill] sm:$0xff]  ;;  %v2965_v21 = vld [vmem:[#allocation66_spill] sm:$0xff] }
  0x6f   : >> { %1201 = vmatmul.mubr.bf16.vlgmr.msra.gmra.mrb[0].mxu1 %v630_v13  ;;  %v1516_v4 = vcombine.low %v2938_v28, %v2937_v25  ;;  %v2944_v13 = vld [vmem:[#allocation91_spill] sm:$0xff]  ;;  %v2952_v28 = vld [vmem:[#allocation93_spill] sm:$0xff] }
  0x70   : >> { %1161 = vmatmul.mubr.bf16.vlgmr.msra.gmra.mrb[0].mxu0 %v1717_v48  ;;  %1627 = vmatpush3.bf16.msra.mxu1 %v1531_v14  ;;  %v2943_v48 = vld [vmem:[#allocation92_spill] sm:$0xff]  ;;  %v569_v14 = vrot.slane %v568_v20, 2  ;;  %v1542_v29 = vcombine.low %v2952_v28, %v2951_v30  ;;  %v2970_v30 = vld [vmem:[#allocation49_spill] sm:$0xff] }
  0x71   : >> { %1605 = vmatpush3.bf16.msra.mxu0 %v1515_v63  ;;  %1628 = vmatprep.subr.bf16.mxu1 %v1540_v12  ;;  %v1541_v19 = vcombine.low %v2944_v13, %v2943_v48  ;;  %v493_v63 = vsel %vm2596_vm6, %v488_v23, %v492_v5  ;;  %v2949_v23 = vld [vmem:[#allocation62_spill] sm:$0xff]  ;;  %v2950_v5 = vld [vmem:[#allocation61_spill] sm:$0xff]  ;;  %v2957_v13 = vld [vmem:[#allocation64_spill] sm:$0xff] }
  0x72   : >> { %1606 = vmatprep.subr.bf16.mxu0 %v1524_v16  ;;  %1240 = vmatprep.mubr.bf16.mxu0 %v659_v3  ;;  %v574_v33 = vsel %vm2596_vm6, %v569_v14, %v573_v18  ;;  %v2946_v16 = vld [vmem:[#allocation43_spill] sm:$0xff]  ;;  %v1526_v20 = vcombine.low %v2950_v5, %v2949_v23  ;;  %v602_v18 = vsel %vm2617_vm13, %v1481_v17, %v601_v0  ;;  %v2959_v14 = vld [vmem:[#allocation96_spill] sm:$0xff]  ;;  %v2967_v0 = vld [vmem:[#allocation98_spill] sm:$0xff] }
  0x73   : >> { %v1517_v12 = vcombine.low %v2946_v16, %v2945_v2  ;;  %v672_v25 = vcombine.low %v493_v63, %v574_v33  ;;  %v1543_v33 = vcombine.low %v2960_v47, %v2959_v14  ;;  %v2962_v17 = vld [vmem:[#allocation47_spill] sm:$0xff]  ;;  %v2963_v16 = vld [vmem:[#allocation80_spill] sm:$0xff]  ;;  %v2968_v23 = vld [vmem:[#allocation97_spill] sm:$0xff] }
  0x74   : >> { %1629 = vmatpush3.bf16.msra.mxu1 %v1532_v15  ;;  %v2954_v15 = vld [vmem:[#allocation45_spill] sm:$0xff]  ;;  %v1544_v5 = vcombine.low %v2968_v23, %v2967_v0  ;;  %v2980_v14 = vld [vmem:[#allocation83_spill] sm:$0xff]  ;;  %v2987_v23 = vld [vmem:[#allocation86_spill] sm:$0xff] }
  0x75   : >> { %1607 = vmatpush3.bf16.msra.mxu0 %v1516_v4  ;;  %1630 = vmatprep.subr.bf16.mxu1 %v1541_v19  ;;  %v679_v8 = vrot.slane %v672_v25, %v2603_v10  ;;  %v681_v4 = vcombine.low %v521_v22, %v602_v18  ;;  %v1518_v27 = vcombine.low %v2954_v15, %v2953_v26  ;;  %v2958_v19 = vld [vmem:[#allocation63_spill] sm:$0xff]  ;;  %v2961_v22 = vld [vmem:[#allocation48_spill] sm:$0xff] }
  0x76   : >> { %1608 = vmatprep.subr.bf16.mxu0 %v1525_v7  ;;  %v2956_v7 = vld [vmem:[#allocation77_spill] sm:$0xff]  ;;  %v1527_v3 = vcombine.low %v2958_v19, %v2957_v13  ;;  %v1519_v2 = vcombine.low %v2962_v17, %v2961_v22  ;;  %v2974_v26 = vld [vmem:[#allocation67_spill] sm:$0xff] }
  0x77   : >> { %v1534_v48 = vcombine.low %v2956_v7, %v2955_v6  ;;  %v2699_v1 = vrot.slane %v681_v4, %v2603_v10  ;;  %1280 = vmatprep.mubr.bf16.mxu1 %v679_v8  ;;  %v2972_v8 = vld [vmem:[#allocation81_spill] sm:$0xff]  ;;  %v2973_v4 = vld [vmem:[#allocation68_spill] sm:$0xff]  ;;  %v2976_v6 = vld [vmem:[#allocation99_spill] sm:$0xff] }
  0x78   : >> { %1631 = vmatpush3.bf16.msra.mxu1 %v1533_v11  ;;  %v2966_v11 = vld [vmem:[#allocation65_spill] sm:$0xff]  ;;  %v1529_v15 = vcombine.low %v2974_v26, %v2973_v4  ;;  %v2978_v13 = vld [vmem:[#allocation51_spill] sm:$0xff]  ;;  %v2993_v26 = vld [vmem:[#allocation108_spill] sm:$0xff] }
  0x79   : >> { %1609 = vmatpush3.bf16.msra.mxu0 %v1517_v12  ;;  %1632 = vmatprep.subr.bf16.mxu1 %v1542_v29  ;;  %v2964_v12 = vld [vmem:[#allocation79_spill] sm:$0xff]  ;;  %v1528_v25 = vcombine.low %v2966_v11, %v2965_v21  ;;  %v2971_v29 = vld [vmem:[#allocation82_spill] sm:$0xff]  ;;  %v2982_v22 = vld [vmem:[#allocation69_spill] sm:$0xff] }
  0x7a   : >> { %1610 = vmatprep.subr.bf16.mxu0 %v1526_v20  ;;  %v1535_v9 = vcombine.low %v2964_v12, %v2963_v16  ;;  %v2969_v20 = vld [vmem:[#allocation50_spill] sm:$0xff]  ;;  %v1536_v18 = vcombine.low %v2972_v8, %v2971_v29  ;;  %v2984_v16 = vld [vmem:[#allocation101_spill] sm:$0xff]  ;;  %v1718_v21 = vld.sshfl [vmem:[%s2550_s27 + $0x8] sm:$0xf pattern:$0x76325410] }
  0x7b   : >> { %v1520_v28 = vcombine.low %v2970_v30, %v2969_v20  ;;  %v2985_v11 = vld [vmem:[#allocation54_spill] sm:$0xff]  ;;  %v2990_v29 = vld [vmem:[#allocation103_spill] sm:$0xff] }
  0x7c   : >> { %1633 = vmatpush3.bf16.msra.mxu1 %v1534_v48  ;;  %v2977_v48 = vld [vmem:[#allocation52_spill] sm:$0xff] }
  0x7d   : >> { %1611 = vmatpush3.bf16.msra.mxu0 %v1518_v27  ;;  %1634 = vmatprep.subr.bf16.mxu1 %v1543_v33  ;;  %v2975_v27 = vld [vmem:[#allocation100_spill] sm:$0xff]  ;;  %v1521_v19 = vcombine.low %v2978_v13, %v2977_v48  ;;  %v2981_v33 = vld [vmem:[#allocation70_spill] sm:$0xff]  ;;  %v2998_v13 = vld [vmem:[#allocation111_spill] sm:$0xff] }
  0x7e   : >> { %1612 = vmatprep.subr.bf16.mxu0 %v1527_v3  ;;  %v1545_v7 = vcombine.low %v2976_v6, %v2975_v27  ;;  %v2979_v3 = vld [vmem:[#allocation84_spill] sm:$0xff]  ;;  %v1530_v17 = vcombine.low %v2982_v22, %v2981_v33  ;;  %v2995_v27 = vld [vmem:[#allocation110_spill] sm:$0xff]  ;;  %v2996_v6 = vld [vmem:[#allocation109_spill] sm:$0xff] }
  0x7f   : >> { %v1537_v47 = vcombine.low %v2980_v14, %v2979_v3  ;;  %v2997_v48 = vld [vmem:[#allocation112_spill] sm:$0xff]  ;;  %v2999_v3 = vld [vmem:[#allocation114_spill] sm:$0xff]  ;;  %v3000_v14 = vld [vmem:[#allocation113_spill] sm:$0xff] }
  0x80   : >> { %1635 = vmatpush3.bf16.msra.mxu1 %v1535_v9  ;;  %v643_v9 = vcombine.low %v2610_v24, %v493_v63  ;;  %v2991_v24 = vld [vmem:[#allocation106_spill] sm:$0xff]  ;;  %v2992_v63 = vld [vmem:[#allocation105_spill] sm:$0xff]  ;;  %v3001_v33 = vld [vmem:[#allocation116_spill] sm:$0xff] }
  0x81   : >> { %1613 = vmatpush3.bf16.msra.mxu0 %v1519_v2  ;;  %1636 = vmatprep.subr.bf16.mxu1 %v1544_v5  ;;  %v2983_v2 = vld [vmem:[#allocation102_spill] sm:$0xff]  ;;  %v2988_v5 = vld [vmem:[#allocation85_spill] sm:$0xff]  ;;  %v1548_v4 = vcombine.low %v2992_v63, %v2991_v24  ;;  %v3002_v22 = vld [vmem:[#allocation115_spill] sm:$0xff] }
  0x82   : >> { %1614 = vmatprep.subr.bf16.mxu0 %v1528_v25  ;;  %v1546_v12 = vcombine.low %v2984_v16, %v2983_v2  ;;  %v2986_v25 = vld [vmem:[#allocation53_spill] sm:$0xff]  ;;  %v1538_v20 = vcombine.low %v2988_v5, %v2987_v23  ;;  %v650_v30 = vrot.slane %v643_v9, %v2603_v10  ;;  %v3003_v2 = vld [vmem:[#allocation118_spill] sm:$0xff] }
  0x83   : >> { %v1522_v0 = vcombine.low %v2986_v25, %v2985_v11  ;;  %v3004_v16 = vld [vmem:[#allocation117_spill] sm:$0xff] }
  0x84   : >> { %1637 = vmatpush3.bf16.msra.mxu1 %v1536_v18  ;;  %v1752_v18 = vmov 0.0  }
  0x85   : >> { %1615 = vmatpush3.bf16.msra.mxu0 %v1520_v28  ;;  %1638 = vmatprep.subr.bf16.mxu1 %v1545_v7  ;;  %v2989_v28 = vld [vmem:[#allocation104_spill] sm:$0xff]  ;;  %v1550_v7 = vcombine.low %v2996_v6, %v2995_v27 }
  0x86   : >> { %1616 = vmatprep.subr.bf16.mxu0 %v1529_v15  ;;  %v1547_v8 = vcombine.low %v2990_v29, %v2989_v28  ;;  %v2994_v15 = vld [vmem:[#allocation107_spill] sm:$0xff] }
  0x87   : >> { %v1549_v10 = vcombine.low %v2994_v15, %v2993_v26  ;;  %v3005_v29 = vld [vmem:[#allocation3_spill] sm:$0xff] }
  0x88   : >> { %1639 = vmatpush3.bf16.msra.mxu1 %v1537_v47  ;;  %v1552_v47 = vcombine.low %v3000_v14, %v2999_v3 }
  0x89   : >> { %1617 = vmatpush3.bf16.msra.mxu0 %v1521_v19  ;;  %1640 = vmatprep.subr.bf16.mxu1 %v1546_v12  ;;  %v1551_v19 = vcombine.low %v2998_v13, %v2997_v48  ;;  %v1554_v12 = vcombine.low %v3004_v16, %v3003_v2 }
  0x8a   : >> { %1618 = vmatprep.subr.bf16.mxu0 %v1530_v17  ;;  %v1553_v17 = vcombine.low %v3002_v22, %v3001_v33 }
  0x8c   : >> { %1641 = vmatpush3.bf16.msra.mxu1 %v1538_v20 }
  0x8d   : >> { %1619 = vmatpush3.bf16.msra.mxu0 %v1522_v0 }
  0x8e   : >> { %1657 = vmatprep.subr.bf16.mxu0 %v1752_v18 }
  0x8f   : >> { %1281 = vmatmul.mubr.bf16.vlgmr.msra.gmra.mrb[4].mxu1 %v1718_v21 }
  0x90   : >> { %1241 = vmatmul.mubr.bf16.vlgmr.msra.gmra.mrb[4].mxu0 %v650_v30 }
  0x91   : >> { %1658 = vmatpush3.bf16.msra.mxu0 %v1547_v8  ;;  %1673 = vmatprep.mubr.msk.bf16.mxu0 %vm1753_vm14, %v1752_v18 }
  0x92   : >> { %1659 = vmatprep.subr.bf16.mxu0 %v1752_v18 }
  0x95   : >> { %1660 = vmatpush3.bf16.msra.mxu0 %v1548_v4 }
  0x96   : >> { %1661 = vmatprep.subr.bf16.mxu0 %v1752_v18 }
  0x99   : >> { %1662 = vmatpush3.bf16.msra.mxu0 %v1549_v10 }
  0x9a   : >> { %1663 = vmatprep.subr.bf16.mxu0 %v1752_v18 }
  0x9d   : >> { %1664 = vmatpush3.bf16.msra.mxu0 %v1550_v7 }
  0x9e   : >> { %1665 = vmatprep.subr.bf16.mxu0 %v1752_v18 }
  0xa1   : >> { %1666 = vmatpush3.bf16.msra.mxu0 %v1551_v19 }
  0xa2   : >> { %1667 = vmatprep.subr.bf16.mxu0 %v1752_v18 }
  0xa5   : >> { %1668 = vmatpush3.bf16.msra.mxu0 %v1552_v47 }
  0xa6   : >> { %1669 = vmatprep.subr.bf16.mxu0 %v1752_v18 }
  0xa9   : >> { %1670 = vmatpush3.bf16.msra.mxu0 %v1553_v17 }
  0xaa   : >> { %1671 = vmatprep.subr.bf16.mxu0 %v1752_v18 }
  0xad   : >> { %1672 = vmatpush3.bf16.msra.mxu0 %v1554_v12 }
  0xb0   : >> { %1674 = vmatmul.mubr.bf16.vlgmr.msra.gmra.mrb[8].mxu0 %v2699_v1 }
 0x142   : >> { %v1598_v21 = vpop.f32.mrb[0].mxu1 }
 0x143   : >> { %v1576_v9 = vpop.f32.mrb[0].mxu0  ;;  %v1599_v25 = vpop.f32.mrb[1].mxu1 }
 0x144   : >> { %v1577_v11 = vpop.f32.mrb[1].mxu0  ;;  %v1600_v5 = vadd.f32 %v1599_v25, %v1598_v21  ;;  %v1601_v20 = vpop.f32.mrb[2].mxu1 }
 0x145   : >> { %v1578_v0 = vadd.f32 %v1577_v11, %v1576_v9  ;;  %v1579_v23 = vpop.f32.mrb[2].mxu0  ;;  %v1602_v28 = vpop.f32.mrb[3].mxu1 }
 0x146   : >> { %v1580_v30 = vpop.f32.mrb[3].mxu0 }
 0x147   : >> { %v1163_v8 = vadd.f32 %v1578_v0, %v3005_v29 }
 0x149   : >> { %v1203_v24 = vadd.f32 %v1600_v5, %v1163_v8 }
 0x162   : >> { %v1642_v4 = vpop.f32.mrb[4].mxu1 }
 0x163   : >> { %v1620_v63 = vpop.f32.mrb[4].mxu0  ;;  %v1643_v18 = vpop.f32.mrb[5].mxu1 }
 0x164   : >> { %v1621_v26 = vpop.f32.mrb[5].mxu0  ;;  %v1644_v1 = vadd.f32 %v1643_v18, %v1642_v4  ;;  %v1645_v27 = vpop.f32.mrb[6].mxu1 }
 0x165   : >> { %v1622_v15 = vadd.f32 %v1621_v26, %v1620_v63  ;;  %v1623_v10 = vpop.f32.mrb[6].mxu0  ;;  %v1646_v7 = vpop.f32.mrb[7].mxu1 }
 0x166   : >> { %v1624_v6 = vpop.f32.mrb[7].mxu0 }
 0x167   : >> { %v1243_v48 = vadd.f32 %v1622_v15, %v1203_v24 }
 0x169   : >> { %v1283_v13 = vadd.f32 %v1644_v1, %v1243_v48 }
 0x183   : >> { %v1322_v19 = vpop.f32.mrb[8].mxu0 }
 0x184   : >> { %v1323_v3 = vadd.f32 %v1322_v19, %v1283_v13  ;;  %v1675_v14 = vpop.f32.mrb[9].mxu0 }
 0x185   : >> { %v1325_v47 = vpop.f32.mrb[10].mxu0 }
 0x186   : >> { %v1328_v33 = vmax.f32 %v1323_v3, 0.0  ;;  %v1676_v22 = vpop.f32.mrb[11].mxu0 }
 0x188   : >> { %v1330_v17 = vrot.slane %v1328_v33, 4 }
 0x18a   : >> { %v1332_v2 = vmax.f32 %v1328_v33, %v1330_v17 }
 0x18c   : >> { %1333 = vst [vmem:[#allocation2] sm:$0xf] %v1332_v2 }
 0x192   : > { %343 = sbr.rel (!%p341_p5) target bundleno = 77 (0x4d), region = 74 }
 0x193   : >> { %v1334_v16 = vld [vmem:[#allocation2] ss:$2 sm:$0x3]  ;;  %v1336_v12 = vld [vmem:[#allocation2 + $0x1] ss:$2 sm:$0x3] }
 0x194   : >> { %v1337_v9 = vmax.f32 %v1334_v16, %v1336_v12 }
 0x196   : >> { %v1338_v21 = vpack.c.bf16 %v1337_v9, %v1337_v9 }
 0x198   : >> { %1340 = vst [vmem:[%s1339_s28] sm:$0x1] %v1338_v21 }
 0x199 PF: > { %s13_s14 = sadd.s32 1, %s1745_s14   ;;  %s3006_s12 = smov %s1741_s13 }
 0x19a   : > { %p10_p6 = scmp.ge.s32.totalorder %s13_s14, 4   ;;  %s3007_s13 = smov %s3009_s15 }
 0x19c   :  { %12 = sbr.rel (!%p10_p6) target bundleno = 2 (0x2), region = 85 }

// kernel: cnn5_forward.11
= control target key start
LH: loop header
LB: loop body
LE: loop exit
PB: predicated region body
PF: predicated region fallthrough
CT: control target
= control target key end

     0   :  { %v381_v1 = vmov 0.0   ;;  %vm382_vm0 = vmmov 0   ;;  %s483_s0 = inlined_call_operand.vmem [shape: bf16[2,128], index: 0, kind: input, shape index: {}]   ;;  %s484_s1 = inlined_call_operand.vmem [shape: bf16[128,128], index: 1, kind: input, shape index: {}]   ;;  %s485_s2 = inlined_call_operand.vmem [shape: f32[1,128], index: 2, kind: input, shape index: {}]   ;;  %s486_s3 = inlined_call_operand.vmem [shape: bf16[128,128], index: 3, kind: input, shape index: {}]   ;;  %s487_s4 = inlined_call_operand.vmem [shape: f32[1,128], index: 4, kind: input, shape index: {}]   ;;  %s488_s5 = inlined_call_operand.hbm [shape: f32[2,128], index: 5, kind: output, shape index: {}]  }
   0x1   :  { %v341_v0 = vld [vmem:[%s484_s1] sm:$0xff]   ;;  %298 = vmatprep.subr.bf16.mxu0 %v381_v1  ;;  %318 = vmatprep.subr.bf16.mxu1 %v381_v1  ;;  %v342_v2 = vld [vmem:[%s484_s1 + $0x8] sm:$0xff]   ;;  %v343_v3 = vld [vmem:[%s484_s1 + $0x10] sm:$0xff]  }
   0x2   :  { %299 = vmatpush3.bf16.msra.mxu0 %v341_v0  ;;  %314 = vmatprep.mubr.msk.bf16.mxu0 %vm382_vm0, %v381_v1  ;;  %v349_v4 = vld [vmem:[%s486_s3] sm:$0xff]   ;;  %v344_v5 = vld [vmem:[%s484_s1 + $0x18] sm:$0xff]   ;;  %v350_v6 = vld [vmem:[%s486_s3 + $0x8] sm:$0xff]  }
   0x3   :  { %300 = vmatprep.subr.bf16.mxu0 %v381_v1  ;;  %334 = vmatprep.mubr.msk.bf16.mxu1 %vm382_vm0, %v381_v1  ;;  %v345_v7 = vld [vmem:[%s484_s1 + $0x20] sm:$0xff]   ;;  %v351_v8 = vld [vmem:[%s486_s3 + $0x10] sm:$0xff]  }
   0x4   :  { %319 = vmatpush3.bf16.msra.mxu1 %v349_v4 }
   0x5   :  { %320 = vmatprep.subr.bf16.mxu1 %v381_v1 }
   0x6   :  { %301 = vmatpush3.bf16.msra.mxu0 %v342_v2 }
   0x7   :  { %302 = vmatprep.subr.bf16.mxu0 %v381_v1 }
   0x8   :  { %321 = vmatpush3.bf16.msra.mxu1 %v350_v6 }
   0x9   :  { %322 = vmatprep.subr.bf16.mxu1 %v381_v1 }
   0xa   :  { %303 = vmatpush3.bf16.msra.mxu0 %v343_v3 }
   0xb   :  { %304 = vmatprep.subr.bf16.mxu0 %v381_v1 }
   0xe   :  { %305 = vmatpush3.bf16.msra.mxu0 %v344_v5 }
   0xf   :  { %306 = vmatprep.subr.bf16.mxu0 %v381_v1 }
  0x10   :  { %10 = vsyncpa [#allocation3], 0  ;;  %v346_v9 = vld [vmem:[%s484_s1 + $0x28] sm:$0xff]   ;;  %323 = vmatpush3.bf16.msra.mxu1 %v351_v8  ;;  %v352_v10 = vld [vmem:[%s486_s3 + $0x18] sm:$0xff]   ;;  %s383_s29 = smov [#allocation2]  }
  0x11   :  { %324 = vmatprep.subr.bf16.mxu1 %v381_v1  ;;  %v347_v11 = vld [vmem:[%s484_s1 + $0x30] sm:$0xff]   ;;  %v353_v12 = vld [vmem:[%s486_s3 + $0x20] sm:$0xff]   ;;  %v348_v13 = vld [vmem:[%s484_s1 + $0x38] sm:$0xff]   ;;  %s254_s30 = sshll.u32 %s383_s29, 4  ;;  %s255_s30 = int_to_ptr.vmem [resolvable:$true] %s254_s30 }
  0x12   :  { %307 = vmatpush3.bf16.msra.mxu0 %v345_v7  ;;  %v354_v14 = vld [vmem:[%s486_s3 + $0x28] sm:$0xff]   ;;  %v22_v15 = vld [vmem:[%s483_s0] sm:$0x1]  ;;  %v355_v16 = vld [vmem:[%s486_s3 + $0x30] sm:$0xff]   ;;  %p362_p1 = scmp.lt.s32.totalorder %s255_s30, %s255_s30 }
  0x13   :  { %308 = vmatprep.subr.bf16.mxu0 %v381_v1  ;;  %v356_v17 = vld [vmem:[%s486_s3 + $0x38] sm:$0xff]   ;;  %v262_v18 = vld [vmem:[%s485_s2] ss:$0 sm:$0xff]  ;;  %s357_s2 = scalar_lea.vmem %s255_s30, 32 }
  0x14   :  { %325 = vmatpush3.bf16.msra.mxu1 %v352_v10  ;;  %v271_v26 = vld [vmem:[%s487_s4] ss:$0 sm:$0xff]  ;;  %p358_p0 = scmp.ne.s32.totalorder %s255_s30, %s357_s2  ;;  %p363_p2 = scmp.lt.s32.totalorder %s357_s2, %s357_s2 }
  0x15   :  { %326 = vmatprep.subr.bf16.mxu1 %v381_v1 }
  0x16   :  { %309 = vmatpush3.bf16.msra.mxu0 %v346_v9  ;;  %p364_p3 = por %p363_p2, %p362_p1 }
  0x17   :  { %310 = vmatprep.subr.bf16.mxu0 %v381_v1 }
  0x18   :  { %327 = vmatpush3.bf16.msra.mxu1 %v353_v12  ;;  %p365_p4 = pnand %p364_p3, %p358_p0 }
  0x19   :  { %328 = vmatprep.subr.bf16.mxu1 %v381_v1 }
  0x1a   :  { %311 = vmatpush3.bf16.msra.mxu0 %v347_v11 }
  0x1b   :  { %312 = vmatprep.subr.bf16.mxu0 %v381_v1 }
  0x1c   :  { %329 = vmatpush3.bf16.msra.mxu1 %v354_v14 }
  0x1d   :  { %330 = vmatprep.subr.bf16.mxu1 %v381_v1 }
  0x1e   :  { %313 = vmatpush3.bf16.msra.mxu0 %v348_v13 }
  0x20   :  { %331 = vmatpush3.bf16.msra.mxu1 %v355_v16 }
  0x21   :  { %315 = vmatmul.mubr.bf16.vlgmr.msra.gmra.mrb[0].mxu0 %v22_v15  ;;  %332 = vmatprep.subr.bf16.mxu1 %v381_v1 }
  0x24   :  { %333 = vmatpush3.bf16.msra.mxu1 %v356_v17 }
  0xf4   :  { %v128_v19 = vpop.f32.mrb[0].mxu0 }
  0xf5   :  { %v129_v20 = vadd.f32 %v262_v18, %v128_v19  ;;  %v316_v21 = vpop.f32.mrb[1].mxu0 }
  0xf6   :  { %v131_v22 = vpop.f32.mrb[2].mxu0 }
  0xf7   :  { %v134_v23 = vmax.f32 %v129_v20, 0.0  ;;  %v317_v24 = vpop.f32.mrb[3].mxu0 }
  0xf9   :  { %v135_v25 = vpack.c.bf16 %v134_v23, %v134_v23 }
  0xfb   :  { %335 = vmatmul.mubr.bf16.vlgmr.msra.gmra.mrb[0].mxu1 %v135_v25 }
 0x1ce   :  { %v241_v27 = vpop.f32.mrb[0].mxu1 }
 0x1cf   :  { %v242_v28 = vadd.f32 %v271_v26, %v241_v27  ;;  %v336_v29 = vpop.f32.mrb[1].mxu1 }
 0x1d0   :  { %v244_v30 = vpop.f32.mrb[2].mxu1 }
 0x1d1   :  { %247 = vst [vmem:[#allocation2] sm:$0x3] %v242_v28  ;;  %v337_v31 = vpop.f32.mrb[3].mxu1 }
 0x1d2   :  { %368 = shalt.err (!%p365_p4)
}
 0x1d3   :  { %s369_s4 = scalar_lea.hbm %s488_s5, 32 }
 0x1d4   :  { %p370_p5 = scmp.ne.s32.totalorder %s488_s5, %s369_s4  ;;  %p373_p6 = scmp.lt.u32.totalorder %s369_s4, %s488_s5 }
 0x1d6   :  { %p375_p7 = pnand %p373_p6, %p370_p5 }
 0x1d8   :  { %378 = shalt.err (!%p375_p7)
}
 0x1d9   :  { %257 = dma.vmem_to_hbm [thread:$0]  %s255_s30, 32, %s488_s5, [#allocation3]  }
 0x1da   :  { %379 = dma.done.wait [#allocation3], 32  }
 0x1db   :  { %380 = vsyncadd [#allocation3], 4294967264 }
 0x1dc   :  { %261 = vsyncpa [#allocation3], 1 }

// kernel: cnn5_forward.10
= control target key start
LH: loop header
LB: loop body
LE: loop exit
PB: predicated region body
PF: predicated region fallthrough
CT: control target
= control target key end

     0   :  { %s1795_s12 = smov 0   ;;  %s1797_s13 = smov 0   ;;  %s2115_s0 = inlined_call_operand.vmem [shape: bf16[2,4,4,128], index: 0, kind: input, shape index: {}]   ;;  %s2116_s1 = inlined_call_operand.vmem [shape: bf16[1152,128], index: 1, kind: input, shape index: {}]   ;;  %s2117_s2 = inlined_call_operand.vmem [shape: f32[1,128], index: 2, kind: input, shape index: {}]   ;;  %s2118_s3 = inlined_call_operand.vmem [shape: bf16[2,1,1,128], index: 3, kind: output, shape index: {}]  }
   0x1   :  { %s1799_s14 = smov 0  }
   0x2 LB: > { %s25_s15 = sadd.s32 1, %s1766_s13  ;;  %p1420_p0 = scmp.ge.s32.totalorder %s1770_s14, 1  ;;  %s1770_s14 = sphi %s1799_s14, %s13_s14   ;;  %s1766_s13 = sphi %s1797_s13, %s2122_s13   ;;  %s1762_s12 = sphi %s1795_s12, %s2121_s12  }
   0x3   : > { %p27_p1 = scmp.ge.s32.totalorder %s25_s15, 2  ;;  %p151_p2 = scmp.lt.s32.totalorder %s1770_s14, 3 }
   0x5   : > { %s2124_s15 = smov (%p27_p1, %s25_s15), 0  ;;  %p152_p3 = pnand %p1420_p0, %p151_p2 }
   0x6   : > { %v1676_v0 = vld [vmem:[%s2116_s1 + $0x40] sm:$0xff] (!%p152_p3)   ;;  %v1680_v4 = vld [vmem:[%s2116_s1 + $0x48] sm:$0xff] (!%p152_p3)   ;;  %v1684_v8 = vld [vmem:[%s2116_s1 + $0x50] sm:$0xff] (!%p152_p3)   ;;  %p176_p4 = scmp.lt.s32.totalorder (!%p152_p3), %s1762_s12, 1  ;;  %vm358_vm0 = vsmask.f32 (!%p152_p3), 256  ;;  %v543_v34 = vlaneseq (!%p152_p3) }
   0x7   : > { %155 = sbr.rel (%p152_p3) target bundleno = 337 (0x151), region = 32  ;;  %v1677_v1 = vld [vmem:[%s2116_s1] sm:$0xff] (!%p152_p3)   ;;  %1532 = vmatprep.subr.bf16.mxu0 (!%p152_p3), %v1676_v0  ;;  %v1681_v5 = vld [vmem:[%s2116_s1 + $0x8] sm:$0xff] (!%p152_p3)   ;;  %v1685_v9 = vld [vmem:[%s2116_s1 + $0x10] sm:$0xff] (!%p152_p3)   ;;  %vm359_vm1 = vsmask.f32 (!%p152_p3), 1284 }
   0x8   : > { %v1678_v2 = vld [vmem:[%s2116_s1 + $0xc0] sm:$0xff] (!%p152_p3)   ;;  %1533 = vmatpush3.bf16.msra.mxu0 (!%p152_p3), %v1677_v1  ;;  %v1682_v6 = vld [vmem:[%s2116_s1 + $0xc8] sm:$0xff] (!%p152_p3)   ;;  %v1686_v10 = vld [vmem:[%s2116_s1 + $0xd0] sm:$0xff] (!%p152_p3)   ;;  %vm361_vm3 = vsmask.f32 (!%p152_p3), 2312  ;;  %v544_v43 = vshrl.u32 (!%p152_p3), %v543_v34, 7 }
   0x9   : > { %v1679_v3 = vld [vmem:[%s2116_s1 + $0x80] sm:$0xff] (!%p152_p3)   ;;  %1554 = vmatprep.subr.bf16.mxu1 (!%p152_p3), %v1678_v2  ;;  %1534 = vmatprep.subr.bf16.mxu0 (!%p152_p3), %v1680_v4  ;;  %v1683_v7 = vld [vmem:[%s2116_s1 + $0x88] sm:$0xff] (!%p152_p3)   ;;  %v1687_v11 = vld [vmem:[%s2116_s1 + $0x90] sm:$0xff] (!%p152_p3)   ;;  %vm363_vm4 = vsmask.f32 (!%p152_p3), 3340  ;;  %vm1774_vm15 = vmmov (!%p152_p3), 0  }
   0xa   : > { %1555 = vmatpush3.bf16.msra.mxu1 (!%p152_p3), %v1679_v3  ;;  %v1688_v12 = vld [vmem:[%s2116_s1 + $0x58] sm:$0xff] (!%p152_p3)   ;;  %v1692_v16 = vld [vmem:[%s2116_s1 + $0x60] sm:$0xff] (!%p152_p3)   ;;  %v1696_v20 = vld [vmem:[%s2116_s1 + $0x68] sm:$0xff] (!%p152_p3)   ;;  %vm365_vm5 = vsmask.f32 (!%p152_p3), 4368 }
   0xb   : > { %1556 = vmatprep.subr.bf16.mxu1 (!%p152_p3), %v1682_v6  ;;  %v1689_v13 = vld [vmem:[%s2116_s1 + $0x18] sm:$0xff] (!%p152_p3)   ;;  %v1693_v17 = vld [vmem:[%s2116_s1 + $0x20] sm:$0xff] (!%p152_p3)   ;;  %v1697_v21 = vld [vmem:[%s2116_s1 + $0x28] sm:$0xff] (!%p152_p3)   ;;  %vm367_vm7 = vsmask.f32 (!%p152_p3), 5396 }
   0xc   : > { %1535 = vmatpush3.bf16.msra.mxu0 (!%p152_p3), %v1681_v5  ;;  %v1690_v14 = vld [vmem:[%s2116_s1 + $0xd8] sm:$0xff] (!%p152_p3)   ;;  %v1694_v18 = vld [vmem:[%s2116_s1 + $0xe0] sm:$0xff] (!%p152_p3)   ;;  %v1698_v22 = vld [vmem:[%s2116_s1 + $0xe8] sm:$0xff] (!%p152_p3)   ;;  %vm369_vm8 = vsmask.f32 (!%p152_p3), 6424 }
   0xd   : > { %1536 = vmatprep.subr.bf16.mxu0 (!%p152_p3), %v1684_v8  ;;  %v1691_v15 = vld [vmem:[%s2116_s1 + $0x98] sm:$0xff] (!%p152_p3)   ;;  %v1695_v19 = vld [vmem:[%s2116_s1 + $0xa0] sm:$0xff] (!%p152_p3)   ;;  %v1699_v23 = vld [vmem:[%s2116_s1 + $0xa8] sm:$0xff] (!%p152_p3)   ;;  %vm371_vm9 = vsmask.f32 (!%p152_p3), 7452 }
   0xe   : > { %1557 = vmatpush3.bf16.msra.mxu1 %v1683_v7  ;;  %s2126_s12 = smov (!%p176_p4, %s1762_s12), 1  ;;  %v1700_v24 = vld [vmem:[%s2116_s1 + $0x70] sm:$0xff]   ;;  %v1704_v28 = vld [vmem:[%s2116_s1 + $0x78] sm:$0xff]   ;;  %vm360_vm2 = vmor %vm358_vm0, %vm359_vm1  ;;  %v1772_v41 = vmov 1966171168   ;;  %vm1336_vm1 = vcmask 1040384  }
   0xf   : > { %1558 = vmatprep.subr.bf16.mxu1 %v1686_v10  ;;  %v1701_v25 = vld [vmem:[%s2116_s1 + $0x30] sm:$0xff]   ;;  %s1531_s22 = sshll.u32 %s2126_s12, 3  ;;  %v1705_v29 = vld [vmem:[%s2116_s1 + $0x38] sm:$0xff]   ;;  %vm362_vm6 = vmor %vm360_vm2, %vm361_vm3  ;;  %v541_v42 = vunpack.c.l.s4 %v1772_v41  ;;  %s186_s6 = scalar_lea.vmem %s2118_s3, %s2126_s12 }
  0x10   : > { %1537 = vmatpush3.bf16.msra.mxu0 %v1685_v9  ;;  %v1702_v26 = vld [vmem:[%s2116_s1 + $0xf0] sm:$0xff]   ;;  %s1910_s4 = scalar_lea.vmem %s2115_s0, %s1531_s22  ;;  %v1706_v30 = vld [vmem:[%s2116_s1 + $0xf8] sm:$0xff]   ;;  %vm364_vm10 = vmor %vm362_vm6, %vm363_vm4 }
  0x11   : > { %1538 = vmatprep.subr.bf16.mxu0 %v1688_v12  ;;  %v1703_v27 = vld [vmem:[%s2116_s1 + $0xb0] sm:$0xff]   ;;  %v1423_v31 = vld.sshfl [vmem:[%s1910_s4] sm:$0x11 pattern:$0x75316420]  ;;  %vm366_vm11 = vmor %vm364_vm10, %vm365_vm5  ;;  %v542_v47 = vunpack.c.0.s8 %v541_v42 }
  0x12   : > { %1559 = vmatpush3.bf16.msra.mxu1 %v1687_v11  ;;  %v1424_v32 = vld.sshfl [vmem:[%s1910_s4 + $0x2] sm:$0x11 pattern:$0x75316420]  ;;  %v349_v33 = vcombine.high %v1423_v31, %v1423_v31  ;;  %v374_v36 = vshrl.u32 %v1423_v31, 16  ;;  %v1707_v40 = vld [vmem:[%s2116_s1 + $0xb8] sm:$0xff]   ;;  %vm368_vm12 = vmor %vm366_vm11, %vm367_vm7 }
  0x13   : > { %1560 = vmatprep.subr.bf16.mxu1 %v1690_v14  ;;  %v357_v35 = vcombine.high %v1424_v32, %v1424_v32  ;;  %v383_v38 = vshrl.u32 %v1424_v32, 16  ;;  %v336_v44 = vld [vmem:[%s1910_s4] sm:$0x1]  ;;  %v337_v45 = vld [vmem:[%s1910_s4 + $0x2] sm:$0x1]  ;;  %vm370_vm13 = vmor %vm368_vm12, %vm369_vm8  ;;  %v1943_v54 = vsub.s32 %v542_v47, %v544_v43 }
  0x14   : > { %1539 = vmatpush3.bf16.msra.mxu0 %v1689_v13  ;;  %v379_v37 = vshll.u32 %v349_v33, 16  ;;  %vm1928_vm14 = vmor %vm370_vm13, %vm371_vm9  ;;  %v539_v48 = vcombine.low %v336_v44, %v337_v45  ;;  %v1708_v49 = vld [vmem:[%s2116_s1 + $0x140] sm:$0xff]   ;;  %v1712_v6 = vld [vmem:[%s2116_s1 + $0x148] sm:$0xff]  }
  0x15   : > { %1540 = vmatprep.subr.bf16.mxu0 %v1692_v16  ;;  %v388_v39 = vshll.u32 %v357_v35, 16  ;;  %v1429_v50 = vld [vmem:[%s1910_s4 + $0x2] sm:$0x1]  ;;  %v1430_v53 = vld [vmem:[%s1910_s4 + $0x4] sm:$0x1]  ;;  %v1714_v8 = vld [vmem:[%s2116_s1 + $0x1c8] sm:$0xff]  }
  0x16   : > { %1561 = vmatpush3.bf16.msra.mxu1 %v1691_v15  ;;  %v381_v51 = vsel %vm1928_vm14, %v374_v36, %v379_v37  ;;  %v589_v56 = vcombine.low %v1429_v50, %v1430_v53  ;;  %v1427_v57 = vld.sshfl [vmem:[%s1910_s4] sm:$0x10 pattern:$0x75316420]  ;;  %v546_v61 = vrot.slane %v539_v48, %v1943_v54  ;;  %v1713_v9 = vld [vmem:[%s2116_s1 + $0x108] sm:$0xff]   ;;  %v1716_v11 = vld [vmem:[%s2116_s1 + $0x150] sm:$0xff]  }
  0x17   : > { %1562 = vmatprep.subr.bf16.mxu1 %v1694_v18  ;;  %v1940_v52 = vsel %vm1928_vm14, %v383_v38, %v388_v39  ;;  %v1710_v58 = vld [vmem:[%s2116_s1 + $0x1c0] sm:$0xff]   ;;  %v1715_v10 = vld [vmem:[%s2116_s1 + $0x188] sm:$0xff]   ;;  %v1718_v12 = vld [vmem:[%s2116_s1 + $0x1d0] sm:$0xff]  }
  0x18   : > { %1541 = vmatpush3.bf16.msra.mxu0 %v1693_v17  ;;  %v555_v55 = vcombine.low %v381_v51, %v1940_v52  ;;  %v1951_v59 = vld.sshfl [vmem:[%s1910_s4 + $0x2] sm:$0x10 pattern:$0x75316420]  ;;  %v596_v62 = vrot.slane %v589_v56, %v1943_v54  ;;  %v553_v2 = vrot.slane %v546_v61, %v1943_v54  ;;  %v1717_v13 = vld [vmem:[%s2116_s1 + $0x110] sm:$0xff]   ;;  %v1720_v15 = vld [vmem:[%s2116_s1 + $0x158] sm:$0xff]  }
  0x19   : > { %1542 = vmatprep.subr.bf16.mxu0 %v1696_v20  ;;  %v1453_v63 = vcombine.high %v1427_v57, %v1951_v59  ;;  %v1709_v0 = vld [vmem:[%s2116_s1 + $0x100] sm:$0xff]   ;;  %v1719_v14 = vld [vmem:[%s2116_s1 + $0x190] sm:$0xff]   ;;  %v1722_v16 = vld [vmem:[%s2116_s1 + $0x1d8] sm:$0xff]  }
  0x1a   : > { %1563 = vmatpush3.bf16.msra.mxu1 %v1695_v19  ;;  %v562_v60 = vrot.slane %v555_v55, %v1943_v54  ;;  %v603_v3 = vrot.slane %v596_v62, %v1943_v54  ;;  %v1711_v5 = vld [vmem:[%s2116_s1 + $0x180] sm:$0xff]   ;;  %v1721_v17 = vld [vmem:[%s2116_s1 + $0x118] sm:$0xff]   ;;  %v1773_v55 = vmov 0.0   ;;  %vm1337_vm2 = vmand %vm1336_vm1, %vm358_vm0 }
  0x1b   : > { %1564 = vmatprep.subr.bf16.mxu1 %v1698_v22  ;;  %v578_v4 = vrot.slane %v1453_v63, %v1943_v54  ;;  %v1723_v18 = vld [vmem:[%s2116_s1 + $0x198] sm:$0xff]   ;;  %v1724_v19 = vld [vmem:[%s2116_s1 + $0x160] sm:$0xff]  }
  0x1c   : > { %1543 = vmatpush3.bf16.msra.mxu0 %v1697_v21  ;;  %v569_v1 = vrot.slane %v562_v60, %v1943_v54  ;;  %1197 = vmatprep.mubr.bf16.mxu1 %v603_v3  ;;  %v1726_v20 = vld [vmem:[%s2116_s1 + $0x1e0] sm:$0xff]   ;;  %v1736_v31 = vld [vmem:[%s2116_s1 + $0x178] sm:$0xff]  }
  0x1d   : > { %1544 = vmatprep.subr.bf16.mxu0 %v1700_v24  ;;  %v585_v7 = vrot.slane %v578_v4, %v1943_v54  ;;  %v1725_v21 = vld [vmem:[%s2116_s1 + $0x120] sm:$0xff]   ;;  %v1730_v24 = vld [vmem:[%s2116_s1 + $0x1e8] sm:$0xff]   ;;  %v1737_v32 = vld [vmem:[%s2116_s1 + $0x138] sm:$0xff]  }
  0x1e   : > { %1565 = vmatpush3.bf16.msra.mxu1 %v1699_v23  ;;  %1157 = vmatprep.mubr.bf16.mxu0 %v569_v1  ;;  %v1727_v22 = vld [vmem:[%s2116_s1 + $0x1a0] sm:$0xff]   ;;  %v1728_v23 = vld [vmem:[%s2116_s1 + $0x168] sm:$0xff]   ;;  %v1738_v33 = vld [vmem:[%s2116_s1 + $0x1f8] sm:$0xff]  }
  0x1f   : > { %1566 = vmatprep.subr.bf16.mxu1 %v1702_v26  ;;  %v1731_v26 = vld [vmem:[%s2116_s1 + $0x1a8] sm:$0xff]   ;;  %v1440_v34 = vld.sshfl [vmem:[%s1910_s4 + $0x4] sm:$0x10 pattern:$0x75316420]  ;;  %v1739_v38 = vld [vmem:[%s2116_s1 + $0x1b8] sm:$0xff]  }
  0x20   : > { %1545 = vmatpush3.bf16.msra.mxu0 %v1701_v25  ;;  %v1729_v25 = vld [vmem:[%s2116_s1 + $0x128] sm:$0xff]   ;;  %v1454_v35 = vcombine.high %v1951_v59, %v1440_v34  ;;  %v1434_v36 = vld.sshfl [vmem:[%s1910_s4 + $0x4] sm:$0x11 pattern:$0x75316420]  ;;  %v1742_v4 = vld [vmem:[%s2116_s1 + $0x210] sm:$0xff]  }
  0x21   : > { %1546 = vmatprep.subr.bf16.mxu0 %v1704_v28  ;;  %v1734_v28 = vld [vmem:[%s2116_s1 + $0x1f0] sm:$0xff]   ;;  %v435_v39 = vcombine.high %v1434_v36, %v1434_v36  ;;  %v1446_v41 = vld.sshfl [vmem:[%s1910_s4 + $0x6] sm:$0x11 pattern:$0x75316420]  ;;  %v1741_v1 = vld [vmem:[%s2116_s1 + $0x208] sm:$0xff]  }
  0x22   : > { %1567 = vmatpush3.bf16.msra.mxu1 %v1703_v27  ;;  %v1732_v27 = vld [vmem:[%s2116_s1 + $0x170] sm:$0xff]   ;;  %v628_v37 = vrot.slane %v1454_v35, %v1943_v54  ;;  %v498_v42 = vcombine.high %v1446_v41, %v1446_v41  ;;  %v509_v43 = vshrl.u32 %v1446_v41, 16  ;;  %v1441_v44 = vld [vmem:[%s1910_s4 + $0x4] sm:$0x1]  ;;  %v1442_v45 = vld [vmem:[%s1910_s4 + $0x6] sm:$0x1] }
  0x23   : > { %1568 = vmatprep.subr.bf16.mxu1 %v1706_v30  ;;  %v1735_v30 = vld [vmem:[%s2116_s1 + $0x1b0] sm:$0xff]   ;;  %v451_v48 = vshll.u32 %v435_v39, 16  ;;  %v1740_v61 = vld [vmem:[%s2116_s1 + $0x200] sm:$0xff]  }
  0x24   : > { %1547 = vmatpush3.bf16.msra.mxu0 %v1705_v29  ;;  %v1733_v29 = vld [vmem:[%s2116_s1 + $0x130] sm:$0xff]   ;;  %v635_v47 = vrot.slane %v628_v37, %v1943_v54  ;;  %v514_v50 = vshll.u32 %v498_v42, 16  ;;  %v1452_v63 = vld.sshfl [vmem:[%s1910_s4 + $0x6] sm:$0x10 pattern:$0x75316420] }
  0x25   : > { %1576 = vmatprep.subr.bf16.mxu0 %v1708_v49  ;;  %v639_v49 = vcombine.low %v1441_v44, %v1442_v45  ;;  %v1455_v46 = vcombine.high %v1440_v34, %v1452_v63  ;;  %v1338_v45 = vld [vmem:[%s186_s6] sm:$0x1] }
  0x26   : > { %1569 = vmatpush3.bf16.msra.mxu1 %v1707_v40  ;;  %v446_v40 = vshrl.u32 %v1434_v36, 16  ;;  %v516_v56 = vsel %vm1928_vm14, %v509_v43, %v514_v50 }
  0x27   : > { %1598 = vmatprep.subr.bf16.mxu1 %v1710_v58  ;;  %1158 = vmatmul.mubr.bf16.vlgmr.msra.gmra.mrb[0].mxu0 %v553_v2  ;;  %v646_v57 = vrot.slane %v639_v49, %v1943_v54  ;;  %v678_v2 = vrot.slane %v1455_v46, %v1943_v54 }
  0x28   : > { %1577 = vmatpush3.bf16.msra.mxu0 %v1709_v0  ;;  %1237 = vmatprep.mubr.bf16.mxu0 %v635_v47  ;;  %v453_v51 = vsel %vm1928_vm14, %v446_v40, %v451_v48 }
  0x29   : > { %1198 = vmatmul.mubr.bf16.vlgmr.msra.gmra.mrb[0].mxu1 %v585_v7  ;;  %1578 = vmatprep.subr.bf16.mxu0 %v1712_v6  ;;  %v605_v53 = vcombine.low %v1940_v52, %v453_v51  ;;  %v655_v58 = vcombine.low %v453_v51, %v516_v56  ;;  %v653_v52 = vrot.slane %v646_v57, %v1943_v54  ;;  %v1744_v6 = vld [vmem:[%s2116_s1 + $0x220] sm:$0xff]   ;;  %v1746_v7 = vld [vmem:[%s2116_s1 + $0x230] sm:$0xff]  }
  0x2a   : > { %1599 = vmatpush3.bf16.msra.mxu1 %v1711_v5  ;;  %v685_v3 = vrot.slane %v678_v2, %v1943_v54  ;;  %v1743_v5 = vld [vmem:[%s2116_s1 + $0x218] sm:$0xff]  }
  0x2b   : > { %1600 = vmatprep.subr.bf16.mxu1 %v1714_v8  ;;  %v612_v59 = vrot.slane %v605_v53, %v1943_v54  ;;  %v662_v60 = vrot.slane %v655_v58, %v1943_v54  ;;  %v1747_v8 = vld [vmem:[%s2116_s1 + $0x238] sm:$0xff]  }
  0x2c   : > { %1579 = vmatpush3.bf16.msra.mxu0 %v1713_v9 }
  0x2d   : > { %1580 = vmatprep.subr.bf16.mxu0 %v1716_v11  ;;  %v619_v62 = vrot.slane %v612_v59, %v1943_v54  ;;  %v669_v0 = vrot.slane %v662_v60, %v1943_v54  ;;  %v1745_v54 = vld [vmem:[%s2116_s1 + $0x228] sm:$0xff]  }
  0x2e   : > { %1601 = vmatpush3.bf16.msra.mxu1 %v1715_v10  ;;  %v1456_v10 = vld [vmem:[%s2117_s2] ss:$0 sm:$0xff] }
  0x2f   : > { %1602 = vmatprep.subr.bf16.mxu1 %v1718_v12  ;;  %1277 = vmatprep.mubr.bf16.mxu1 %v669_v0 }
  0x30   : > { %1581 = vmatpush3.bf16.msra.mxu0 %v1717_v13 }
  0x31   : > { %1582 = vmatprep.subr.bf16.mxu0 %v1720_v15 }
  0x32   : > { %1603 = vmatpush3.bf16.msra.mxu1 %v1719_v14 }
  0x33   : > { %1604 = vmatprep.subr.bf16.mxu1 %v1722_v16 }
  0x34   : > { %1583 = vmatpush3.bf16.msra.mxu0 %v1721_v17 }
  0x35   : > { %1584 = vmatprep.subr.bf16.mxu0 %v1724_v19 }
  0x36   : > { %1605 = vmatpush3.bf16.msra.mxu1 %v1723_v18 }
  0x37   : > { %1606 = vmatprep.subr.bf16.mxu1 %v1726_v20 }
  0x38   : > { %1585 = vmatpush3.bf16.msra.mxu0 %v1725_v21 }
  0x39   : > { %1586 = vmatprep.subr.bf16.mxu0 %v1728_v23 }
  0x3a   : > { %1607 = vmatpush3.bf16.msra.mxu1 %v1727_v22 }
  0x3b   : > { %1608 = vmatprep.subr.bf16.mxu1 %v1730_v24 }
  0x3c   : > { %1587 = vmatpush3.bf16.msra.mxu0 %v1729_v25 }
  0x3d   : > { %1588 = vmatprep.subr.bf16.mxu0 %v1732_v27 }
  0x3e   : > { %1609 = vmatpush3.bf16.msra.mxu1 %v1731_v26 }
  0x3f   : > { %1610 = vmatprep.subr.bf16.mxu1 %v1734_v28 }
  0x40   : > { %1589 = vmatpush3.bf16.msra.mxu0 %v1733_v29 }
  0x41   : > { %1590 = vmatprep.subr.bf16.mxu0 %v1736_v31 }
  0x42   : > { %1611 = vmatpush3.bf16.msra.mxu1 %v1735_v30 }
  0x43   : > { %1612 = vmatprep.subr.bf16.mxu1 %v1738_v33 }
  0x44   : > { %1591 = vmatpush3.bf16.msra.mxu0 %v1737_v32 }
  0x45   : > { %1629 = vmatprep.subr.bf16.mxu0 %v1773_v55 }
  0x46   : > { %1613 = vmatpush3.bf16.msra.mxu1 %v1739_v38 }
  0x47   : > { %1238 = vmatmul.mubr.bf16.vlgmr.msra.gmra.mrb[4].mxu0 %v619_v62 }
  0x48   : > { %1630 = vmatpush3.bf16.msra.mxu0 %v1740_v61  ;;  %1645 = vmatprep.mubr.msk.bf16.mxu0 %vm1774_vm15, %v1773_v55 }
  0x49   : > { %1278 = vmatmul.mubr.bf16.vlgmr.msra.gmra.mrb[4].mxu1 %v653_v52  ;;  %1631 = vmatprep.subr.bf16.mxu0 %v1773_v55 }
  0x4c   : > { %1632 = vmatpush3.bf16.msra.mxu0 %v1741_v1 }
  0x4d   : > { %1633 = vmatprep.subr.bf16.mxu0 %v1773_v55 }
  0x50   : > { %1634 = vmatpush3.bf16.msra.mxu0 %v1742_v4 }
  0x51   : > { %1635 = vmatprep.subr.bf16.mxu0 %v1773_v55 }
  0x54   : > { %1636 = vmatpush3.bf16.msra.mxu0 %v1743_v5 }
  0x55   : > { %1637 = vmatprep.subr.bf16.mxu0 %v1773_v55 }
  0x58   : > { %1638 = vmatpush3.bf16.msra.mxu0 %v1744_v6 }
  0x59   : > { %1639 = vmatprep.subr.bf16.mxu0 %v1773_v55 }
  0x5c   : > { %1640 = vmatpush3.bf16.msra.mxu0 %v1745_v54 }
  0x5d   : > { %1641 = vmatprep.subr.bf16.mxu0 %v1773_v55 }
  0x60   : > { %1642 = vmatpush3.bf16.msra.mxu0 %v1746_v7 }
  0x61   : > { %1643 = vmatprep.subr.bf16.mxu0 %v1773_v55 }
  0x64   : > { %1644 = vmatpush3.bf16.msra.mxu0 %v1747_v8 }
  0x67   : > { %1646 = vmatmul.mubr.bf16.vlgmr.msra.gmra.mrb[8].mxu0 %v685_v3 }
  0xfa   : > { %v1548_v9 = vpop.f32.mrb[0].mxu0 }
  0xfb   : > { %v1549_v11 = vpop.f32.mrb[1].mxu0 }
  0xfc   : > { %v1570_v12 = vpop.f32.mrb[0].mxu1  ;;  %v1550_v13 = vadd.f32 %v1549_v11, %v1548_v9  ;;  %v1551_v14 = vpop.f32.mrb[2].mxu0 }
  0xfd   : > { %v1571_v15 = vpop.f32.mrb[1].mxu1  ;;  %v1552_v16 = vpop.f32.mrb[3].mxu0 }
  0xfe   : > { %v1572_v17 = vadd.f32 %v1571_v15, %v1570_v12  ;;  %v1573_v18 = vpop.f32.mrb[2].mxu1  ;;  %v1160_v19 = vadd.f32 %v1550_v13, %v1456_v10 }
  0xff   : > { %v1574_v20 = vpop.f32.mrb[3].mxu1 }
 0x100   : > { %v1200_v21 = vadd.f32 %v1572_v17, %v1160_v19 }
 0x11a   : > { %v1592_v22 = vpop.f32.mrb[4].mxu0 }
 0x11b   : > { %v1593_v23 = vpop.f32.mrb[5].mxu0 }
 0x11c   : > { %v1594_v24 = vadd.f32 %v1593_v23, %v1592_v22  ;;  %v1595_v25 = vpop.f32.mrb[6].mxu0  ;;  %v1614_v26 = vpop.f32.mrb[4].mxu1 }
 0x11d   : > { %v1596_v27 = vpop.f32.mrb[7].mxu0  ;;  %v1615_v28 = vpop.f32.mrb[5].mxu1 }
 0x11e   : > { %v1240_v29 = vadd.f32 %v1594_v24, %v1200_v21  ;;  %v1616_v30 = vadd.f32 %v1615_v28, %v1614_v26  ;;  %v1617_v31 = vpop.f32.mrb[6].mxu1 }
 0x11f   : > { %v1618_v32 = vpop.f32.mrb[7].mxu1 }
 0x120   : > { %v1280_v33 = vadd.f32 %v1616_v30, %v1240_v29 }
 0x13a   : > { %v1319_v34 = vpop.f32.mrb[8].mxu0 }
 0x13b   : > { %v1320_v35 = vadd.f32 %v1319_v34, %v1280_v33  ;;  %v1647_v36 = vpop.f32.mrb[9].mxu0 }
 0x13c   : > { %v1322_v37 = vpop.f32.mrb[10].mxu0 }
 0x13d   : > { %v1325_v38 = vmax.f32 %v1320_v35, 0.0  ;;  %v1648_v39 = vpop.f32.mrb[11].mxu0 }
 0x13f   : > { %v1327_v40 = vrot.slane %v1325_v38, 2 }
 0x141   : > { %v1329_v41 = vmax.f32 %v1325_v38, %v1327_v40 }
 0x143   : > { %1330 = vst [vmem:[#allocation2] sm:$0x3] %v1329_v41 }
 0x14a   : > { %v1331_v42 = vld [vmem:[#allocation2] ss:$2 sm:$0x1]  ;;  %v1333_v43 = vld [vmem:[#allocation2 + $0x1] ss:$2 sm:$0x1] }
 0x14b   : > { %v1334_v44 = vmax.f32 %v1331_v42, %v1333_v43 }
 0x14d   : > { %v1335_v47 = vpack.c.bf16 %v1334_v44, %v1334_v44 }
 0x14f   : > { %v1339_v48 = vsel %vm1337_vm2, %v1335_v47, %v1338_v45 }
 0x150   : > { %1340 = vst [vmem:[%s186_s6] sm:$0x1] %v1339_v48 }
 0x151 PF: > { %s13_s14 = sadd.s32 1, %s1770_s14   ;;  %s2121_s12 = smov %s1766_s13 }
 0x152   : > { %p10_p5 = scmp.ge.s32.totalorder %s13_s14, 4   ;;  %s2122_s13 = smov %s2124_s15 }
 0x154   :  { %12 = sbr.rel (!%p10_p5) target bundleno = 2 (0x2), region = 66 }

</bundles_post_ra>
